<compile_context>
chip_gen: v6e
topology: v6e:2x2x1
jax: 0.10.0
libtpu: 0.0.40
codegen_flags: <defaults>
</compile_context>

<pallas_src>
import numpy as np
import jax
import jax.numpy as jnp
from jax import lax
from jax.experimental import pallas as pl
from jax.experimental.pallas import tpu as pltpu

VMEM_LIMIT = 48 * 1024 * 1024    # v7x-safe (64 MiB physical), ample on v5e/v6e


def _round_up(x, m):
    return (x + m - 1) // m * m


# ----------------------------------------------------------------------------
# Pallas kernels
# ----------------------------------------------------------------------------
def _conv_mm_bias_relu_kernel(p_ref, w_ref, b_ref, o_ref):
    """im2col conv tile: (tile_m, K) bf16 @ (K, Cout) bf16 -> f32 acc,
    + bias, ReLU, stored as bf16 (halves conv-output writes / head reads)."""
    acc = jnp.dot(p_ref[...], w_ref[...], preferred_element_type=jnp.float32)
    acc = jnp.maximum(acc + b_ref[...], 0.0)
    o_ref[...] = acc.astype(o_ref.dtype)


def _make_head_layer_kernel(n_img, hw, tile_hw):
    """One LPIPS head layer (unit-norm, diff^2, 1x1 lin, spatial mean), tiled
    over the spatial dim; accumulates into a resident (N, 1) output block."""
    inv_hw = 1.0 / hw

    def kernel(f_ref, w_ref, o_ref):
        c = pl.program_id(0)

        @pl.when(c == 0)
        def _():
            o_ref[...] = jnp.zeros_like(o_ref)

        f = f_ref[...].astype(jnp.float32)             # (2N, tile_hw, C) f32
        w = w_ref[...]                                  # (1, 1, C) f32
        f1, f2 = f[:n_img], f[n_img:]
        eps = 1e-10
        # normalize_tensor: x / (||x||_c + eps)  ->  single EUP rsqrt each
        inv1 = lax.rsqrt(jnp.sum(f1 * f1, axis=-1, keepdims=True) + eps * eps)
        inv2 = lax.rsqrt(jnp.sum(f2 * f2, axis=-1, keepdims=True) + eps * eps)
        d = f1 * inv1 - f2 * inv2
        val = jnp.sum(d * d * w, axis=-1)               # 1x1 lin -> (N, tile_hw)
        # mask rows past hw (ragged last chunk reads unspecified boundary data)
        row = c * tile_hw + lax.broadcasted_iota(jnp.int32, (1, tile_hw), 1)
        val = jnp.where(row < hw, val, 0.0)
        o_ref[...] += jnp.sum(val, axis=-1, keepdims=True) * inv_hw

    return kernel


# ----------------------------------------------------------------------------
# Wrappers (glue: im2col, channel padding, pooling)
# ----------------------------------------------------------------------------
def conv2d_relu(x_nhwc, w_oihw, b, stride, pad, cout_pad):
    """PyTorch-equivalent Conv2d(+ReLU) as NHWC im2col + tiled Pallas matmul.

    The batch dim already carries BOTH images (single weight DMA per layer).
    Output channels are zero-padded to `cout_pad` (multiple of 128) for
    lane-dense stores; zero channels are carried forward (zero Cin weights in
    the next layer / zero lin_w in the head), so the LPIPS value is unchanged.
    """
    n = x_nhwc.shape[0]
    cin_x = x_nhwc.shape[-1]
    cout, cin, kh, kw = w_oihw.shape

    # TODO(synk): patch extraction stays as an XLA op (identity conv); strided
    # overlapping 11x11/5x5/3x3 windows have no clean rectangular BlockSpec.
    patches = lax.conv_general_dilated_patches(
        x_nhwc, filter_shape=(kh, kw), window_strides=(stride, stride),
        padding=[(pad, pad), (pad, pad)],
        dimension_numbers=("NHWC", "HWIO", "NHWC"))
    _, ho, wo, k = patches.shape               # feature dim is (Cin, kh, kw)-major
    m = n * ho * wo
    k_pad = _round_up(k, 128)

    # im2col matrix stays bf16 end-to-end; no M padding (ragged boundary block).
    pmat = patches.reshape(m, k)
    if k_pad != k:                              # only conv1 (K = 363 -> 384)
        pmat = jnp.pad(pmat, ((0, 0), (0, k_pad - k)))

    w_p = jnp.pad(w_oihw, ((0, cout_pad - cout), (0, cin_x - cin), (0, 0), (0, 0)))
    wmat = jnp.transpose(w_p.reshape(cout_pad, k)).astype(jnp.bfloat16)
    if k_pad != k:
        wmat = jnp.pad(wmat, ((0, k_pad - k), (0, 0)))
    bmat = jnp.pad(b, (0, cout_pad - cout)).reshape(1, cout_pad).astype(jnp.float32)

    # tile_m: multiple of 16 (bf16 sublane packing), capped at 512, and >=2
    # grid steps per conv so both v7x TensorCores get work on the parallel axis.
    if m <= 16:
        tile_m = m
    else:
        tile_m = min(512, _round_up(pl.cdiv(m, 2), 16))
    grid_m = pl.cdiv(m, tile_m)

    out = pl.pallas_call(
        _conv_mm_bias_relu_kernel,
        out_shape=jax.ShapeDtypeStruct((m, cout_pad), jnp.bfloat16),
        grid=(grid_m,),
        in_specs=[
            pl.BlockSpec((tile_m, k_pad), lambda i: (i, 0)),    # patch tile
            pl.BlockSpec((k_pad, cout_pad), lambda i: (0, 0)),  # weights (resident)
            pl.BlockSpec((1, cout_pad), lambda i: (0, 0)),      # bias
        ],
        out_specs=pl.BlockSpec((tile_m, cout_pad), lambda i: (i, 0)),
        compiler_params=pltpu.CompilerParams(
            dimension_semantics=("parallel",),
            vmem_limit_bytes=VMEM_LIMIT),
    )(pmat, wmat, bmat)
    return out.reshape(n, ho, wo, cout_pad)


def maxpool3x3s2(x_nhwc):
    # TODO(synk): MaxPool(3,2) kept in plain JAX (reduce_window); tiny op, the
    # overlapping strided window has no clean rectangular BlockSpec mapping.
    return lax.reduce_window(
        x_nhwc, jnp.array(-jnp.inf, x_nhwc.dtype), lax.max,
        window_dimensions=(1, 3, 3, 1), window_strides=(1, 2, 2, 1),
        padding="VALID")


def lpips_layer_score(feat, lin_w, n_img):
    """One LPIPS head layer as a spatially-tiled, accumulating Pallas call."""
    two_n, hw, c = feat.shape
    tile_hw = hw if hw <= 512 else 512          # full dim or 8-aligned chunk
    w = jnp.pad(lin_w, (0, c - lin_w.shape[0])).reshape(1, 1, c).astype(jnp.float32)
    return pl.pallas_call(
        _make_head_layer_kernel(n_img, hw, tile_hw),
        out_shape=jax.ShapeDtypeStruct((n_img, 1), jnp.float32),
        grid=(pl.cdiv(hw, tile_hw),),
        in_specs=[
            pl.BlockSpec((two_n, tile_hw, c), lambda i: (0, i, 0)),
            pl.BlockSpec((1, 1, c), lambda i: (0, 0, 0)),
        ],
        out_specs=pl.BlockSpec((n_img, 1), lambda i: (0, 0)),
        compiler_params=pltpu.CompilerParams(
            dimension_semantics=("arbitrary",),
            vmem_limit_bytes=VMEM_LIMIT),
    )(feat, w)


# ----------------------------------------------------------------------------
# LPIPS ('alex') model definition
# ----------------------------------------------------------------------------
# AlexNet.features conv config: (cin, cout, kernel, stride, pad)
ALEX_CFG = [
    (3, 64, 11, 4, 2),
    (64, 192, 5, 1, 2),
    (192, 384, 3, 1, 1),
    (384, 256, 3, 1, 1),
    (256, 256, 3, 1, 1),
]
# lane-dense (multiple-of-128) output channel counts carried through the net
COUT_PAD = [_round_up(c[1], 128) for c in ALEX_CFG]     # [128, 256, 384, 256, 256]
LIN_CHNS = [c[1] for c in ALEX_CFG]

# lpips ScalingLayer constants
SHIFT = jnp.array([-0.030, -0.088, -0.188], jnp.float32)
SCALE = jnp.array([0.458, 0.448, 0.450], jnp.float32)


def init_params(key):
    """Deterministic synthetic parameters matching LPIPS('alex') shapes."""
    params = {"conv_w": [], "conv_b": [], "lin_w": []}
    for (cin, cout, k, _, _) in ALEX_CFG:
        key, k1, k2 = jax.random.split(key, 3)
        fan_in = cin * k * k
        w = jax.random.normal(k1, (cout, cin, k, k), jnp.float32) / np.sqrt(fan_in)
        b = jax.random.uniform(k2, (cout,), jnp.float32, minval=0.0, maxval=0.05)
        params["conv_w"].append(w)
        params["conv_b"].append(b)
    for c in LIN_CHNS:
        key, k1 = jax.random.split(key)
        params["lin_w"].append(
            jax.random.uniform(k1, (c,), jnp.float32, minval=0.0, maxval=0.2))
    return params


def alexnet_features(x_nhwc, params):
    """relu1..relu5 activations (pre-pool), matching lpips' alexnet slices."""
    # TODO(synk): conv3-5 (3x3 s1) could avoid im2col via a 9-tap accumulation
    # grid axis; at the benchmarked sizes those layers are overhead-bound.
    feats = []
    h = x_nhwc
    for li, (_, _, _, s, p) in enumerate(ALEX_CFG):
        h = conv2d_relu(h, params["conv_w"][li], params["conv_b"][li], s, p,
                        COUT_PAD[li])
        feats.append(h)
        if li in (0, 1):               # MaxPool after relu1 and relu2 only
            h = maxpool3x3s2(h)
    return feats


def lpips_forward(img1, img2, params):
    """LPIPS.forward: images in [0,1], NHWC, batch dim; returns squeezed distance."""
    n = img1.shape[0]

    def prep(img):
        # lpips.im2tensor(img*255): (img*255)/127.5 - 1  ->  [-1, 1]
        x = img * 255.0 / 127.5 - 1.0
        # ScalingLayer: (x - shift) / scale   (channel-last broadcast)
        return (x - SHIFT) / SCALE

    # Both images share the batch dim -> every conv layer is ONE pallas_call;
    # bf16 before im2col so the (kh*kw)-inflated patch matrices are half size.
    x = jnp.concatenate([prep(img1), prep(img2)], axis=0).astype(jnp.bfloat16)
    feats = alexnet_features(x, params)

    total = jnp.zeros((n, 1), jnp.float32)
    for f, w in zip(feats, params["lin_w"]):
        ff = f.reshape(f.shape[0], f.shape[1] * f.shape[2], f.shape[3])
        total = total + lpips_layer_score(ff, w, n)
    return jnp.squeeze(total)


def _verify_patch_order():
    """One-time f32 check: conv_general_dilated_patches' feature dim is
    (Cin, kh, kw)-major, matching the OIHW weight flatten used above."""
    kx = jax.random.PRNGKey(42)
    x = jax.random.normal(kx, (1, 6, 6, 3), jnp.float32)
    w = jax.random.normal(jax.random.fold_in(kx, 1), (4, 3, 3, 3), jnp.float32)
    p = lax.conv_general_dilated_patches(
        x, (3, 3), (1, 1), [(1, 1), (1, 1)],
        dimension_numbers=("NHWC", "HWIO", "NHWC"))
    got = jnp.dot(p.reshape(-1, 27), w.reshape(4, 27).T,
                  precision=lax.Precision.HIGHEST).reshape(1, 6, 6, 4)
    ref = lax.conv_general_dilated(
        x, jnp.transpose(w, (2, 3, 1, 0)), (1, 1), [(1, 1), (1, 1)],
        dimension_numbers=("NHWC", "HWIO", "NHWC"),
        precision=lax.Precision.HIGHEST)
    np.testing.assert_allclose(np.asarray(got), np.asarray(ref),
                               rtol=1e-4, atol=1e-4)


# ----------------------------------------------------------------------------
if __name__ == "__main__":
    _verify_patch_order()

    key = jax.random.PRNGKey(0)
    kp, k1, k2 = jax.random.split(key, 3)
    params = init_params(kp)

    # im2tensor implies a single image with batch=1, HWC in [0,1]
    N, H, W = 1, 64, 64
    img1 = jax.random.uniform(k1, (N, H, W, 3), jnp.float32)
    img2 = jax.random.uniform(k2, (N, H, W, 3), jnp.float32)

    lpips_fn = jax.jit(lambda a, b: lpips_forward(a, b, params))
    out = jax.block_until_ready(lpips_fn(img1, img2))
    _ = np.asarray(out)  # .detach().cpu().numpy() equivalent
    print("KERNEL_OK")
</pallas_src>

<mosaic_0001>
module attributes {stable_mosaic.version = 11 : i64} {
  func.func @_conv_mm_bias_relu_kernel(%arg0: i32, %arg1: memref<240x384xbf16, #tpu.memory_space<vmem>>, %arg2: memref<384x128xbf16, #tpu.memory_space<vmem>>, %arg3: memref<1x128xf32, #tpu.memory_space<vmem>>, %arg4: memref<240x128xbf16, #tpu.memory_space<vmem>>) attributes {dimension_semantics = [#tpu.dimension_semantics<parallel>], iteration_bounds = array<i64: 2>, scalar_prefetch = 0 : i64, scratch_operands = 0 : i64, tpu.core_type = #tpu.core_type<tc>, window_params = [{transform_indices = @transform_0, window_bounds = array<i64: 240, 384>}, {pipeline_mode = #tpu.pipeline_mode<synchronous>, transform_indices = @transform_1, window_bounds = array<i64: 384, 128>}, {pipeline_mode = #tpu.pipeline_mode<synchronous>, transform_indices = @transform_2, window_bounds = array<i64: 1, 128>}, {transform_indices = @transform_3, window_bounds = array<i64: 240, 128>}]} {
    %c0 = arith.constant 0 : index
    %c0_0 = arith.constant 0 : index
    %0 = vector.load %arg1[%c0, %c0_0] : memref<240x384xbf16, #tpu.memory_space<vmem>>, vector<240x384xbf16>
    %c0_1 = arith.constant 0 : index
    %c0_2 = arith.constant 0 : index
    %1 = vector.load %arg2[%c0_1, %c0_2] : memref<384x128xbf16, #tpu.memory_space<vmem>>, vector<384x128xbf16>
    %cst = arith.constant dense<0.000000e+00> : vector<240x128xf32>
    %2 = tpu.matmul %0, %1, %cst {dimension_numbers = #tpu.dot_dimension_numbers<[1], [0], [0], [1], [0, 0, 1, 1], [], []>} : vector<240x384xbf16>, vector<384x128xbf16>, vector<240x128xf32> -> vector<240x128xf32>
    %c0_3 = arith.constant 0 : index
    %c0_4 = arith.constant 0 : index
    %3 = vector.load %arg3[%c0_3, %c0_4] : memref<1x128xf32, #tpu.memory_space<vmem>>, vector<1x128xf32>
    %4 = vector.broadcast %3 : vector<1x128xf32> to vector<240x128xf32>
    %5 = arith.addf %2, %4 : vector<240x128xf32>
    %cst_5 = arith.constant 0.000000e+00 : f32
    %6 = vector.broadcast %cst_5 : f32 to vector<240x128xf32>
    %7 = arith.maximumf %5, %6 : vector<240x128xf32>
    %8 = arith.truncf %7 : vector<240x128xf32> to vector<240x128xbf16>
    %c0_6 = arith.constant 0 : index
    %c0_7 = arith.constant 0 : index
    %9 = vector.load %arg4[%c0_6, %c0_7] : memref<240x128xbf16, #tpu.memory_space<vmem>>, vector<240x128xbf16>
    tpu.vector_store %arg4[%c0_6, %c0_7], %8 {strides = array<i32>} : memref<240x128xbf16, #tpu.memory_space<vmem>>, vector<240x128xbf16>,
    return
  }
  func.func @transform_0(%arg0: i32) -> (i32, i32) {
    %c0_i32 = arith.constant 0 : i32
    %c0_i32_0 = arith.constant 0 : i32
    return %arg0, %c0_i32 : i32, i32
  }
  func.func @transform_1(%arg0: i32) -> (i32, i32) {
    %c0_i32 = arith.constant 0 : i32
    %c0_i32_0 = arith.constant 0 : i32
    %c0_i32_1 = arith.constant 0 : i32
    return %c0_i32, %c0_i32_0 : i32, i32
  }
  func.func @transform_2(%arg0: i32) -> (i32, i32) {
    %c0_i32 = arith.constant 0 : i32
    %c0_i32_0 = arith.constant 0 : i32
    %c0_i32_1 = arith.constant 0 : i32
    return %c0_i32, %c0_i32_0 : i32, i32
  }
  func.func @transform_3(%arg0: i32) -> (i32, i32) {
    %c0_i32 = arith.constant 0 : i32
    %c0_i32_0 = arith.constant 0 : i32
    return %arg0, %c0_i32 : i32, i32
  }
}

module attributes {stable_mosaic.version = 11 : i64} {
  func.func @kernel(%arg0: i32, %arg1: memref<2x225x128xbf16, #tpu.memory_space<vmem>>, %arg2: memref<1x1x128xf32, #tpu.memory_space<vmem>>, %arg3: memref<1x1xf32, #tpu.memory_space<vmem>>) attributes {dimension_semantics = [#tpu.dimension_semantics<arbitrary>], iteration_bounds = array<i64: 1>, scalar_prefetch = 0 : i64, scratch_operands = 0 : i64, tpu.core_type = #tpu.core_type<tc>, window_params = [{transform_indices = @transform_0, window_bounds = array<i64: 2, 225, 128>}, {pipeline_mode = #tpu.pipeline_mode<synchronous>, transform_indices = @transform_1, window_bounds = array<i64: 1, 1, 128>}, {pipeline_mode = #tpu.pipeline_mode<synchronous>, transform_indices = @transform_2, window_bounds = array<i64: 1, 1>}]} {
    %c0_i32 = arith.constant 0 : i32
    %0 = arith.cmpi eq, %arg0, %c0_i32 : i32
    %1 = arith.extui %0 : i1 to i32
    %c0_i32_0 = arith.constant 0 : i32
    %2 = arith.cmpi ne, %1, %c0_i32_0 : i32
    scf.if %2 {
      %cst_18 = arith.constant 0.000000e+00 : f32
      %44 = vector.broadcast %cst_18 : f32 to vector<1x1xf32>
      %c0_19 = arith.constant 0 : index
      %c0_20 = arith.constant 0 : index
      %45 = vector.load %arg3[%c0_19, %c0_20] : memref<1x1xf32, #tpu.memory_space<vmem>>, vector<1x1xf32>
      tpu.vector_store %arg3[%c0_19, %c0_20], %44 {strides = array<i32>} : memref<1x1xf32, #tpu.memory_space<vmem>>, vector<1x1xf32>,
    } else {
    }
    %c0 = arith.constant 0 : index
    %c0_1 = arith.constant 0 : index
    %c0_2 = arith.constant 0 : index
    %3 = vector.load %arg1[%c0, %c0_1, %c0_2] : memref<2x225x128xbf16, #tpu.memory_space<vmem>>, vector<2x225x128xbf16>
    %4 = arith.extf %3 : vector<2x225x128xbf16> to vector<2x225x128xf32>
    %c0_3 = arith.constant 0 : index
    %c0_4 = arith.constant 0 : index
    %c0_5 = arith.constant 0 : index
    %5 = vector.load %arg2[%c0_3, %c0_4, %c0_5] : memref<1x1x128xf32, #tpu.memory_space<vmem>>, vector<1x1x128xf32>
    %6 = vector.extract_strided_slice %4 {offsets = [0, 0, 0], sizes = [1, 225, 128], strides = [1, 1, 1]} : vector<2x225x128xf32> to vector<1x225x128xf32>
    %7 = vector.extract_strided_slice %4 {offsets = [1, 0, 0], sizes = [1, 225, 128], strides = [1, 1, 1]} : vector<2x225x128xf32> to vector<1x225x128xf32>
    %8 = arith.mulf %6, %6 : vector<1x225x128xf32>
    %cst = arith.constant dense<0.000000e+00> : vector<1x225xf32>
    %9 = vector.multi_reduction <add>, %8, %cst [2] : vector<1x225x128xf32> to vector<1x225xf32>
    %10 = vector.shape_cast %9 : vector<1x225xf32> to vector<1x225x1xf32>
    %cst_6 = arith.constant 9.99999968E-21 : f32
    %11 = vector.broadcast %cst_6 : f32 to vector<1x225x1xf32>
    %12 = arith.addf %10, %11 : vector<1x225x1xf32>
    %13 = math.rsqrt %12 : vector<1x225x1xf32>
    %14 = arith.mulf %7, %7 : vector<1x225x128xf32>
    %cst_7 = arith.constant dense<0.000000e+00> : vector<1x225xf32>
    %15 = vector.multi_reduction <add>, %14, %cst_7 [2] : vector<1x225x128xf32> to vector<1x225xf32>
    %16 = vector.shape_cast %15 : vector<1x225xf32> to vector<1x225x1xf32>
    %cst_8 = arith.constant 9.99999968E-21 : f32
    %17 = vector.broadcast %cst_8 : f32 to vector<1x225x1xf32>
    %18 = arith.addf %16, %17 : vector<1x225x1xf32>
    %19 = math.rsqrt %18 : vector<1x225x1xf32>
    %20 = vector.broadcast %13 : vector<1x225x1xf32> to vector<1x225x128xf32>
    %21 = arith.mulf %6, %20 : vector<1x225x128xf32>
    %22 = vector.broadcast %19 : vector<1x225x1xf32> to vector<1x225x128xf32>
    %23 = arith.mulf %7, %22 : vector<1x225x128xf32>
    %24 = arith.subf %21, %23 : vector<1x225x128xf32>
    %25 = arith.mulf %24, %24 : vector<1x225x128xf32>
    %26 = vector.broadcast %5 : vector<1x1x128xf32> to vector<1x225x128xf32>
    %27 = arith.mulf %25, %26 : vector<1x225x128xf32>
    %cst_9 = arith.constant dense<0.000000e+00> : vector<1x225xf32>
    %28 = vector.multi_reduction <add>, %27, %cst_9 [2] : vector<1x225x128xf32> to vector<1x225xf32>
    %c225_i32 = arith.constant 225 : i32
    %29 = arith.muli %arg0, %c225_i32 : i32
    %30 = tpu.iota {dimensions = array<i32: 1>} : vector<1x225xi32>
    %31 = vector.broadcast %29 : i32 to vector<1x225xi32>
    %32 = arith.addi %31, %30 : vector<1x225xi32>
    %c225_i32_10 = arith.constant 225 : i32
    %33 = vector.broadcast %c225_i32_10 : i32 to vector<1x225xi32>
    %34 = arith.cmpi slt, %32, %33 : vector<1x225xi32>
    %cst_11 = arith.constant 0.000000e+00 : f32
    %35 = vector.broadcast %cst_11 : f32 to vector<1x225xf32>
    %36 = arith.select %34, %28, %35 : vector<1x225xi1>, vector<1x225xf32>
    %c0_12 = arith.constant 0 : index
    %c0_13 = arith.constant 0 : index
    %37 = vector.load %arg3[%c0_12, %c0_13] : memref<1x1xf32, #tpu.memory_space<vmem>>, vector<1x1xf32>
    %cst_14 = arith.constant dense<0.000000e+00> : vector<1xf32>
    %38 = vector.multi_reduction <add>, %36, %cst_14 [1] : vector<1x225xf32> to vector<1xf32>
    %39 = vector.shape_cast %38 : vector<1xf32> to vector<1x1xf32>
    %cst_15 = arith.constant 0.00444444455 : f32
    %40 = vector.broadcast %cst_15 : f32 to vector<1x1xf32>
    %41 = arith.mulf %39, %40 : vector<1x1xf32>
    %42 = arith.addf %37, %41 : vector<1x1xf32>
    %c0_16 = arith.constant 0 : index
    %c0_17 = arith.constant 0 : index
    %43 = vector.load %arg3[%c0_16, %c0_17] : memref<1x1xf32, #tpu.memory_space<vmem>>, vector<1x1xf32>
    tpu.vector_store %arg3[%c0_16, %c0_17], %42 {strides = array<i32>} : memref<1x1xf32, #tpu.memory_space<vmem>>, vector<1x1xf32>,
    return
  }
  func.func @transform_0(%arg0: i32) -> (i32, i32, i32) {
    %c0_i32 = arith.constant 0 : i32
    %c0_i32_0 = arith.constant 0 : i32
    %c0_i32_1 = arith.constant 0 : i32
    return %c0_i32, %arg0, %c0_i32_0 : i32, i32, i32
  }
  func.func @transform_1(%arg0: i32) -> (i32, i32, i32) {
    %c0_i32 = arith.constant 0 : i32
    %c0_i32_0 = arith.constant 0 : i32
    %c0_i32_1 = arith.constant 0 : i32
    %c0_i32_2 = arith.constant 0 : i32
    return %c0_i32, %c0_i32_0, %c0_i32_1 : i32, i32, i32
  }
  func.func @transform_2(%arg0: i32) -> (i32, i32) {
    %c0_i32 = arith.constant 0 : i32
    %c0_i32_0 = arith.constant 0 : i32
    %c0_i32_1 = arith.constant 0 : i32
    return %c0_i32, %c0_i32_0 : i32, i32
  }
}

module attributes {stable_mosaic.version = 11 : i64} {
  func.func @_conv_mm_bias_relu_kernel(%arg0: i32, %arg1: memref<64x3200xbf16, #tpu.memory_space<vmem>>, %arg2: memref<3200x256xbf16, #tpu.memory_space<vmem>>, %arg3: memref<1x256xf32, #tpu.memory_space<vmem>>, %arg4: memref<64x256xbf16, #tpu.memory_space<vmem>>) attributes {dimension_semantics = [#tpu.dimension_semantics<parallel>], iteration_bounds = array<i64: 2>, scalar_prefetch = 0 : i64, scratch_operands = 0 : i64, tpu.core_type = #tpu.core_type<tc>, window_params = [{transform_indices = @transform_0, window_bounds = array<i64: 64, 3200>}, {pipeline_mode = #tpu.pipeline_mode<synchronous>, transform_indices = @transform_1, window_bounds = array<i64: 3200, 256>}, {pipeline_mode = #tpu.pipeline_mode<synchronous>, transform_indices = @transform_2, window_bounds = array<i64: 1, 256>}, {transform_indices = @transform_3, window_bounds = array<i64: 64, 256>}]} {
    %c0 = arith.constant 0 : index
    %c0_0 = arith.constant 0 : index
    %0 = vector.load %arg1[%c0, %c0_0] : memref<64x3200xbf16, #tpu.memory_space<vmem>>, vector<64x3200xbf16>
    %c0_1 = arith.constant 0 : index
    %c0_2 = arith.constant 0 : index
    %1 = vector.load %arg2[%c0_1, %c0_2] : memref<3200x256xbf16, #tpu.memory_space<vmem>>, vector<3200x256xbf16>
    %cst = arith.constant dense<0.000000e+00> : vector<64x256xf32>
    %2 = tpu.matmul %0, %1, %cst {dimension_numbers = #tpu.dot_dimension_numbers<[1], [0], [0], [1], [0, 0, 1, 1], [], []>} : vector<64x3200xbf16>, vector<3200x256xbf16>, vector<64x256xf32> -> vector<64x256xf32>
    %c0_3 = arith.constant 0 : index
    %c0_4 = arith.constant 0 : index
    %3 = vector.load %arg3[%c0_3, %c0_4] : memref<1x256xf32, #tpu.memory_space<vmem>>, vector<1x256xf32>
    %4 = vector.broadcast %3 : vector<1x256xf32> to vector<64x256xf32>
    %5 = arith.addf %2, %4 : vector<64x256xf32>
    %cst_5 = arith.constant 0.000000e+00 : f32
    %6 = vector.broadcast %cst_5 : f32 to vector<64x256xf32>
    %7 = arith.maximumf %5, %6 : vector<64x256xf32>
    %8 = arith.truncf %7 : vector<64x256xf32> to vector<64x256xbf16>
    %c0_6 = arith.constant 0 : index
    %c0_7 = arith.constant 0 : index
    %9 = vector.load %arg4[%c0_6, %c0_7] : memref<64x256xbf16, #tpu.memory_space<vmem>>, vector<64x256xbf16>
    tpu.vector_store %arg4[%c0_6, %c0_7], %8 {strides = array<i32>} : memref<64x256xbf16, #tpu.memory_space<vmem>>, vector<64x256xbf16>,
    return
  }
  func.func @transform_0(%arg0: i32) -> (i32, i32) {
    %c0_i32 = arith.constant 0 : i32
    %c0_i32_0 = arith.constant 0 : i32
    return %arg0, %c0_i32 : i32, i32
  }
  func.func @transform_1(%arg0: i32) -> (i32, i32) {
    %c0_i32 = arith.constant 0 : i32
    %c0_i32_0 = arith.constant 0 : i32
    %c0_i32_1 = arith.constant 0 : i32
    return %c0_i32, %c0_i32_0 : i32, i32
  }
  func.func @transform_2(%arg0: i32) -> (i32, i32) {
    %c0_i32 = arith.constant 0 : i32
    %c0_i32_0 = arith.constant 0 : i32
    %c0_i32_1 = arith.constant 0 : i32
    return %c0_i32, %c0_i32_0 : i32, i32
  }
  func.func @transform_3(%arg0: i32) -> (i32, i32) {
    %c0_i32 = arith.constant 0 : i32
    %c0_i32_0 = arith.constant 0 : i32
    return %arg0, %c0_i32 : i32, i32
  }
}

module attributes {stable_mosaic.version = 11 : i64} {
  func.func @kernel(%arg0: i32, %arg1: memref<2x49x256xbf16, #tpu.memory_space<vmem>>, %arg2: memref<1x1x256xf32, #tpu.memory_space<vmem>>, %arg3: memref<1x1xf32, #tpu.memory_space<vmem>>) attributes {dimension_semantics = [#tpu.dimension_semantics<arbitrary>], iteration_bounds = array<i64: 1>, scalar_prefetch = 0 : i64, scratch_operands = 0 : i64, tpu.core_type = #tpu.core_type<tc>, window_params = [{transform_indices = @transform_0, window_bounds = array<i64: 2, 49, 256>}, {pipeline_mode = #tpu.pipeline_mode<synchronous>, transform_indices = @transform_1, window_bounds = array<i64: 1, 1, 256>}, {pipeline_mode = #tpu.pipeline_mode<synchronous>, transform_indices = @transform_2, window_bounds = array<i64: 1, 1>}]} {
    %c0_i32 = arith.constant 0 : i32
    %0 = arith.cmpi eq, %arg0, %c0_i32 : i32
    %1 = arith.extui %0 : i1 to i32
    %c0_i32_0 = arith.constant 0 : i32
    %2 = arith.cmpi ne, %1, %c0_i32_0 : i32
    scf.if %2 {
      %cst_18 = arith.constant 0.000000e+00 : f32
      %44 = vector.broadcast %cst_18 : f32 to vector<1x1xf32>
      %c0_19 = arith.constant 0 : index
      %c0_20 = arith.constant 0 : index
      %45 = vector.load %arg3[%c0_19, %c0_20] : memref<1x1xf32, #tpu.memory_space<vmem>>, vector<1x1xf32>
      tpu.vector_store %arg3[%c0_19, %c0_20], %44 {strides = array<i32>} : memref<1x1xf32, #tpu.memory_space<vmem>>, vector<1x1xf32>,
    } else {
    }
    %c0 = arith.constant 0 : index
    %c0_1 = arith.constant 0 : index
    %c0_2 = arith.constant 0 : index
    %3 = vector.load %arg1[%c0, %c0_1, %c0_2] : memref<2x49x256xbf16, #tpu.memory_space<vmem>>, vector<2x49x256xbf16>
    %4 = arith.extf %3 : vector<2x49x256xbf16> to vector<2x49x256xf32>
    %c0_3 = arith.constant 0 : index
    %c0_4 = arith.constant 0 : index
    %c0_5 = arith.constant 0 : index
    %5 = vector.load %arg2[%c0_3, %c0_4, %c0_5] : memref<1x1x256xf32, #tpu.memory_space<vmem>>, vector<1x1x256xf32>
    %6 = vector.extract_strided_slice %4 {offsets = [0, 0, 0], sizes = [1, 49, 256], strides = [1, 1, 1]} : vector<2x49x256xf32> to vector<1x49x256xf32>
    %7 = vector.extract_strided_slice %4 {offsets = [1, 0, 0], sizes = [1, 49, 256], strides = [1, 1, 1]} : vector<2x49x256xf32> to vector<1x49x256xf32>
    %8 = arith.mulf %6, %6 : vector<1x49x256xf32>
    %cst = arith.constant dense<0.000000e+00> : vector<1x49xf32>
    %9 = vector.multi_reduction <add>, %8, %cst [2] : vector<1x49x256xf32> to vector<1x49xf32>
    %10 = vector.shape_cast %9 : vector<1x49xf32> to vector<1x49x1xf32>
    %cst_6 = arith.constant 9.99999968E-21 : f32
    %11 = vector.broadcast %cst_6 : f32 to vector<1x49x1xf32>
    %12 = arith.addf %10, %11 : vector<1x49x1xf32>
    %13 = math.rsqrt %12 : vector<1x49x1xf32>
    %14 = arith.mulf %7, %7 : vector<1x49x256xf32>
    %cst_7 = arith.constant dense<0.000000e+00> : vector<1x49xf32>
    %15 = vector.multi_reduction <add>, %14, %cst_7 [2] : vector<1x49x256xf32> to vector<1x49xf32>
    %16 = vector.shape_cast %15 : vector<1x49xf32> to vector<1x49x1xf32>
    %cst_8 = arith.constant 9.99999968E-21 : f32
    %17 = vector.broadcast %cst_8 : f32 to vector<1x49x1xf32>
    %18 = arith.addf %16, %17 : vector<1x49x1xf32>
    %19 = math.rsqrt %18 : vector<1x49x1xf32>
    %20 = vector.broadcast %13 : vector<1x49x1xf32> to vector<1x49x256xf32>
    %21 = arith.mulf %6, %20 : vector<1x49x256xf32>
    %22 = vector.broadcast %19 : vector<1x49x1xf32> to vector<1x49x256xf32>
    %23 = arith.mulf %7, %22 : vector<1x49x256xf32>
    %24 = arith.subf %21, %23 : vector<1x49x256xf32>
    %25 = arith.mulf %24, %24 : vector<1x49x256xf32>
    %26 = vector.broadcast %5 : vector<1x1x256xf32> to vector<1x49x256xf32>
    %27 = arith.mulf %25, %26 : vector<1x49x256xf32>
    %cst_9 = arith.constant dense<0.000000e+00> : vector<1x49xf32>
    %28 = vector.multi_reduction <add>, %27, %cst_9 [2] : vector<1x49x256xf32> to vector<1x49xf32>
    %c49_i32 = arith.constant 49 : i32
    %29 = arith.muli %arg0, %c49_i32 : i32
    %30 = tpu.iota {dimensions = array<i32: 1>} : vector<1x49xi32>
    %31 = vector.broadcast %29 : i32 to vector<1x49xi32>
    %32 = arith.addi %31, %30 : vector<1x49xi32>
    %c49_i32_10 = arith.constant 49 : i32
    %33 = vector.broadcast %c49_i32_10 : i32 to vector<1x49xi32>
    %34 = arith.cmpi slt, %32, %33 : vector<1x49xi32>
    %cst_11 = arith.constant 0.000000e+00 : f32
    %35 = vector.broadcast %cst_11 : f32 to vector<1x49xf32>
    %36 = arith.select %34, %28, %35 : vector<1x49xi1>, vector<1x49xf32>
    %c0_12 = arith.constant 0 : index
    %c0_13 = arith.constant 0 : index
    %37 = vector.load %arg3[%c0_12, %c0_13] : memref<1x1xf32, #tpu.memory_space<vmem>>, vector<1x1xf32>
    %cst_14 = arith.constant dense<0.000000e+00> : vector<1xf32>
    %38 = vector.multi_reduction <add>, %36, %cst_14 [1] : vector<1x49xf32> to vector<1xf32>
    %39 = vector.shape_cast %38 : vector<1xf32> to vector<1x1xf32>
    %cst_15 = arith.constant 0.0204081628 : f32
    %40 = vector.broadcast %cst_15 : f32 to vector<1x1xf32>
    %41 = arith.mulf %39, %40 : vector<1x1xf32>
    %42 = arith.addf %37, %41 : vector<1x1xf32>
    %c0_16 = arith.constant 0 : index
    %c0_17 = arith.constant 0 : index
    %43 = vector.load %arg3[%c0_16, %c0_17] : memref<1x1xf32, #tpu.memory_space<vmem>>, vector<1x1xf32>
    tpu.vector_store %arg3[%c0_16, %c0_17], %42 {strides = array<i32>} : memref<1x1xf32, #tpu.memory_space<vmem>>, vector<1x1xf32>,
    return
  }
  func.func @transform_0(%arg0: i32) -> (i32, i32, i32) {
    %c0_i32 = arith.constant 0 : i32
    %c0_i32_0 = arith.constant 0 : i32
    %c0_i32_1 = arith.constant 0 : i32
    return %c0_i32, %arg0, %c0_i32_0 : i32, i32, i32
  }
  func.func @transform_1(%arg0: i32) -> (i32, i32, i32) {
    %c0_i32 = arith.constant 0 : i32
    %c0_i32_0 = arith.constant 0 : i32
    %c0_i32_1 = arith.constant 0 : i32
    %c0_i32_2 = arith.constant 0 : i32
    return %c0_i32, %c0_i32_0, %c0_i32_1 : i32, i32, i32
  }
  func.func @transform_2(%arg0: i32) -> (i32, i32) {
    %c0_i32 = arith.constant 0 : i32
    %c0_i32_0 = arith.constant 0 : i32
    %c0_i32_1 = arith.constant 0 : i32
    return %c0_i32, %c0_i32_0 : i32, i32
  }
}

module attributes {stable_mosaic.version = 11 : i64} {
  func.func @_conv_mm_bias_relu_kernel(%arg0: i32, %arg1: memref<16x2304xbf16, #tpu.memory_space<vmem>>, %arg2: memref<2304x384xbf16, #tpu.memory_space<vmem>>, %arg3: memref<1x384xf32, #tpu.memory_space<vmem>>, %arg4: memref<16x384xbf16, #tpu.memory_space<vmem>>) attributes {dimension_semantics = [#tpu.dimension_semantics<parallel>], iteration_bounds = array<i64: 2>, scalar_prefetch = 0 : i64, scratch_operands = 0 : i64, tpu.core_type = #tpu.core_type<tc>, window_params = [{transform_indices = @transform_0, window_bounds = array<i64: 16, 2304>}, {pipeline_mode = #tpu.pipeline_mode<synchronous>, transform_indices = @transform_1, window_bounds = array<i64: 2304, 384>}, {pipeline_mode = #tpu.pipeline_mode<synchronous>, transform_indices = @transform_2, window_bounds = array<i64: 1, 384>}, {transform_indices = @transform_3, window_bounds = array<i64: 16, 384>}]} {
    %c0 = arith.constant 0 : index
    %c0_0 = arith.constant 0 : index
    %0 = vector.load %arg1[%c0, %c0_0] : memref<16x2304xbf16, #tpu.memory_space<vmem>>, vector<16x2304xbf16>
    %c0_1 = arith.constant 0 : index
    %c0_2 = arith.constant 0 : index
    %1 = vector.load %arg2[%c0_1, %c0_2] : memref<2304x384xbf16, #tpu.memory_space<vmem>>, vector<2304x384xbf16>
    %cst = arith.constant dense<0.000000e+00> : vector<16x384xf32>
    %2 = tpu.matmul %0, %1, %cst {dimension_numbers = #tpu.dot_dimension_numbers<[1], [0], [0], [1], [0, 0, 1, 1], [], []>} : vector<16x2304xbf16>, vector<2304x384xbf16>, vector<16x384xf32> -> vector<16x384xf32>
    %c0_3 = arith.constant 0 : index
    %c0_4 = arith.constant 0 : index
    %3 = vector.load %arg3[%c0_3, %c0_4] : memref<1x384xf32, #tpu.memory_space<vmem>>, vector<1x384xf32>
    %4 = vector.broadcast %3 : vector<1x384xf32> to vector<16x384xf32>
    %5 = arith.addf %2, %4 : vector<16x384xf32>
    %cst_5 = arith.constant 0.000000e+00 : f32
    %6 = vector.broadcast %cst_5 : f32 to vector<16x384xf32>
    %7 = arith.maximumf %5, %6 : vector<16x384xf32>
    %8 = arith.truncf %7 : vector<16x384xf32> to vector<16x384xbf16>
    %c0_6 = arith.constant 0 : index
    %c0_7 = arith.constant 0 : index
    %9 = vector.load %arg4[%c0_6, %c0_7] : memref<16x384xbf16, #tpu.memory_space<vmem>>, vector<16x384xbf16>
    tpu.vector_store %arg4[%c0_6, %c0_7], %8 {strides = array<i32>} : memref<16x384xbf16, #tpu.memory_space<vmem>>, vector<16x384xbf16>,
    return
  }
  func.func @transform_0(%arg0: i32) -> (i32, i32) {
    %c0_i32 = arith.constant 0 : i32
    %c0_i32_0 = arith.constant 0 : i32
    return %arg0, %c0_i32 : i32, i32
  }
  func.func @transform_1(%arg0: i32) -> (i32, i32) {
    %c0_i32 = arith.constant 0 : i32
    %c0_i32_0 = arith.constant 0 : i32
    %c0_i32_1 = arith.constant 0 : i32
    return %c0_i32, %c0_i32_0 : i32, i32
  }
  func.func @transform_2(%arg0: i32) -> (i32, i32) {
    %c0_i32 = arith.constant 0 : i32
    %c0_i32_0 = arith.constant 0 : i32
    %c0_i32_1 = arith.constant 0 : i32
    return %c0_i32, %c0_i32_0 : i32, i32
  }
  func.func @transform_3(%arg0: i32) -> (i32, i32) {
    %c0_i32 = arith.constant 0 : i32
    %c0_i32_0 = arith.constant 0 : i32
    return %arg0, %c0_i32 : i32, i32
  }
}

module attributes {stable_mosaic.version = 11 : i64} {
  func.func @kernel(%arg0: i32, %arg1: memref<2x9x384xbf16, #tpu.memory_space<vmem>>, %arg2: memref<1x1x384xf32, #tpu.memory_space<vmem>>, %arg3: memref<1x1xf32, #tpu.memory_space<vmem>>) attributes {dimension_semantics = [#tpu.dimension_semantics<arbitrary>], iteration_bounds = array<i64: 1>, scalar_prefetch = 0 : i64, scratch_operands = 0 : i64, tpu.core_type = #tpu.core_type<tc>, window_params = [{transform_indices = @transform_0, window_bounds = array<i64: 2, 9, 384>}, {pipeline_mode = #tpu.pipeline_mode<synchronous>, transform_indices = @transform_1, window_bounds = array<i64: 1, 1, 384>}, {pipeline_mode = #tpu.pipeline_mode<synchronous>, transform_indices = @transform_2, window_bounds = array<i64: 1, 1>}]} {
    %c0_i32 = arith.constant 0 : i32
    %0 = arith.cmpi eq, %arg0, %c0_i32 : i32
    %1 = arith.extui %0 : i1 to i32
    %c0_i32_0 = arith.constant 0 : i32
    %2 = arith.cmpi ne, %1, %c0_i32_0 : i32
    scf.if %2 {
      %cst_18 = arith.constant 0.000000e+00 : f32
      %44 = vector.broadcast %cst_18 : f32 to vector<1x1xf32>
      %c0_19 = arith.constant 0 : index
      %c0_20 = arith.constant 0 : index
      %45 = vector.load %arg3[%c0_19, %c0_20] : memref<1x1xf32, #tpu.memory_space<vmem>>, vector<1x1xf32>
      tpu.vector_store %arg3[%c0_19, %c0_20], %44 {strides = array<i32>} : memref<1x1xf32, #tpu.memory_space<vmem>>, vector<1x1xf32>,
    } else {
    }
    %c0 = arith.constant 0 : index
    %c0_1 = arith.constant 0 : index
    %c0_2 = arith.constant 0 : index
    %3 = vector.load %arg1[%c0, %c0_1, %c0_2] : memref<2x9x384xbf16, #tpu.memory_space<vmem>>, vector<2x9x384xbf16>
    %4 = arith.extf %3 : vector<2x9x384xbf16> to vector<2x9x384xf32>
    %c0_3 = arith.constant 0 : index
    %c0_4 = arith.constant 0 : index
    %c0_5 = arith.constant 0 : index
    %5 = vector.load %arg2[%c0_3, %c0_4, %c0_5] : memref<1x1x384xf32, #tpu.memory_space<vmem>>, vector<1x1x384xf32>
    %6 = vector.extract_strided_slice %4 {offsets = [0, 0, 0], sizes = [1, 9, 384], strides = [1, 1, 1]} : vector<2x9x384xf32> to vector<1x9x384xf32>
    %7 = vector.extract_strided_slice %4 {offsets = [1, 0, 0], sizes = [1, 9, 384], strides = [1, 1, 1]} : vector<2x9x384xf32> to vector<1x9x384xf32>
    %8 = arith.mulf %6, %6 : vector<1x9x384xf32>
    %cst = arith.constant dense<0.000000e+00> : vector<1x9xf32>
    %9 = vector.multi_reduction <add>, %8, %cst [2] : vector<1x9x384xf32> to vector<1x9xf32>
    %10 = vector.shape_cast %9 : vector<1x9xf32> to vector<1x9x1xf32>
    %cst_6 = arith.constant 9.99999968E-21 : f32
    %11 = vector.broadcast %cst_6 : f32 to vector<1x9x1xf32>
    %12 = arith.addf %10, %11 : vector<1x9x1xf32>
    %13 = math.rsqrt %12 : vector<1x9x1xf32>
    %14 = arith.mulf %7, %7 : vector<1x9x384xf32>
    %cst_7 = arith.constant dense<0.000000e+00> : vector<1x9xf32>
    %15 = vector.multi_reduction <add>, %14, %cst_7 [2] : vector<1x9x384xf32> to vector<1x9xf32>
    %16 = vector.shape_cast %15 : vector<1x9xf32> to vector<1x9x1xf32>
    %cst_8 = arith.constant 9.99999968E-21 : f32
    %17 = vector.broadcast %cst_8 : f32 to vector<1x9x1xf32>
    %18 = arith.addf %16, %17 : vector<1x9x1xf32>
    %19 = math.rsqrt %18 : vector<1x9x1xf32>
    %20 = vector.broadcast %13 : vector<1x9x1xf32> to vector<1x9x384xf32>
    %21 = arith.mulf %6, %20 : vector<1x9x384xf32>
    %22 = vector.broadcast %19 : vector<1x9x1xf32> to vector<1x9x384xf32>
    %23 = arith.mulf %7, %22 : vector<1x9x384xf32>
    %24 = arith.subf %21, %23 : vector<1x9x384xf32>
    %25 = arith.mulf %24, %24 : vector<1x9x384xf32>
    %26 = vector.broadcast %5 : vector<1x1x384xf32> to vector<1x9x384xf32>
    %27 = arith.mulf %25, %26 : vector<1x9x384xf32>
    %cst_9 = arith.constant dense<0.000000e+00> : vector<1x9xf32>
    %28 = vector.multi_reduction <add>, %27, %cst_9 [2] : vector<1x9x384xf32> to vector<1x9xf32>
    %c9_i32 = arith.constant 9 : i32
    %29 = arith.muli %arg0, %c9_i32 : i32
    %30 = tpu.iota {dimensions = array<i32: 1>} : vector<1x9xi32>
    %31 = vector.broadcast %29 : i32 to vector<1x9xi32>
    %32 = arith.addi %31, %30 : vector<1x9xi32>
    %c9_i32_10 = arith.constant 9 : i32
    %33 = vector.broadcast %c9_i32_10 : i32 to vector<1x9xi32>
    %34 = arith.cmpi slt, %32, %33 : vector<1x9xi32>
    %cst_11 = arith.constant 0.000000e+00 : f32
    %35 = vector.broadcast %cst_11 : f32 to vector<1x9xf32>
    %36 = arith.select %34, %28, %35 : vector<1x9xi1>, vector<1x9xf32>
    %c0_12 = arith.constant 0 : index
    %c0_13 = arith.constant 0 : index
    %37 = vector.load %arg3[%c0_12, %c0_13] : memref<1x1xf32, #tpu.memory_space<vmem>>, vector<1x1xf32>
    %cst_14 = arith.constant dense<0.000000e+00> : vector<1xf32>
    %38 = vector.multi_reduction <add>, %36, %cst_14 [1] : vector<1x9xf32> to vector<1xf32>
    %39 = vector.shape_cast %38 : vector<1xf32> to vector<1x1xf32>
    %cst_15 = arith.constant 0.111111112 : f32
    %40 = vector.broadcast %cst_15 : f32 to vector<1x1xf32>
    %41 = arith.mulf %39, %40 : vector<1x1xf32>
    %42 = arith.addf %37, %41 : vector<1x1xf32>
    %c0_16 = arith.constant 0 : index
    %c0_17 = arith.constant 0 : index
    %43 = vector.load %arg3[%c0_16, %c0_17] : memref<1x1xf32, #tpu.memory_space<vmem>>, vector<1x1xf32>
    tpu.vector_store %arg3[%c0_16, %c0_17], %42 {strides = array<i32>} : memref<1x1xf32, #tpu.memory_space<vmem>>, vector<1x1xf32>,
    return
  }
  func.func @transform_0(%arg0: i32) -> (i32, i32, i32) {
    %c0_i32 = arith.constant 0 : i32
    %c0_i32_0 = arith.constant 0 : i32
    %c0_i32_1 = arith.constant 0 : i32
    return %c0_i32, %arg0, %c0_i32_0 : i32, i32, i32
  }
  func.func @transform_1(%arg0: i32) -> (i32, i32, i32) {
    %c0_i32 = arith.constant 0 : i32
    %c0_i32_0 = arith.constant 0 : i32
    %c0_i32_1 = arith.constant 0 : i32
    %c0_i32_2 = arith.constant 0 : i32
    return %c0_i32, %c0_i32_0, %c0_i32_1 : i32, i32, i32
  }
  func.func @transform_2(%arg0: i32) -> (i32, i32) {
    %c0_i32 = arith.constant 0 : i32
    %c0_i32_0 = arith.constant 0 : i32
    %c0_i32_1 = arith.constant 0 : i32
    return %c0_i32, %c0_i32_0 : i32, i32
  }
}

module attributes {stable_mosaic.version = 11 : i64} {
  func.func @_conv_mm_bias_relu_kernel(%arg0: i32, %arg1: memref<16x3456xbf16, #tpu.memory_space<vmem>>, %arg2: memref<3456x256xbf16, #tpu.memory_space<vmem>>, %arg3: memref<1x256xf32, #tpu.memory_space<vmem>>, %arg4: memref<16x256xbf16, #tpu.memory_space<vmem>>) attributes {dimension_semantics = [#tpu.dimension_semantics<parallel>], iteration_bounds = array<i64: 2>, scalar_prefetch = 0 : i64, scratch_operands = 0 : i64, tpu.core_type = #tpu.core_type<tc>, window_params = [{transform_indices = @transform_0, window_bounds = array<i64: 16, 3456>}, {pipeline_mode = #tpu.pipeline_mode<synchronous>, transform_indices = @transform_1, window_bounds = array<i64: 3456, 256>}, {pipeline_mode = #tpu.pipeline_mode<synchronous>, transform_indices = @transform_2, window_bounds = array<i64: 1, 256>}, {transform_indices = @transform_3, window_bounds = array<i64: 16, 256>}]} {
    %c0 = arith.constant 0 : index
    %c0_0 = arith.constant 0 : index
    %0 = vector.load %arg1[%c0, %c0_0] : memref<16x3456xbf16, #tpu.memory_space<vmem>>, vector<16x3456xbf16>
    %c0_1 = arith.constant 0 : index
    %c0_2 = arith.constant 0 : index
    %1 = vector.load %arg2[%c0_1, %c0_2] : memref<3456x256xbf16, #tpu.memory_space<vmem>>, vector<3456x256xbf16>
    %cst = arith.constant dense<0.000000e+00> : vector<16x256xf32>
    %2 = tpu.matmul %0, %1, %cst {dimension_numbers = #tpu.dot_dimension_numbers<[1], [0], [0], [1], [0, 0, 1, 1], [], []>} : vector<16x3456xbf16>, vector<3456x256xbf16>, vector<16x256xf32> -> vector<16x256xf32>
    %c0_3 = arith.constant 0 : index
    %c0_4 = arith.constant 0 : index
    %3 = vector.load %arg3[%c0_3, %c0_4] : memref<1x256xf32, #tpu.memory_space<vmem>>, vector<1x256xf32>
    %4 = vector.broadcast %3 : vector<1x256xf32> to vector<16x256xf32>
    %5 = arith.addf %2, %4 : vector<16x256xf32>
    %cst_5 = arith.constant 0.000000e+00 : f32
    %6 = vector.broadcast %cst_5 : f32 to vector<16x256xf32>
    %7 = arith.maximumf %5, %6 : vector<16x256xf32>
    %8 = arith.truncf %7 : vector<16x256xf32> to vector<16x256xbf16>
    %c0_6 = arith.constant 0 : index
    %c0_7 = arith.constant 0 : index
    %9 = vector.load %arg4[%c0_6, %c0_7] : memref<16x256xbf16, #tpu.memory_space<vmem>>, vector<16x256xbf16>
    tpu.vector_store %arg4[%c0_6, %c0_7], %8 {strides = array<i32>} : memref<16x256xbf16, #tpu.memory_space<vmem>>, vector<16x256xbf16>,
    return
  }
  func.func @transform_0(%arg0: i32) -> (i32, i32) {
    %c0_i32 = arith.constant 0 : i32
    %c0_i32_0 = arith.constant 0 : i32
    return %arg0, %c0_i32 : i32, i32
  }
  func.func @transform_1(%arg0: i32) -> (i32, i32) {
    %c0_i32 = arith.constant 0 : i32
    %c0_i32_0 = arith.constant 0 : i32
    %c0_i32_1 = arith.constant 0 : i32
    return %c0_i32, %c0_i32_0 : i32, i32
  }
  func.func @transform_2(%arg0: i32) -> (i32, i32) {
    %c0_i32 = arith.constant 0 : i32
    %c0_i32_0 = arith.constant 0 : i32
    %c0_i32_1 = arith.constant 0 : i32
    return %c0_i32, %c0_i32_0 : i32, i32
  }
  func.func @transform_3(%arg0: i32) -> (i32, i32) {
    %c0_i32 = arith.constant 0 : i32
    %c0_i32_0 = arith.constant 0 : i32
    return %arg0, %c0_i32 : i32, i32
  }
}

module attributes {stable_mosaic.version = 11 : i64} {
  func.func @kernel(%arg0: i32, %arg1: memref<2x9x256xbf16, #tpu.memory_space<vmem>>, %arg2: memref<1x1x256xf32, #tpu.memory_space<vmem>>, %arg3: memref<1x1xf32, #tpu.memory_space<vmem>>) attributes {dimension_semantics = [#tpu.dimension_semantics<arbitrary>], iteration_bounds = array<i64: 1>, scalar_prefetch = 0 : i64, scratch_operands = 0 : i64, tpu.core_type = #tpu.core_type<tc>, window_params = [{transform_indices = @transform_0, window_bounds = array<i64: 2, 9, 256>}, {pipeline_mode = #tpu.pipeline_mode<synchronous>, transform_indices = @transform_1, window_bounds = array<i64: 1, 1, 256>}, {pipeline_mode = #tpu.pipeline_mode<synchronous>, transform_indices = @transform_2, window_bounds = array<i64: 1, 1>}]} {
    %c0_i32 = arith.constant 0 : i32
    %0 = arith.cmpi eq, %arg0, %c0_i32 : i32
    %1 = arith.extui %0 : i1 to i32
    %c0_i32_0 = arith.constant 0 : i32
    %2 = arith.cmpi ne, %1, %c0_i32_0 : i32
    scf.if %2 {
      %cst_18 = arith.constant 0.000000e+00 : f32
      %44 = vector.broadcast %cst_18 : f32 to vector<1x1xf32>
      %c0_19 = arith.constant 0 : index
      %c0_20 = arith.constant 0 : index
      %45 = vector.load %arg3[%c0_19, %c0_20] : memref<1x1xf32, #tpu.memory_space<vmem>>, vector<1x1xf32>
      tpu.vector_store %arg3[%c0_19, %c0_20], %44 {strides = array<i32>} : memref<1x1xf32, #tpu.memory_space<vmem>>, vector<1x1xf32>,
    } else {
    }
    %c0 = arith.constant 0 : index
    %c0_1 = arith.constant 0 : index
    %c0_2 = arith.constant 0 : index
    %3 = vector.load %arg1[%c0, %c0_1, %c0_2] : memref<2x9x256xbf16, #tpu.memory_space<vmem>>, vector<2x9x256xbf16>
    %4 = arith.extf %3 : vector<2x9x256xbf16> to vector<2x9x256xf32>
    %c0_3 = arith.constant 0 : index
    %c0_4 = arith.constant 0 : index
    %c0_5 = arith.constant 0 : index
    %5 = vector.load %arg2[%c0_3, %c0_4, %c0_5] : memref<1x1x256xf32, #tpu.memory_space<vmem>>, vector<1x1x256xf32>
    %6 = vector.extract_strided_slice %4 {offsets = [0, 0, 0], sizes = [1, 9, 256], strides = [1, 1, 1]} : vector<2x9x256xf32> to vector<1x9x256xf32>
    %7 = vector.extract_strided_slice %4 {offsets = [1, 0, 0], sizes = [1, 9, 256], strides = [1, 1, 1]} : vector<2x9x256xf32> to vector<1x9x256xf32>
    %8 = arith.mulf %6, %6 : vector<1x9x256xf32>
    %cst = arith.constant dense<0.000000e+00> : vector<1x9xf32>
    %9 = vector.multi_reduction <add>, %8, %cst [2] : vector<1x9x256xf32> to vector<1x9xf32>
    %10 = vector.shape_cast %9 : vector<1x9xf32> to vector<1x9x1xf32>
    %cst_6 = arith.constant 9.99999968E-21 : f32
    %11 = vector.broadcast %cst_6 : f32 to vector<1x9x1xf32>
    %12 = arith.addf %10, %11 : vector<1x9x1xf32>
    %13 = math.rsqrt %12 : vector<1x9x1xf32>
    %14 = arith.mulf %7, %7 : vector<1x9x256xf32>
    %cst_7 = arith.constant dense<0.000000e+00> : vector<1x9xf32>
    %15 = vector.multi_reduction <add>, %14, %cst_7 [2] : vector<1x9x256xf32> to vector<1x9xf32>
    %16 = vector.shape_cast %15 : vector<1x9xf32> to vector<1x9x1xf32>
    %cst_8 = arith.constant 9.99999968E-21 : f32
    %17 = vector.broadcast %cst_8 : f32 to vector<1x9x1xf32>
    %18 = arith.addf %16, %17 : vector<1x9x1xf32>
    %19 = math.rsqrt %18 : vector<1x9x1xf32>
    %20 = vector.broadcast %13 : vector<1x9x1xf32> to vector<1x9x256xf32>
    %21 = arith.mulf %6, %20 : vector<1x9x256xf32>
    %22 = vector.broadcast %19 : vector<1x9x1xf32> to vector<1x9x256xf32>
    %23 = arith.mulf %7, %22 : vector<1x9x256xf32>
    %24 = arith.subf %21, %23 : vector<1x9x256xf32>
    %25 = arith.mulf %24, %24 : vector<1x9x256xf32>
    %26 = vector.broadcast %5 : vector<1x1x256xf32> to vector<1x9x256xf32>
    %27 = arith.mulf %25, %26 : vector<1x9x256xf32>
    %cst_9 = arith.constant dense<0.000000e+00> : vector<1x9xf32>
    %28 = vector.multi_reduction <add>, %27, %cst_9 [2] : vector<1x9x256xf32> to vector<1x9xf32>
    %c9_i32 = arith.constant 9 : i32
    %29 = arith.muli %arg0, %c9_i32 : i32
    %30 = tpu.iota {dimensions = array<i32: 1>} : vector<1x9xi32>
    %31 = vector.broadcast %29 : i32 to vector<1x9xi32>
    %32 = arith.addi %31, %30 : vector<1x9xi32>
    %c9_i32_10 = arith.constant 9 : i32
    %33 = vector.broadcast %c9_i32_10 : i32 to vector<1x9xi32>
    %34 = arith.cmpi slt, %32, %33 : vector<1x9xi32>
    %cst_11 = arith.constant 0.000000e+00 : f32
    %35 = vector.broadcast %cst_11 : f32 to vector<1x9xf32>
    %36 = arith.select %34, %28, %35 : vector<1x9xi1>, vector<1x9xf32>
    %c0_12 = arith.constant 0 : index
    %c0_13 = arith.constant 0 : index
    %37 = vector.load %arg3[%c0_12, %c0_13] : memref<1x1xf32, #tpu.memory_space<vmem>>, vector<1x1xf32>
    %cst_14 = arith.constant dense<0.000000e+00> : vector<1xf32>
    %38 = vector.multi_reduction <add>, %36, %cst_14 [1] : vector<1x9xf32> to vector<1xf32>
    %39 = vector.shape_cast %38 : vector<1xf32> to vector<1x1xf32>
    %cst_15 = arith.constant 0.111111112 : f32
    %40 = vector.broadcast %cst_15 : f32 to vector<1x1xf32>
    %41 = arith.mulf %39, %40 : vector<1x1xf32>
    %42 = arith.addf %37, %41 : vector<1x1xf32>
    %c0_16 = arith.constant 0 : index
    %c0_17 = arith.constant 0 : index
    %43 = vector.load %arg3[%c0_16, %c0_17] : memref<1x1xf32, #tpu.memory_space<vmem>>, vector<1x1xf32>
    tpu.vector_store %arg3[%c0_16, %c0_17], %42 {strides = array<i32>} : memref<1x1xf32, #tpu.memory_space<vmem>>, vector<1x1xf32>,
    return
  }
  func.func @transform_0(%arg0: i32) -> (i32, i32, i32) {
    %c0_i32 = arith.constant 0 : i32
    %c0_i32_0 = arith.constant 0 : i32
    %c0_i32_1 = arith.constant 0 : i32
    return %c0_i32, %arg0, %c0_i32_0 : i32, i32, i32
  }
  func.func @transform_1(%arg0: i32) -> (i32, i32, i32) {
    %c0_i32 = arith.constant 0 : i32
    %c0_i32_0 = arith.constant 0 : i32
    %c0_i32_1 = arith.constant 0 : i32
    %c0_i32_2 = arith.constant 0 : i32
    return %c0_i32, %c0_i32_0, %c0_i32_1 : i32, i32, i32
  }
  func.func @transform_2(%arg0: i32) -> (i32, i32) {
    %c0_i32 = arith.constant 0 : i32
    %c0_i32_0 = arith.constant 0 : i32
    %c0_i32_1 = arith.constant 0 : i32
    return %c0_i32, %c0_i32_0 : i32, i32
  }
}

module attributes {stable_mosaic.version = 11 : i64} {
  func.func @_conv_mm_bias_relu_kernel(%arg0: i32, %arg1: memref<16x2304xbf16, #tpu.memory_space<vmem>>, %arg2: memref<2304x256xbf16, #tpu.memory_space<vmem>>, %arg3: memref<1x256xf32, #tpu.memory_space<vmem>>, %arg4: memref<16x256xbf16, #tpu.memory_space<vmem>>) attributes {dimension_semantics = [#tpu.dimension_semantics<parallel>], iteration_bounds = array<i64: 2>, scalar_prefetch = 0 : i64, scratch_operands = 0 : i64, tpu.core_type = #tpu.core_type<tc>, window_params = [{transform_indices = @transform_0, window_bounds = array<i64: 16, 2304>}, {pipeline_mode = #tpu.pipeline_mode<synchronous>, transform_indices = @transform_1, window_bounds = array<i64: 2304, 256>}, {pipeline_mode = #tpu.pipeline_mode<synchronous>, transform_indices = @transform_2, window_bounds = array<i64: 1, 256>}, {transform_indices = @transform_3, window_bounds = array<i64: 16, 256>}]} {
    %c0 = arith.constant 0 : index
    %c0_0 = arith.constant 0 : index
    %0 = vector.load %arg1[%c0, %c0_0] : memref<16x2304xbf16, #tpu.memory_space<vmem>>, vector<16x2304xbf16>
    %c0_1 = arith.constant 0 : index
    %c0_2 = arith.constant 0 : index
    %1 = vector.load %arg2[%c0_1, %c0_2] : memref<2304x256xbf16, #tpu.memory_space<vmem>>, vector<2304x256xbf16>
    %cst = arith.constant dense<0.000000e+00> : vector<16x256xf32>
    %2 = tpu.matmul %0, %1, %cst {dimension_numbers = #tpu.dot_dimension_numbers<[1], [0], [0], [1], [0, 0, 1, 1], [], []>} : vector<16x2304xbf16>, vector<2304x256xbf16>, vector<16x256xf32> -> vector<16x256xf32>
    %c0_3 = arith.constant 0 : index
    %c0_4 = arith.constant 0 : index
    %3 = vector.load %arg3[%c0_3, %c0_4] : memref<1x256xf32, #tpu.memory_space<vmem>>, vector<1x256xf32>
    %4 = vector.broadcast %3 : vector<1x256xf32> to vector<16x256xf32>
    %5 = arith.addf %2, %4 : vector<16x256xf32>
    %cst_5 = arith.constant 0.000000e+00 : f32
    %6 = vector.broadcast %cst_5 : f32 to vector<16x256xf32>
    %7 = arith.maximumf %5, %6 : vector<16x256xf32>
    %8 = arith.truncf %7 : vector<16x256xf32> to vector<16x256xbf16>
    %c0_6 = arith.constant 0 : index
    %c0_7 = arith.constant 0 : index
    %9 = vector.load %arg4[%c0_6, %c0_7] : memref<16x256xbf16, #tpu.memory_space<vmem>>, vector<16x256xbf16>
    tpu.vector_store %arg4[%c0_6, %c0_7], %8 {strides = array<i32>} : memref<16x256xbf16, #tpu.memory_space<vmem>>, vector<16x256xbf16>,
    return
  }
  func.func @transform_0(%arg0: i32) -> (i32, i32) {
    %c0_i32 = arith.constant 0 : i32
    %c0_i32_0 = arith.constant 0 : i32
    return %arg0, %c0_i32 : i32, i32
  }
  func.func @transform_1(%arg0: i32) -> (i32, i32) {
    %c0_i32 = arith.constant 0 : i32
    %c0_i32_0 = arith.constant 0 : i32
    %c0_i32_1 = arith.constant 0 : i32
    return %c0_i32, %c0_i32_0 : i32, i32
  }
  func.func @transform_2(%arg0: i32) -> (i32, i32) {
    %c0_i32 = arith.constant 0 : i32
    %c0_i32_0 = arith.constant 0 : i32
    %c0_i32_1 = arith.constant 0 : i32
    return %c0_i32, %c0_i32_0 : i32, i32
  }
  func.func @transform_3(%arg0: i32) -> (i32, i32) {
    %c0_i32 = arith.constant 0 : i32
    %c0_i32_0 = arith.constant 0 : i32
    return %arg0, %c0_i32 : i32, i32
  }
}

</mosaic_0001>

<bundles_post_ra>
// kernel: _lambda_.10
= control target key start
LH: loop header
LB: loop body
LE: loop exit
PB: predicated region body
PF: predicated region fallthrough
CT: control target
= control target key end

     0   :  { %s2253_s12 = smov 0   ;;  %s2255_s13 = smov 0   ;;  %s2626_s0 = inlined_call_operand.vmem [shape: bf16[450,384], index: 0, kind: input, shape index: {}]   ;;  %s2627_s1 = inlined_call_operand.vmem [shape: bf16[384,128], index: 1, kind: input, shape index: {}]   ;;  %s2628_s2 = inlined_call_operand.vmem [shape: f32[1,128], index: 2, kind: input, shape index: {}]   ;;  %s2629_s3 = inlined_call_operand.vmem [shape: bf16[450,128], index: 3, kind: output, shape index: {}]  }
   0x1   :  { %s2257_s14 = smov 0  }
   0x2 LB: > { %s2266_s15 = sadd.s32 4294967295, %s2197_s14   ;;  %s2268_s16 = sadd.s32 1, %s2197_s14   ;;  %s2197_s14 = sphi %s2257_s14, %s2636_s14   ;;  %s2193_s13 = sphi %s2255_s13, %s2635_s13   ;;  %s2189_s12 = sphi %s2253_s12, %s2634_s12  }
   0x3   : > { %s85_s17 = ssub.s32 %s2197_s14, %s2268_s16  ;;  %s88_s18 = sadd.s32 1, %s2193_s13 }
   0x4   : > { %p86_p0 = scmp.eq.s32.totalorder %s85_s17, 0  ;;  %p98_p1 = scmp.ne.s32.totalorder %s2193_s13, %s2189_s12 }
   0x5   : > { %p99_p2 = scmp.eq.s32.totalorder %s2266_s15, 1  ;;  %p1523_p3 = scmp.ge.s32.totalorder %s2197_s14, 1 }
   0x6   : > { %s2276_s19 = scalar_select %p86_p0, %s2193_s13, %s88_s18  }
   0x7   : > { %p2278_p4 = por %p99_p2, %p98_p1  ;;  %p149_p5 = scmp.lt.s32.totalorder %s2197_s14, 3 }
   0x9   : > { %p150_p6 = pnand %p1523_p3, %p149_p5 }
   0xa   : > { %s2308_s8 = smul.u32 (!%p150_p6), 30, %s2266_s15 }
   0xb   : > { %153 = sbr.rel (%p150_p6) target bundleno = 444 (0x1bc), region = 32 }
   0xc   : > { %p184_p7 = scmp.lt.s32.totalorder (!%p150_p6), %s2308_s8, 56 }
  0x10   : > { %v2055_v0 = vld [vmem:[%s2627_s1 + $0x78] sm:$0xff]   ;;  %v2231_v1 = vmov 0.0   ;;  %v2058_v4 = vld [vmem:[%s2627_s1 + $0x70] sm:$0xff]   ;;  %vm2232_vm0 = vmmov 0   ;;  %v2061_v7 = vld [vmem:[%s2627_s1 + $0x68] sm:$0xff]   ;;  %s185_s29 = scalar_select %p184_p7, %s2308_s8, 56 }
  0x11   : > { %1886 = vmatprep.subr.bf16.mxu1 %v2231_v1  ;;  %v2056_v2 = vld [vmem:[%s2627_s1 + $0x38] sm:$0xff]   ;;  %1757 = vmatprep.subr.bf16.mxu0 %v2055_v0  ;;  %v2059_v5 = vld [vmem:[%s2627_s1 + $0x30] sm:$0xff]   ;;  %v2062_v8 = vld [vmem:[%s2627_s1 + $0x28] sm:$0xff]   ;;  %s1194_s14 = ssub.s32 (%p2278_p4), 57, %s2308_s8  ;;  %s1667_s17 = smul.u32 (%p2278_p4), 120, %s2266_s15 }
  0x12   : > { %v2057_v3 = vld [vmem:[%s2627_s1 + $0xb8] sm:$0xff]   ;;  %1758 = vmatpush3.bf16.msra.mxu0 %v2056_v2  ;;  %1902 = vmatprep.mubr.msk.bf16.mxu1 %vm2232_vm0, %v2231_v1  ;;  %v2060_v6 = vld [vmem:[%s2627_s1 + $0xb0] sm:$0xff]   ;;  %v2063_v9 = vld [vmem:[%s2627_s1 + $0xa8] sm:$0xff]   ;;  %s1963_s10 = smul.u32 12, %s185_s29  ;;  %p1195_p8 = scmp.lt.s32.totalorder (%p2278_p4), %s1194_s14, 30 }
  0x13   : > { %1887 = vmatpush3.bf16.msra.mxu1 %v2057_v3  ;;  %1759 = vmatprep.subr.bf16.mxu0 %v2058_v4  ;;  %v2064_v10 = vld [vmem:[%s2627_s1 + $0x60] sm:$0xff]   ;;  %v2067_v13 = vld [vmem:[%s2627_s1 + $0x58] sm:$0xff]   ;;  %v2070_v16 = vld [vmem:[%s2627_s1 + $0x50] sm:$0xff]   ;;  %s2507_s22 = scalar_lea.vmem (%p2278_p4), %s2629_s3, %s1667_s17  }
  0x14   : > { %1888 = vmatprep.subr.bf16.mxu1 %v2231_v1  ;;  %v2065_v11 = vld [vmem:[%s2627_s1 + $0x20] sm:$0xff]   ;;  %v2068_v14 = vld [vmem:[%s2627_s1 + $0x18] sm:$0xff]   ;;  %v2071_v17 = vld [vmem:[%s2627_s1 + $0x10] sm:$0xff]   ;;  %s2358_s25 = scalar_lea.vmem %s2626_s0, %s1963_s10  ;;  %s175_s10 = sand.u32 1, %s2189_s12  }
  0x15   : > { %v2066_v12 = vld [vmem:[%s2627_s1 + $0xa0] sm:$0xff]   ;;  %v2069_v15 = vld [vmem:[%s2627_s1 + $0x98] sm:$0xff]   ;;  %v2072_v18 = vld [vmem:[%s2627_s1 + $0x90] sm:$0xff]   ;;  %s1962_s11 = smul.u32 120, %s175_s10 }
  0x16   : > { %1760 = vmatpush3.bf16.msra.mxu0 %v2059_v5  ;;  %v2073_v19 = vld [vmem:[%s2627_s1 + $0x48] sm:$0xff]   ;;  %v2076_v22 = vld [vmem:[%s2627_s1 + $0x40] sm:$0xff]   ;;  %v2089_v32 = vld [vmem:[%s2358_s25 + $0x30] ss:$12 sps:$4 sm:$0xff]  }
  0x17   : > { %1889 = vmatpush3.bf16.msra.mxu1 %v2060_v6  ;;  %1761 = vmatprep.subr.bf16.mxu0 %v2061_v7  ;;  %v2074_v20 = vld [vmem:[%s2627_s1 + $0x8] sm:$0xff]   ;;  %v2081_v23 = vld [vmem:[%s2358_s25 + $0x4] ss:$12 sps:$4 sm:$0xff]   ;;  %v2087_v31 = vld [vmem:[%s2358_s25 + $0x34] ss:$12 sps:$4 sm:$0xff]   ;;  %s2456_s12 = scalar_lea.vmem [#allocation2], %s1962_s11  }
  0x18   : > { %1890 = vmatprep.subr.bf16.mxu1 %v2231_v1  ;;  %v2075_v21 = vld [vmem:[%s2627_s1 + $0x88] sm:$0xff]   ;;  %v2077_v24 = vld [vmem:[%s2627_s1] sm:$0xff]   ;;  %732 = vmatprep.mubr.bf16.mxu0 %v2081_v23  ;;  %v2094_v36 = vld [vmem:[%s2358_s25 + $0x50] ss:$12 sps:$4 sm:$0xff]  }
  0x19   : > { %v2078_v25 = vld [vmem:[%s2627_s1 + $0x80] sm:$0xff]   ;;  %v2082_v27 = vld [vmem:[%s2358_s25 + $0x8] ss:$12 sps:$4 sm:$0xff]   ;;  %v2091_v34 = vld [vmem:[%s2358_s25 + $0x4c] ss:$12 sps:$4 sm:$0xff]  }
  0x1a   : > { %1762 = vmatpush3.bf16.msra.mxu0 %v2062_v8  ;;  %v2079_v26 = vld [vmem:[%s2358_s25] ss:$12 sps:$4 sm:$0xff]   ;;  %v2083_v28 = vld [vmem:[%s2358_s25 + $0x1c] ss:$12 sps:$4 sm:$0xff]   ;;  %v2085_v29 = vld [vmem:[%s2358_s25 + $0x18] ss:$12 sps:$4 sm:$0xff]  }
  0x1b   : > { %1891 = vmatpush3.bf16.msra.mxu1 %v2063_v9  ;;  %1763 = vmatprep.subr.bf16.mxu0 %v2064_v10  ;;  %v2086_v30 = vld [vmem:[%s2358_s25 + $0x20] ss:$12 sps:$4 sm:$0xff]   ;;  %v2090_v33 = vld [vmem:[%s2358_s25 + $0x38] ss:$12 sps:$4 sm:$0xff]   ;;  %v2093_v35 = vld [vmem:[%s2358_s25 + $0x48] ss:$12 sps:$4 sm:$0xff]  }
  0x1c   : > { %1892 = vmatprep.subr.bf16.mxu1 %v2231_v1  ;;  %v2095_v37 = vld [vmem:[%s2358_s25 + $0x64] ss:$12 sps:$4 sm:$0xff]   ;;  %v2097_v38 = vld [vmem:[%s2358_s25 + $0x60] ss:$12 sps:$4 sm:$0xff]   ;;  %v2098_v39 = vld [vmem:[%s2358_s25 + $0x68] ss:$12 sps:$4 sm:$0xff]  }
  0x1d   : > { %v2099_v40 = vld [vmem:[%s2358_s25 + $0x7c] ss:$12 sps:$4 sm:$0xff]   ;;  %v2101_v41 = vld [vmem:[%s2358_s25 + $0x78] ss:$12 sps:$4 sm:$0xff]   ;;  %v2102_v42 = vld [vmem:[%s2358_s25 + $0x80] ss:$12 sps:$4 sm:$0xff]  }
  0x1e   : > { %1764 = vmatpush3.bf16.msra.mxu0 %v2065_v11  ;;  %v2103_v43 = vld [vmem:[%s2358_s25 + $0x94] ss:$12 sps:$4 sm:$0xff]   ;;  %v2105_v44 = vld [vmem:[%s2358_s25 + $0x90] ss:$12 sps:$4 sm:$0xff]   ;;  %v2106_v45 = vld [vmem:[%s2358_s25 + $0x98] ss:$12 sps:$4 sm:$0xff]  }
  0x1f   : > { %1893 = vmatpush3.bf16.msra.mxu1 %v2066_v12  ;;  %1765 = vmatprep.subr.bf16.mxu0 %v2067_v13  ;;  %v2107_v46 = vld [vmem:[%s2358_s25 + $0xac] ss:$12 sps:$4 sm:$0xff]   ;;  %v2109_v47 = vld [vmem:[%s2358_s25 + $0xa8] ss:$12 sps:$4 sm:$0xff]   ;;  %v2110_v48 = vld [vmem:[%s2358_s25 + $0xb0] ss:$12 sps:$4 sm:$0xff]  }
  0x20   : > { %1894 = vmatprep.subr.bf16.mxu1 %v2231_v1  ;;  %v2111_v49 = vld [vmem:[%s2358_s25 + $0xc4] ss:$12 sps:$4 sm:$0xff]   ;;  %v2113_v50 = vld [vmem:[%s2358_s25 + $0xc0] ss:$12 sps:$4 sm:$0xff]   ;;  %v2114_v51 = vld [vmem:[%s2358_s25 + $0xc8] ss:$12 sps:$4 sm:$0xff]  }
  0x21   : > { %v2115_v52 = vld [vmem:[%s2358_s25 + $0xdc] ss:$12 sps:$4 sm:$0xff]   ;;  %v2117_v53 = vld [vmem:[%s2358_s25 + $0xd8] ss:$12 sps:$4 sm:$0xff]   ;;  %v2118_v54 = vld [vmem:[%s2358_s25 + $0xe0] ss:$12 sps:$4 sm:$0xff]  }
  0x22   : > { %1766 = vmatpush3.bf16.msra.mxu0 %v2068_v14  ;;  %v2119_v55 = vld [vmem:[%s2358_s25 + $0xf4] ss:$12 sps:$4 sm:$0xff]   ;;  %v2121_v56 = vld [vmem:[%s2358_s25 + $0xf0] ss:$12 sps:$4 sm:$0xff]   ;;  %v2122_v57 = vld [vmem:[%s2358_s25 + $0xf8] ss:$12 sps:$4 sm:$0xff]  }
  0x23   : > { %1895 = vmatpush3.bf16.msra.mxu1 %v2069_v15  ;;  %1767 = vmatprep.subr.bf16.mxu0 %v2070_v16  ;;  %v2123_v58 = vld [vmem:[%s2358_s25 + $0x10c] ss:$12 sps:$4 sm:$0xff]   ;;  %v2125_v59 = vld [vmem:[%s2358_s25 + $0x108] ss:$12 sps:$4 sm:$0xff]   ;;  %v2126_v60 = vld [vmem:[%s2358_s25 + $0x110] ss:$12 sps:$4 sm:$0xff]  }
  0x24   : > { %1896 = vmatprep.subr.bf16.mxu1 %v2231_v1  ;;  %v2127_v61 = vld [vmem:[%s2358_s25 + $0x124] ss:$12 sps:$4 sm:$0xff]   ;;  %v2129_v62 = vld [vmem:[%s2358_s25 + $0x120] ss:$12 sps:$4 sm:$0xff]   ;;  %v2130_v63 = vld [vmem:[%s2358_s25 + $0x128] ss:$12 sps:$4 sm:$0xff]  }
  0x25   : > { %v2131_v0 = vld [vmem:[%s2358_s25 + $0x13c] ss:$12 sps:$4 sm:$0xff]   ;;  %v2133_v2 = vld [vmem:[%s2358_s25 + $0x138] ss:$12 sps:$4 sm:$0xff]   ;;  %v2134_v3 = vld [vmem:[%s2358_s25 + $0x140] ss:$12 sps:$4 sm:$0xff]  }
  0x26   : > { %1768 = vmatpush3.bf16.msra.mxu0 %v2071_v17  ;;  %v2135_v4 = vld [vmem:[%s2358_s25 + $0x154] ss:$12 sps:$4 sm:$0xff]   ;;  %v2137_v5 = vld [vmem:[%s2358_s25 + $0x150] ss:$12 sps:$4 sm:$0xff]   ;;  %v2138_v6 = vld [vmem:[%s2358_s25 + $0x158] ss:$12 sps:$4 sm:$0xff]  }
  0x27   : > { %1897 = vmatpush3.bf16.msra.mxu1 %v2072_v18  ;;  %1769 = vmatprep.subr.bf16.mxu0 %v2073_v19  ;;  %v2450_v9 = vld [vmem:[%s2628_s2] ss:$0 sm:$0xff] }
  0x28   : > { %1898 = vmatprep.subr.bf16.mxu1 %v2231_v1 }
  0x2a   : > { %1770 = vmatpush3.bf16.msra.mxu0 %v2074_v20 }
  0x2b   : > { %1899 = vmatpush3.bf16.msra.mxu1 %v2075_v21  ;;  %1771 = vmatprep.subr.bf16.mxu0 %v2076_v22 }
  0x2c   : > { %1900 = vmatprep.subr.bf16.mxu1 %v2231_v1 }
  0x2e   : > { %1772 = vmatpush3.bf16.msra.mxu0 %v2077_v24 }
  0x2f   : > { %1901 = vmatpush3.bf16.msra.mxu1 %v2078_v25 }
  0x31   : > { %733 = vmatmul.mubr.bf16.vlgmr.msra.gmra.mxu0 %v2079_v26 }
  0x32   : > { %1903 = vmatmul.mubr.bf16.vlgmr.msra.gmra.mxu1 %v2082_v27  ;;  %740 = vmatprep.mubr.bf16.mxu0 %v2083_v28 }
  0x33   : > { %1906 = vmatprep.mubr.msk.bf16.mxu1 %vm2232_vm0, %v2231_v1 }
  0x39   : > { %741 = vmatmul.mubr.bf16.gmra.mxu0 %v2085_v29 }
  0x3a   : > { %1907 = vmatmul.mubr.bf16.gmra.mxu1 %v2086_v30  ;;  %748 = vmatprep.mubr.bf16.mxu0 %v2087_v31 }
  0x3b   : > { %1910 = vmatprep.mubr.msk.bf16.mxu1 %vm2232_vm0, %v2231_v1 }
  0x41   : > { %749 = vmatmul.mubr.bf16.gmra.mxu0 %v2089_v32 }
  0x42   : > { %1911 = vmatmul.mubr.bf16.gmra.mxu1 %v2090_v33  ;;  %756 = vmatprep.mubr.bf16.mxu0 %v2091_v34 }
  0x43   : > { %1914 = vmatprep.mubr.msk.bf16.mxu1 %vm2232_vm0, %v2231_v1 }
  0x49   : > { %757 = vmatmul.mubr.bf16.gmra.mxu0 %v2093_v35 }
  0x4a   : > { %1915 = vmatmul.mubr.bf16.gmra.mxu1 %v2094_v36  ;;  %764 = vmatprep.mubr.bf16.mxu0 %v2095_v37 }
  0x4b   : > { %1918 = vmatprep.mubr.msk.bf16.mxu1 %vm2232_vm0, %v2231_v1 }
  0x51   : > { %765 = vmatmul.mubr.bf16.gmra.mxu0 %v2097_v38 }
  0x52   : > { %1919 = vmatmul.mubr.bf16.gmra.mxu1 %v2098_v39  ;;  %772 = vmatprep.mubr.bf16.mxu0 %v2099_v40 }
  0x53   : > { %1922 = vmatprep.mubr.msk.bf16.mxu1 %vm2232_vm0, %v2231_v1 }
  0x59   : > { %773 = vmatmul.mubr.bf16.gmra.mxu0 %v2101_v41 }
  0x5a   : > { %1923 = vmatmul.mubr.bf16.gmra.mxu1 %v2102_v42  ;;  %780 = vmatprep.mubr.bf16.mxu0 %v2103_v43 }
  0x5b   : > { %1926 = vmatprep.mubr.msk.bf16.mxu1 %vm2232_vm0, %v2231_v1 }
  0x61   : > { %781 = vmatmul.mubr.bf16.gmra.mxu0 %v2105_v44 }
  0x62   : > { %1927 = vmatmul.mubr.bf16.gmra.mxu1 %v2106_v45  ;;  %788 = vmatprep.mubr.bf16.mxu0 %v2107_v46 }
  0x63   : > { %1930 = vmatprep.mubr.msk.bf16.mxu1 %vm2232_vm0, %v2231_v1 }
  0x69   : > { %789 = vmatmul.mubr.bf16.gmra.mxu0 %v2109_v47 }
  0x6a   : > { %1931 = vmatmul.mubr.bf16.gmra.mxu1 %v2110_v48  ;;  %796 = vmatprep.mubr.bf16.mxu0 %v2111_v49 }
  0x6b   : > { %1934 = vmatprep.mubr.msk.bf16.mxu1 %vm2232_vm0, %v2231_v1 }
  0x71   : > { %797 = vmatmul.mubr.bf16.gmra.mxu0 %v2113_v50 }
  0x72   : > { %1935 = vmatmul.mubr.bf16.gmra.mxu1 %v2114_v51  ;;  %804 = vmatprep.mubr.bf16.mxu0 %v2115_v52 }
  0x73   : > { %1938 = vmatprep.mubr.msk.bf16.mxu1 %vm2232_vm0, %v2231_v1 }
  0x79   : > { %805 = vmatmul.mubr.bf16.gmra.mxu0 %v2117_v53 }
  0x7a   : > { %1939 = vmatmul.mubr.bf16.gmra.mxu1 %v2118_v54  ;;  %812 = vmatprep.mubr.bf16.mxu0 %v2119_v55 }
  0x7b   : > { %1942 = vmatprep.mubr.msk.bf16.mxu1 %vm2232_vm0, %v2231_v1 }
  0x81   : > { %813 = vmatmul.mubr.bf16.gmra.mxu0 %v2121_v56 }
  0x82   : > { %1943 = vmatmul.mubr.bf16.gmra.mxu1 %v2122_v57  ;;  %820 = vmatprep.mubr.bf16.mxu0 %v2123_v58 }
  0x83   : > { %1946 = vmatprep.mubr.msk.bf16.mxu1 %vm2232_vm0, %v2231_v1 }
  0x89   : > { %821 = vmatmul.mubr.bf16.gmra.mxu0 %v2125_v59 }
  0x8a   : > { %1947 = vmatmul.mubr.bf16.gmra.mxu1 %v2126_v60  ;;  %828 = vmatprep.mubr.bf16.mxu0 %v2127_v61 }
  0x8b   : > { %1950 = vmatprep.mubr.msk.bf16.mxu1 %vm2232_vm0, %v2231_v1 }
  0x91   : > { %829 = vmatmul.mubr.bf16.gmra.mxu0 %v2129_v62 }
  0x92   : > { %1951 = vmatmul.mubr.bf16.gmra.mxu1 %v2130_v63  ;;  %836 = vmatprep.mubr.bf16.mxu0 %v2131_v0 }
  0x93   : > { %1954 = vmatprep.mubr.msk.bf16.mxu1 %vm2232_vm0, %v2231_v1 }
  0x99   : > { %837 = vmatmul.mubr.bf16.gmra.mxu0 %v2133_v2 }
  0x9a   : > { %1955 = vmatmul.mubr.bf16.gmra.mxu1 %v2134_v3  ;;  %844 = vmatprep.mubr.bf16.mxu0 %v2135_v4 }
  0x9b   : > { %1958 = vmatprep.mubr.msk.bf16.mxu1 %vm2232_vm0, %v2231_v1 }
  0xa1   : > { %845 = vmatmul.mubr.bf16.gmra.mxu0 %v2137_v5 }
  0xa2   : > { %1959 = vmatmul.mubr.bf16.gmra.mxu1 %v2138_v6 }
  0xf1   : > { %v1773_v7 = vpop.f32.mrf.mxu0 }
  0xf2   : > { %v887_v8 = vpop.f32.mrf.mxu1 }
  0xf3   : > { %v1774_v10 = vpop.f32.mrf.mxu0 }
  0xf4   : > { %v1775_v11 = vadd.f32 %v1774_v10, %v1773_v7  ;;  %v1904_v12 = vpop.f32.mrf.mxu1 }
  0xf5   : > { %v1776_v13 = vpop.f32.mrf.mxu0 }
  0xf6   : > { %v735_v14 = vadd.f32 %v1775_v11, %v2450_v9  ;;  %v890_v15 = vpop.f32.mrf.mxu1 }
  0xf7   : > { %v1777_v16 = vpop.f32.mrf.mxu0 }
  0xf8   : > { %v1778_v1 = vadd.f32 %v1777_v16, %v1776_v13  ;;  %v1905_v17 = vpop.f32.mrf.mxu1  ;;  %v888_v19 = vadd.f32 %v887_v8, %v735_v14 }
  0xf9   : > { %v1779_v18 = vpop.f32.mrf.mxu0 }
  0xfa   : > { %v738_v20 = vadd.f32 %v1778_v1, %v2450_v9  ;;  %v895_v21 = vpop.f32.mrf.mxu1  ;;  %v1006_v27 = vmax.f32 %v888_v19, 0.0 }
  0xfb   : > { %v1780_v22 = vpop.f32.mrf.mxu0 }
  0xfc   : > { %v891_v23 = vadd.f32 %v890_v15, %v738_v20  ;;  %v1781_v24 = vadd.f32 %v1780_v22, %v1779_v18  ;;  %v1908_v25 = vpop.f32.mrf.mxu1 }
  0xfd   : > { %v1782_v26 = vpop.f32.mrf.mxu0 }
  0xfe   : > { %v1007_v28 = vmax.f32 %v891_v23, 0.0  ;;  %v743_v29 = vadd.f32 %v1781_v24, %v2450_v9  ;;  %v898_v30 = vpop.f32.mrf.mxu1 }
  0xff   : > { %v1783_v31 = vpop.f32.mrf.mxu0 }
 0x100   : > { %v1671_v32 = vpack.c.bf16 %v1007_v28, %v1006_v27  ;;  %v1784_v33 = vadd.f32 %v1783_v31, %v1782_v26  ;;  %v1909_v34 = vpop.f32.mrf.mxu1  ;;  %v896_v36 = vadd.f32 %v895_v21, %v743_v29 }
 0x101   : > { %v1785_v35 = vpop.f32.mrf.mxu0 }
 0x102   : > { %1672 = vst [vmem:[%s2456_s12] sm:$0xff] %v1671_v32   ;;  %v746_v37 = vadd.f32 %v1784_v33, %v2450_v9  ;;  %v903_v38 = vpop.f32.mrf.mxu1  ;;  %v1008_v44 = vmax.f32 %v896_v36, 0.0 }
 0x103   : > { %v1786_v39 = vpop.f32.mrf.mxu0 }
 0x104   : > { %v899_v40 = vadd.f32 %v898_v30, %v746_v37  ;;  %v1787_v41 = vadd.f32 %v1786_v39, %v1785_v35  ;;  %v1912_v42 = vpop.f32.mrf.mxu1 }
 0x105   : > { %v1788_v43 = vpop.f32.mrf.mxu0 }
 0x106   : > { %v1009_v45 = vmax.f32 %v899_v40, 0.0  ;;  %v751_v46 = vadd.f32 %v1787_v41, %v2450_v9  ;;  %v906_v47 = vpop.f32.mrf.mxu1 }
 0x107   : > { %v1789_v48 = vpop.f32.mrf.mxu0 }
 0x108   : > { %v1676_v49 = vpack.c.bf16 %v1009_v45, %v1008_v44  ;;  %v1790_v50 = vadd.f32 %v1789_v48, %v1788_v43  ;;  %v1913_v51 = vpop.f32.mrf.mxu1  ;;  %v904_v53 = vadd.f32 %v903_v38, %v751_v46 }
 0x109   : > { %v1791_v52 = vpop.f32.mrf.mxu0 }
 0x10a   : > { %1743 = vst [vmem:[%s2456_s12 + $0x8] sm:$0xff] %v1676_v49   ;;  %v754_v54 = vadd.f32 %v1790_v50, %v2450_v9  ;;  %v911_v55 = vpop.f32.mrf.mxu1  ;;  %v1010_v61 = vmax.f32 %v904_v53, 0.0 }
 0x10b   : > { %v1792_v56 = vpop.f32.mrf.mxu0 }
 0x10c   : > { %v907_v57 = vadd.f32 %v906_v47, %v754_v54  ;;  %v1793_v58 = vadd.f32 %v1792_v56, %v1791_v52  ;;  %v1916_v59 = vpop.f32.mrf.mxu1 }
 0x10d   : > { %v1794_v60 = vpop.f32.mrf.mxu0 }
 0x10e   : > { %v1011_v62 = vmax.f32 %v907_v57, 0.0  ;;  %v759_v63 = vadd.f32 %v1793_v58, %v2450_v9  ;;  %v914_v0 = vpop.f32.mrf.mxu1 }
 0x10f   : > { %v1795_v2 = vpop.f32.mrf.mxu0 }
 0x110   : > { %v1681_v3 = vpack.c.bf16 %v1011_v62, %v1010_v61  ;;  %v1796_v4 = vadd.f32 %v1795_v2, %v1794_v60  ;;  %v1917_v5 = vpop.f32.mrf.mxu1  ;;  %v912_v7 = vadd.f32 %v911_v55, %v759_v63 }
 0x111   : > { %v1797_v6 = vpop.f32.mrf.mxu0 }
 0x112   : > { %1744 = vst [vmem:[%s2456_s12 + $0x10] sm:$0xff] %v1681_v3   ;;  %v762_v8 = vadd.f32 %v1796_v4, %v2450_v9  ;;  %v919_v10 = vpop.f32.mrf.mxu1  ;;  %v1012_v16 = vmax.f32 %v912_v7, 0.0 }
 0x113   : > { %v1798_v11 = vpop.f32.mrf.mxu0 }
 0x114   : > { %v915_v12 = vadd.f32 %v914_v0, %v762_v8  ;;  %v1799_v13 = vadd.f32 %v1798_v11, %v1797_v6  ;;  %v1920_v14 = vpop.f32.mrf.mxu1 }
 0x115   : > { %v1800_v15 = vpop.f32.mrf.mxu0 }
 0x116   : > { %v1013_v1 = vmax.f32 %v915_v12, 0.0  ;;  %v767_v17 = vadd.f32 %v1799_v13, %v2450_v9  ;;  %v922_v18 = vpop.f32.mrf.mxu1 }
 0x117   : > { %v1801_v19 = vpop.f32.mrf.mxu0 }
 0x118   : > { %v1686_v20 = vpack.c.bf16 %v1013_v1, %v1012_v16  ;;  %v1802_v21 = vadd.f32 %v1801_v19, %v1800_v15  ;;  %v1921_v22 = vpop.f32.mrf.mxu1  ;;  %v920_v24 = vadd.f32 %v919_v10, %v767_v17 }
 0x119   : > { %v1803_v23 = vpop.f32.mrf.mxu0 }
 0x11a   : > { %1745 = vst [vmem:[%s2456_s12 + $0x18] sm:$0xff] %v1686_v20   ;;  %v770_v25 = vadd.f32 %v1802_v21, %v2450_v9  ;;  %v927_v26 = vpop.f32.mrf.mxu1  ;;  %v1014_v32 = vmax.f32 %v920_v24, 0.0 }
 0x11b   : > { %v1804_v27 = vpop.f32.mrf.mxu0 }
 0x11c   : > { %v923_v28 = vadd.f32 %v922_v18, %v770_v25  ;;  %v1805_v29 = vadd.f32 %v1804_v27, %v1803_v23  ;;  %v1924_v30 = vpop.f32.mrf.mxu1 }
 0x11d   : > { %v1806_v31 = vpop.f32.mrf.mxu0 }
 0x11e   : > { %v1015_v33 = vmax.f32 %v923_v28, 0.0  ;;  %v775_v34 = vadd.f32 %v1805_v29, %v2450_v9  ;;  %v930_v35 = vpop.f32.mrf.mxu1 }
 0x11f   : > { %v1807_v36 = vpop.f32.mrf.mxu0 }
 0x120   : > { %v1691_v37 = vpack.c.bf16 %v1015_v33, %v1014_v32  ;;  %v1808_v38 = vadd.f32 %v1807_v36, %v1806_v31  ;;  %v1925_v39 = vpop.f32.mrf.mxu1  ;;  %v928_v41 = vadd.f32 %v927_v26, %v775_v34 }
 0x121   : > { %v1809_v40 = vpop.f32.mrf.mxu0 }
 0x122   : > { %1746 = vst [vmem:[%s2456_s12 + $0x20] sm:$0xff] %v1691_v37   ;;  %v778_v42 = vadd.f32 %v1808_v38, %v2450_v9  ;;  %v935_v43 = vpop.f32.mrf.mxu1  ;;  %v1016_v49 = vmax.f32 %v928_v41, 0.0 }
 0x123   : > { %v1810_v44 = vpop.f32.mrf.mxu0 }
 0x124   : > { %v931_v45 = vadd.f32 %v930_v35, %v778_v42  ;;  %v1811_v46 = vadd.f32 %v1810_v44, %v1809_v40  ;;  %v1928_v47 = vpop.f32.mrf.mxu1 }
 0x125   : > { %v1812_v48 = vpop.f32.mrf.mxu0 }
 0x126   : > { %v1017_v50 = vmax.f32 %v931_v45, 0.0  ;;  %v783_v51 = vadd.f32 %v1811_v46, %v2450_v9  ;;  %v938_v52 = vpop.f32.mrf.mxu1 }
 0x127   : > { %v1813_v53 = vpop.f32.mrf.mxu0 }
 0x128   : > { %v1696_v54 = vpack.c.bf16 %v1017_v50, %v1016_v49  ;;  %v1814_v55 = vadd.f32 %v1813_v53, %v1812_v48  ;;  %v1929_v56 = vpop.f32.mrf.mxu1  ;;  %v936_v58 = vadd.f32 %v935_v43, %v783_v51 }
 0x129   : > { %v1815_v57 = vpop.f32.mrf.mxu0 }
 0x12a   : > { %1747 = vst [vmem:[%s2456_s12 + $0x28] sm:$0xff] %v1696_v54   ;;  %v786_v59 = vadd.f32 %v1814_v55, %v2450_v9  ;;  %v943_v60 = vpop.f32.mrf.mxu1  ;;  %v1018_v3 = vmax.f32 %v936_v58, 0.0 }
 0x12b   : > { %v1816_v61 = vpop.f32.mrf.mxu0 }
 0x12c   : > { %v939_v62 = vadd.f32 %v938_v52, %v786_v59  ;;  %v1817_v63 = vadd.f32 %v1816_v61, %v1815_v57  ;;  %v1932_v0 = vpop.f32.mrf.mxu1 }
 0x12d   : > { %v1818_v2 = vpop.f32.mrf.mxu0 }
 0x12e   : > { %v1019_v4 = vmax.f32 %v939_v62, 0.0  ;;  %v791_v5 = vadd.f32 %v1817_v63, %v2450_v9  ;;  %v946_v6 = vpop.f32.mrf.mxu1 }
 0x12f   : > { %v1819_v7 = vpop.f32.mrf.mxu0 }
 0x130   : > { %v1701_v8 = vpack.c.bf16 %v1019_v4, %v1018_v3  ;;  %v1820_v10 = vadd.f32 %v1819_v7, %v1818_v2  ;;  %v1933_v11 = vpop.f32.mrf.mxu1  ;;  %v944_v13 = vadd.f32 %v943_v60, %v791_v5 }
 0x131   : > { %v1821_v12 = vpop.f32.mrf.mxu0 }
 0x132   : > { %1748 = vst [vmem:[%s2456_s12 + $0x30] sm:$0xff] %v1701_v8   ;;  %v794_v14 = vadd.f32 %v1820_v10, %v2450_v9  ;;  %v951_v15 = vpop.f32.mrf.mxu1  ;;  %v1020_v20 = vmax.f32 %v944_v13, 0.0 }
 0x133   : > { %v1822_v16 = vpop.f32.mrf.mxu0 }
 0x134   : > { %v947_v1 = vadd.f32 %v946_v6, %v794_v14  ;;  %v1823_v17 = vadd.f32 %v1822_v16, %v1821_v12  ;;  %v1936_v18 = vpop.f32.mrf.mxu1 }
 0x135   : > { %v1824_v19 = vpop.f32.mrf.mxu0 }
 0x136   : > { %v1021_v21 = vmax.f32 %v947_v1, 0.0  ;;  %v799_v22 = vadd.f32 %v1823_v17, %v2450_v9  ;;  %v954_v23 = vpop.f32.mrf.mxu1 }
 0x137   : > { %v1825_v24 = vpop.f32.mrf.mxu0 }
 0x138   : > { %v1706_v25 = vpack.c.bf16 %v1021_v21, %v1020_v20  ;;  %v1826_v26 = vadd.f32 %v1825_v24, %v1824_v19  ;;  %v1937_v27 = vpop.f32.mrf.mxu1  ;;  %v952_v29 = vadd.f32 %v951_v15, %v799_v22 }
 0x139   : > { %v1827_v28 = vpop.f32.mrf.mxu0 }
 0x13a   : > { %1749 = vst [vmem:[%s2456_s12 + $0x38] sm:$0xff] %v1706_v25   ;;  %v802_v30 = vadd.f32 %v1826_v26, %v2450_v9  ;;  %v959_v31 = vpop.f32.mrf.mxu1  ;;  %v1022_v37 = vmax.f32 %v952_v29, 0.0 }
 0x13b   : > { %v1828_v32 = vpop.f32.mrf.mxu0 }
 0x13c   : > { %v955_v33 = vadd.f32 %v954_v23, %v802_v30  ;;  %v1829_v34 = vadd.f32 %v1828_v32, %v1827_v28  ;;  %v1940_v35 = vpop.f32.mrf.mxu1 }
 0x13d   : > { %v1830_v36 = vpop.f32.mrf.mxu0 }
 0x13e   : > { %v1023_v38 = vmax.f32 %v955_v33, 0.0  ;;  %v807_v39 = vadd.f32 %v1829_v34, %v2450_v9  ;;  %v962_v40 = vpop.f32.mrf.mxu1 }
 0x13f   : > { %v1831_v41 = vpop.f32.mrf.mxu0 }
 0x140   : > { %v1711_v42 = vpack.c.bf16 %v1023_v38, %v1022_v37  ;;  %v1832_v43 = vadd.f32 %v1831_v41, %v1830_v36  ;;  %v1941_v44 = vpop.f32.mrf.mxu1  ;;  %v960_v46 = vadd.f32 %v959_v31, %v807_v39 }
 0x141   : > { %v1833_v45 = vpop.f32.mrf.mxu0 }
 0x142   : > { %1750 = vst [vmem:[%s2456_s12 + $0x40] sm:$0xff] %v1711_v42   ;;  %v810_v47 = vadd.f32 %v1832_v43, %v2450_v9  ;;  %v967_v48 = vpop.f32.mrf.mxu1  ;;  %v1024_v54 = vmax.f32 %v960_v46, 0.0 }
 0x143   : > { %v1834_v49 = vpop.f32.mrf.mxu0 }
 0x144   : > { %v963_v50 = vadd.f32 %v962_v40, %v810_v47  ;;  %v1835_v51 = vadd.f32 %v1834_v49, %v1833_v45  ;;  %v1944_v52 = vpop.f32.mrf.mxu1 }
 0x145   : > { %v1836_v53 = vpop.f32.mrf.mxu0 }
 0x146   : > { %v1025_v55 = vmax.f32 %v963_v50, 0.0  ;;  %v815_v56 = vadd.f32 %v1835_v51, %v2450_v9  ;;  %v970_v57 = vpop.f32.mrf.mxu1 }
 0x147   : > { %v1837_v58 = vpop.f32.mrf.mxu0 }
 0x148   : > { %v1716_v59 = vpack.c.bf16 %v1025_v55, %v1024_v54  ;;  %v1838_v60 = vadd.f32 %v1837_v58, %v1836_v53  ;;  %v1945_v61 = vpop.f32.mrf.mxu1  ;;  %v968_v63 = vadd.f32 %v967_v48, %v815_v56 }
 0x149   : > { %v1839_v62 = vpop.f32.mrf.mxu0 }
 0x14a   : > { %1751 = vst [vmem:[%s2456_s12 + $0x48] sm:$0xff] %v1716_v59   ;;  %v818_v0 = vadd.f32 %v1838_v60, %v2450_v9  ;;  %v975_v2 = vpop.f32.mrf.mxu1  ;;  %v1026_v8 = vmax.f32 %v968_v63, 0.0 }
 0x14b   : > { %v1840_v3 = vpop.f32.mrf.mxu0 }
 0x14c   : > { %v971_v4 = vadd.f32 %v970_v57, %v818_v0  ;;  %v1841_v5 = vadd.f32 %v1840_v3, %v1839_v62  ;;  %v1948_v6 = vpop.f32.mrf.mxu1 }
 0x14d   : > { %v1842_v7 = vpop.f32.mrf.mxu0 }
 0x14e   : > { %v1027_v10 = vmax.f32 %v971_v4, 0.0  ;;  %v823_v11 = vadd.f32 %v1841_v5, %v2450_v9  ;;  %v978_v12 = vpop.f32.mrf.mxu1 }
 0x14f   : > { %v1843_v13 = vpop.f32.mrf.mxu0 }
 0x150   : > { %v1721_v14 = vpack.c.bf16 %v1027_v10, %v1026_v8  ;;  %v1844_v15 = vadd.f32 %v1843_v13, %v1842_v7  ;;  %v1949_v16 = vpop.f32.mrf.mxu1  ;;  %v976_v17 = vadd.f32 %v975_v2, %v823_v11 }
 0x151   : > { %v1845_v1 = vpop.f32.mrf.mxu0 }
 0x152   : > { %1752 = vst [vmem:[%s2456_s12 + $0x50] sm:$0xff] %v1721_v14   ;;  %v826_v18 = vadd.f32 %v1844_v15, %v2450_v9  ;;  %v983_v19 = vpop.f32.mrf.mxu1  ;;  %v1028_v25 = vmax.f32 %v976_v17, 0.0 }
 0x153   : > { %v1846_v20 = vpop.f32.mrf.mxu0 }
 0x154   : > { %v979_v21 = vadd.f32 %v978_v12, %v826_v18  ;;  %v1847_v22 = vadd.f32 %v1846_v20, %v1845_v1  ;;  %v1952_v23 = vpop.f32.mrf.mxu1 }
 0x155   : > { %v1848_v24 = vpop.f32.mrf.mxu0 }
 0x156   : > { %v1029_v26 = vmax.f32 %v979_v21, 0.0  ;;  %v831_v27 = vadd.f32 %v1847_v22, %v2450_v9  ;;  %v986_v28 = vpop.f32.mrf.mxu1 }
 0x157   : > { %v1849_v29 = vpop.f32.mrf.mxu0 }
 0x158   : > { %v1726_v30 = vpack.c.bf16 %v1029_v26, %v1028_v25  ;;  %v1850_v31 = vadd.f32 %v1849_v29, %v1848_v24  ;;  %v1953_v32 = vpop.f32.mrf.mxu1  ;;  %v984_v34 = vadd.f32 %v983_v19, %v831_v27 }
 0x159   : > { %v1851_v33 = vpop.f32.mrf.mxu0 }
 0x15a   : > { %1753 = vst [vmem:[%s2456_s12 + $0x58] sm:$0xff] %v1726_v30   ;;  %v834_v35 = vadd.f32 %v1850_v31, %v2450_v9  ;;  %v991_v36 = vpop.f32.mrf.mxu1  ;;  %v1030_v42 = vmax.f32 %v984_v34, 0.0 }
 0x15b   : > { %v1852_v37 = vpop.f32.mrf.mxu0 }
 0x15c   : > { %v987_v38 = vadd.f32 %v986_v28, %v834_v35  ;;  %v1853_v39 = vadd.f32 %v1852_v37, %v1851_v33  ;;  %v1956_v40 = vpop.f32.mrf.mxu1 }
 0x15d   : > { %v1854_v41 = vpop.f32.mrf.mxu0 }
 0x15e   : > { %v1031_v43 = vmax.f32 %v987_v38, 0.0  ;;  %v839_v44 = vadd.f32 %v1853_v39, %v2450_v9  ;;  %v994_v45 = vpop.f32.mrf.mxu1 }
 0x15f   : > { %v1855_v46 = vpop.f32.mrf.mxu0 }
 0x160   : > { %v1731_v47 = vpack.c.bf16 %v1031_v43, %v1030_v42  ;;  %v1856_v48 = vadd.f32 %v1855_v46, %v1854_v41  ;;  %v1957_v49 = vpop.f32.mrf.mxu1  ;;  %v992_v51 = vadd.f32 %v991_v36, %v839_v44 }
 0x161   : > { %v1857_v50 = vpop.f32.mrf.mxu0 }
 0x162   : > { %1754 = vst [vmem:[%s2456_s12 + $0x60] sm:$0xff] %v1731_v47   ;;  %v842_v52 = vadd.f32 %v1856_v48, %v2450_v9  ;;  %v999_v53 = vpop.f32.mrf.mxu1  ;;  %v1032_v59 = vmax.f32 %v992_v51, 0.0 }
 0x163   : > { %v1858_v54 = vpop.f32.mrf.mxu0 }
 0x164   : > { %v995_v55 = vadd.f32 %v994_v45, %v842_v52  ;;  %v1859_v56 = vadd.f32 %v1858_v54, %v1857_v50  ;;  %v1960_v57 = vpop.f32.mrf.mxu1 }
 0x165   : > { %v1860_v58 = vpop.f32.mrf.mxu0 }
 0x166   : > { %v1033_v60 = vmax.f32 %v995_v55, 0.0  ;;  %v847_v61 = vadd.f32 %v1859_v56, %v2450_v9  ;;  %v1002_v62 = vpop.f32.mrf.mxu1 }
 0x167   : > { %v1861_v63 = vpop.f32.mrf.mxu0 }
 0x168   : > { %v1736_v0 = vpack.c.bf16 %v1033_v60, %v1032_v59  ;;  %v1862_v2 = vadd.f32 %v1861_v63, %v1860_v58  ;;  %v1961_v3 = vpop.f32.mrf.mxu1  ;;  %v1000_v4 = vadd.f32 %v999_v53, %v847_v61 }
 0x16a   : > { %1755 = vst [vmem:[%s2456_s12 + $0x68] sm:$0xff] %v1736_v0   ;;  %v850_v5 = vadd.f32 %v1862_v2, %v2450_v9  ;;  %v1034_v7 = vmax.f32 %v1000_v4, 0.0 }
 0x16c   : > { %v1003_v6 = vadd.f32 %v1002_v62, %v850_v5 }
 0x16e   : > { %v1035_v8 = vmax.f32 %v1003_v6, 0.0  ;;  %1192 = sbr.rel (!%p2278_p4) target bundleno = 444 (0x1bc), region = 36 }
 0x170   : > { %v1741_v10 = vpack.c.bf16 %v1035_v8, %v1034_v7 }
 0x172   : > { %1756 = vst [vmem:[%s2456_s12 + $0x70] sm:$0xff] %v1741_v10  }
 0x173   : > { %s2638_s14 = smov (!%p1195_p8, %s1194_s14), 30 }
 0x174   : > { %s1625_s23 = sshll.u32 %s2638_s14, 6 }
 0x175   : > { %p1628_p9 = scmp.eq.s32.totalorder %s1625_s23, 0 }
 0x176   : > { %2139 = sdivrem.u32 (!%p1628_p9), %s2638_s14, 30 }
 0x177   : > { %1203 = sbr.rel (%p1628_p9) target bundleno = 444 (0x1bc), region = 40 }
 0x17f   : > { %s2513_s20 = spop.drf %2139 }
 0x180   : > { %p1629_p10 = scmp.le.s32.totalorder %s2513_s20, 0 }
 0x181   : > { %s2631_s15 = smov (!%p1629_p10), %s2507_s22  ;;  %s2632_s8 = smov (!%p1629_p10), %s2456_s12 }
 0x182   : > { %1476 = sbr.rel (%p1629_p10) target bundleno = 419 (0x1a3), region = 112  ;;  %s2522_s24 = smov (!%p1629_p10), 0  }
 0x183   : > { %s2524_s25 = smov (!%p1629_p10), 0  }
 0x187 LB: >> { %v1221_v9 = vld [vmem:[%s2205_s8] sm:$0xf]  ;;  %v1223_v11 = vld [vmem:[%s2205_s8 + $0x4] sm:$0xf]  ;;  %v1225_v12 = vld [vmem:[%s2205_s8 + $0x8] sm:$0xf]  ;;  %s2213_s25 = sphi %s2524_s25, %s1215_s25   ;;  %s2209_s24 = sphi %s2522_s24, %s2633_s24   ;;  %s2205_s8 = sphi %s2632_s8, %s1286_s8   ;;  %s2201_s15 = sphi %s2631_s15, %s1287_s15  }
 0x188   : >> { %1222 = vst [vmem:[%s2201_s15] sm:$0xf] %v1221_v9  ;;  %1224 = vst [vmem:[%s2201_s15 + $0x4] sm:$0xf] %v1223_v11  ;;  %v1227_v13 = vld [vmem:[%s2205_s8 + $0xc] sm:$0xf]  ;;  %s1281_s26 = sadd.s32 1, %s2209_s24 }
 0x189   : >> { %1226 = vst [vmem:[%s2201_s15 + $0x8] sm:$0xf] %v1225_v12  ;;  %v1229_v14 = vld [vmem:[%s2205_s8 + $0x10] sm:$0xf]  ;;  %v1231_v15 = vld [vmem:[%s2205_s8 + $0x14] sm:$0xf]  ;;  %p1282_p11 = scmp.ge.s32.totalorder %s1281_s26, %s2513_s20 }
 0x18a   : >> { %1228 = vst [vmem:[%s2201_s15 + $0xc] sm:$0xf] %v1227_v13  ;;  %1230 = vst [vmem:[%s2201_s15 + $0x10] sm:$0xf] %v1229_v14  ;;  %v1233_v16 = vld [vmem:[%s2205_s8 + $0x18] sm:$0xf] }
 0x18b   : >> { %1232 = vst [vmem:[%s2201_s15 + $0x14] sm:$0xf] %v1231_v15  ;;  %v1235_v1 = vld [vmem:[%s2205_s8 + $0x1c] sm:$0xf]  ;;  %v1237_v17 = vld [vmem:[%s2205_s8 + $0x20] sm:$0xf] }
 0x18c   : >> { %1234 = vst [vmem:[%s2201_s15 + $0x18] sm:$0xf] %v1233_v16  ;;  %1236 = vst [vmem:[%s2201_s15 + $0x1c] sm:$0xf] %v1235_v1  ;;  %v1239_v18 = vld [vmem:[%s2205_s8 + $0x24] sm:$0xf] }
 0x18d   : >> { %1238 = vst [vmem:[%s2201_s15 + $0x20] sm:$0xf] %v1237_v17  ;;  %v1241_v19 = vld [vmem:[%s2205_s8 + $0x28] sm:$0xf]  ;;  %v1243_v20 = vld [vmem:[%s2205_s8 + $0x2c] sm:$0xf] }
 0x18e   : >> { %1240 = vst [vmem:[%s2201_s15 + $0x24] sm:$0xf] %v1239_v18  ;;  %1242 = vst [vmem:[%s2201_s15 + $0x28] sm:$0xf] %v1241_v19  ;;  %v1245_v21 = vld [vmem:[%s2205_s8 + $0x30] sm:$0xf] }
 0x18f   : >> { %1244 = vst [vmem:[%s2201_s15 + $0x2c] sm:$0xf] %v1243_v20  ;;  %v1247_v22 = vld [vmem:[%s2205_s8 + $0x34] sm:$0xf]  ;;  %v1249_v23 = vld [vmem:[%s2205_s8 + $0x38] sm:$0xf] }
 0x190   : >> { %1246 = vst [vmem:[%s2201_s15 + $0x30] sm:$0xf] %v1245_v21  ;;  %1248 = vst [vmem:[%s2201_s15 + $0x34] sm:$0xf] %v1247_v22  ;;  %v1251_v24 = vld [vmem:[%s2205_s8 + $0x3c] sm:$0xf] }
 0x191   : >> { %1250 = vst [vmem:[%s2201_s15 + $0x38] sm:$0xf] %v1249_v23  ;;  %v1253_v25 = vld [vmem:[%s2205_s8 + $0x40] sm:$0xf]  ;;  %v1255_v26 = vld [vmem:[%s2205_s8 + $0x44] sm:$0xf] }
 0x192   : >> { %1252 = vst [vmem:[%s2201_s15 + $0x3c] sm:$0xf] %v1251_v24  ;;  %1254 = vst [vmem:[%s2201_s15 + $0x40] sm:$0xf] %v1253_v25  ;;  %v1257_v27 = vld [vmem:[%s2205_s8 + $0x48] sm:$0xf] }
 0x193   : >> { %1256 = vst [vmem:[%s2201_s15 + $0x44] sm:$0xf] %v1255_v26  ;;  %v1259_v28 = vld [vmem:[%s2205_s8 + $0x4c] sm:$0xf]  ;;  %v1261_v29 = vld [vmem:[%s2205_s8 + $0x50] sm:$0xf] }
 0x194   : >> { %1258 = vst [vmem:[%s2201_s15 + $0x48] sm:$0xf] %v1257_v27  ;;  %1260 = vst [vmem:[%s2201_s15 + $0x4c] sm:$0xf] %v1259_v28  ;;  %v1263_v30 = vld [vmem:[%s2205_s8 + $0x54] sm:$0xf] }
 0x195   : >> { %1262 = vst [vmem:[%s2201_s15 + $0x50] sm:$0xf] %v1261_v29  ;;  %v1265_v31 = vld [vmem:[%s2205_s8 + $0x58] sm:$0xf]  ;;  %v1267_v32 = vld [vmem:[%s2205_s8 + $0x5c] sm:$0xf] }
 0x196   : >> { %1264 = vst [vmem:[%s2201_s15 + $0x54] sm:$0xf] %v1263_v30  ;;  %1266 = vst [vmem:[%s2201_s15 + $0x58] sm:$0xf] %v1265_v31  ;;  %v1269_v33 = vld [vmem:[%s2205_s8 + $0x60] sm:$0xf] }
 0x197   : >> { %1268 = vst [vmem:[%s2201_s15 + $0x5c] sm:$0xf] %v1267_v32  ;;  %v1271_v34 = vld [vmem:[%s2205_s8 + $0x64] sm:$0xf]  ;;  %v1273_v35 = vld [vmem:[%s2205_s8 + $0x68] sm:$0xf] }
 0x198   : >> { %1270 = vst [vmem:[%s2201_s15 + $0x60] sm:$0xf] %v1269_v33  ;;  %1272 = vst [vmem:[%s2201_s15 + $0x64] sm:$0xf] %v1271_v34  ;;  %v1275_v36 = vld [vmem:[%s2205_s8 + $0x6c] sm:$0xf] }
 0x199   : >> { %1274 = vst [vmem:[%s2201_s15 + $0x68] sm:$0xf] %v1273_v35  ;;  %v1277_v37 = vld [vmem:[%s2205_s8 + $0x70] sm:$0xf]  ;;  %v1279_v38 = vld [vmem:[%s2205_s8 + $0x74] sm:$0xf] }
 0x19a   : >> { %1276 = vst [vmem:[%s2201_s15 + $0x6c] sm:$0xf] %v1275_v36  ;;  %1278 = vst [vmem:[%s2201_s15 + $0x70] sm:$0xf] %v1277_v37  ;;  %s2640_s26 = smov (%p1282_p11, %s1281_s26), 0  ;;  %s1215_s25 = sadd.s32 1, %s2213_s25  }
 0x19b   : >> { %1280 = vst [vmem:[%s2201_s15 + $0x74] sm:$0xf] %v1279_v38  ;;  %s1284_s27 = smul.u32 120, %s2640_s26  ;;  %p1214_p12 = scmp.ge.s32.totalorder %s1215_s25, %s2513_s20 }
 0x19c   : >> { %s2633_s24 = smov %s2640_s26 }
 0x19d   : >> { %s1286_s8 = scalar_lea.vmem %s2456_s12, %s1284_s27 [#allocation2]   ;;  %s1287_s15 = scalar_lea.vmem %s2507_s22, %s1284_s27  }
 0x19e   : > { %1217 = sbr.rel (!%p1214_p12) target bundleno = 391 (0x187), region = 118 }
 0x1a3 PF: > { %2141 = sdivrem.u32 %s2638_s14, 30 }
 0x1a4   : > { %s1630_s28 = smul.u32 120, %s2513_s20 }
 0x1a6   : > { %s1292_s29 = scalar_lea.vmem %s2456_s12, %s1630_s28 [#allocation2]   ;;  %s1294_s30 = scalar_lea.vmem %s2507_s22, %s1630_s28  }
 0x1ac   : > { %s2142_s4 = spop.drf %2141 }
 0x1ad   : > { %p1632_p13 = scmp.le.s32.totalorder %s2142_s4, 0 }
 0x1ae   : > { %s2215_s5 = smov (!%p1632_p13), %s1294_s30   ;;  %s2219_s6 = smov (!%p1632_p13), %s1292_s29  }
 0x1af   : > { %1490 = sbr.rel (%p1632_p13) target bundleno = 444 (0x1bc), region = 123  ;;  %s2223_s7 = smov (!%p1632_p13), 0  }
 0x1b0   : > { %s2227_s9 = smov (!%p1632_p13), 0  }
 0x1b4 LB: >> { %v1304_v39 = vld [vmem:[%s2221_s6] sm:$0xf]  ;;  %s1306_s10 = sadd.s32 1, %s2225_s7  ;;  %s1298_s9 = sadd.s32 1, %s2229_s9   ;;  %s2229_s9 = sphi %s2227_s9, %s1298_s9   ;;  %s2225_s7 = sphi %s2223_s7, %s2224_s7   ;;  %s2221_s6 = sphi %s2219_s6, %s1311_s6   ;;  %s2217_s5 = sphi %s2215_s5, %s1312_s5  }
 0x1b5   : >> { %1305 = vst [vmem:[%s2217_s5] sm:$0xf] %v1304_v39  ;;  %p1307_p0 = scmp.ge.s32.totalorder %s1306_s10, %s2142_s4  ;;  %p1297_p1 = scmp.ge.s32.totalorder %s1298_s9, %s2142_s4 }
 0x1b7   : >> { %s2642_s10 = smov (%p1307_p0, %s1306_s10), 0  ;;  %1300 = sbr.rel (!%p1297_p1) target bundleno = 436 (0x1b4), region = 129 }
 0x1b8   : >> { %s1633_s11 = sshll.u32 %s2642_s10, 2  ;;  %s2224_s7 = smov %s2642_s10  }
 0x1b9   : >> { %s1311_s6 = scalar_lea.vmem %s1292_s29, %s1633_s11 [#allocation2]   ;;  %s1312_s5 = scalar_lea.vmem %s1294_s30, %s1633_s11  }
 0x1bc PF: > { %p10_p2 = scmp.ge.s32.totalorder %s2268_s16, 4   ;;  %s2634_s12 = smov %s2193_s13 }
 0x1bd   : > { %s2635_s13 = smov %s2276_s19  ;;  %s2636_s14 = smov %s2268_s16 }
 0x1be   :  { %12 = sbr.rel (!%p10_p2) target bundleno = 2 (0x2), region = 140 }

// kernel: _lambda_.15
= control target key start
LH: loop header
LB: loop body
LE: loop exit
PB: predicated region body
PF: predicated region fallthrough
CT: control target
= control target key end

     0   :  { %s1750_s0 = inlined_call_operand.vmem [shape: bf16[2,225,128], index: 0, kind: input, shape index: {}]   ;;  %s1751_s1 = inlined_call_operand.vmem [shape: f32[1,1,128], index: 1, kind: input, shape index: {}]   ;;  %s1752_s2 = inlined_call_operand.hbm [shape: f32[1,1], index: 2, kind: output, shape index: {}]  }
   0x1   :  { %v1173_v0 = vld [vmem:[%s1750_s0 + $0x74] ss:$108 sps:$4 sm:$0xff]   ;;  %v1000_v2 = vld [vmem:[%s1750_s0 + $0x78] sm:$0xff]   ;;  %v987_v7 = vld [vmem:[%s1750_s0 + $0x8] sm:$0xff]  }
   0x2   :  { %v880_v1 = vld [vmem:[%s1750_s0] sm:$0xff]   ;;  %v1182_v3 = vunpack.c.l.bf16 %v1173_v0  ;;  %v1186_v5 = vunpack.c.l.bf16 %v1000_v2  ;;  %v1201_v12 = vunpack.c.h.bf16 %v1000_v2  ;;  %v1203_v13 = vunpack.c.l.bf16 %v987_v7 }
   0x3   :  { %v1184_v4 = vunpack.c.l.bf16 %v880_v1  ;;  %v1188_v6 = vunpack.c.h.bf16 %v880_v1  ;;  %v994_v14 = vld [vmem:[%s1750_s0 + $0x40] sm:$0xff]   ;;  %v1214_v18 = vunpack.c.h.bf16 %v987_v7 }
   0x4   :  { %v282_v8 = vmul.f32 %v1182_v3, %v1182_v3  ;;  %v283_v10 = vmul.f32 %v1186_v5, %v1186_v5  ;;  %v284_v15 = vmul.f32 %v1201_v12, %v1201_v12  ;;  %v137_v16 = vmul.f32 %v1203_v13, %v1203_v13  ;;  %v1001_v19 = vld [vmem:[%s1750_s0 + $0x80] sm:$0xff]  }
   0x5   :  { %v135_v9 = vmul.f32 %v1184_v4, %v1184_v4  ;;  %v136_v11 = vmul.f32 %v1188_v6, %v1188_v6  ;;  %v1212_v17 = vunpack.c.l.bf16 %v994_v14 }
   0x6   :  { %311 = vadd.xlane.f32.xlu1 %v282_v8 }
   0x7   :  { %164 = vadd.xlane.f32.xlu0 %v135_v9 }
   0xa   :  { %313 = vadd.xlane.f32.xlu1 %v283_v10 }
   0xb   :  { %166 = vadd.xlane.f32.xlu0 %v136_v11 }
   0xc   :  { %7 = vsyncpa [#allocation3], 0  ;;  %v151_v20 = vmul.f32 %v1212_v17, %v1212_v17  ;;  %v138_v21 = vmul.f32 %v1214_v18, %v1214_v18  ;;  %v1223_v22 = vunpack.c.l.bf16 %v1001_v19  ;;  %v1225_v23 = vunpack.c.h.bf16 %v994_v14  ;;  %v1008_v24 = vld [vmem:[%s1750_s0 + $0xb8] sm:$0xff]   ;;  %v1233_v25 = vld [vmem:[%s1750_s0 + $0xb0] sm:$0xff]  }
   0xd   :  { %v1239_v28 = vunpack.c.l.bf16 %v1008_v24  ;;  %v1242_v29 = vunpack.c.h.bf16 %v1233_v25  ;;  %v995_v30 = vld [vmem:[%s1750_s0 + $0x48] sm:$0xff]   ;;  %v988_v31 = vld [vmem:[%s1750_s0 + $0x10] sm:$0xff]   ;;  %v1262_v38 = vunpack.c.h.bf16 %v1008_v24  ;;  %v1264_v39 = vunpack.c.h.bf16 %v1001_v19  ;;  %v1009_v44 = vld [vmem:[%s1750_s0 + $0xc0] sm:$0xff]  }
   0xe   :  { %315 = vadd.xlane.f32.xlu1 %v284_v15  ;;  %v285_v26 = vmul.f32 %v1223_v22, %v1223_v22  ;;  %v152_v27 = vmul.f32 %v1225_v23, %v1225_v23  ;;  %v1254_v34 = vunpack.c.l.bf16 %v995_v30  ;;  %v1256_v35 = vunpack.c.l.bf16 %v988_v31  ;;  %v1002_v45 = vld [vmem:[%s1750_s0 + $0x88] sm:$0xff]   ;;  %v996_v50 = vld [vmem:[%s1750_s0 + $0x50] sm:$0xff]   ;;  %v989_v51 = vld [vmem:[%s1750_s0 + $0x18] sm:$0xff]  }
   0xf   :  { %168 = vadd.xlane.f32.xlu0 %v137_v16  ;;  %v299_v32 = vmul.f32 %v1239_v28, %v1239_v28  ;;  %v298_v33 = vmul.f32 %v1242_v29, %v1242_v29  ;;  %v300_v40 = vmul.f32 %v1262_v38, %v1262_v38  ;;  %v286_v41 = vmul.f32 %v1264_v39, %v1264_v39  ;;  %v1010_v1 = vld [vmem:[%s1750_s0 + $0xc8] sm:$0xff]   ;;  %v1003_v2 = vld [vmem:[%s1750_s0 + $0x90] sm:$0xff]   ;;  %v997_v11 = vld [vmem:[%s1750_s0 + $0x58] sm:$0xff]  }
  0x10   :  { %v153_v36 = vmul.f32 %v1254_v34, %v1254_v34  ;;  %v139_v37 = vmul.f32 %v1256_v35, %v1256_v35  ;;  %v1270_v42 = vunpack.c.h.bf16 %v995_v30  ;;  %v1272_v43 = vunpack.c.h.bf16 %v988_v31  ;;  %v990_v14 = vld [vmem:[%s1750_s0 + $0x20] sm:$0xff]  }
  0x11   :  { %v1284_v48 = vunpack.c.l.bf16 %v1009_v44  ;;  %v1286_v49 = vunpack.c.l.bf16 %v1002_v45  ;;  %v1298_v54 = vunpack.c.l.bf16 %v996_v50  ;;  %v1300_v55 = vunpack.c.l.bf16 %v989_v51 }
  0x12   :  { %196 = vadd.xlane.f32.xlu1 %v151_v20  ;;  %v154_v46 = vmul.f32 %v1270_v42, %v1270_v42  ;;  %v140_v47 = vmul.f32 %v1272_v43, %v1272_v43  ;;  %v1306_v58 = vunpack.c.h.bf16 %v1009_v44  ;;  %v1308_v59 = vunpack.c.h.bf16 %v1002_v45 }
  0x13   :  { %170 = vadd.xlane.f32.xlu0 %v138_v21  ;;  %v301_v52 = vmul.f32 %v1284_v48, %v1284_v48  ;;  %v287_v53 = vmul.f32 %v1286_v49, %v1286_v49  ;;  %v155_v56 = vmul.f32 %v1298_v54, %v1298_v54  ;;  %v141_v57 = vmul.f32 %v1300_v55, %v1300_v55 }
  0x14   :  { %v302_v60 = vmul.f32 %v1306_v58, %v1306_v58  ;;  %v288_v61 = vmul.f32 %v1308_v59, %v1308_v59  ;;  %v1314_v62 = vunpack.c.h.bf16 %v996_v50  ;;  %v1316_v63 = vunpack.c.h.bf16 %v989_v51 }
  0x15   :  { %v1328_v9 = vunpack.c.l.bf16 %v1010_v1  ;;  %v1330_v10 = vunpack.c.l.bf16 %v1003_v2  ;;  %v1342_v19 = vunpack.c.l.bf16 %v997_v11  ;;  %v1344_v20 = vunpack.c.l.bf16 %v990_v14 }
  0x16   :  { %317 = vadd.xlane.f32.xlu1 %v285_v26  ;;  %v156_v7 = vmul.f32 %v1314_v62, %v1314_v62  ;;  %v142_v8 = vmul.f32 %v1316_v63, %v1316_v63  ;;  %v1350_v26 = vunpack.c.h.bf16 %v1010_v1  ;;  %vm220_vm0 = vcmask 1040384  }
  0x17   :  { %198 = vadd.xlane.f32.xlu0 %v152_v27  ;;  %v303_v15 = vmul.f32 %v1328_v9, %v1328_v9  ;;  %v289_v16 = vmul.f32 %v1330_v10, %v1330_v10  ;;  %v157_v21 = vmul.f32 %v1342_v19, %v1342_v19  ;;  %v143_v24 = vmul.f32 %v1344_v20, %v1344_v20 }
  0x18   :  { %v1352_v27 = vunpack.c.h.bf16 %v1003_v2  ;;  %v304_v30 = vmul.f32 %v1350_v26, %v1350_v26  ;;  %vm685_vm1 = vcmask 130112   ;;  %vm692_vm2 = vcmask 195712  }
  0x19   :  { %vm699_vm3 = vcmask 261312   ;;  %vm706_vm4 = vcmask 326912   ;;  %vm713_vm5 = vcmask 392512   ;;  %vm720_vm6 = vcmask 458112  }
  0x1a   :  { %345 = vadd.xlane.f32.xlu1 %v299_v32  ;;  %v290_v31 = vmul.f32 %v1352_v27, %v1352_v27  ;;  %v1358_v32 = vunpack.c.h.bf16 %v997_v11  ;;  %v1012_v11 = vld [vmem:[%s1750_s0 + $0xd8] sm:$0xff]   ;;  %vm727_vm7 = vcmask 523712   ;;  %vm734_vm8 = vcmask 589312  }
  0x1b   :  { %343 = vadd.xlane.f32.xlu0 %v298_v33  ;;  %v1360_v33 = vunpack.c.h.bf16 %v990_v14  ;;  %v1005_v14 = vld [vmem:[%s1750_s0 + $0xa0] sm:$0xff]   ;;  %vm741_vm9 = vcmask 654912   ;;  %vm748_vm10 = vcmask 720512   ;;  %vm755_vm11 = vcmask 786112  }
  0x1c   :  { %vm762_vm12 = vcmask 851712   ;;  %vm769_vm13 = vcmask 917312   ;;  %vm776_vm15 = vcmask 982912  }
  0x1e   :  { %200 = vadd.xlane.f32.xlu1 %v153_v36  ;;  %v1011_v36 = vld [vmem:[%s1750_s0 + $0xd0] sm:$0xff]  }
  0x1f   :  { %172 = vadd.xlane.f32.xlu0 %v139_v37  ;;  %v1004_v37 = vld [vmem:[%s1750_s0 + $0x98] sm:$0xff]   ;;  %v1372_v44 = vunpack.c.l.bf16 %v1011_v36 }
  0x20   :  { %v1374_v45 = vunpack.c.l.bf16 %v1004_v37 }
  0x21   :  { %v305_v50 = vmul.f32 %v1372_v44, %v1372_v44 }
  0x22   :  { %347 = vadd.xlane.f32.xlu1 %v300_v40  ;;  %v158_v40 = vmul.f32 %v1358_v32, %v1358_v32  ;;  %v291_v51 = vmul.f32 %v1374_v45, %v1374_v45 }
  0x23   :  { %319 = vadd.xlane.f32.xlu0 %v286_v41  ;;  %v144_v41 = vmul.f32 %v1360_v33, %v1360_v33 }
  0x26   :  { %202 = vadd.xlane.f32.xlu1 %v154_v46  ;;  %v998_v46 = vld [vmem:[%s1750_s0 + $0x60] sm:$0xff]  }
  0x27   :  { %174 = vadd.xlane.f32.xlu0 %v140_v47  ;;  %v991_v47 = vld [vmem:[%s1750_s0 + $0x28] sm:$0xff]  }
  0x2a   :  { %349 = vadd.xlane.f32.xlu1 %v301_v52  ;;  %v1386_v52 = vunpack.c.l.bf16 %v998_v46 }
  0x2b   :  { %321 = vadd.xlane.f32.xlu0 %v287_v53  ;;  %v1388_v53 = vunpack.c.l.bf16 %v991_v47 }
  0x2e   :  { %204 = vadd.xlane.f32.xlu1 %v155_v56  ;;  %v159_v56 = vmul.f32 %v1386_v52, %v1386_v52 }
  0x2f   :  { %176 = vadd.xlane.f32.xlu0 %v141_v57  ;;  %v145_v57 = vmul.f32 %v1388_v53, %v1388_v53 }
  0x32   :  { %351 = vadd.xlane.f32.xlu1 %v302_v60  ;;  %v1394_v60 = vunpack.c.h.bf16 %v1011_v36 }
  0x33   :  { %323 = vadd.xlane.f32.xlu0 %v288_v61  ;;  %v1396_v61 = vunpack.c.h.bf16 %v1004_v37 }
  0x34   :  { %v306_v1 = vmul.f32 %v1394_v60, %v1394_v60 }
  0x35   :  { %v292_v2 = vmul.f32 %v1396_v61, %v1396_v61 }
  0x36   :  { %206 = vadd.xlane.f32.xlu1 %v156_v7  ;;  %v1402_v7 = vunpack.c.h.bf16 %v998_v46 }
  0x37   :  { %178 = vadd.xlane.f32.xlu0 %v142_v8  ;;  %v1404_v8 = vunpack.c.h.bf16 %v991_v47 }
  0x3a   :  { %353 = vadd.xlane.f32.xlu1 %v303_v15  ;;  %v160_v15 = vmul.f32 %v1402_v7, %v1402_v7 }
  0x3b   :  { %325 = vadd.xlane.f32.xlu0 %v289_v16  ;;  %v146_v16 = vmul.f32 %v1404_v8, %v1404_v8 }
  0x3e   :  { %208 = vadd.xlane.f32.xlu1 %v157_v21  ;;  %v1416_v21 = vunpack.c.l.bf16 %v1012_v11 }
  0x3f   :  { %180 = vadd.xlane.f32.xlu0 %v143_v24  ;;  %v1418_v24 = vunpack.c.l.bf16 %v1005_v14 }
  0x40   :  { %v307_v36 = vmul.f32 %v1416_v21, %v1416_v21 }
  0x41   :  { %v293_v37 = vmul.f32 %v1418_v24, %v1418_v24 }
  0x42   :  { %355 = vadd.xlane.f32.xlu1 %v304_v30  ;;  %v999_v30 = vld [vmem:[%s1750_s0 + $0x68] sm:$0xff]  }
  0x43   :  { %327 = vadd.xlane.f32.xlu0 %v290_v31  ;;  %v992_v31 = vld [vmem:[%s1750_s0 + $0x30] sm:$0xff]  }
  0x46   :  { %210 = vadd.xlane.f32.xlu1 %v158_v40  ;;  %v1430_v40 = vunpack.c.l.bf16 %v999_v30 }
  0x47   :  { %182 = vadd.xlane.f32.xlu0 %v144_v41  ;;  %v1432_v41 = vunpack.c.l.bf16 %v992_v31 }
  0x48   :  { %v161_v46 = vmul.f32 %v1430_v40, %v1430_v40 }
  0x49   :  { %1765 = vst [vmem:[#allocation5_spill] sm:$0xff] %v1432_v41  ;;  %v147_v47 = vmul.f32 %v1432_v41, %v1432_v41 }
  0x4a   :  { %357 = vadd.xlane.f32.xlu1 %v305_v50  ;;  %v1438_v50 = vunpack.c.h.bf16 %v1012_v11  ;;  %v1006_v11 = vld [vmem:[%s1750_s0 + $0xa8] sm:$0xff]  }
  0x4b   :  { %329 = vadd.xlane.f32.xlu0 %v291_v51  ;;  %v1440_v51 = vunpack.c.h.bf16 %v1005_v14 }
  0x4d   :  { %1766 = vst [vmem:[#allocation6_spill] sm:$0xff] %v1440_v51 }
  0x4e   :  { %212 = vadd.xlane.f32.xlu1 %v159_v56  ;;  %v46_v56 = vld [vmem:[%s1750_s0 + $0x70] sm:$0x1] }
  0x4f   :  { %184 = vadd.xlane.f32.xlu0 %v145_v57  ;;  %v308_v57 = vmul.f32 %v1438_v50, %v1438_v50  ;;  %v1456_v14 = vunpack.c.l.bf16 %v46_v56  ;;  %v1474_v56 = vunpack.c.h.bf16 %v1173_v0 }
  0x51   :  { %1769 = vst [vmem:[#allocation9_spill] sm:$0xff] %v1456_v14  ;;  %1772 = vst [vmem:[#allocation12_spill] sm:$0xff] %v1474_v56 }
  0x52   :  { %359 = vadd.xlane.f32.xlu1 %v306_v1  ;;  %v294_v1 = vmul.f32 %v1440_v51, %v1440_v51 }
  0x53   :  { %331 = vadd.xlane.f32.xlu0 %v292_v2  ;;  %v1449_v2 = vunpack.c.h.bf16 %v999_v30 }
  0x55   :  { %1767 = vst [vmem:[#allocation7_spill] sm:$0xff] %v1449_v2 }
  0x56   :  { %214 = vadd.xlane.f32.xlu1 %v160_v15  ;;  %v1451_v15 = vunpack.c.h.bf16 %v992_v31  ;;  %v1465_v31 = vunpack.c.l.bf16 %v1006_v11 }
  0x57   :  { %186 = vadd.xlane.f32.xlu0 %v146_v16  ;;  %v75_v16 = vld [vmem:[%s1750_s0 + $0xe4] sm:$0x1] }
  0x58   :  { %1768 = vst [vmem:[#allocation8_spill] sm:$0xff] %v1451_v15  ;;  %v148_v30 = vmul.f32 %v1451_v15, %v1451_v15  ;;  %1770 = vst [vmem:[#allocation10_spill] sm:$0xff] %v1465_v31 }
  0x5a   :  { %361 = vadd.xlane.f32.xlu1 %v307_v36  ;;  %v162_v36 = vmul.f32 %v1449_v2, %v1449_v2  ;;  %v993_v2 = vld [vmem:[%s1750_s0 + $0x38] sm:$0xff]  }
  0x5b   :  { %333 = vadd.xlane.f32.xlu0 %v293_v37  ;;  %v163_v37 = vmul.f32 %v1456_v14, %v1456_v14 }
  0x5e   :  { %216 = vadd.xlane.f32.xlu1 %v161_v46  ;;  %v1469_v46 = vunpack.c.l.bf16 %v75_v16  ;;  %v309_v16 = vmul.f32 %v1474_v56, %v1474_v56 }
  0x5f   :  { %188 = vadd.xlane.f32.xlu0 %v147_v47  ;;  %v295_v47 = vmul.f32 %v1465_v31, %v1465_v31 }
  0x60   :  { %1771 = vst [vmem:[#allocation11_spill] sm:$0xff] %v1469_v46 }
  0x62   :  { %363 = vadd.xlane.f32.xlu1 %v308_v57  ;;  %v221_v57 = vsel %vm220_vm0, %v163_v37, 0.0 }
  0x63   :  { %335 = vadd.xlane.f32.xlu0 %v294_v1  ;;  %v310_v1 = vmul.f32 %v1469_v46, %v1469_v46 }
  0x65   :  { %v367_v0 = vsel %vm220_vm0, %v310_v1, 0.0 }
  0x66   :  { %218 = vadd.xlane.f32.xlu1 %v162_v36  ;;  %v1484_v36 = vunpack.c.h.bf16 %v1006_v11 }
  0x67   :  { %190 = vadd.xlane.f32.xlu0 %v148_v30  ;;  %v1486_v30 = vunpack.c.l.bf16 %v993_v2 }
  0x68   :  { %1773 = vst [vmem:[#allocation13_spill] sm:$0xff] %v1484_v36  ;;  %v296_v37 = vmul.f32 %v1484_v36, %v1484_v36 }
  0x69   :  { %1774 = vst [vmem:[#allocation14_spill] sm:$0xff] %v1486_v30  ;;  %v149_v46 = vmul.f32 %v1486_v30, %v1486_v30 }
  0x6a   :  { %337 = vadd.xlane.f32.xlu1 %v295_v47  ;;  %v1494_v47 = vunpack.c.l.bf16 %v1233_v25 }
  0x6b   :  { %222 = vadd.xlane.f32.xlu0 %v221_v57  ;;  %v1496_v57 = vunpack.c.h.bf16 %v993_v2 }
  0x6c   :  { %1775 = vst [vmem:[#allocation15_spill] sm:$0xff] %v1494_v47  ;;  %v297_v11 = vmul.f32 %v1494_v47, %v1494_v47 }
  0x6d   :  { %1776 = vst [vmem:[#allocation16_spill] sm:$0xff] %v1496_v57  ;;  %v150_v1 = vmul.f32 %v1496_v57, %v1496_v57 }
  0x6e   :  { %368 = vadd.xlane.f32.xlu1 %v367_v0 }
  0x6f   :  { %365 = vadd.xlane.f32.xlu0 %v309_v16 }
  0x72   :  { %339 = vadd.xlane.f32.xlu1 %v296_v37 }
  0x73   :  { %192 = vadd.xlane.f32.xlu0 %v149_v46 }
  0x76   :  { %341 = vadd.xlane.f32.xlu1 %v297_v11 }
  0x77   :  { %194 = vadd.xlane.f32.xlu0 %v150_v1 }
  0x8f   :  { %v312_v16 = vpop.xlane.xlu1 %311 }
  0x90   :  { %v165_v0 = vpop.xlane.xlu0 %164  ;;  %v370_v36 = vadd.f32 1e-20, %v312_v16 }
  0x91   :  { %v224_v56 = vadd.f32 1e-20, %v165_v0 }
  0x92   :  { %1015 = vrsqrt.f32 %v370_v36 }
  0x93   :  { %1017 = vrsqrt.f32 %v224_v56  ;;  %v314_v25 = vpop.xlane.xlu1 %313 }
  0x94   :  { %v167_v30 = vpop.xlane.xlu0 %166  ;;  %v371_v2 = vadd.f32 1e-20, %v314_v25 }
  0x95   :  { %v225_v14 = vadd.f32 1e-20, %v167_v30 }
  0x96   :  { %1019 = vrsqrt.f32 %v371_v2 }
  0x97   :  { %1021 = vrsqrt.f32 %v225_v14  ;;  %v316_v46 = vpop.xlane.xlu1 %315 }
  0x98   :  { %v169_v37 = vpop.xlane.xlu0 %168  ;;  %v372_v47 = vadd.f32 1e-20, %v316_v46 }
  0x99   :  { %v226_v31 = vadd.f32 1e-20, %v169_v37 }
  0x9a   :  { %1023 = vrsqrt.f32 %v372_v47 }
  0x9b   :  { %1025 = vrsqrt.f32 %v226_v31  ;;  %v197_v11 = vpop.xlane.xlu1 %196 }
  0x9c   :  { %v171_v1 = vpop.xlane.xlu0 %170  ;;  %v240_v25 = vadd.f32 1e-20, %v197_v11 }
  0x9d   :  { %v227_v57 = vadd.f32 1e-20, %v171_v1 }
  0x9f   :  { %v1016_v15 = vpop.eup %1015  ;;  %v318_v16 = vpop.xlane.xlu1 %317  ;;  %1027 = vrsqrt.f32 %v227_v57  ;;  %v1507_v57 = vld [vmem:[%s1751_s1] ss:$0 sm:$0xff]  ;;  %s1154_s1 = smov [#allocation2]  }
  0xa0   :  { %v199_v0 = vpop.xlane.xlu0 %198  ;;  %v1018_v36 = vpop.eup %1017  ;;  %v373_v56 = vadd.f32 1e-20, %v318_v16  ;;  %v457_v30 = vmul.f32 %v1016_v15, %v1182_v3  ;;  %s870_s14 = sshll.u32 %s1154_s1, 4  ;;  %s871_s14 = int_to_ptr.vmem [resolvable:$true] %s870_s14 }
  0xa1   :  { %v241_v51 = vadd.f32 1e-20, %v199_v0  ;;  %v428_v14 = vmul.f32 %v1018_v36, %v1184_v4  ;;  %s1131_s15 = scalar_lea.vmem %s871_s14, 16  ;;  %s1135_s16 = scalar_lea.vmem %s871_s14, 32 }
  0xa2   :  { %1029 = vrsqrt.f32 %v373_v56  ;;  %p1132_p0 = scmp.ne.s32.totalorder %s871_s14, %s1131_s15  ;;  %p1136_p1 = scmp.lt.s32.totalorder %s871_s14, %s871_s14 }
  0xa3   :  { %v1020_v2 = vpop.eup %1019  ;;  %1031 = vrsqrt.f32 %v241_v51  ;;  %v346_v47 = vpop.xlane.xlu1 %345  ;;  %v486_v46 = vsub.f32 %v428_v14, %v457_v30  ;;  %p1137_p2 = scmp.lt.s32.totalorder %s1135_s16, %s1131_s15 }
  0xa4   :  { %v344_v31 = vpop.xlane.xlu0 %343  ;;  %v1022_v37 = vpop.eup %1021  ;;  %v387_v1 = vadd.f32 1e-20, %v346_v47  ;;  %v458_v16 = vmul.f32 %v1020_v2, %v1186_v5  ;;  %1033 = vrsqrt.f32 %v240_v25 }
  0xa5   :  { %v386_v41 = vadd.f32 1e-20, %v344_v31  ;;  %v515_v3 = vmul.f32 %v486_v46, %v486_v46  ;;  %v429_v4 = vmul.f32 %v1022_v37, %v1188_v6  ;;  %p1138_p3 = por %p1137_p2, %p1136_p1 }
  0xa6   :  { %1035 = vrsqrt.f32 %v387_v1 }
  0xa7   :  { %v1024_v15 = vpop.eup %1023  ;;  %1037 = vrsqrt.f32 %v386_v41  ;;  %v201_v51 = vpop.xlane.xlu1 %200  ;;  %v550_v0 = vmul.f32 %v1507_v57, %v515_v3  ;;  %v487_v36 = vsub.f32 %v429_v4, %v458_v16  ;;  %p1139_p4 = pnand %p1138_p3, %p1132_p0 }
  0xa8   :  { %v173_v11 = vpop.xlane.xlu0 %172  ;;  %v1026_v56 = vpop.eup %1025  ;;  %v242_v30 = vadd.f32 1e-20, %v201_v51  ;;  %v459_v14 = vmul.f32 %v1024_v15, %v1201_v12 }
  0xa9   :  { %v228_v47 = vadd.f32 1e-20, %v173_v11  ;;  %579 = vadd.xlane.f32.xlu0 %v550_v0  ;;  %v516_v31 = vmul.f32 %v487_v36, %v487_v36  ;;  %v430_v5 = vmul.f32 %v1026_v56, %v1203_v13 }
  0xaa   :  { %1039 = vrsqrt.f32 %v242_v30 }
  0xab   :  { %v348_v25 = vpop.xlane.xlu1 %347  ;;  %v551_v6 = vmul.f32 %v1507_v57, %v516_v31  ;;  %v488_v46 = vsub.f32 %v430_v5, %v459_v14  ;;  %1041 = vrsqrt.f32 %v228_v47 }
  0xac   :  { %v320_v2 = vpop.xlane.xlu0 %319  ;;  %v388_v41 = vadd.f32 1e-20, %v348_v25  ;;  %v1028_v1 = vpop.eup %1027 }
  0xad   :  { %v374_v37 = vadd.f32 1e-20, %v320_v2  ;;  %581 = vadd.xlane.f32.xlu1 %v551_v6  ;;  %v517_v16 = vmul.f32 %v488_v46, %v488_v46  ;;  %v431_v11 = vmul.f32 %v1028_v1, %v1214_v18 }
  0xae   :  { %1043 = vrsqrt.f32 %v388_v41 }
  0xaf   :  { %v1030_v3 = vpop.eup %1029  ;;  %1045 = vrsqrt.f32 %v374_v37  ;;  %v203_v12 = vpop.xlane.xlu1 %202  ;;  %v552_v15 = vmul.f32 %v1507_v57, %v517_v16 }
  0xb0   :  { %v175_v4 = vpop.xlane.xlu0 %174  ;;  %v1032_v13 = vpop.eup %1031  ;;  %v243_v51 = vadd.f32 1e-20, %v203_v12  ;;  %v460_v0 = vmul.f32 %v1030_v3, %v1223_v22 }
  0xb1   :  { %v229_v36 = vadd.f32 1e-20, %v175_v4  ;;  %583 = vadd.xlane.f32.xlu0 %v552_v15  ;;  %v1034_v56 = vpop.eup %1033  ;;  %v445_v5 = vmul.f32 %v1032_v13, %v1225_v23 }
  0xb2   :  { %v489_v30 = vsub.f32 %v431_v11, %v460_v0  ;;  %1047 = vrsqrt.f32 %v243_v51  ;;  %v444_v18 = vmul.f32 %v1034_v56, %v1212_v17 }
  0xb3   :  { %v1036_v14 = vpop.eup %1035  ;;  %v350_v47 = vpop.xlane.xlu1 %349  ;;  %1049 = vrsqrt.f32 %v229_v36 }
  0xb4   :  { %v322_v31 = vpop.xlane.xlu0 %321  ;;  %v1038_v25 = vpop.eup %1037  ;;  %v389_v2 = vadd.f32 1e-20, %v350_v47  ;;  %v518_v46 = vmul.f32 %v489_v30, %v489_v30  ;;  %v474_v41 = vmul.f32 %v1036_v14, %v1239_v28 }
  0xb5   :  { %v375_v6 = vadd.f32 1e-20, %v322_v31  ;;  %v473_v22 = vmul.f32 %v1038_v25, %v1242_v29 }
  0xb6   :  { %1051 = vrsqrt.f32 %v389_v2  ;;  %v553_v37 = vmul.f32 %v1507_v57, %v518_v46  ;;  %v503_v1 = vsub.f32 %v445_v5, %v474_v41 }
  0xb7   :  { %1053 = vrsqrt.f32 %v375_v6  ;;  %v205_v16 = vpop.xlane.xlu1 %204  ;;  %v502_v12 = vsub.f32 %v444_v18, %v473_v22  ;;  %v1040_v15 = vpop.eup %1039 }
  0xb8   :  { %v177_v3 = vpop.xlane.xlu0 %176  ;;  %v244_v23 = vadd.f32 1e-20, %v205_v16  ;;  %585 = vadd.xlane.f32.xlu1 %v553_v37  ;;  %v532_v4 = vmul.f32 %v503_v1, %v503_v1  ;;  %v1042_v28 = vpop.eup %1041  ;;  %v446_v47 = vmul.f32 %v1040_v15, %v1254_v34 }
  0xb9   :  { %v230_v13 = vadd.f32 1e-20, %v177_v3  ;;  %v531_v51 = vmul.f32 %v502_v12, %v502_v12  ;;  %v432_v5 = vmul.f32 %v1042_v28, %v1256_v35 }
  0xba   :  { %v567_v11 = vmul.f32 %v1507_v57, %v532_v4  ;;  %1055 = vrsqrt.f32 %v244_v23 }
  0xbb   :  { %v1044_v17 = vpop.eup %1043  ;;  %v352_v29 = vpop.xlane.xlu1 %351  ;;  %v566_v36 = vmul.f32 %v1507_v57, %v531_v51  ;;  %1057 = vrsqrt.f32 %v230_v13 }
  0xbc   :  { %v324_v0 = vpop.xlane.xlu0 %323  ;;  %v1046_v56 = vpop.eup %1045  ;;  %v390_v30 = vadd.f32 1e-20, %v352_v29  ;;  %613 = vadd.xlane.f32.xlu1 %v567_v11  ;;  %v475_v31 = vmul.f32 %v1044_v17, %v1262_v38 }
  0xbd   :  { %v376_v14 = vadd.f32 1e-20, %v324_v0  ;;  %611 = vadd.xlane.f32.xlu0 %v566_v36  ;;  %v461_v25 = vmul.f32 %v1046_v56, %v1264_v39 }
  0xbe   :  { %1059 = vrsqrt.f32 %v390_v30  ;;  %v504_v2 = vsub.f32 %v446_v47, %v475_v31 }
  0xbf   :  { %1061 = vrsqrt.f32 %v376_v14  ;;  %v207_v6 = vpop.xlane.xlu1 %206  ;;  %v490_v41 = vsub.f32 %v432_v5, %v461_v25  ;;  %v1048_v18 = vpop.eup %1047 }
  0xc0   :  { %v179_v46 = vpop.xlane.xlu0 %178  ;;  %v245_v22 = vadd.f32 1e-20, %v207_v6  ;;  %v533_v37 = vmul.f32 %v504_v2, %v504_v2  ;;  %v1050_v34 = vpop.eup %1049  ;;  %v447_v13 = vmul.f32 %v1048_v18, %v1270_v42 }
  0xc1   :  { %v231_v1 = vadd.f32 1e-20, %v179_v46  ;;  %v519_v16 = vmul.f32 %v490_v41, %v490_v41  ;;  %v433_v28 = vmul.f32 %v1050_v34, %v1272_v43 }
  0xc2   :  { %v568_v38 = vmul.f32 %v1507_v57, %v533_v37  ;;  %1063 = vrsqrt.f32 %v245_v22 }
  0xc3   :  { %v1052_v3 = vpop.eup %1051  ;;  %v354_v12 = vpop.xlane.xlu1 %353  ;;  %v554_v39 = vmul.f32 %v1507_v57, %v519_v16  ;;  %1065 = vrsqrt.f32 %v231_v1 }
  0xc4   :  { %v326_v35 = vpop.xlane.xlu0 %325  ;;  %v1054_v23 = vpop.eup %1053  ;;  %v391_v4 = vadd.f32 1e-20, %v354_v12  ;;  %615 = vadd.xlane.f32.xlu1 %v568_v38  ;;  %v476_v51 = vmul.f32 %v1052_v3, %v1284_v48 }
  0xc5   :  { %v377_v15 = vadd.f32 1e-20, %v326_v35  ;;  %587 = vadd.xlane.f32.xlu0 %v554_v39  ;;  %v462_v11 = vmul.f32 %v1054_v23, %v1286_v49 }
  0xc6   :  { %1067 = vrsqrt.f32 %v391_v4  ;;  %v505_v17 = vsub.f32 %v447_v13, %v476_v51 }
  0xc7   :  { %1069 = vrsqrt.f32 %v377_v15  ;;  %v209_v29 = vpop.xlane.xlu1 %208  ;;  %v491_v36 = vsub.f32 %v433_v28, %v462_v11  ;;  %v1056_v56 = vpop.eup %1055 }
  0xc8   :  { %v181_v0 = vpop.xlane.xlu0 %180  ;;  %v246_v30 = vadd.f32 1e-20, %v209_v29  ;;  %v534_v14 = vmul.f32 %v505_v17, %v505_v17  ;;  %v1058_v42 = vpop.eup %1057  ;;  %v448_v49 = vmul.f32 %v1056_v56, %v1298_v54 }
  0xc9   :  { %v232_v47 = vadd.f32 1e-20, %v181_v0  ;;  %v520_v31 = vmul.f32 %v491_v36, %v491_v36  ;;  %v434_v22 = vmul.f32 %v1058_v42, %v1300_v55 }
  0xca   :  { %v569_v48 = vmul.f32 %v1507_v57, %v534_v14  ;;  %1071 = vrsqrt.f32 %v246_v30 }
  0xcb   :  { %v1060_v5 = vpop.eup %1059  ;;  %v356_v25 = vpop.xlane.xlu1 %355  ;;  %v555_v43 = vmul.f32 %v1507_v57, %v520_v31  ;;  %1073 = vrsqrt.f32 %v232_v47 }
  0xcc   :  { %v328_v2 = vpop.xlane.xlu0 %327  ;;  %v1062_v6 = vpop.eup %1061  ;;  %v392_v46 = vadd.f32 1e-20, %v356_v25  ;;  %617 = vadd.xlane.f32.xlu1 %v569_v48  ;;  %v477_v18 = vmul.f32 %v1060_v5, %v1306_v58 }
  0xcd   :  { %v378_v41 = vadd.f32 1e-20, %v328_v2  ;;  %589 = vadd.xlane.f32.xlu0 %v555_v43  ;;  %v463_v37 = vmul.f32 %v1062_v6, %v1308_v59 }
  0xce   :  { %1075 = vrsqrt.f32 %v392_v46  ;;  %v506_v1 = vsub.f32 %v448_v49, %v477_v18 }
  0xcf   :  { %1077 = vrsqrt.f32 %v378_v41  ;;  %v211_v16 = vpop.xlane.xlu1 %210  ;;  %v492_v38 = vsub.f32 %v434_v22, %v463_v37  ;;  %v1064_v54 = vpop.eup %1063 }
  0xd0   :  { %v183_v34 = vpop.xlane.xlu0 %182  ;;  %v247_v3 = vadd.f32 1e-20, %v211_v16  ;;  %v535_v12 = vmul.f32 %v506_v1, %v506_v1  ;;  %v1066_v23 = vpop.eup %1065  ;;  %v449_v59 = vmul.f32 %v1064_v54, %v1314_v62 }
  0xd1   :  { %v233_v35 = vadd.f32 1e-20, %v183_v34  ;;  %v521_v39 = vmul.f32 %v492_v38, %v492_v38  ;;  %v435_v29 = vmul.f32 %v1066_v23, %v1316_v63 }
  0xd2   :  { %v570_v58 = vmul.f32 %v1507_v57, %v535_v12  ;;  %1079 = vrsqrt.f32 %v247_v3 }
  0xd3   :  { %v1068_v4 = vpop.eup %1067  ;;  %v358_v15 = vpop.xlane.xlu1 %357  ;;  %v556_v55 = vmul.f32 %v1507_v57, %v521_v39  ;;  %1081 = vrsqrt.f32 %v233_v35 }
  0xd4   :  { %v330_v13 = vpop.xlane.xlu0 %329  ;;  %v1070_v51 = vpop.eup %1069  ;;  %v393_v28 = vadd.f32 1e-20, %v358_v15  ;;  %619 = vadd.xlane.f32.xlu1 %v570_v58  ;;  %v478_v17 = vmul.f32 %v1068_v4, %v1328_v9 }
  0xd5   :  { %v379_v11 = vadd.f32 1e-20, %v330_v13  ;;  %591 = vadd.xlane.f32.xlu0 %v556_v55  ;;  %v464_v0 = vmul.f32 %v1070_v51, %v1330_v10 }
  0xd6   :  { %1083 = vrsqrt.f32 %v393_v28  ;;  %v507_v36 = vsub.f32 %v449_v59, %v478_v17 }
  0xd7   :  { %1085 = vrsqrt.f32 %v379_v11  ;;  %v213_v56 = vpop.xlane.xlu1 %212  ;;  %v493_v14 = vsub.f32 %v435_v29, %v464_v0  ;;  %v1072_v31 = vpop.eup %1071 }
  0xd8   :  { %v185_v30 = vpop.xlane.xlu0 %184  ;;  %v248_v62 = vadd.f32 1e-20, %v213_v56  ;;  %v536_v47 = vmul.f32 %v507_v36, %v507_v36  ;;  %v1074_v5 = vpop.eup %1073  ;;  %v450_v46 = vmul.f32 %v1072_v31, %v1342_v19 }
  0xd9   :  { %v234_v42 = vadd.f32 1e-20, %v185_v30  ;;  %v522_v48 = vmul.f32 %v493_v14, %v493_v14  ;;  %v436_v18 = vmul.f32 %v1074_v5, %v1344_v20 }
  0xda   :  { %v571_v9 = vmul.f32 %v1507_v57, %v536_v47  ;;  %1087 = vrsqrt.f32 %v248_v62 }
  0xdb   :  { %v1076_v25 = vpop.eup %1075  ;;  %v360_v2 = vpop.xlane.xlu1 %359  ;;  %v557_v10 = vmul.f32 %v1507_v57, %v522_v48  ;;  %1089 = vrsqrt.f32 %v234_v42 }
  0xdc   :  { %v332_v63 = vpop.xlane.xlu0 %331  ;;  %v1078_v43 = vpop.eup %1077  ;;  %v394_v49 = vadd.f32 1e-20, %v360_v2  ;;  %621 = vadd.xlane.f32.xlu1 %v571_v9  ;;  %v479_v41 = vmul.f32 %v1076_v25, %v1350_v26 }
  0xdd   :  { %v380_v6 = vadd.f32 1e-20, %v332_v63  ;;  %593 = vadd.xlane.f32.xlu0 %v557_v10  ;;  %v465_v22 = vmul.f32 %v1078_v43, %v1352_v27 }
  0xde   :  { %1091 = vrsqrt.f32 %v394_v49  ;;  %v508_v37 = vsub.f32 %v450_v46, %v479_v41 }
  0xdf   :  { %1093 = vrsqrt.f32 %v380_v6  ;;  %v215_v1 = vpop.xlane.xlu1 %214  ;;  %v494_v34 = vsub.f32 %v436_v18, %v465_v22  ;;  %v1080_v3 = vpop.eup %1079 }
  0xe0   :  { %v187_v16 = vpop.xlane.xlu0 %186  ;;  %v249_v38 = vadd.f32 1e-20, %v215_v1  ;;  %v537_v54 = vmul.f32 %v508_v37, %v508_v37  ;;  %v1082_v19 = vpop.eup %1081  ;;  %v451_v13 = vmul.f32 %v1080_v3, %v1358_v32 }
  0xe1   :  { %v235_v12 = vadd.f32 1e-20, %v187_v16  ;;  %v523_v35 = vmul.f32 %v494_v34, %v494_v34  ;;  %v437_v59 = vmul.f32 %v1082_v19, %v1360_v33 }
  0xe2   :  { %v572_v26 = vmul.f32 %v1507_v57, %v537_v54  ;;  %1095 = vrsqrt.f32 %v249_v38 }
  0xe3   :  { %v1084_v39 = vpop.eup %1083  ;;  %v362_v23 = vpop.xlane.xlu1 %361  ;;  %v558_v27 = vmul.f32 %v1507_v57, %v523_v35  ;;  %1097 = vrsqrt.f32 %v235_v12 }
  0xe4   :  { %v334_v20 = vpop.xlane.xlu0 %333  ;;  %v1086_v58 = vpop.eup %1085  ;;  %v395_v4 = vadd.f32 1e-20, %v362_v23  ;;  %623 = vadd.xlane.f32.xlu1 %v572_v26  ;;  %v480_v55 = vmul.f32 %v1084_v39, %v1372_v44 }
  0xe5   :  { %v381_v15 = vadd.f32 1e-20, %v334_v20  ;;  %595 = vadd.xlane.f32.xlu0 %v558_v27  ;;  %v466_v51 = vmul.f32 %v1086_v58, %v1374_v45 }
  0xe6   :  { %1099 = vrsqrt.f32 %v395_v4  ;;  %v509_v28 = vsub.f32 %v451_v13, %v480_v55 }
  0xe7   :  { %1101 = vrsqrt.f32 %v381_v15  ;;  %v217_v11 = vpop.xlane.xlu1 %216  ;;  %v495_v29 = vsub.f32 %v437_v59, %v466_v51  ;;  %v1088_v0 = vpop.eup %1087 }
  0xe8   :  { %v189_v17 = vpop.xlane.xlu0 %188  ;;  %v250_v36 = vadd.f32 1e-20, %v217_v11  ;;  %v538_v56 = vmul.f32 %v509_v28, %v509_v28  ;;  %v1090_v32 = vpop.eup %1089  ;;  %v452_v45 = vmul.f32 %v1088_v0, %v1386_v52 }
  0xe9   :  { %v236_v30 = vadd.f32 1e-20, %v189_v17  ;;  %v524_v14 = vmul.f32 %v495_v29, %v495_v29  ;;  %v438_v25 = vmul.f32 %v1090_v32, %v1388_v53  ;;  %v1777_v29 = vld [vmem:[#allocation5_spill] sm:$0xff] }
  0xea   :  { %v573_v44 = vmul.f32 %v1507_v57, %v538_v56  ;;  %1103 = vrsqrt.f32 %v250_v36  ;;  %v1778_v36 = vld [vmem:[#allocation6_spill] sm:$0xff] }
  0xeb   :  { %v1092_v62 = vpop.eup %1091  ;;  %v364_v47 = vpop.xlane.xlu1 %363  ;;  %v559_v33 = vmul.f32 %v1507_v57, %v524_v14  ;;  %1105 = vrsqrt.f32 %v236_v30 }
  0xec   :  { %v336_v31 = vpop.xlane.xlu0 %335  ;;  %v1094_v42 = vpop.eup %1093  ;;  %v396_v48 = vadd.f32 1e-20, %v364_v47  ;;  %625 = vadd.xlane.f32.xlu1 %v573_v44  ;;  %v481_v9 = vmul.f32 %v1092_v62, %v1394_v60 }
  0xed   :  { %v382_v5 = vadd.f32 1e-20, %v336_v31  ;;  %597 = vadd.xlane.f32.xlu0 %v559_v33  ;;  %v467_v2 = vmul.f32 %v1094_v42, %v1396_v61 }
  0xee   :  { %1107 = vrsqrt.f32 %v396_v48  ;;  %v510_v63 = vsub.f32 %v452_v45, %v481_v9  ;;  %v1779_v48 = vld [vmem:[#allocation8_spill] sm:$0xff]  ;;  %v1780_v9 = vld [vmem:[#allocation10_spill] sm:$0xff] }
  0xef   :  { %1109 = vrsqrt.f32 %v382_v5  ;;  %v219_v10 = vpop.xlane.xlu1 %218  ;;  %v496_v49 = vsub.f32 %v438_v25, %v467_v2  ;;  %v1096_v52 = vpop.eup %1095 }
  0xf0   :  { %v191_v43 = vpop.xlane.xlu0 %190  ;;  %v539_v46 = vmul.f32 %v510_v63, %v510_v63  ;;  %v1098_v18 = vpop.eup %1097  ;;  %v453_v61 = vmul.f32 %v1096_v52, %v1402_v7  ;;  %v251_v3 = vadd.f32 1e-20, %v219_v10 }
  0xf1   :  { %v237_v6 = vadd.f32 1e-20, %v191_v43  ;;  %v525_v41 = vmul.f32 %v496_v49, %v496_v49  ;;  %v439_v12 = vmul.f32 %v1098_v18, %v1404_v8 }
  0xf2   :  { %v574_v22 = vmul.f32 %v1507_v57, %v539_v46 }
  0xf3   :  { %v1100_v60 = vpop.eup %1099  ;;  %v338_v37 = vpop.xlane.xlu1 %337  ;;  %v560_v53 = vmul.f32 %v1507_v57, %v525_v41  ;;  %1111 = vrsqrt.f32 %v237_v6  ;;  %v1781_v6 = vld [vmem:[#allocation9_spill] sm:$0xff]  ;;  %v1782_v41 = vld [vmem:[#allocation11_spill] sm:$0xff] }
  0xf4   :  { %v223_v1 = vpop.xlane.xlu0 %222  ;;  %v1102_v16 = vpop.eup %1101  ;;  %v383_v34 = vadd.f32 1e-20, %v338_v37  ;;  %627 = vadd.xlane.f32.xlu1 %v574_v22  ;;  %v482_v54 = vmul.f32 %v1100_v60, %v1416_v21  ;;  %v1783_v22 = vld [vmem:[#allocation7_spill] sm:$0xff]  ;;  %v1784_v37 = vld [vmem:[#allocation12_spill] sm:$0xff] }
  0xf5   :  { %v252_v38 = vadd.f32 1e-20, %v223_v1  ;;  %599 = vadd.xlane.f32.xlu0 %v560_v53  ;;  %v468_v35 = vmul.f32 %v1102_v16, %v1418_v24 }
  0xf6   :  { %1113 = vrsqrt.f32 %v383_v34  ;;  %v511_v19 = vsub.f32 %v453_v61, %v482_v54 }
  0xf7   :  { %v369_v26 = vpop.xlane.xlu1 %368  ;;  %v497_v23 = vsub.f32 %v439_v12, %v468_v35  ;;  %1115 = vrsqrt.f32 %v252_v38  ;;  %v1104_v58 = vpop.eup %1103 }
  0xf8   :  { %v366_v39 = vpop.xlane.xlu0 %365  ;;  %v398_v7 = vadd.f32 1e-20, %v369_v26  ;;  %v540_v27 = vmul.f32 %v511_v19, %v511_v19  ;;  %1117 = vrsqrt.f32 %v251_v3  ;;  %v1106_v15 = vpop.eup %1105  ;;  %v454_v11 = vmul.f32 %v1104_v58, %v1430_v40  ;;  %v1785_v3 = vld [vmem:[#allocation13_spill] sm:$0xff]  ;;  %v1786_v19 = vld [vmem:[#allocation14_spill] sm:$0xff]  ;;  %v1787_v58 = vld [vmem:[#allocation15_spill] sm:$0xff] }
  0xf9   :  { %v397_v20 = vadd.f32 1e-20, %v366_v39  ;;  %v526_v4 = vmul.f32 %v497_v23, %v497_v23  ;;  %v440_v0 = vmul.f32 %v1106_v15, %v1777_v29 }
  0xfa   :  { %1119 = vrsqrt.f32 %v398_v7  ;;  %v575_v21 = vmul.f32 %v1507_v57, %v540_v27 }
  0xfb   :  { %v1108_v13 = vpop.eup %1107  ;;  %1121 = vrsqrt.f32 %v397_v20  ;;  %v340_v8 = vpop.xlane.xlu1 %339  ;;  %v561_v55 = vmul.f32 %v1507_v57, %v526_v4 }
  0xfc   :  { %v193_v24 = vpop.xlane.xlu0 %192  ;;  %v1110_v59 = vpop.eup %1109  ;;  %v384_v51 = vadd.f32 1e-20, %v340_v8  ;;  %629 = vadd.xlane.f32.xlu1 %v575_v21  ;;  %v483_v17 = vmul.f32 %v1108_v13, %v1438_v50  ;;  %v1788_v21 = vld [vmem:[#allocation16_spill] sm:$0xff] }
  0xfd   :  { %v238_v28 = vadd.f32 1e-20, %v193_v24  ;;  %601 = vadd.xlane.f32.xlu0 %v561_v55  ;;  %v469_v56 = vmul.f32 %v1110_v59, %v1778_v36 }
  0xfe   :  { %1123 = vrsqrt.f32 %v384_v51  ;;  %v512_v30 = vsub.f32 %v454_v11, %v483_v17 }
  0xff   :  { %1125 = vrsqrt.f32 %v238_v28  ;;  %v342_v14 = vpop.xlane.xlu1 %341  ;;  %v498_v44 = vsub.f32 %v440_v0, %v469_v56 }
 0x100   :  { %v195_v32 = vpop.xlane.xlu0 %194  ;;  %v385_v62 = vadd.f32 1e-20, %v342_v14  ;;  %v541_v31 = vmul.f32 %v512_v30, %v512_v30  ;;  %v1112_v33 = vpop.eup %1111 }
 0x101   :  { %v239_v47 = vadd.f32 1e-20, %v195_v32  ;;  %v527_v45 = vmul.f32 %v498_v44, %v498_v44  ;;  %v441_v5 = vmul.f32 %v1112_v33, %v1779_v48 }
 0x102   :  { %1127 = vrsqrt.f32 %v385_v62  ;;  %v576_v40 = vmul.f32 %v1507_v57, %v541_v31  ;;  %v639_v62 = vlaneseq }
 0x103   :  { %v1114_v50 = vpop.eup %1113  ;;  %1129 = vrsqrt.f32 %v239_v47  ;;  %v562_v42 = vmul.f32 %v1507_v57, %v527_v45 }
 0x104   :  { %631 = vadd.xlane.f32.xlu1 %v576_v40  ;;  %v470_v25 = vmul.f32 %v1114_v50, %v1780_v9  ;;  %v1116_v2 = vpop.eup %1115  ;;  %v1623_v33 = vand.u32 127, %v639_v62  ;;  %v1629_v50 = vshrl.u32 %v639_v62, 7 }
 0x105   :  { %603 = vadd.xlane.f32.xlu0 %v562_v42  ;;  %v1118_v63 = vpop.eup %1117  ;;  %v456_v46 = vmul.f32 %v1116_v2, %v1781_v6 }
 0x106   :  { %v499_v10 = vsub.f32 %v441_v5, %v470_v25  ;;  %v455_v60 = vmul.f32 %v1118_v63, %v1783_v22  ;;  %v680_v42 = vadd.s32 4294967288, %v1623_v33  ;;  %v687_v48 = vadd.s32 4294967280, %v1623_v33 }
 0x107   :  { %v1120_v43 = vpop.eup %1119  ;;  %v694_v5 = vadd.s32 4294967272, %v1623_v33  ;;  %v678_v2 = vsub.s32 %v1623_v33, %v1629_v50  ;;  %v701_v63 = vadd.s32 4294967264, %v1623_v33  ;;  %v722_v6 = vadd.s32 4294967240, %v1623_v33 }
 0x108   :  { %v1122_v49 = vpop.eup %1121  ;;  %v528_v52 = vmul.f32 %v499_v10, %v499_v10  ;;  %v485_v18 = vmul.f32 %v1120_v43, %v1782_v41  ;;  %v683_v10 = vsub.s32 %v680_v42, %v1629_v50  ;;  %v690_v43 = vsub.s32 %v687_v48, %v1629_v50 }
 0x109   :  { %v484_v1 = vmul.f32 %v1122_v49, %v1784_v37  ;;  %v708_v49 = vadd.s32 4294967256, %v1623_v33  ;;  %v697_v41 = vsub.s32 %v694_v5, %v1629_v50 }
 0x10a   :  { %v563_v53 = vmul.f32 %v1507_v57, %v528_v52  ;;  %v514_v61 = vsub.f32 %v456_v46, %v485_v18  ;;  %v715_v52 = vadd.s32 4294967248, %v1623_v33  ;;  %v729_v46 = vadd.s32 4294967232, %v1623_v33 }
 0x10b   :  { %v1124_v16 = vpop.eup %1123  ;;  %v513_v34 = vsub.f32 %v455_v60, %v484_v1  ;;  %v736_v18 = vadd.s32 4294967224, %v1623_v33  ;;  %v743_v60 = vadd.s32 4294967216, %v1623_v33  ;;  %v704_v1 = vsub.s32 %v701_v63, %v1629_v50 }
 0x10c   :  { %v1126_v38 = vpop.eup %1125  ;;  %605 = vadd.xlane.f32.xlu0 %v563_v53  ;;  %v543_v54 = vmul.f32 %v514_v61, %v514_v61  ;;  %v471_v12 = vmul.f32 %v1124_v16, %v1785_v3  ;;  %v750_v53 = vadd.s32 4294967208, %v1623_v33  ;;  %v757_v61 = vadd.s32 4294967200, %v1623_v33 }
 0x10d   :  { %v542_v35 = vmul.f32 %v513_v34, %v513_v34  ;;  %v442_v26 = vmul.f32 %v1126_v38, %v1786_v19  ;;  %v711_v16 = vsub.s32 %v708_v49, %v1629_v50  ;;  %v1659_v34 = vadd.s32 4294967192, %v1623_v33 }
 0x10e   :  { %v578_v27 = vmul.f32 %v1507_v57, %v543_v54  ;;  %v1662_v38 = vadd.s32 4294967184, %v1623_v33  ;;  %v718_v54 = vsub.s32 %v715_v52, %v1629_v50  ;;  %v725_v3 = vsub.s32 %v722_v6, %v1629_v50 }
 0x10f   :  { %v1128_v39 = vpop.eup %1127  ;;  %v577_v23 = vmul.f32 %v1507_v57, %v542_v35  ;;  %v500_v7 = vsub.f32 %v442_v26, %v471_v12  ;;  %v1667_v12 = vsub.s32 %v729_v46, %v1629_v50  ;;  %v1672_v26 = vsub.s32 %v736_v18, %v1629_v50 }
 0x110   :  { %v1130_v20 = vpop.eup %1129  ;;  %v472_v4 = vmul.f32 %v1128_v39, %v1787_v58  ;;  %v635_v55 = vsel %vm220_vm0, %v578_v27, 0.0  ;;  %v1675_v39 = vsub.s32 %v743_v60, %v1629_v50  ;;  %v1682_v58 = vsub.s32 %v750_v53, %v1629_v50 }
 0x111   :  { %633 = vadd.xlane.f32.xlu1 %v577_v23  ;;  %v529_v15 = vmul.f32 %v500_v7, %v500_v7  ;;  %v443_v13 = vmul.f32 %v1130_v20, %v1788_v21 }
 0x113   :  { %v564_v8 = vmul.f32 %v1507_v57, %v529_v15  ;;  %v501_v24 = vsub.f32 %v443_v13, %v472_v4  ;;  %v1685_v4 = vsub.s32 %v757_v61, %v1629_v50  ;;  %v767_v13 = vsub.s32 %v1659_v34, %v1629_v50 }
 0x115   :  { %636 = vadd.xlane.f32.xlu1 %v635_v55  ;;  %607 = vadd.xlane.f32.xlu0 %v564_v8  ;;  %v530_v59 = vmul.f32 %v501_v24, %v501_v24  ;;  %v774_v8 = vsub.s32 %v1662_v38, %v1629_v50 }
 0x117   :  { %v565_v51 = vmul.f32 %v1507_v57, %v530_v59 }
 0x119   :  { %609 = vadd.xlane.f32.xlu0 %v565_v51  ;;  %v778_v51 = vadd.s32 4294967176, %v1623_v33 }
 0x132   :  { %v1597_v11 = vpop.xlane.xlu0 %579 }
 0x133   :  { %v679_v24 = vrot.slane %v1597_v11, %v678_v2 }
 0x136   :  { %v1595_v28 = vpop.xlane.xlu1 %581 }
 0x137   :  { %v684_v20 = vrot.slane %v1595_v28, %v683_v10 }
 0x139   :  { %v686_v11 = vsel %vm685_vm1, %v684_v20, %v679_v24  ;;  %v1153_v24 = vmov 0.0  }
 0x13a   :  { %v1601_v29 = vpop.xlane.xlu0 %583 }
 0x13b   :  { %v691_v15 = vrot.slane %v1601_v29, %v690_v43 }
 0x13d   :  { %v693_v42 = vsel %vm692_vm2, %v691_v15, %v686_v11 }
 0x141   :  { %v1599_v17 = vpop.xlane.xlu1 %585 }
 0x142   :  { %v698_v55 = vrot.slane %v1599_v17, %v697_v41 }
 0x144   :  { %v700_v5 = vsel %vm699_vm3, %v698_v55, %v693_v42 }
 0x145   :  { %v1603_v0 = vpop.xlane.xlu1 %613 }
 0x146   :  { %v1605_v36 = vpop.xlane.xlu0 %611  ;;  %v792_v35 = vrot.slane %v1603_v0, %v683_v10 }
 0x147   :  { %v788_v19 = vrot.slane %v1605_v36, %v678_v2 }
 0x149   :  { %v793_v28 = vsel %vm685_vm1, %v792_v35, %v788_v19  ;;  %vm783_vm1 = vcmask 1048512  }
 0x14d   :  { %v1607_v56 = vpop.xlane.xlu1 %615 }
 0x14e   :  { %v1609_v30 = vpop.xlane.xlu0 %587  ;;  %v797_v27 = vrot.slane %v1607_v56, %v690_v43 }
 0x14f   :  { %v705_v29 = vrot.slane %v1609_v30, %v704_v1 }
 0x150   :  { %v798_v17 = vsel %vm692_vm2, %v797_v27, %v793_v28  ;;  %vm855_vm2 = vcmask 786432  }
 0x155   :  { %v1611_v14 = vpop.xlane.xlu1 %617 }
 0x156   :  { %v1613_v57 = vpop.xlane.xlu0 %589  ;;  %v802_v21 = vrot.slane %v1611_v14, %v697_v41  ;;  %v641_v14 = vadd.s32 128, %v1623_v33 }
 0x158   :  { %v803_v30 = vsel %vm699_vm3, %v802_v21, %v798_v17  ;;  %vm646_vm14 = vcmp.lt.s32.totalorder %v641_v14, 225  ;;  %vm16_vm3 = vcmask 0  }
 0x159   :  { %17 = vst.msk [vmem:[#allocation2] sm:$0x1] %vm16_vm3, %v1153_v24 }
 0x15d   :  { %v1615_v32 = vpop.xlane.xlu1 %619 }
 0x15e   :  { %v1617_v44 = vpop.xlane.xlu0 %591  ;;  %v807_v59 = vrot.slane %v1615_v32, %v704_v1  ;;  %v712_v32 = vrot.slane %v1613_v57, %v711_v16 }
 0x160   :  { %v808_v33 = vsel %vm706_vm4, %v807_v59, %v803_v30  ;;  %v853_v59 = vld [vmem:[#allocation2] sm:$0x1] }
 0x165   :  { %v1619_v47 = vpop.xlane.xlu1 %621 }
 0x166   :  { %v1621_v31 = vpop.xlane.xlu0 %593  ;;  %v812_v0 = vrot.slane %v1619_v47, %v711_v16  ;;  %v719_v47 = vrot.slane %v1617_v44, %v718_v54 }
 0x167   :  { %v726_v2 = vrot.slane %v1621_v31, %v725_v3 }
 0x168   :  { %v813_v63 = vsel %vm713_vm5, %v812_v0, %v808_v33 }
 0x16d   :  { %v1625_v45 = vpop.xlane.xlu1 %623 }
 0x16e   :  { %v1627_v40 = vpop.xlane.xlu0 %595  ;;  %v817_v62 = vrot.slane %v1625_v45, %v718_v54  ;;  %v707_v45 = vsel %vm706_vm4, %v705_v29, %v700_v5 }
 0x16f   :  { %v733_v10 = vrot.slane %v1627_v40, %v1667_v12  ;;  %v714_v49 = vsel %vm713_vm5, %v712_v32, %v707_v45 }
 0x170   :  { %v818_v52 = vsel %vm720_vm6, %v817_v62, %v813_v63  ;;  %v721_v46 = vsel %vm720_vm6, %v719_v47, %v714_v49 }
 0x175   :  { %v1634_v9 = vpop.xlane.xlu1 %625 }
 0x176   :  { %v1636_v25 = vpop.xlane.xlu0 %597  ;;  %v822_v48 = vrot.slane %v1634_v9, %v725_v3 }
 0x177   :  { %v740_v31 = vrot.slane %v1636_v25, %v1672_v26 }
 0x178   :  { %v823_v41 = vsel %vm727_vm7, %v822_v48, %v818_v52 }
 0x17d   :  { %v1649_v22 = vpop.xlane.xlu1 %627 }
 0x17e   :  { %v1652_v37 = vpop.xlane.xlu0 %599  ;;  %v827_v57 = vrot.slane %v1649_v22, %v1667_v12  ;;  %v728_v22 = vsel %vm727_vm7, %v726_v2, %v721_v46 }
 0x17f   :  { %v747_v40 = vrot.slane %v1652_v37, %v1675_v39  ;;  %v735_v25 = vsel %vm734_vm8, %v733_v10, %v728_v22  ;;  %v781_v37 = vsub.s32 %v778_v51, %v1629_v50 }
 0x180   :  { %v828_v60 = vsel %vm734_vm8, %v827_v57, %v823_v41  ;;  %v742_v38 = vsel %vm741_vm9, %v740_v31, %v735_v25 }
 0x181   :  { %v749_v35 = vsel %vm748_vm10, %v747_v40, %v742_v38 }
 0x185   :  { %v630_v23 = vpop.xlane.xlu1 %629 }
 0x186   :  { %v1677_v7 = vpop.xlane.xlu0 %601  ;;  %v832_v44 = vrot.slane %v630_v23, %v1672_v26 }
 0x187   :  { %v754_v1 = vrot.slane %v1677_v7, %v1682_v58 }
 0x188   :  { %v833_v53 = vsel %vm741_vm9, %v832_v44, %v828_v60 }
 0x18d   :  { %v632_v36 = vpop.xlane.xlu1 %631 }
 0x18e   :  { %v604_v56 = vpop.xlane.xlu0 %603  ;;  %v837_v6 = vrot.slane %v632_v36, %v1675_v39  ;;  %v756_v39 = vsel %vm755_vm11, %v754_v1, %v749_v35 }
 0x18f   :  { %v761_v61 = vrot.slane %v604_v56, %v1685_v4 }
 0x190   :  { %v838_v54 = vsel %vm748_vm10, %v837_v6, %v833_v53 }
 0x191   :  { %v763_v50 = vsel %vm762_vm12, %v761_v61, %v756_v39 }
 0x195   :  { %v606_v43 = vpop.xlane.xlu0 %605 }
 0x196   :  { %v768_v3 = vrot.slane %v606_v43, %v767_v13 }
 0x198   :  { %v770_v20 = vsel %vm769_vm13, %v768_v3, %v763_v50 }
 0x19a   :  { %v634_v9 = vpop.xlane.xlu1 %633 }
 0x19b   :  { %v842_v18 = vrot.slane %v634_v9, %v1682_v58 }
 0x19d   :  { %v843_v19 = vsel %vm755_vm11, %v842_v18, %v838_v54 }
 0x19e   :  { %v637_v16 = vpop.xlane.xlu1 %636  ;;  %v608_v34 = vpop.xlane.xlu0 %607 }
 0x19f   :  { %v847_v12 = vrot.slane %v637_v16, %v1685_v4  ;;  %v775_v26 = vrot.slane %v608_v34, %v774_v8 }
 0x1a1   :  { %v848_v23 = vsel %vm762_vm12, %v847_v12, %v843_v19  ;;  %v777_v4 = vsel %vm776_vm15, %v775_v26, %v770_v20 }
 0x1a2   :  { %v610_v7 = vpop.xlane.xlu0 %609  ;;  %v852_v58 = vsel %vm646_vm14, %v848_v23, 0.0 }
 0x1a3   :  { %v782_v27 = vrot.slane %v610_v7, %v781_v37  ;;  %v856_v13 = vsel %vm855_vm2, %v852_v58, 0.0 }
 0x1a5   :  { %v784_v15 = vsel %vm783_vm1, %v782_v27, %v777_v4 }
 0x1a6   :  { %v854_v21 = vsel %vm220_vm0, %v784_v15, 0.0 }
 0x1a7   :  { %v857_v8 = vadd.f32 %v856_v13, %v854_v21 }
 0x1a9   :  { %858 = vadd.xlane.f32.xlu1 %v857_v8 }
 0x232   :  { %v859_v55 = vpop.xlane.xlu1 %858 }
 0x233   :  { %v860_v51 = vmul.f32 0.0044444446, %v859_v55 }
 0x235   :  { %v861_v28 = vadd.f32 %v860_v51, %v853_v59 }
 0x237   :  { %863 = vst.msk [vmem:[#allocation2] sm:$0x1] %vm16_vm3, %v861_v28 }
 0x238   :  { %1142 = shalt.err (!%p1139_p4)
}
 0x239   :  { %873 = dma.vmem_to_hbm [thread:$0]  %s871_s14, 16, %s1752_s2, [#allocation3]  }
 0x23a   :  { %1151 = dma.done.wait [#allocation3], 16  }
 0x23b   :  { %1152 = vsyncadd [#allocation3], 4294967280 }
 0x23c   :  { %877 = vsyncpa [#allocation3], 1 }

// kernel: _lambda_.16
= control target key start
LH: loop header
LB: loop body
LE: loop exit
PB: predicated region body
PF: predicated region fallthrough
CT: control target
= control target key end

     0   :  { %s646_s0 = inlined_call_operand.vmem [shape: bf16[2,49,256], index: 0, kind: input, shape index: {}]   ;;  %s647_s1 = inlined_call_operand.vmem [shape: f32[1,1,256], index: 1, kind: input, shape index: {}]   ;;  %s648_s2 = inlined_call_operand.hbm [shape: f32[1,1], index: 2, kind: output, shape index: {}]  }
   0x1   :  { %v25_v0 = vld [vmem:[%s646_s0 + $0x38] sm:$0xff]  ;;  %v18_v1 = vld [vmem:[%s646_s0] sm:$0xff]  ;;  %v19_v7 = vld [vmem:[%s646_s0 + $0x8] sm:$0xff] }
   0x2   :  { %v26_v2 = vld [vmem:[%s646_s0 + $0x40] sm:$0xff]  ;;  %v430_v3 = vunpack.c.l.bf16 %v25_v0  ;;  %v432_v4 = vunpack.c.h.bf16 %v25_v0  ;;  %v434_v5 = vunpack.c.l.bf16 %v18_v1  ;;  %v436_v6 = vunpack.c.h.bf16 %v18_v1  ;;  %v27_v12 = vld [vmem:[%s646_s0 + $0x48] sm:$0xff]  ;;  %v20_v17 = vld [vmem:[%s646_s0 + $0x10] sm:$0xff] }
   0x3   :  { %v441_v8 = vunpack.c.l.bf16 %v26_v2  ;;  %v443_v9 = vunpack.c.h.bf16 %v26_v2  ;;  %v445_v10 = vunpack.c.l.bf16 %v19_v7  ;;  %v447_v11 = vunpack.c.h.bf16 %v19_v7  ;;  %v28_v22 = vld [vmem:[%s646_s0 + $0x50] sm:$0xff] }
   0x4   :  { %v113_v13 = vmul.f32 %v430_v3, %v430_v3  ;;  %v114_v14 = vmul.f32 %v432_v4, %v432_v4  ;;  %v61_v15 = vmul.f32 %v434_v5, %v434_v5  ;;  %v62_v16 = vmul.f32 %v436_v6, %v436_v6 }
   0x5   :  { %v115_v18 = vmul.f32 %v441_v8, %v441_v8  ;;  %v116_v19 = vmul.f32 %v443_v9, %v443_v9  ;;  %v63_v20 = vmul.f32 %v445_v10, %v445_v10  ;;  %v64_v21 = vmul.f32 %v447_v11, %v447_v11 }
   0x6   :  { %7 = vsyncpa [#allocation3], 0  ;;  %v127_v23 = vadd.f32 %v114_v14, %v113_v13  ;;  %v75_v24 = vadd.f32 %v62_v16, %v61_v15  ;;  %v474_v25 = vunpack.c.l.bf16 %v27_v12  ;;  %v476_v26 = vunpack.c.h.bf16 %v27_v12  ;;  %v21_v27 = vld [vmem:[%s646_s0 + $0x18] sm:$0xff]  ;;  %v22_v41 = vld [vmem:[%s646_s0 + $0x20] sm:$0xff] }
   0x7   :  { %v130_v28 = vadd.f32 %v116_v19, %v115_v18  ;;  %v78_v29 = vadd.f32 %v64_v21, %v63_v20  ;;  %v481_v30 = vunpack.c.l.bf16 %v20_v17  ;;  %v483_v31 = vunpack.c.h.bf16 %v20_v17  ;;  %v29_v32 = vld [vmem:[%s646_s0 + $0x58] sm:$0xff]  ;;  %v24_v45 = vld [vmem:[%s646_s0 + $0x30] sm:$0x11]  ;;  %v23_v53 = vld [vmem:[%s646_s0 + $0x28] sm:$0xff] }
   0x8   :  { %128 = vadd.xlane.f32.xlu1 %v127_v23  ;;  %76 = vadd.xlane.f32.xlu0 %v75_v24  ;;  %v117_v33 = vmul.f32 %v474_v25, %v474_v25  ;;  %v118_v34 = vmul.f32 %v476_v26, %v476_v26  ;;  %v492_v35 = vunpack.c.l.bf16 %v28_v22  ;;  %v494_v36 = vunpack.c.h.bf16 %v28_v22  ;;  %v31_v59 = vld [vmem:[%s646_s0 + $0x68] sm:$0x11]  ;;  %v30_v13 = vld [vmem:[%s646_s0 + $0x60] sm:$0xff] }
   0x9   :  { %v65_v37 = vmul.f32 %v481_v30, %v481_v30  ;;  %v66_v38 = vmul.f32 %v483_v31, %v483_v31  ;;  %v500_v39 = vunpack.c.l.bf16 %v21_v27  ;;  %v502_v40 = vunpack.c.h.bf16 %v21_v27 }
   0xa   :  { %v119_v42 = vmul.f32 %v492_v35, %v492_v35  ;;  %v120_v43 = vmul.f32 %v494_v36, %v494_v36  ;;  %v511_v44 = vunpack.c.l.bf16 %v29_v32  ;;  %v133_v46 = vadd.f32 %v118_v34, %v117_v33 }
   0xb   :  { %v81_v47 = vadd.f32 %v66_v38, %v65_v37  ;;  %v516_v48 = vunpack.c.h.bf16 %v29_v32  ;;  %v67_v49 = vmul.f32 %v500_v39, %v500_v39  ;;  %v68_v50 = vmul.f32 %v502_v40, %v502_v40 }
   0xc   :  { %131 = vadd.xlane.f32.xlu1 %v130_v28  ;;  %79 = vadd.xlane.f32.xlu0 %v78_v29  ;;  %v522_v51 = vunpack.c.l.bf16 %v22_v41  ;;  %v524_v52 = vunpack.c.h.bf16 %v22_v41  ;;  %v529_v54 = vunpack.c.l.bf16 %v24_v45  ;;  %v531_v55 = vunpack.c.h.bf16 %v24_v45 }
   0xd   :  { %v136_v56 = vadd.f32 %v120_v43, %v119_v42  ;;  %v121_v57 = vmul.f32 %v511_v44, %v511_v44  ;;  %v122_v58 = vmul.f32 %v516_v48, %v516_v48  ;;  %v544_v62 = vunpack.c.l.bf16 %v23_v53 }
   0xe   :  { %v69_v60 = vmul.f32 %v522_v51, %v522_v51  ;;  %v70_v61 = vmul.f32 %v524_v52, %v524_v52  ;;  %v546_v63 = vunpack.c.h.bf16 %v23_v53  ;;  %v84_v0 = vadd.f32 %v68_v50, %v67_v49 }
   0xf   :  { %v73_v1 = vmul.f32 %v529_v54, %v529_v54  ;;  %v74_v2 = vmul.f32 %v531_v55, %v531_v55  ;;  %vm93_vm0 = vcmask 1040384   ;;  %v552_v7 = vunpack.c.l.bf16 %v31_v59 }
  0x10   :  { %134 = vadd.xlane.f32.xlu1 %v133_v46  ;;  %82 = vadd.xlane.f32.xlu0 %v81_v47  ;;  %v554_v12 = vunpack.c.h.bf16 %v31_v59  ;;  %v139_v14 = vadd.f32 %v122_v58, %v121_v57  ;;  %v87_v15 = vadd.f32 %v70_v61, %v69_v60  ;;  %v71_v16 = vmul.f32 %v544_v62, %v544_v62 }
  0x11   :  { %v72_v17 = vmul.f32 %v546_v63, %v546_v63  ;;  %v94_v18 = vsel %vm93_vm0, %v73_v1, 0.0  ;;  %v95_v19 = vsel %vm93_vm0, %v74_v2, 0.0  ;;  %v565_v20 = vunpack.c.l.bf16 %v30_v13 }
  0x12   :  { %v567_v21 = vunpack.c.h.bf16 %v30_v13  ;;  %v125_v22 = vmul.f32 %v552_v7, %v552_v7  ;;  %v126_v23 = vmul.f32 %v554_v12, %v554_v12  ;;  %v96_v24 = vadd.f32 %v95_v19, %v94_v18 }
  0x13   :  { %v90_v27 = vadd.f32 %v72_v17, %v71_v16  ;;  %v123_v28 = vmul.f32 %v565_v20, %v565_v20  ;;  %v221_v50 = vlaneseq  ;;  %v60_v16 = vld [vmem:[%s647_s1] sm:$0x3]  ;;  %vm290_vm1 = vcmask 130112   ;;  %s405_s1 = smov [#allocation2]  }
  0x14   :  { %137 = vadd.xlane.f32.xlu1 %v136_v56  ;;  %85 = vadd.xlane.f32.xlu0 %v84_v0  ;;  %v124_v29 = vmul.f32 %v567_v21, %v567_v21  ;;  %v145_v32 = vsel %vm93_vm0, %v125_v22, 0.0  ;;  %v146_v33 = vsel %vm93_vm0, %v126_v23, 0.0  ;;  %vm297_vm2 = vcmask 195712   ;;  %s344_s10 = sshll.u32 %s405_s1, 4  ;;  %s345_s10 = int_to_ptr.vmem [resolvable:$true] %s344_s10 }
  0x15   :  { %v147_v34 = vadd.f32 %v146_v33, %v145_v32  ;;  %v580_v59 = vshrl.u32 %v221_v50, 7  ;;  %vm304_vm3 = vcmask 261312   ;;  %vm311_vm4 = vcmask 326912   ;;  %s382_s11 = scalar_lea.vmem %s345_s10, 16  ;;  %s386_s12 = scalar_lea.vmem %s345_s10, 32 }
  0x16   :  { %v142_v37 = vadd.f32 %v124_v29, %v123_v28  ;;  %vm318_vm5 = vcmask 392512   ;;  %vm325_vm6 = vcmask 458112   ;;  %vm330_vm8 = vcmask 393216   ;;  %p383_p0 = scmp.ne.s32.totalorder %s345_s10, %s382_s11  ;;  %p387_p1 = scmp.lt.s32.totalorder %s345_s10, %s345_s10 }
  0x17   :  { %v223_v2 = vsub.s32 0, %v580_v59  ;;  %v227_v17 = vsub.s32 1, %v580_v59  ;;  %vm16_vm9 = vcmask 0   ;;  %p388_p2 = scmp.lt.s32.totalorder %s386_s12, %s382_s11 }
  0x18   :  { %140 = vadd.xlane.f32.xlu1 %v139_v14  ;;  %88 = vadd.xlane.f32.xlu0 %v87_v15 }
  0x19   :  { %v591_v29 = vrot.slane %v60_v16, %v223_v2  ;;  %p389_p3 = por %p388_p2, %p387_p1 }
  0x1b   :  { %p390_p4 = pnand %p389_p3, %p383_p0 }
  0x1c   :  { %97 = vadd.xlane.f32.xlu1 %v96_v24  ;;  %91 = vadd.xlane.f32.xlu0 %v90_v27 }
  0x20   :  { %148 = vadd.xlane.f32.xlu1 %v147_v34  ;;  %143 = vadd.xlane.f32.xlu0 %v142_v37 }
  0x91   :  { %v129_v38 = vpop.xlane.xlu1 %128  ;;  %v77_v41 = vpop.xlane.xlu0 %76 }
  0x92   :  { %v150_v42 = vadd.f32 1e-20, %v129_v38  ;;  %v99_v43 = vadd.f32 1e-20, %v77_v41  ;;  %v593_v41 = vrot.slane %v60_v16, %v227_v17 }
  0x94   :  { %354 = vrsqrt.f32 %v150_v42 }
  0x95   :  { %356 = vrsqrt.f32 %v99_v43  ;;  %v132_v45 = vpop.xlane.xlu1 %131  ;;  %v80_v46 = vpop.xlane.xlu0 %79 }
  0x96   :  { %v151_v47 = vadd.f32 1e-20, %v132_v45  ;;  %v100_v49 = vadd.f32 1e-20, %v80_v46 }
  0x98   :  { %358 = vrsqrt.f32 %v151_v47 }
  0x99   :  { %360 = vrsqrt.f32 %v100_v49  ;;  %v135_v53 = vpop.xlane.xlu1 %134  ;;  %v83_v56 = vpop.xlane.xlu0 %82 }
  0x9a   :  { %v152_v57 = vadd.f32 1e-20, %v135_v53  ;;  %v101_v58 = vadd.f32 1e-20, %v83_v56 }
  0x9c   :  { %362 = vrsqrt.f32 %v152_v57 }
  0x9d   :  { %364 = vrsqrt.f32 %v101_v58  ;;  %v138_v60 = vpop.xlane.xlu1 %137  ;;  %v86_v61 = vpop.xlane.xlu0 %85 }
  0x9e   :  { %v153_v0 = vadd.f32 1e-20, %v138_v60  ;;  %v102_v1 = vadd.f32 1e-20, %v86_v61 }
  0xa0   :  { %366 = vrsqrt.f32 %v153_v0 }
  0xa1   :  { %v355_v13 = vpop.eup %354  ;;  %368 = vrsqrt.f32 %v102_v1  ;;  %v141_v14 = vpop.xlane.xlu1 %140 }
  0xa2   :  { %v89_v15 = vpop.xlane.xlu0 %88  ;;  %v357_v18 = vpop.eup %356  ;;  %v154_v19 = vadd.f32 1e-20, %v141_v14  ;;  %v178_v23 = vmul.f32 %v355_v13, %v430_v3  ;;  %v179_v24 = vmul.f32 %v355_v13, %v432_v4 }
  0xa3   :  { %v103_v22 = vadd.f32 1e-20, %v89_v15  ;;  %v164_v27 = vmul.f32 %v357_v18, %v434_v5  ;;  %v165_v28 = vmul.f32 %v357_v18, %v436_v6 }
  0xa4   :  { %370 = vrsqrt.f32 %v154_v19 }
  0xa5   :  { %v359_v32 = vpop.eup %358  ;;  %372 = vrsqrt.f32 %v103_v22  ;;  %v98_v33 = vpop.xlane.xlu1 %97  ;;  %v192_v37 = vsub.f32 %v164_v27, %v178_v23  ;;  %v193_v38 = vsub.f32 %v165_v28, %v179_v24 }
  0xa6   :  { %v92_v34 = vpop.xlane.xlu0 %91  ;;  %v361_v42 = vpop.eup %360  ;;  %v105_v43 = vadd.f32 1e-20, %v98_v33  ;;  %v180_v4 = vmul.f32 %v359_v32, %v441_v8  ;;  %v181_v5 = vmul.f32 %v359_v32, %v443_v9 }
  0xa7   :  { %v104_v3 = vadd.f32 1e-20, %v92_v34  ;;  %v206_v45 = vmul.f32 %v192_v37, %v192_v37  ;;  %v207_v6 = vmul.f32 %v193_v38, %v193_v38  ;;  %v166_v46 = vmul.f32 %v361_v42, %v445_v10 }
  0xa8   :  { %v167_v47 = vmul.f32 %v361_v42, %v447_v11  ;;  %374 = vrsqrt.f32 %v105_v43 }
  0xa9   :  { %v363_v49 = vpop.eup %362  ;;  %376 = vrsqrt.f32 %v104_v3  ;;  %v149_v53 = vpop.xlane.xlu1 %148  ;;  %v231_v57 = vmul.f32 %v591_v29, %v206_v45  ;;  %v232_v58 = vmul.f32 %v593_v41, %v207_v6  ;;  %v194_v60 = vsub.f32 %v166_v46, %v180_v4 }
  0xaa   :  { %v144_v56 = vpop.xlane.xlu0 %143  ;;  %v365_v61 = vpop.eup %364  ;;  %v156_v8 = vadd.f32 1e-20, %v149_v53  ;;  %v195_v9 = vsub.f32 %v167_v47, %v181_v5  ;;  %v182_v1 = vmul.f32 %v363_v49, %v474_v25  ;;  %v183_v15 = vmul.f32 %v363_v49, %v476_v26 }
  0xab   :  { %v155_v0 = vadd.f32 1e-20, %v144_v56  ;;  %v245_v2 = vadd.f32 %v232_v58, %v231_v57  ;;  %v208_v10 = vmul.f32 %v194_v60, %v194_v60  ;;  %v168_v11 = vmul.f32 %v365_v61, %v481_v30 }
  0xac   :  { %v169_v13 = vmul.f32 %v365_v61, %v483_v31  ;;  %378 = vrsqrt.f32 %v156_v8  ;;  %v209_v14 = vmul.f32 %v195_v9, %v195_v9 }
  0xad   :  { %v367_v16 = vpop.eup %366  ;;  %380 = vrsqrt.f32 %v155_v0  ;;  %246 = vadd.xlane.f32.xlu0 %v245_v2  ;;  %v233_v17 = vmul.f32 %v591_v29, %v208_v10  ;;  %v196_v18 = vsub.f32 %v168_v11, %v182_v1 }
  0xae   :  { %v369_v19 = vpop.eup %368  ;;  %v234_v22 = vmul.f32 %v593_v41, %v209_v14  ;;  %v197_v25 = vsub.f32 %v169_v13, %v183_v15  ;;  %v184_v23 = vmul.f32 %v367_v16, %v492_v35  ;;  %v185_v30 = vmul.f32 %v367_v16, %v494_v36 }
  0xaf   :  { %v210_v24 = vmul.f32 %v196_v18, %v196_v18  ;;  %v170_v31 = vmul.f32 %v369_v19, %v500_v39  ;;  %v171_v27 = vmul.f32 %v369_v19, %v502_v40 }
  0xb0   :  { %v248_v26 = vadd.f32 %v234_v22, %v233_v17  ;;  %v211_v28 = vmul.f32 %v197_v25, %v197_v25  ;;  %v270_v22 = vand.u32 127, %v221_v50 }
  0xb1   :  { %v371_v32 = vpop.eup %370  ;;  %v235_v33 = vmul.f32 %v591_v29, %v210_v24  ;;  %v198_v34 = vsub.f32 %v170_v31, %v184_v23  ;;  %v199_v37 = vsub.f32 %v171_v27, %v185_v30 }
  0xb2   :  { %v373_v38 = vpop.eup %372  ;;  %249 = vadd.xlane.f32.xlu1 %v248_v26  ;;  %v236_v42 = vmul.f32 %v593_v41, %v211_v28  ;;  %v186_v35 = vmul.f32 %v371_v32, %v511_v44  ;;  %v187_v36 = vmul.f32 %v371_v32, %v516_v48  ;;  %v285_v23 = vadd.s32 4294967288, %v270_v22 }
  0xb3   :  { %v212_v43 = vmul.f32 %v198_v34, %v198_v34  ;;  %v213_v3 = vmul.f32 %v199_v37, %v199_v37  ;;  %v172_v39 = vmul.f32 %v373_v38, %v522_v51  ;;  %v173_v40 = vmul.f32 %v373_v38, %v524_v52 }
  0xb4   :  { %v251_v4 = vadd.f32 %v236_v42, %v235_v33  ;;  %v292_v30 = vadd.s32 4294967280, %v270_v22  ;;  %v299_v24 = vadd.s32 4294967272, %v270_v22  ;;  %v306_v27 = vadd.s32 4294967264, %v270_v22 }
  0xb5   :  { %v375_v5 = vpop.eup %374  ;;  %v237_v45 = vmul.f32 %v591_v29, %v212_v43  ;;  %v238_v6 = vmul.f32 %v593_v41, %v213_v3  ;;  %v200_v46 = vsub.f32 %v172_v39, %v186_v35  ;;  %v201_v47 = vsub.f32 %v173_v40, %v187_v36 }
  0xb6   :  { %v377_v49 = vpop.eup %376  ;;  %252 = vadd.xlane.f32.xlu0 %v251_v4  ;;  %v176_v52 = vmul.f32 %v375_v5, %v529_v54  ;;  %v177_v61 = vmul.f32 %v375_v5, %v531_v55  ;;  %v283_v28 = vsub.s32 %v270_v22, %v580_v59  ;;  %v302_v32 = vsub.s32 %v299_v24, %v580_v59 }
  0xb7   :  { %v254_v53 = vadd.f32 %v238_v6, %v237_v45  ;;  %v214_v44 = vmul.f32 %v200_v46, %v200_v46  ;;  %v215_v56 = vmul.f32 %v201_v47, %v201_v47  ;;  %v174_v60 = vmul.f32 %v377_v49, %v544_v62 }
  0xb8   :  { %v175_v1 = vmul.f32 %v377_v49, %v546_v63  ;;  %v313_v33 = vadd.s32 4294967256, %v270_v22  ;;  %v320_v34 = vadd.s32 4294967248, %v270_v22  ;;  %v309_v50 = vsub.s32 %v306_v27, %v580_v59 }
  0xb9   :  { %v379_v48 = vpop.eup %378  ;;  %255 = vadd.xlane.f32.xlu1 %v254_v53  ;;  %v239_v57 = vmul.f32 %v591_v29, %v214_v44  ;;  %v240_v51 = vmul.f32 %v593_v41, %v215_v56  ;;  %vm273_vm7 = vcmp.lt.s32.totalorder %v270_v22, 49 }
  0xba   :  { %v381_v58 = vpop.eup %380  ;;  %v190_v8 = vmul.f32 %v379_v48, %v552_v7  ;;  %v191_v0 = vmul.f32 %v379_v48, %v554_v12  ;;  %v316_v3 = vsub.s32 %v313_v33, %v580_v59  ;;  %v323_v39 = vsub.s32 %v320_v34, %v580_v59 }
  0xbb   :  { %v257_v9 = vadd.f32 %v240_v51, %v239_v57  ;;  %v188_v2 = vmul.f32 %v381_v58, %v565_v20  ;;  %v189_v10 = vmul.f32 %v381_v58, %v567_v21 }
  0xbc   :  { %v204_v11 = vsub.f32 %v176_v52, %v190_v8  ;;  %v205_v13 = vsub.f32 %v177_v61, %v191_v0 }
  0xbd   :  { %258 = vadd.xlane.f32.xlu0 %v257_v9  ;;  %v202_v54 = vsub.f32 %v174_v60, %v188_v2  ;;  %v203_v14 = vsub.f32 %v175_v1, %v189_v10 }
  0xbe   :  { %v218_v15 = vmul.f32 %v204_v11, %v204_v11  ;;  %v219_v62 = vmul.f32 %v205_v13, %v205_v13 }
  0xbf   :  { %v216_v16 = vmul.f32 %v202_v54, %v202_v54  ;;  %v217_v55 = vmul.f32 %v203_v14, %v203_v14 }
  0xc0   :  { %v243_v7 = vmul.f32 %v591_v29, %v218_v15  ;;  %v244_v12 = vmul.f32 %v593_v41, %v219_v62 }
  0xc1   :  { %v241_v17 = vmul.f32 %v591_v29, %v216_v16  ;;  %v242_v63 = vmul.f32 %v593_v41, %v217_v55  ;;  %v288_v29 = vsub.s32 %v285_v23, %v580_v59  ;;  %v295_v41 = vsub.s32 %v292_v30, %v580_v59 }
  0xc2   :  { %v263_v20 = vsel %vm93_vm0, %v243_v7, 0.0  ;;  %v264_v21 = vsel %vm93_vm0, %v244_v12, 0.0  ;;  %v404_v59 = vmov 0.0  }
  0xc3   :  { %v260_v18 = vadd.f32 %v242_v63, %v241_v17  ;;  %v265_v19 = vadd.f32 %v264_v21, %v263_v20  ;;  %17 = vst.msk [vmem:[#allocation2] sm:$0x1] %vm16_vm9, %v404_v59 }
  0xc5   :  { %261 = vadd.xlane.f32.xlu1 %v260_v18  ;;  %266 = vadd.xlane.f32.xlu0 %v265_v19 }
  0xca   :  { %v329_v52 = vld [vmem:[#allocation2] sm:$0x1] }
 0x136   :  { %v247_v25 = vpop.xlane.xlu0 %246 }
 0x137   :  { %v284_v36 = vrot.slane %v247_v25, %v283_v28 }
 0x13b   :  { %v250_v31 = vpop.xlane.xlu1 %249 }
 0x13c   :  { %v289_v38 = vrot.slane %v250_v31, %v288_v29 }
 0x13e   :  { %v291_v4 = vsel %vm290_vm1, %v289_v38, %v284_v36 }
 0x13f   :  { %v253_v26 = vpop.xlane.xlu0 %252 }
 0x140   :  { %v296_v35 = vrot.slane %v253_v26, %v295_v41 }
 0x142   :  { %v256_v37 = vpop.xlane.xlu1 %255  ;;  %v298_v5 = vsel %vm297_vm2, %v296_v35, %v291_v4 }
 0x143   :  { %v303_v43 = vrot.slane %v256_v37, %v302_v32 }
 0x145   :  { %v305_v46 = vsel %vm304_vm3, %v303_v43, %v298_v5 }
 0x146   :  { %v259_v42 = vpop.xlane.xlu0 %258 }
 0x147   :  { %v310_v40 = vrot.slane %v259_v42, %v309_v50 }
 0x149   :  { %v312_v53 = vsel %vm311_vm4, %v310_v40, %v305_v46 }
 0x14e   :  { %v262_v45 = vpop.xlane.xlu1 %261  ;;  %v267_v6 = vpop.xlane.xlu0 %266 }
 0x14f   :  { %v317_v47 = vrot.slane %v262_v45, %v316_v3  ;;  %v324_v49 = vrot.slane %v267_v6, %v323_v39 }
 0x151   :  { %v319_v44 = vsel %vm318_vm5, %v317_v47, %v312_v53 }
 0x152   :  { %v326_v56 = vsel %vm325_vm6, %v324_v49, %v319_v44 }
 0x153   :  { %v328_v48 = vsel %vm273_vm7, %v326_v56, 0.0 }
 0x154   :  { %v331_v57 = vsel %vm330_vm8, %v328_v48, 0.0 }
 0x155   :  { %332 = vadd.xlane.f32.xlu1 %v331_v57 }
 0x1de   :  { %v333_v51 = vpop.xlane.xlu1 %332 }
 0x1df   :  { %v334_v58 = vmul.f32 0.020408163, %v333_v51 }
 0x1e1   :  { %v335_v60 = vadd.f32 %v334_v58, %v329_v52 }
 0x1e3   :  { %337 = vst.msk [vmem:[#allocation2] sm:$0x1] %vm16_vm9, %v335_v60 }
 0x1e4   :  { %393 = shalt.err (!%p390_p4)
}
 0x1e5   :  { %347 = dma.vmem_to_hbm [thread:$0]  %s345_s10, 16, %s648_s2, [#allocation3]  }
 0x1e6   :  { %402 = dma.done.wait [#allocation3], 16  }
 0x1e7   :  { %403 = vsyncadd [#allocation3], 4294967280 }
 0x1e8   :  { %351 = vsyncpa [#allocation3], 1 }

// kernel: _lambda_.11
= control target key start
LH: loop header
LB: loop body
LE: loop exit
PB: predicated region body
PF: predicated region fallthrough
CT: control target
= control target key end

     0   :  { %s5999_s12 = smov 0   ;;  %s6001_s13 = smov 0   ;;  %s7730_s0 = inlined_call_operand.vmem [shape: bf16[98,3200], index: 0, kind: input, shape index: {}]   ;;  %s7731_s1 = inlined_call_operand.vmem [shape: bf16[3200,256], index: 1, kind: input, shape index: {}]   ;;  %s7732_s2 = inlined_call_operand.vmem [shape: f32[1,256], index: 2, kind: input, shape index: {}]   ;;  %s7733_s3 = inlined_call_operand.vmem [shape: bf16[98,256], index: 3, kind: output, shape index: {}]  }
   0x1   :  { %s6003_s14 = smov 0  }
   0x2 LB: > { %s6012_s15 = sadd.s32 4294967295, %s5944_s14   ;;  %s6014_s16 = sadd.s32 1, %s5944_s14   ;;  %s5944_s14 = sphi %s6003_s14, %s7776_s14   ;;  %s5940_s13 = sphi %s6001_s13, %s7775_s13   ;;  %s5936_s12 = sphi %s5999_s12, %s7774_s12  }
   0x3   : > { %s85_s17 = ssub.s32 %s5944_s14, %s6014_s16  ;;  %s88_s18 = sadd.s32 1, %s5940_s13 }
   0x4   : > { %p86_p0 = scmp.eq.s32.totalorder %s85_s17, 0  ;;  %p98_p1 = scmp.ne.s32.totalorder %s5940_s13, %s5936_s12 }
   0x5   : > { %p99_p2 = scmp.eq.s32.totalorder %s6012_s15, 1  ;;  %p4492_p3 = scmp.ge.s32.totalorder %s5944_s14, 1 }
   0x6   : > { %s6022_s19 = scalar_select %p86_p0, %s5940_s13, %s88_s18  }
   0x7   : > { %p6024_p4 = por %p99_p2, %p98_p1  ;;  %p149_p5 = scmp.lt.s32.totalorder %s5944_s14, 3 }
   0x9   : > { %p150_p6 = pnand %p4492_p3, %p149_p5 }
   0xb   : > { %153 = sbr.rel (%p150_p6) target bundleno = 687 (0x2af), region = 32 }
  0x10   : > { %v5142_v0 = vld [vmem:[%s7731_s1 + $0x74] ss:$8 sps:$4 sm:$0xff]   ;;  %v5146_v2 = vld [vmem:[%s7731_s1 + $0x70] ss:$8 sps:$4 sm:$0xff]   ;;  %v5148_v4 = vld [vmem:[%s7731_s1 + $0x64] ss:$8 sps:$4 sm:$0xff]  }
  0x11   : > { %v5144_v1 = vld [vmem:[%s7731_s1 + $0x174] ss:$8 sps:$4 sm:$0xff]   ;;  %3222 = vmatprep.subr.bf16.mxu0 %v5142_v0  ;;  %v5147_v3 = vld [vmem:[%s7731_s1 + $0x170] ss:$8 sps:$4 sm:$0xff]   ;;  %v5150_v5 = vld [vmem:[%s7731_s1 + $0x164] ss:$8 sps:$4 sm:$0xff]  }
  0x12   : > { %3295 = vmatprep.subr.bf16.mxu1 %v5144_v1  ;;  %3223 = vmatpush1.bf16.msra.mxu0 %v5146_v2  ;;  %v5152_v6 = vld [vmem:[%s7731_s1 + $0x60] ss:$8 sps:$4 sm:$0xff]   ;;  %v5154_v8 = vld [vmem:[%s7731_s1 + $0x54] ss:$8 sps:$4 sm:$0xff]   ;;  %v5158_v10 = vld [vmem:[%s7731_s1 + $0x50] ss:$8 sps:$4 sm:$0xff]  }
  0x13   : > { %3296 = vmatpush1.bf16.msra.mxu1 %v5147_v3  ;;  %3224 = vmatprep.subr.bf16.mxu0 %v5148_v4  ;;  %v5153_v7 = vld [vmem:[%s7731_s1 + $0x160] ss:$8 sps:$4 sm:$0xff]   ;;  %v5156_v9 = vld [vmem:[%s7731_s1 + $0x154] ss:$8 sps:$4 sm:$0xff]   ;;  %v5159_v11 = vld [vmem:[%s7731_s1 + $0x150] ss:$8 sps:$4 sm:$0xff]  }
  0x14   : > { %3297 = vmatprep.subr.bf16.mxu1 %v5150_v5  ;;  %v5160_v12 = vld [vmem:[%s7731_s1 + $0x44] ss:$8 sps:$4 sm:$0xff]   ;;  %v5164_v14 = vld [vmem:[%s7731_s1 + $0x40] ss:$8 sps:$4 sm:$0xff]   ;;  %v5166_v16 = vld [vmem:[%s7731_s1 + $0x34] ss:$8 sps:$4 sm:$0xff]  }
  0x15   : > { %v5162_v13 = vld [vmem:[%s7731_s1 + $0x144] ss:$8 sps:$4 sm:$0xff]   ;;  %v5165_v15 = vld [vmem:[%s7731_s1 + $0x140] ss:$8 sps:$4 sm:$0xff]   ;;  %v5168_v17 = vld [vmem:[%s7731_s1 + $0x134] ss:$8 sps:$4 sm:$0xff]  }
  0x16   : > { %3225 = vmatpush1.bf16.msra.mxu0 %v5152_v6  ;;  %v5170_v18 = vld [vmem:[%s7731_s1 + $0x30] ss:$8 sps:$4 sm:$0xff]   ;;  %v5172_v20 = vld [vmem:[%s7731_s1 + $0x24] ss:$8 sps:$4 sm:$0xff]   ;;  %v5176_v22 = vld [vmem:[%s7731_s1 + $0x20] ss:$8 sps:$4 sm:$0xff]  }
  0x17   : > { %3298 = vmatpush1.bf16.msra.mxu1 %v5153_v7  ;;  %3226 = vmatprep.subr.bf16.mxu0 %v5154_v8  ;;  %v5171_v19 = vld [vmem:[%s7731_s1 + $0x130] ss:$8 sps:$4 sm:$0xff]   ;;  %v5174_v21 = vld [vmem:[%s7731_s1 + $0x124] ss:$8 sps:$4 sm:$0xff]   ;;  %v5177_v23 = vld [vmem:[%s7731_s1 + $0x120] ss:$8 sps:$4 sm:$0xff]  }
  0x18   : > { %3299 = vmatprep.subr.bf16.mxu1 %v5156_v9  ;;  %v5178_v24 = vld [vmem:[%s7731_s1 + $0x14] ss:$8 sps:$4 sm:$0xff]   ;;  %v5182_v26 = vld [vmem:[%s7731_s1 + $0x10] ss:$8 sps:$4 sm:$0xff]   ;;  %v5184_v28 = vld [vmem:[%s7731_s1 + $0x4] ss:$8 sps:$4 sm:$0xff]  }
  0x19   : > { %v5180_v25 = vld [vmem:[%s7731_s1 + $0x114] ss:$8 sps:$4 sm:$0xff]   ;;  %v5183_v27 = vld [vmem:[%s7731_s1 + $0x110] ss:$8 sps:$4 sm:$0xff]   ;;  %v5186_v29 = vld [vmem:[%s7731_s1 + $0x104] ss:$8 sps:$4 sm:$0xff]  }
  0x1a   : > { %3227 = vmatpush1.bf16.msra.mxu0 %v5158_v10  ;;  %s6119_s14 = sshll.u32 %s6012_s15, 3  ;;  %v5188_v30 = vld [vmem:[%s7731_s1] ss:$8 sps:$4 sm:$0xff]   ;;  %v5190_v32 = vld [vmem:[%s7731_s1 + $0xf4] ss:$8 sps:$4 sm:$0xff]   ;;  %s5033_s25 = sshll.u32 (%p6024_p4), %s6012_s15, 6 }
  0x1b   : > { %3300 = vmatpush1.bf16.msra.mxu1 %v5159_v11  ;;  %3228 = vmatprep.subr.bf16.mxu0 %v5160_v12  ;;  %v5189_v31 = vld [vmem:[%s7731_s1 + $0x100] ss:$8 sps:$4 sm:$0xff]   ;;  %p184_p7 = scmp.lt.s32.totalorder %s6119_s14, 12  ;;  %v5192_v33 = vld [vmem:[%s7731_s1 + $0x1f4] ss:$8 sps:$4 sm:$0xff]   ;;  %s4251_s24 = ssub.s32 (%p6024_p4), 13, %s6119_s14 }
  0x1c   : > { %3301 = vmatprep.subr.bf16.mxu1 %v5162_v13  ;;  %v5194_v34 = vld [vmem:[%s7731_s1 + $0xf0] ss:$8 sps:$4 sm:$0xff]   ;;  %v5196_v36 = vld [vmem:[%s7731_s1 + $0xe4] ss:$8 sps:$4 sm:$0xff]   ;;  %v5200_v38 = vld [vmem:[%s7731_s1 + $0xe0] ss:$8 sps:$4 sm:$0xff]   ;;  %s7676_s28 = scalar_lea.vmem (%p6024_p4), %s7733_s3, %s5033_s25  }
  0x1d   : > { %v5195_v35 = vld [vmem:[%s7731_s1 + $0x1f0] ss:$8 sps:$4 sm:$0xff]   ;;  %s185_s6 = scalar_select %p184_p7, %s6119_s14, 12  ;;  %v5198_v37 = vld [vmem:[%s7731_s1 + $0x1e4] ss:$8 sps:$4 sm:$0xff]  }
  0x1e   : > { %3229 = vmatpush1.bf16.msra.mxu0 %v5164_v14  ;;  %v5201_v39 = vld [vmem:[%s7731_s1 + $0x1e0] ss:$8 sps:$4 sm:$0xff]   ;;  %v5202_v40 = vld [vmem:[%s7731_s1 + $0xd4] ss:$8 sps:$4 sm:$0xff]   ;;  %v5206_v42 = vld [vmem:[%s7731_s1 + $0xd0] ss:$8 sps:$4 sm:$0xff]  }
  0x1f   : > { %3302 = vmatpush1.bf16.msra.mxu1 %v5165_v15  ;;  %3230 = vmatprep.subr.bf16.mxu0 %v5166_v16  ;;  %s5052_s22 = smul.u32 100, %s185_s6  ;;  %v5204_v41 = vld [vmem:[%s7731_s1 + $0x1d4] ss:$8 sps:$4 sm:$0xff]   ;;  %v5207_v43 = vld [vmem:[%s7731_s1 + $0x1d0] ss:$8 sps:$4 sm:$0xff]   ;;  %p4252_p8 = scmp.lt.s32.totalorder (%p6024_p4), %s4251_s24, 8 }
  0x20   : > { %3303 = vmatprep.subr.bf16.mxu1 %v5168_v17  ;;  %v5208_v44 = vld [vmem:[%s7731_s1 + $0xc4] ss:$8 sps:$4 sm:$0xff]   ;;  %v5212_v46 = vld [vmem:[%s7731_s1 + $0xc0] ss:$8 sps:$4 sm:$0xff]   ;;  %v5214_v48 = vld [vmem:[%s7731_s1 + $0xb4] ss:$8 sps:$4 sm:$0xff]  }
  0x21   : > { %s6171_s6 = scalar_lea.vmem %s7730_s0, %s5052_s22  ;;  %v5210_v45 = vld [vmem:[%s7731_s1 + $0x1c4] ss:$8 sps:$4 sm:$0xff]   ;;  %v5213_v47 = vld [vmem:[%s7731_s1 + $0x1c0] ss:$8 sps:$4 sm:$0xff]   ;;  %v5216_v50 = vld [vmem:[%s7731_s1 + $0x1b4] ss:$8 sps:$4 sm:$0xff]  }
  0x22   : > { %3231 = vmatpush1.bf16.msra.mxu0 %v5170_v18  ;;  %v5240_v49 = vld [vmem:[%s6171_s6 + $0x4] ss:$100 sps:$4 sm:$0xff]   ;;  %v5243_v51 = vld [vmem:[%s6171_s6 + $0xc] ss:$100 sps:$4 sm:$0xff]   ;;  %v5226_v58 = vld [vmem:[%s7731_s1 + $0x94] ss:$8 sps:$4 sm:$0xff]  }
  0x23   : > { %3304 = vmatpush1.bf16.msra.mxu1 %v5171_v19  ;;  %3232 = vmatprep.subr.bf16.mxu0 %v5172_v20  ;;  %v5218_v52 = vld [vmem:[%s7731_s1 + $0xb0] ss:$8 sps:$4 sm:$0xff]   ;;  %v5220_v54 = vld [vmem:[%s7731_s1 + $0xa4] ss:$8 sps:$4 sm:$0xff]   ;;  %v5224_v56 = vld [vmem:[%s7731_s1 + $0xa0] ss:$8 sps:$4 sm:$0xff]  }
  0x24   : > { %3305 = vmatprep.subr.bf16.mxu1 %v5174_v21  ;;  %3254 = vmatprep.mubr.bf16.mxu0 %v5240_v49  ;;  %v5219_v53 = vld [vmem:[%s7731_s1 + $0x1b0] ss:$8 sps:$4 sm:$0xff]   ;;  %v5222_v55 = vld [vmem:[%s7731_s1 + $0x1a4] ss:$8 sps:$4 sm:$0xff]   ;;  %v5225_v57 = vld [vmem:[%s7731_s1 + $0x1a0] ss:$8 sps:$4 sm:$0xff]  }
  0x25   : > { %3327 = vmatprep.mubr.bf16.mxu1 %v5243_v51  ;;  %v5228_v59 = vld [vmem:[%s7731_s1 + $0x194] ss:$8 sps:$4 sm:$0xff]   ;;  %v5230_v60 = vld [vmem:[%s7731_s1 + $0x90] ss:$8 sps:$4 sm:$0xff]   ;;  %v5232_v62 = vld [vmem:[%s7731_s1 + $0x84] ss:$8 sps:$4 sm:$0xff]  }
  0x26   : > { %3233 = vmatpush1.bf16.msra.mxu0 %v5176_v22  ;;  %v5231_v61 = vld [vmem:[%s7731_s1 + $0x190] ss:$8 sps:$4 sm:$0xff]   ;;  %v5234_v63 = vld [vmem:[%s7731_s1 + $0x184] ss:$8 sps:$4 sm:$0xff]   ;;  %v5236_v0 = vld [vmem:[%s7731_s1 + $0x80] ss:$8 sps:$4 sm:$0xff]  }
  0x27   : > { %3306 = vmatpush1.bf16.msra.mxu1 %v5177_v23  ;;  %3234 = vmatprep.subr.bf16.mxu0 %v5178_v24  ;;  %v5237_v1 = vld [vmem:[%s7731_s1 + $0x180] ss:$8 sps:$4 sm:$0xff]   ;;  %v5246_v2 = vld [vmem:[%s7731_s1 + $0x274] ss:$8 sps:$4 sm:$0xff]   ;;  %v5244_v6 = vld [vmem:[%s7731_s1 + $0x270] ss:$8 sps:$4 sm:$0xff]  }
  0x28   : > { %3307 = vmatprep.subr.bf16.mxu1 %v5180_v25  ;;  %v5249_v3 = vld [vmem:[%s7731_s1 + $0x374] ss:$8 sps:$4 sm:$0xff]   ;;  %v5238_v4 = vld [vmem:[%s6171_s6] ss:$100 sps:$4 sm:$0xff]   ;;  %v5241_v5 = vld [vmem:[%s6171_s6 + $0x8] ss:$100 sps:$4 sm:$0xff]  }
  0x29   : > { %v5247_v7 = vld [vmem:[%s7731_s1 + $0x370] ss:$8 sps:$4 sm:$0xff]   ;;  %v5252_v8 = vld [vmem:[%s7731_s1 + $0x264] ss:$8 sps:$4 sm:$0xff]   ;;  %v5250_v10 = vld [vmem:[%s7731_s1 + $0x260] ss:$8 sps:$4 sm:$0xff]  }
  0x2a   : > { %3235 = vmatpush1.bf16.msra.mxu0 %v5182_v26  ;;  %v5255_v9 = vld [vmem:[%s7731_s1 + $0x364] ss:$8 sps:$4 sm:$0xff]   ;;  %v5253_v12 = vld [vmem:[%s7731_s1 + $0x360] ss:$8 sps:$4 sm:$0xff]   ;;  %v5258_v13 = vld [vmem:[%s7731_s1 + $0x254] ss:$8 sps:$4 sm:$0xff]  }
  0x2b   : > { %3308 = vmatpush1.bf16.msra.mxu1 %v5183_v27  ;;  %3236 = vmatprep.subr.bf16.mxu0 %v5184_v28  ;;  %v5292_v11 = vld [vmem:[%s6171_s6 + $0xcc] ss:$100 sps:$4 sm:$0xff]   ;;  %v5261_v14 = vld [vmem:[%s7731_s1 + $0x354] ss:$8 sps:$4 sm:$0xff]   ;;  %v5262_v22 = vld [vmem:[%s7731_s1 + $0x240] ss:$8 sps:$4 sm:$0xff]  }
  0x2c   : > { %3309 = vmatprep.subr.bf16.mxu1 %v5186_v29  ;;  %v5256_v15 = vld [vmem:[%s7731_s1 + $0x250] ss:$8 sps:$4 sm:$0xff]   ;;  %v5300_v17 = vld [vmem:[%s6171_s6 + $0xc8] ss:$100 sps:$4 sm:$0xff]   ;;  %v5270_v25 = vld [vmem:[%s7731_s1 + $0x234] ss:$8 sps:$4 sm:$0xff]  }
  0x2d   : > { %v5259_v16 = vld [vmem:[%s7731_s1 + $0x350] ss:$8 sps:$4 sm:$0xff]   ;;  %v5264_v20 = vld [vmem:[%s7731_s1 + $0x244] ss:$8 sps:$4 sm:$0xff]   ;;  %v5265_v24 = vld [vmem:[%s7731_s1 + $0x340] ss:$8 sps:$4 sm:$0xff]  }
  0x2e   : > { %3237 = vmatpush1.bf16.msra.mxu0 %v5188_v30  ;;  %v5301_v18 = vld [vmem:[%s6171_s6 + $0xd4] ss:$100 sps:$4 sm:$0xff]   ;;  %v5267_v21 = vld [vmem:[%s7731_s1 + $0x344] ss:$8 sps:$4 sm:$0xff]   ;;  %v5319_v30 = vld [vmem:[%s6171_s6 + $0x19c] ss:$100 sps:$4 sm:$0xff]  }
  0x2f   : > { %3310 = vmatpush1.bf16.msra.mxu1 %v5189_v31  ;;  %3238 = vmatprep.subr.bf16.mxu0 %v5190_v32  ;;  %v5303_v19 = vld [vmem:[%s6171_s6 + $0xd0] ss:$100 sps:$4 sm:$0xff]   ;;  %v5321_v31 = vld [vmem:[%s6171_s6 + $0x198] ss:$100 sps:$4 sm:$0xff]   ;;  %v5276_v32 = vld [vmem:[%s7731_s1 + $0x224] ss:$8 sps:$4 sm:$0xff]  }
  0x30   : > { %3311 = vmatprep.subr.bf16.mxu1 %v5192_v33  ;;  %v5310_v23 = vld [vmem:[%s6171_s6 + $0x194] ss:$100 sps:$4 sm:$0xff]   ;;  %v5279_v33 = vld [vmem:[%s7731_s1 + $0x324] ss:$8 sps:$4 sm:$0xff]  }
  0x31   : > { %v5273_v26 = vld [vmem:[%s7731_s1 + $0x334] ss:$8 sps:$4 sm:$0xff]   ;;  %v5268_v27 = vld [vmem:[%s7731_s1 + $0x230] ss:$8 sps:$4 sm:$0xff]  }
  0x32   : > { %3239 = vmatpush2.bf16.msra.mxu0 %v5194_v34  ;;  %v5271_v28 = vld [vmem:[%s7731_s1 + $0x330] ss:$8 sps:$4 sm:$0xff]   ;;  %v5274_v34 = vld [vmem:[%s7731_s1 + $0x220] ss:$8 sps:$4 sm:$0xff]   ;;  %v5299_v49 = vld [vmem:[%s7731_s1 + $0x3f4] ss:$8 sps:$4 sm:$0xff]  }
  0x33   : > { %3312 = vmatpush2.bf16.msra.mxu1 %v5195_v35  ;;  %3240 = vmatprep.subr.bf16.mxu0 %v5196_v36  ;;  %v5318_v29 = vld [vmem:[%s6171_s6 + $0x190] ss:$100 sps:$4 sm:$0xff]   ;;  %v5328_v35 = vld [vmem:[%s6171_s6 + $0x25c] ss:$100 sps:$4 sm:$0xff]  }
  0x34   : > { %3313 = vmatprep.subr.bf16.mxu1 %v5198_v37  ;;  %v5277_v36 = vld [vmem:[%s7731_s1 + $0x320] ss:$8 sps:$4 sm:$0xff]   ;;  %v5282_v37 = vld [vmem:[%s7731_s1 + $0x214] ss:$8 sps:$4 sm:$0xff]   ;;  %v5297_v51 = vld [vmem:[%s7731_s1 + $0x3f0] ss:$8 sps:$4 sm:$0xff]  }
  0x36   : > { %3241 = vmatpush2.bf16.msra.mxu0 %v5200_v38  ;;  %v5285_v38 = vld [vmem:[%s7731_s1 + $0x314] ss:$8 sps:$4 sm:$0xff]  }
  0x37   : > { %3314 = vmatpush2.bf16.msra.mxu1 %v5201_v39  ;;  %3242 = vmatprep.subr.bf16.mxu0 %v5202_v40  ;;  %v5280_v39 = vld [vmem:[%s7731_s1 + $0x210] ss:$8 sps:$4 sm:$0xff]  }
  0x38   : > { %3315 = vmatprep.subr.bf16.mxu1 %v5204_v41  ;;  %v5283_v40 = vld [vmem:[%s7731_s1 + $0x310] ss:$8 sps:$4 sm:$0xff]  }
  0x39   : > { %v5336_v41 = vld [vmem:[%s6171_s6 + $0x258] ss:$100 sps:$4 sm:$0xff]  }
  0x3a   : > { %3243 = vmatpush2.bf16.msra.mxu0 %v5206_v42  ;;  %v5337_v42 = vld [vmem:[%s6171_s6 + $0x264] ss:$100 sps:$4 sm:$0xff]  }
  0x3b   : > { %3316 = vmatpush2.bf16.msra.mxu1 %v5207_v43  ;;  %3244 = vmatprep.subr.bf16.mxu0 %v5208_v44  ;;  %v5339_v43 = vld [vmem:[%s6171_s6 + $0x260] ss:$100 sps:$4 sm:$0xff]  }
  0x3c   : > { %3317 = vmatprep.subr.bf16.mxu1 %v5210_v45  ;;  %v5288_v44 = vld [vmem:[%s7731_s1 + $0x204] ss:$8 sps:$4 sm:$0xff]  }
  0x3d   : > { %v5291_v45 = vld [vmem:[%s7731_s1 + $0x304] ss:$8 sps:$4 sm:$0xff]  }
  0x3e   : > { %3245 = vmatpush2.bf16.msra.mxu0 %v5212_v46  ;;  %v5286_v46 = vld [vmem:[%s7731_s1 + $0x200] ss:$8 sps:$4 sm:$0xff]  }
  0x3f   : > { %3318 = vmatpush2.bf16.msra.mxu1 %v5213_v47  ;;  %3246 = vmatprep.subr.bf16.mxu0 %v5214_v48  ;;  %v5289_v47 = vld [vmem:[%s7731_s1 + $0x300] ss:$8 sps:$4 sm:$0xff]   ;;  %v5296_v48 = vld [vmem:[%s7731_s1 + $0x2f4] ss:$8 sps:$4 sm:$0xff]  }
  0x40   : > { %3319 = vmatprep.subr.bf16.mxu1 %v5216_v50  ;;  %v5294_v50 = vld [vmem:[%s7731_s1 + $0x2f0] ss:$8 sps:$4 sm:$0xff]  }
  0x42   : > { %3247 = vmatpush2.bf16.msra.mxu0 %v5218_v52  ;;  %v5306_v52 = vld [vmem:[%s7731_s1 + $0x2e4] ss:$8 sps:$4 sm:$0xff]  }
  0x43   : > { %3320 = vmatpush2.bf16.msra.mxu1 %v5219_v53  ;;  %3248 = vmatprep.subr.bf16.mxu0 %v5220_v54  ;;  %v5309_v53 = vld [vmem:[%s7731_s1 + $0x3e4] ss:$8 sps:$4 sm:$0xff]   ;;  %v5360_v54 = vld [vmem:[%s6171_s6 + $0x14] ss:$100 sps:$4 sm:$0xff]  }
  0x44   : > { %3321 = vmatprep.subr.bf16.mxu1 %v5222_v55  ;;  %v5363_v55 = vld [vmem:[%s6171_s6 + $0x1c] ss:$100 sps:$4 sm:$0xff]  }
  0x46   : > { %3249 = vmatpush2.bf16.msra.mxu0 %v5224_v56  ;;  %v5304_v56 = vld [vmem:[%s7731_s1 + $0x2e0] ss:$8 sps:$4 sm:$0xff]  }
  0x47   : > { %3322 = vmatpush2.bf16.msra.mxu1 %v5225_v57  ;;  %3250 = vmatprep.subr.bf16.mxu0 %v5226_v58  ;;  %v5307_v57 = vld [vmem:[%s7731_s1 + $0x3e0] ss:$8 sps:$4 sm:$0xff]   ;;  %v5314_v58 = vld [vmem:[%s7731_s1 + $0x2d4] ss:$8 sps:$4 sm:$0xff]  }
  0x48   : > { %3323 = vmatprep.subr.bf16.mxu1 %v5228_v59  ;;  %v5317_v59 = vld [vmem:[%s7731_s1 + $0x3d4] ss:$8 sps:$4 sm:$0xff]  }
  0x4a   : > { %3251 = vmatpush2.bf16.msra.mxu0 %v5230_v60  ;;  %v5312_v60 = vld [vmem:[%s7731_s1 + $0x2d0] ss:$8 sps:$4 sm:$0xff]  }
  0x4b   : > { %3324 = vmatpush2.bf16.msra.mxu1 %v5231_v61  ;;  %3252 = vmatprep.subr.bf16.mxu0 %v5232_v62  ;;  %v5315_v61 = vld [vmem:[%s7731_s1 + $0x3d0] ss:$8 sps:$4 sm:$0xff]   ;;  %v5324_v62 = vld [vmem:[%s7731_s1 + $0x2c4] ss:$8 sps:$4 sm:$0xff]  }
  0x4c   : > { %3325 = vmatprep.subr.bf16.mxu1 %v5234_v63  ;;  %v5327_v63 = vld [vmem:[%s7731_s1 + $0x3c4] ss:$8 sps:$4 sm:$0xff]  }
  0x4e   : > { %3253 = vmatpush2.bf16.msra.mxu0 %v5236_v0  ;;  %v5322_v0 = vld [vmem:[%s7731_s1 + $0x2c0] ss:$8 sps:$4 sm:$0xff]  }
  0x4f   : > { %3326 = vmatpush2.bf16.msra.mxu1 %v5237_v1  ;;  %3368 = vmatprep.subr.bf16.mxu0 %v5246_v2  ;;  %v5325_v1 = vld [vmem:[%s7731_s1 + $0x3c0] ss:$8 sps:$4 sm:$0xff]   ;;  %v5332_v2 = vld [vmem:[%s7731_s1 + $0x2b4] ss:$8 sps:$4 sm:$0xff]  }
  0x50   : > { %3441 = vmatprep.subr.bf16.mxu1 %v5249_v3  ;;  %v5335_v3 = vld [vmem:[%s7731_s1 + $0x3b4] ss:$8 sps:$4 sm:$0xff]  }
  0x51   : > { %3255 = vmatmul.mubr.bf16.vlgmr.msra.gmra.mxu0 %v5238_v4  ;;  %v5330_v4 = vld [vmem:[%s7731_s1 + $0x2b0] ss:$8 sps:$4 sm:$0xff]  }
  0x52   : > { %3328 = vmatmul.mubr.bf16.vlgmr.msra.gmra.mxu1 %v5241_v5  ;;  %3369 = vmatpush1.bf16.msra.mxu0 %v5244_v6  ;;  %v5333_v5 = vld [vmem:[%s7731_s1 + $0x3b0] ss:$8 sps:$4 sm:$0xff]   ;;  %v5342_v6 = vld [vmem:[%s7731_s1 + $0x2a4] ss:$8 sps:$4 sm:$0xff]  }
  0x53   : > { %3442 = vmatpush1.bf16.msra.mxu1 %v5247_v7  ;;  %3370 = vmatprep.subr.bf16.mxu0 %v5252_v8  ;;  %v5345_v7 = vld [vmem:[%s7731_s1 + $0x3a4] ss:$8 sps:$4 sm:$0xff]   ;;  %v5340_v8 = vld [vmem:[%s7731_s1 + $0x2a0] ss:$8 sps:$4 sm:$0xff]  }
  0x54   : > { %3443 = vmatprep.subr.bf16.mxu1 %v5255_v9  ;;  %3264 = vmatprep.mubr.bf16.mxu0 %v5292_v11  ;;  %v5343_v9 = vld [vmem:[%s7731_s1 + $0x3a0] ss:$8 sps:$4 sm:$0xff]   ;;  %v5351_v11 = vld [vmem:[%s7731_s1 + $0x394] ss:$8 sps:$4 sm:$0xff]  }
  0x55   : > { %3337 = vmatprep.mubr.bf16.mxu1 %v5301_v18  ;;  %v5366_v18 = vld [vmem:[%s7731_s1 + $0x474] ss:$8 sps:$4 sm:$0xff]  }
  0x56   : > { %3371 = vmatpush1.bf16.msra.mxu0 %v5250_v10  ;;  %v5348_v10 = vld [vmem:[%s7731_s1 + $0x294] ss:$8 sps:$4 sm:$0xff]  }
  0x57   : > { %3444 = vmatpush1.bf16.msra.mxu1 %v5253_v12  ;;  %3372 = vmatprep.subr.bf16.mxu0 %v5258_v13  ;;  %v5346_v12 = vld [vmem:[%s7731_s1 + $0x290] ss:$8 sps:$4 sm:$0xff]  }
  0x58   : > { %3445 = vmatprep.subr.bf16.mxu1 %v5261_v14  ;;  %v5349_v13 = vld [vmem:[%s7731_s1 + $0x390] ss:$8 sps:$4 sm:$0xff]   ;;  %v5354_v14 = vld [vmem:[%s7731_s1 + $0x284] ss:$8 sps:$4 sm:$0xff]  }
  0x59   : > { %3265 = vmatmul.mubr.bf16.gmra.mxu0 %v5300_v17  ;;  %v5355_v17 = vld [vmem:[%s7731_s1 + $0x380] ss:$8 sps:$4 sm:$0xff]  }
  0x5a   : > { %3338 = vmatmul.mubr.bf16.gmra.mxu1 %v5303_v19  ;;  %3373 = vmatpush1.bf16.msra.mxu0 %v5256_v15  ;;  %v5357_v15 = vld [vmem:[%s7731_s1 + $0x384] ss:$8 sps:$4 sm:$0xff]   ;;  %v5369_v19 = vld [vmem:[%s7731_s1 + $0x574] ss:$8 sps:$4 sm:$0xff]  }
  0x5b   : > { %3446 = vmatpush1.bf16.msra.mxu1 %v5259_v16  ;;  %3374 = vmatprep.subr.bf16.mxu0 %v5264_v20  ;;  %v5352_v16 = vld [vmem:[%s7731_s1 + $0x280] ss:$8 sps:$4 sm:$0xff]   ;;  %v5358_v20 = vld [vmem:[%s6171_s6 + $0x10] ss:$100 sps:$4 sm:$0xff]  }
  0x5c   : > { %3447 = vmatprep.subr.bf16.mxu1 %v5267_v21  ;;  %3274 = vmatprep.mubr.bf16.mxu0 %v5310_v23  ;;  %v5361_v21 = vld [vmem:[%s6171_s6 + $0x18] ss:$100 sps:$4 sm:$0xff]  }
  0x5d   : > { %3347 = vmatprep.mubr.bf16.mxu1 %v5319_v30  ;;  %v5367_v23 = vld [vmem:[%s7731_s1 + $0x570] ss:$8 sps:$4 sm:$0xff]   ;;  %v5381_v30 = vld [vmem:[%s7731_s1 + $0x454] ss:$8 sps:$4 sm:$0xff]  }
  0x5e   : > { %3375 = vmatpush1.bf16.msra.mxu0 %v5262_v22  ;;  %v5364_v22 = vld [vmem:[%s7731_s1 + $0x470] ss:$8 sps:$4 sm:$0xff]  }
  0x5f   : > { %3448 = vmatpush1.bf16.msra.mxu1 %v5265_v24  ;;  %3376 = vmatprep.subr.bf16.mxu0 %v5270_v25  ;;  %v5372_v24 = vld [vmem:[%s7731_s1 + $0x464] ss:$8 sps:$4 sm:$0xff]  }
  0x60   : > { %3449 = vmatprep.subr.bf16.mxu1 %v5273_v26  ;;  %v5375_v25 = vld [vmem:[%s7731_s1 + $0x564] ss:$8 sps:$4 sm:$0xff]   ;;  %v5376_v26 = vld [vmem:[%s6171_s6 + $0xdc] ss:$100 sps:$4 sm:$0xff]  }
  0x61   : > { %3275 = vmatmul.mubr.bf16.gmra.mxu0 %v5318_v29  ;;  %v5373_v29 = vld [vmem:[%s7731_s1 + $0x560] ss:$8 sps:$4 sm:$0xff]  }
  0x62   : > { %3348 = vmatmul.mubr.bf16.gmra.mxu1 %v5321_v31  ;;  %3377 = vmatpush1.bf16.msra.mxu0 %v5268_v27  ;;  %v5385_v27 = vld [vmem:[%s6171_s6 + $0xe4] ss:$100 sps:$4 sm:$0xff]   ;;  %v5384_v31 = vld [vmem:[%s7731_s1 + $0x554] ss:$8 sps:$4 sm:$0xff]  }
  0x63   : > { %3450 = vmatpush1.bf16.msra.mxu1 %v5271_v28  ;;  %3378 = vmatprep.subr.bf16.mxu0 %v5276_v32  ;;  %v5370_v28 = vld [vmem:[%s7731_s1 + $0x460] ss:$8 sps:$4 sm:$0xff]   ;;  %v5378_v32 = vld [vmem:[%s6171_s6 + $0xd8] ss:$100 sps:$4 sm:$0xff]  }
  0x64   : > { %3451 = vmatprep.subr.bf16.mxu1 %v5279_v33  ;;  %3284 = vmatprep.mubr.bf16.mxu0 %v5328_v35  ;;  %v5379_v33 = vld [vmem:[%s7731_s1 + $0x450] ss:$8 sps:$4 sm:$0xff]   ;;  %v5387_v35 = vld [vmem:[%s6171_s6 + $0xe0] ss:$100 sps:$4 sm:$0xff]  }
  0x65   : > { %3357 = vmatprep.mubr.bf16.mxu1 %v5337_v42  ;;  %v5399_v42 = vld [vmem:[%s7731_s1 + $0x434] ss:$8 sps:$4 sm:$0xff]  }
  0x66   : > { %3379 = vmatpush1.bf16.msra.mxu0 %v5274_v34  ;;  %v5382_v34 = vld [vmem:[%s7731_s1 + $0x550] ss:$8 sps:$4 sm:$0xff]  }
  0x67   : > { %3452 = vmatpush1.bf16.msra.mxu1 %v5277_v36  ;;  %3380 = vmatprep.subr.bf16.mxu0 %v5282_v37  ;;  %v5390_v36 = vld [vmem:[%s7731_s1 + $0x444] ss:$8 sps:$4 sm:$0xff]  }
  0x68   : > { %3453 = vmatprep.subr.bf16.mxu1 %v5285_v38  ;;  %v5393_v37 = vld [vmem:[%s7731_s1 + $0x544] ss:$8 sps:$4 sm:$0xff]  }
  0x69   : > { %3285 = vmatmul.mubr.bf16.gmra.mxu0 %v5336_v41  ;;  %v5394_v38 = vld [vmem:[%s6171_s6 + $0x1a4] ss:$100 sps:$4 sm:$0xff]  }
  0x6a   : > { %3358 = vmatmul.mubr.bf16.gmra.mxu1 %v5339_v43  ;;  %3381 = vmatpush1.bf16.msra.mxu0 %v5280_v39  ;;  %v5403_v39 = vld [vmem:[%s6171_s6 + $0x1ac] ss:$100 sps:$4 sm:$0xff]   ;;  %v5391_v41 = vld [vmem:[%s7731_s1 + $0x540] ss:$8 sps:$4 sm:$0xff]   ;;  %v5402_v43 = vld [vmem:[%s7731_s1 + $0x534] ss:$8 sps:$4 sm:$0xff]  }
  0x6b   : > { %3454 = vmatpush1.bf16.msra.mxu1 %v5283_v40  ;;  %3382 = vmatprep.subr.bf16.mxu0 %v5288_v44  ;;  %v5388_v40 = vld [vmem:[%s7731_s1 + $0x440] ss:$8 sps:$4 sm:$0xff]  }
  0x6c   : > { %3455 = vmatprep.subr.bf16.mxu1 %v5291_v45  ;;  %3400 = vmatprep.mubr.bf16.mxu0 %v5360_v54  ;;  %v5396_v44 = vld [vmem:[%s6171_s6 + $0x1a0] ss:$100 sps:$4 sm:$0xff]   ;;  %v5397_v45 = vld [vmem:[%s7731_s1 + $0x430] ss:$8 sps:$4 sm:$0xff]   ;;  %v5417_v54 = vld [vmem:[%s7731_s1 + $0x414] ss:$8 sps:$4 sm:$0xff]  }
  0x6d   : > { %3473 = vmatprep.mubr.bf16.mxu1 %v5363_v55  ;;  %v5420_v55 = vld [vmem:[%s7731_s1 + $0x514] ss:$8 sps:$4 sm:$0xff]  }
  0x6e   : > { %3383 = vmatpush1.bf16.msra.mxu0 %v5286_v46  ;;  %v5400_v46 = vld [vmem:[%s7731_s1 + $0x530] ss:$8 sps:$4 sm:$0xff]  }
  0x6f   : > { %3456 = vmatpush1.bf16.msra.mxu1 %v5289_v47  ;;  %3384 = vmatprep.subr.bf16.mxu0 %v5296_v48  ;;  %v5405_v47 = vld [vmem:[%s6171_s6 + $0x1a8] ss:$100 sps:$4 sm:$0xff]  }
  0x70   : > { %3457 = vmatprep.subr.bf16.mxu1 %v5299_v49  ;;  %v5408_v48 = vld [vmem:[%s7731_s1 + $0x424] ss:$8 sps:$4 sm:$0xff]  }
  0x71   : > { %v5411_v49 = vld [vmem:[%s7731_s1 + $0x524] ss:$8 sps:$4 sm:$0xff]  }
  0x72   : > { %3385 = vmatpush2.bf16.msra.mxu0 %v5294_v50  ;;  %v5412_v50 = vld [vmem:[%s6171_s6 + $0x26c] ss:$100 sps:$4 sm:$0xff]  }
  0x73   : > { %3458 = vmatpush2.bf16.msra.mxu1 %v5297_v51  ;;  %3386 = vmatprep.subr.bf16.mxu0 %v5306_v52  ;;  %v5421_v51 = vld [vmem:[%s6171_s6 + $0x274] ss:$100 sps:$4 sm:$0xff]   ;;  %v5406_v52 = vld [vmem:[%s7731_s1 + $0x420] ss:$8 sps:$4 sm:$0xff]  }
  0x74   : > { %3459 = vmatprep.subr.bf16.mxu1 %v5309_v53  ;;  %v5409_v53 = vld [vmem:[%s7731_s1 + $0x520] ss:$8 sps:$4 sm:$0xff]  }
  0x76   : > { %3387 = vmatpush2.bf16.msra.mxu0 %v5304_v56  ;;  %v5414_v56 = vld [vmem:[%s6171_s6 + $0x268] ss:$100 sps:$4 sm:$0xff]  }
  0x77   : > { %3460 = vmatpush2.bf16.msra.mxu1 %v5307_v57  ;;  %3388 = vmatprep.subr.bf16.mxu0 %v5314_v58  ;;  %v5415_v57 = vld [vmem:[%s7731_s1 + $0x410] ss:$8 sps:$4 sm:$0xff]  }
  0x78   : > { %3461 = vmatprep.subr.bf16.mxu1 %v5317_v59  ;;  %v5418_v58 = vld [vmem:[%s7731_s1 + $0x510] ss:$8 sps:$4 sm:$0xff]  }
  0x79   : > { %v5423_v59 = vld [vmem:[%s6171_s6 + $0x270] ss:$100 sps:$4 sm:$0xff]  }
  0x7a   : > { %3389 = vmatpush2.bf16.msra.mxu0 %v5312_v60  ;;  %v5426_v60 = vld [vmem:[%s7731_s1 + $0x404] ss:$8 sps:$4 sm:$0xff]  }
  0x7b   : > { %3462 = vmatpush2.bf16.msra.mxu1 %v5315_v61  ;;  %3390 = vmatprep.subr.bf16.mxu0 %v5324_v62  ;;  %v5429_v61 = vld [vmem:[%s7731_s1 + $0x504] ss:$8 sps:$4 sm:$0xff]  }
  0x7c   : > { %3463 = vmatprep.subr.bf16.mxu1 %v5327_v63  ;;  %v5480_v62 = vld [vmem:[%s6171_s6 + $0x24] ss:$100 sps:$4 sm:$0xff]   ;;  %v5483_v63 = vld [vmem:[%s6171_s6 + $0x2c] ss:$100 sps:$4 sm:$0xff]  }
  0x7e   : > { %3391 = vmatpush2.bf16.msra.mxu0 %v5322_v0  ;;  %v5424_v0 = vld [vmem:[%s7731_s1 + $0x400] ss:$8 sps:$4 sm:$0xff]  }
  0x7f   : > { %3464 = vmatpush2.bf16.msra.mxu1 %v5325_v1  ;;  %3392 = vmatprep.subr.bf16.mxu0 %v5332_v2  ;;  %v5427_v1 = vld [vmem:[%s7731_s1 + $0x500] ss:$8 sps:$4 sm:$0xff]   ;;  %v5432_v2 = vld [vmem:[%s7731_s1 + $0x4f4] ss:$8 sps:$4 sm:$0xff]  }
  0x80   : > { %3465 = vmatprep.subr.bf16.mxu1 %v5335_v3  ;;  %v5435_v3 = vld [vmem:[%s7731_s1 + $0x5f4] ss:$8 sps:$4 sm:$0xff]  }
  0x82   : > { %3393 = vmatpush2.bf16.msra.mxu0 %v5330_v4  ;;  %v5430_v4 = vld [vmem:[%s7731_s1 + $0x4f0] ss:$8 sps:$4 sm:$0xff]  }
  0x83   : > { %3466 = vmatpush2.bf16.msra.mxu1 %v5333_v5  ;;  %3394 = vmatprep.subr.bf16.mxu0 %v5342_v6  ;;  %v5433_v5 = vld [vmem:[%s7731_s1 + $0x5f0] ss:$8 sps:$4 sm:$0xff]   ;;  %v5438_v6 = vld [vmem:[%s7731_s1 + $0x4e4] ss:$8 sps:$4 sm:$0xff]  }
  0x84   : > { %3467 = vmatprep.subr.bf16.mxu1 %v5345_v7  ;;  %v5441_v7 = vld [vmem:[%s7731_s1 + $0x5e4] ss:$8 sps:$4 sm:$0xff]  }
  0x86   : > { %3395 = vmatpush2.bf16.msra.mxu0 %v5340_v8  ;;  %v5436_v8 = vld [vmem:[%s7731_s1 + $0x4e0] ss:$8 sps:$4 sm:$0xff]  }
  0x87   : > { %3468 = vmatpush2.bf16.msra.mxu1 %v5343_v9  ;;  %3396 = vmatprep.subr.bf16.mxu0 %v5348_v10  ;;  %v5439_v9 = vld [vmem:[%s7731_s1 + $0x5e0] ss:$8 sps:$4 sm:$0xff]   ;;  %v5444_v10 = vld [vmem:[%s7731_s1 + $0x4d4] ss:$8 sps:$4 sm:$0xff]  }
  0x88   : > { %3469 = vmatprep.subr.bf16.mxu1 %v5351_v11  ;;  %v5447_v11 = vld [vmem:[%s7731_s1 + $0x5d4] ss:$8 sps:$4 sm:$0xff]  }
  0x8a   : > { %3397 = vmatpush2.bf16.msra.mxu0 %v5346_v12  ;;  %v5442_v12 = vld [vmem:[%s7731_s1 + $0x4d0] ss:$8 sps:$4 sm:$0xff]  }
  0x8b   : > { %3470 = vmatpush2.bf16.msra.mxu1 %v5349_v13  ;;  %3398 = vmatprep.subr.bf16.mxu0 %v5354_v14  ;;  %v5445_v13 = vld [vmem:[%s7731_s1 + $0x5d0] ss:$8 sps:$4 sm:$0xff]   ;;  %v5450_v14 = vld [vmem:[%s7731_s1 + $0x4c4] ss:$8 sps:$4 sm:$0xff]  }
  0x8c   : > { %3471 = vmatprep.subr.bf16.mxu1 %v5357_v15  ;;  %v5453_v15 = vld [vmem:[%s7731_s1 + $0x5c4] ss:$8 sps:$4 sm:$0xff]  }
  0x8e   : > { %3399 = vmatpush2.bf16.msra.mxu0 %v5352_v16  ;;  %v5448_v16 = vld [vmem:[%s7731_s1 + $0x4c0] ss:$8 sps:$4 sm:$0xff]  }
  0x8f   : > { %3472 = vmatpush2.bf16.msra.mxu1 %v5355_v17  ;;  %3514 = vmatprep.subr.bf16.mxu0 %v5366_v18  ;;  %v5451_v17 = vld [vmem:[%s7731_s1 + $0x5c0] ss:$8 sps:$4 sm:$0xff]   ;;  %v5456_v18 = vld [vmem:[%s7731_s1 + $0x4b4] ss:$8 sps:$4 sm:$0xff]  }
  0x90   : > { %3587 = vmatprep.subr.bf16.mxu1 %v5369_v19  ;;  %v5459_v19 = vld [vmem:[%s7731_s1 + $0x5b4] ss:$8 sps:$4 sm:$0xff]  }
  0x91   : > { %3401 = vmatmul.mubr.bf16.vlgmr.msra.gmra.mxu0 %v5358_v20  ;;  %v5454_v20 = vld [vmem:[%s7731_s1 + $0x4b0] ss:$8 sps:$4 sm:$0xff]  }
  0x92   : > { %3474 = vmatmul.mubr.bf16.vlgmr.msra.gmra.mxu1 %v5361_v21  ;;  %3515 = vmatpush1.bf16.msra.mxu0 %v5364_v22  ;;  %v5457_v21 = vld [vmem:[%s7731_s1 + $0x5b0] ss:$8 sps:$4 sm:$0xff]   ;;  %v5462_v22 = vld [vmem:[%s7731_s1 + $0x4a4] ss:$8 sps:$4 sm:$0xff]  }
  0x93   : > { %3588 = vmatpush1.bf16.msra.mxu1 %v5367_v23  ;;  %3516 = vmatprep.subr.bf16.mxu0 %v5372_v24  ;;  %v5465_v23 = vld [vmem:[%s7731_s1 + $0x5a4] ss:$8 sps:$4 sm:$0xff]   ;;  %v5460_v24 = vld [vmem:[%s7731_s1 + $0x4a0] ss:$8 sps:$4 sm:$0xff]  }
  0x94   : > { %3589 = vmatprep.subr.bf16.mxu1 %v5375_v25  ;;  %3410 = vmatprep.mubr.bf16.mxu0 %v5376_v26  ;;  %v5463_v25 = vld [vmem:[%s7731_s1 + $0x5a0] ss:$8 sps:$4 sm:$0xff]   ;;  %v5468_v26 = vld [vmem:[%s7731_s1 + $0x494] ss:$8 sps:$4 sm:$0xff]  }
  0x95   : > { %3483 = vmatprep.mubr.bf16.mxu1 %v5385_v27  ;;  %v5471_v27 = vld [vmem:[%s7731_s1 + $0x594] ss:$8 sps:$4 sm:$0xff]  }
  0x96   : > { %3517 = vmatpush1.bf16.msra.mxu0 %v5370_v28  ;;  %v5466_v28 = vld [vmem:[%s7731_s1 + $0x490] ss:$8 sps:$4 sm:$0xff]  }
  0x97   : > { %3590 = vmatpush1.bf16.msra.mxu1 %v5373_v29  ;;  %3518 = vmatprep.subr.bf16.mxu0 %v5381_v30  ;;  %v5469_v29 = vld [vmem:[%s7731_s1 + $0x590] ss:$8 sps:$4 sm:$0xff]   ;;  %v5474_v30 = vld [vmem:[%s7731_s1 + $0x484] ss:$8 sps:$4 sm:$0xff]  }
  0x98   : > { %3591 = vmatprep.subr.bf16.mxu1 %v5384_v31  ;;  %v5477_v31 = vld [vmem:[%s7731_s1 + $0x584] ss:$8 sps:$4 sm:$0xff]  }
  0x99   : > { %3411 = vmatmul.mubr.bf16.gmra.mxu0 %v5378_v32  ;;  %v5472_v32 = vld [vmem:[%s7731_s1 + $0x480] ss:$8 sps:$4 sm:$0xff]  }
  0x9a   : > { %3484 = vmatmul.mubr.bf16.gmra.mxu1 %v5387_v35  ;;  %3519 = vmatpush1.bf16.msra.mxu0 %v5379_v33  ;;  %v5475_v33 = vld [vmem:[%s7731_s1 + $0x580] ss:$8 sps:$4 sm:$0xff]   ;;  %v5489_v35 = vld [vmem:[%s7731_s1 + $0x774] ss:$8 sps:$4 sm:$0xff]  }
  0x9b   : > { %3592 = vmatpush1.bf16.msra.mxu1 %v5382_v34  ;;  %3520 = vmatprep.subr.bf16.mxu0 %v5390_v36  ;;  %v5486_v34 = vld [vmem:[%s7731_s1 + $0x674] ss:$8 sps:$4 sm:$0xff]   ;;  %v5478_v36 = vld [vmem:[%s6171_s6 + $0x20] ss:$100 sps:$4 sm:$0xff]  }
  0x9c   : > { %3593 = vmatprep.subr.bf16.mxu1 %v5393_v37  ;;  %3420 = vmatprep.mubr.bf16.mxu0 %v5394_v38  ;;  %v5481_v37 = vld [vmem:[%s6171_s6 + $0x28] ss:$100 sps:$4 sm:$0xff]   ;;  %v5484_v38 = vld [vmem:[%s7731_s1 + $0x670] ss:$8 sps:$4 sm:$0xff]  }
  0x9d   : > { %3493 = vmatprep.mubr.bf16.mxu1 %v5403_v39  ;;  %v5487_v39 = vld [vmem:[%s7731_s1 + $0x770] ss:$8 sps:$4 sm:$0xff]  }
  0x9e   : > { %3521 = vmatpush1.bf16.msra.mxu0 %v5388_v40  ;;  %v5492_v40 = vld [vmem:[%s7731_s1 + $0x664] ss:$8 sps:$4 sm:$0xff]  }
  0x9f   : > { %3594 = vmatpush1.bf16.msra.mxu1 %v5391_v41  ;;  %3522 = vmatprep.subr.bf16.mxu0 %v5399_v42  ;;  %v5495_v41 = vld [vmem:[%s7731_s1 + $0x764] ss:$8 sps:$4 sm:$0xff]  }
  0xa0   : > { %3595 = vmatprep.subr.bf16.mxu1 %v5402_v43  ;;  %v5496_v42 = vld [vmem:[%s6171_s6 + $0xec] ss:$100 sps:$4 sm:$0xff]   ;;  %v5505_v43 = vld [vmem:[%s6171_s6 + $0xf4] ss:$100 sps:$4 sm:$0xff]  }
  0xa1   : > { %3421 = vmatmul.mubr.bf16.gmra.mxu0 %v5396_v44  ;;  %v5490_v44 = vld [vmem:[%s7731_s1 + $0x660] ss:$8 sps:$4 sm:$0xff]  }
  0xa2   : > { %3494 = vmatmul.mubr.bf16.gmra.mxu1 %v5405_v47  ;;  %3523 = vmatpush1.bf16.msra.mxu0 %v5397_v45  ;;  %v5493_v45 = vld [vmem:[%s7731_s1 + $0x760] ss:$8 sps:$4 sm:$0xff]   ;;  %v5504_v47 = vld [vmem:[%s7731_s1 + $0x754] ss:$8 sps:$4 sm:$0xff]  }
  0xa3   : > { %3596 = vmatpush1.bf16.msra.mxu1 %v5400_v46  ;;  %3524 = vmatprep.subr.bf16.mxu0 %v5408_v48  ;;  %v5501_v46 = vld [vmem:[%s7731_s1 + $0x654] ss:$8 sps:$4 sm:$0xff]   ;;  %v5498_v48 = vld [vmem:[%s6171_s6 + $0xe8] ss:$100 sps:$4 sm:$0xff]  }
  0xa4   : > { %3597 = vmatprep.subr.bf16.mxu1 %v5411_v49  ;;  %3430 = vmatprep.mubr.bf16.mxu0 %v5412_v50  ;;  %v5499_v49 = vld [vmem:[%s7731_s1 + $0x650] ss:$8 sps:$4 sm:$0xff]  }
  0xa5   : > { %3503 = vmatprep.mubr.bf16.mxu1 %v5421_v51  ;;  %v5502_v50 = vld [vmem:[%s7731_s1 + $0x750] ss:$8 sps:$4 sm:$0xff]  }
  0xa6   : > { %3525 = vmatpush1.bf16.msra.mxu0 %v5406_v52  ;;  %v5507_v51 = vld [vmem:[%s6171_s6 + $0xf0] ss:$100 sps:$4 sm:$0xff]   ;;  %v5510_v52 = vld [vmem:[%s7731_s1 + $0x644] ss:$8 sps:$4 sm:$0xff]  }
  0xa7   : > { %3598 = vmatpush1.bf16.msra.mxu1 %v5409_v53  ;;  %3526 = vmatprep.subr.bf16.mxu0 %v5417_v54  ;;  %v5513_v53 = vld [vmem:[%s7731_s1 + $0x744] ss:$8 sps:$4 sm:$0xff]   ;;  %v5514_v54 = vld [vmem:[%s6171_s6 + $0x1b4] ss:$100 sps:$4 sm:$0xff]  }
  0xa8   : > { %3599 = vmatprep.subr.bf16.mxu1 %v5420_v55  ;;  %v5523_v55 = vld [vmem:[%s6171_s6 + $0x1bc] ss:$100 sps:$4 sm:$0xff]  }
  0xa9   : > { %3431 = vmatmul.mubr.bf16.gmra.mxu0 %v5414_v56  ;;  %v5508_v56 = vld [vmem:[%s7731_s1 + $0x640] ss:$8 sps:$4 sm:$0xff]  }
  0xaa   : > { %3504 = vmatmul.mubr.bf16.gmra.mxu1 %v5423_v59  ;;  %3527 = vmatpush1.bf16.msra.mxu0 %v5415_v57  ;;  %v5511_v57 = vld [vmem:[%s7731_s1 + $0x740] ss:$8 sps:$4 sm:$0xff]   ;;  %v5522_v59 = vld [vmem:[%s7731_s1 + $0x734] ss:$8 sps:$4 sm:$0xff]  }
  0xab   : > { %3600 = vmatpush1.bf16.msra.mxu1 %v5418_v58  ;;  %3528 = vmatprep.subr.bf16.mxu0 %v5426_v60  ;;  %v5519_v58 = vld [vmem:[%s7731_s1 + $0x634] ss:$8 sps:$4 sm:$0xff]  }
  0xac   : > { %3601 = vmatprep.subr.bf16.mxu1 %v5429_v61  ;;  %3546 = vmatprep.mubr.bf16.mxu0 %v5480_v62  ;;  %v5516_v60 = vld [vmem:[%s6171_s6 + $0x1b0] ss:$100 sps:$4 sm:$0xff]   ;;  %v5525_v62 = vld [vmem:[%s6171_s6 + $0x1b8] ss:$100 sps:$4 sm:$0xff]  }
  0xad   : > { %3619 = vmatprep.mubr.bf16.mxu1 %v5483_v63  ;;  %v5517_v61 = vld [vmem:[%s7731_s1 + $0x630] ss:$8 sps:$4 sm:$0xff]  }
  0xae   : > { %3529 = vmatpush1.bf16.msra.mxu0 %v5424_v0  ;;  %v5520_v63 = vld [vmem:[%s7731_s1 + $0x730] ss:$8 sps:$4 sm:$0xff]   ;;  %v5528_v0 = vld [vmem:[%s7731_s1 + $0x624] ss:$8 sps:$4 sm:$0xff]  }
  0xaf   : > { %3602 = vmatpush1.bf16.msra.mxu1 %v5427_v1  ;;  %3530 = vmatprep.subr.bf16.mxu0 %v5432_v2  ;;  %v5531_v1 = vld [vmem:[%s7731_s1 + $0x724] ss:$8 sps:$4 sm:$0xff]   ;;  %v5532_v2 = vld [vmem:[%s6171_s6 + $0x27c] ss:$100 sps:$4 sm:$0xff]  }
  0xb0   : > { %3603 = vmatprep.subr.bf16.mxu1 %v5435_v3  ;;  %v5541_v3 = vld [vmem:[%s6171_s6 + $0x284] ss:$100 sps:$4 sm:$0xff]  }
  0xb2   : > { %3531 = vmatpush2.bf16.msra.mxu0 %v5430_v4  ;;  %v5526_v4 = vld [vmem:[%s7731_s1 + $0x620] ss:$8 sps:$4 sm:$0xff]  }
  0xb3   : > { %3604 = vmatpush2.bf16.msra.mxu1 %v5433_v5  ;;  %3532 = vmatprep.subr.bf16.mxu0 %v5438_v6  ;;  %v5529_v5 = vld [vmem:[%s7731_s1 + $0x720] ss:$8 sps:$4 sm:$0xff]   ;;  %v5537_v6 = vld [vmem:[%s7731_s1 + $0x614] ss:$8 sps:$4 sm:$0xff]  }
  0xb4   : > { %3605 = vmatprep.subr.bf16.mxu1 %v5441_v7  ;;  %v5540_v7 = vld [vmem:[%s7731_s1 + $0x714] ss:$8 sps:$4 sm:$0xff]  }
  0xb6   : > { %3533 = vmatpush2.bf16.msra.mxu0 %v5436_v8  ;;  %v5534_v8 = vld [vmem:[%s6171_s6 + $0x278] ss:$100 sps:$4 sm:$0xff]  }
  0xb7   : > { %3606 = vmatpush2.bf16.msra.mxu1 %v5439_v9  ;;  %3534 = vmatprep.subr.bf16.mxu0 %v5444_v10  ;;  %v5535_v9 = vld [vmem:[%s7731_s1 + $0x610] ss:$8 sps:$4 sm:$0xff]   ;;  %v5543_v10 = vld [vmem:[%s6171_s6 + $0x280] ss:$100 sps:$4 sm:$0xff]  }
  0xb8   : > { %3607 = vmatprep.subr.bf16.mxu1 %v5447_v11  ;;  %v5538_v11 = vld [vmem:[%s7731_s1 + $0x710] ss:$8 sps:$4 sm:$0xff]  }
  0xba   : > { %3535 = vmatpush2.bf16.msra.mxu0 %v5442_v12  ;;  %v5546_v12 = vld [vmem:[%s7731_s1 + $0x604] ss:$8 sps:$4 sm:$0xff]  }
  0xbb   : > { %3608 = vmatpush2.bf16.msra.mxu1 %v5445_v13  ;;  %3536 = vmatprep.subr.bf16.mxu0 %v5450_v14  ;;  %v5549_v13 = vld [vmem:[%s7731_s1 + $0x704] ss:$8 sps:$4 sm:$0xff]   ;;  %v5600_v14 = vld [vmem:[%s6171_s6 + $0x34] ss:$100 sps:$4 sm:$0xff]  }
  0xbc   : > { %3609 = vmatprep.subr.bf16.mxu1 %v5453_v15  ;;  %v5603_v15 = vld [vmem:[%s6171_s6 + $0x3c] ss:$100 sps:$4 sm:$0xff]  }
  0xbe   : > { %3537 = vmatpush2.bf16.msra.mxu0 %v5448_v16  ;;  %v5544_v16 = vld [vmem:[%s7731_s1 + $0x600] ss:$8 sps:$4 sm:$0xff]  }
  0xbf   : > { %3610 = vmatpush2.bf16.msra.mxu1 %v5451_v17  ;;  %3538 = vmatprep.subr.bf16.mxu0 %v5456_v18  ;;  %v5547_v17 = vld [vmem:[%s7731_s1 + $0x700] ss:$8 sps:$4 sm:$0xff]   ;;  %v5552_v18 = vld [vmem:[%s7731_s1 + $0x6f4] ss:$8 sps:$4 sm:$0xff]  }
  0xc0   : > { %3611 = vmatprep.subr.bf16.mxu1 %v5459_v19  ;;  %v5555_v19 = vld [vmem:[%s7731_s1 + $0x7f4] ss:$8 sps:$4 sm:$0xff]  }
  0xc2   : > { %3539 = vmatpush2.bf16.msra.mxu0 %v5454_v20  ;;  %v5550_v20 = vld [vmem:[%s7731_s1 + $0x6f0] ss:$8 sps:$4 sm:$0xff]  }
  0xc3   : > { %3612 = vmatpush2.bf16.msra.mxu1 %v5457_v21  ;;  %3540 = vmatprep.subr.bf16.mxu0 %v5462_v22  ;;  %v5553_v21 = vld [vmem:[%s7731_s1 + $0x7f0] ss:$8 sps:$4 sm:$0xff]   ;;  %v5558_v22 = vld [vmem:[%s7731_s1 + $0x6e4] ss:$8 sps:$4 sm:$0xff]  }
  0xc4   : > { %3613 = vmatprep.subr.bf16.mxu1 %v5465_v23  ;;  %v5561_v23 = vld [vmem:[%s7731_s1 + $0x7e4] ss:$8 sps:$4 sm:$0xff]  }
  0xc6   : > { %3541 = vmatpush2.bf16.msra.mxu0 %v5460_v24  ;;  %v5556_v24 = vld [vmem:[%s7731_s1 + $0x6e0] ss:$8 sps:$4 sm:$0xff]  }
  0xc7   : > { %3614 = vmatpush2.bf16.msra.mxu1 %v5463_v25  ;;  %3542 = vmatprep.subr.bf16.mxu0 %v5468_v26  ;;  %v5559_v25 = vld [vmem:[%s7731_s1 + $0x7e0] ss:$8 sps:$4 sm:$0xff]   ;;  %v5564_v26 = vld [vmem:[%s7731_s1 + $0x6d4] ss:$8 sps:$4 sm:$0xff]  }
  0xc8   : > { %3615 = vmatprep.subr.bf16.mxu1 %v5471_v27  ;;  %v5567_v27 = vld [vmem:[%s7731_s1 + $0x7d4] ss:$8 sps:$4 sm:$0xff]  }
  0xca   : > { %3543 = vmatpush2.bf16.msra.mxu0 %v5466_v28  ;;  %v5562_v28 = vld [vmem:[%s7731_s1 + $0x6d0] ss:$8 sps:$4 sm:$0xff]  }
  0xcb   : > { %3616 = vmatpush2.bf16.msra.mxu1 %v5469_v29  ;;  %3544 = vmatprep.subr.bf16.mxu0 %v5474_v30  ;;  %v5565_v29 = vld [vmem:[%s7731_s1 + $0x7d0] ss:$8 sps:$4 sm:$0xff]   ;;  %v5570_v30 = vld [vmem:[%s7731_s1 + $0x6c4] ss:$8 sps:$4 sm:$0xff]  }
  0xcc   : > { %3617 = vmatprep.subr.bf16.mxu1 %v5477_v31  ;;  %v5573_v31 = vld [vmem:[%s7731_s1 + $0x7c4] ss:$8 sps:$4 sm:$0xff]  }
  0xce   : > { %3545 = vmatpush2.bf16.msra.mxu0 %v5472_v32  ;;  %v5568_v32 = vld [vmem:[%s7731_s1 + $0x6c0] ss:$8 sps:$4 sm:$0xff]  }
  0xcf   : > { %3618 = vmatpush2.bf16.msra.mxu1 %v5475_v33  ;;  %3660 = vmatprep.subr.bf16.mxu0 %v5486_v34  ;;  %v5571_v33 = vld [vmem:[%s7731_s1 + $0x7c0] ss:$8 sps:$4 sm:$0xff]   ;;  %v5576_v34 = vld [vmem:[%s7731_s1 + $0x6b4] ss:$8 sps:$4 sm:$0xff]  }
  0xd0   : > { %3733 = vmatprep.subr.bf16.mxu1 %v5489_v35  ;;  %v5579_v35 = vld [vmem:[%s7731_s1 + $0x7b4] ss:$8 sps:$4 sm:$0xff]  }
  0xd1   : > { %3547 = vmatmul.mubr.bf16.vlgmr.msra.gmra.mxu0 %v5478_v36  ;;  %v5574_v36 = vld [vmem:[%s7731_s1 + $0x6b0] ss:$8 sps:$4 sm:$0xff]  }
  0xd2   : > { %3620 = vmatmul.mubr.bf16.vlgmr.msra.gmra.mxu1 %v5481_v37  ;;  %3661 = vmatpush1.bf16.msra.mxu0 %v5484_v38  ;;  %v5577_v37 = vld [vmem:[%s7731_s1 + $0x7b0] ss:$8 sps:$4 sm:$0xff]   ;;  %v5582_v38 = vld [vmem:[%s7731_s1 + $0x6a4] ss:$8 sps:$4 sm:$0xff]  }
  0xd3   : > { %3734 = vmatpush1.bf16.msra.mxu1 %v5487_v39  ;;  %3662 = vmatprep.subr.bf16.mxu0 %v5492_v40  ;;  %v5585_v39 = vld [vmem:[%s7731_s1 + $0x7a4] ss:$8 sps:$4 sm:$0xff]   ;;  %v5580_v40 = vld [vmem:[%s7731_s1 + $0x6a0] ss:$8 sps:$4 sm:$0xff]  }
  0xd4   : > { %3735 = vmatprep.subr.bf16.mxu1 %v5495_v41  ;;  %3556 = vmatprep.mubr.bf16.mxu0 %v5496_v42  ;;  %v5583_v41 = vld [vmem:[%s7731_s1 + $0x7a0] ss:$8 sps:$4 sm:$0xff]   ;;  %v708_v42 = vlaneseq }
  0xd5   : > { %3629 = vmatprep.mubr.bf16.mxu1 %v5505_v43  ;;  %v5588_v43 = vld [vmem:[%s7731_s1 + $0x694] ss:$8 sps:$4 sm:$0xff]  }
  0xd6   : > { %3663 = vmatpush1.bf16.msra.mxu0 %v5490_v44  ;;  %v5591_v44 = vld [vmem:[%s7731_s1 + $0x794] ss:$8 sps:$4 sm:$0xff]  }
  0xd7   : > { %3736 = vmatpush1.bf16.msra.mxu1 %v5493_v45  ;;  %3664 = vmatprep.subr.bf16.mxu0 %v5501_v46  ;;  %v5586_v45 = vld [vmem:[%s7731_s1 + $0x690] ss:$8 sps:$4 sm:$0xff]  }
  0xd8   : > { %3737 = vmatprep.subr.bf16.mxu1 %v5504_v47  ;;  %v5589_v46 = vld [vmem:[%s7731_s1 + $0x790] ss:$8 sps:$4 sm:$0xff]   ;;  %v709_v47 = vshrl.u32 %v708_v42, 7 }
  0xd9   : > { %3557 = vmatmul.mubr.bf16.gmra.mxu0 %v5498_v48  ;;  %v5594_v48 = vld [vmem:[%s7731_s1 + $0x684] ss:$8 sps:$4 sm:$0xff]  }
  0xda   : > { %3630 = vmatmul.mubr.bf16.gmra.mxu1 %v5507_v51  ;;  %3665 = vmatpush1.bf16.msra.mxu0 %v5499_v49  ;;  %v5597_v49 = vld [vmem:[%s7731_s1 + $0x784] ss:$8 sps:$4 sm:$0xff]   ;;  %v5595_v51 = vld [vmem:[%s7731_s1 + $0x780] ss:$8 sps:$4 sm:$0xff]  }
  0xdb   : > { %3738 = vmatpush1.bf16.msra.mxu1 %v5502_v50  ;;  %3666 = vmatprep.subr.bf16.mxu0 %v5510_v52  ;;  %v5592_v50 = vld [vmem:[%s7731_s1 + $0x680] ss:$8 sps:$4 sm:$0xff]  }
  0xdc   : > { %3739 = vmatprep.subr.bf16.mxu1 %v5513_v53  ;;  %3566 = vmatprep.mubr.bf16.mxu0 %v5514_v54  ;;  %v706_v52 = vld [vmem:[%s7732_s2] sm:$0x3]  ;;  %v710_v53 = vsub.s32 0, %v709_v47  ;;  %v5606_v54 = vld [vmem:[%s7731_s1 + $0x874] ss:$8 sps:$4 sm:$0xff]  }
  0xdd   : > { %3639 = vmatprep.mubr.bf16.mxu1 %v5523_v55  ;;  %v5609_v55 = vld [vmem:[%s7731_s1 + $0x974] ss:$8 sps:$4 sm:$0xff]  }
  0xde   : > { %3667 = vmatpush1.bf16.msra.mxu0 %v5508_v56  ;;  %v5598_v56 = vld [vmem:[%s6171_s6 + $0x30] ss:$100 sps:$4 sm:$0xff]  }
  0xdf   : > { %3740 = vmatpush1.bf16.msra.mxu1 %v5511_v57  ;;  %3668 = vmatprep.subr.bf16.mxu0 %v5519_v58  ;;  %v5601_v57 = vld [vmem:[%s6171_s6 + $0x38] ss:$100 sps:$4 sm:$0xff]   ;;  %v714_v58 = vsub.s32 1, %v709_v47 }
  0xe0   : > { %3741 = vmatprep.subr.bf16.mxu1 %v5522_v59  ;;  %v5604_v59 = vld [vmem:[%s7731_s1 + $0x870] ss:$8 sps:$4 sm:$0xff]  }
  0xe1   : > { %3567 = vmatmul.mubr.bf16.gmra.mxu0 %v5516_v60  ;;  %v6870_v60 = vrot.slane %v706_v52, %v710_v53  ;;  %v5640_v47 = vld [vmem:[%s7731_s1 + $0x930] ss:$8 sps:$4 sm:$0xff]  }
  0xe2   : > { %3640 = vmatmul.mubr.bf16.gmra.mxu1 %v5525_v62  ;;  %3669 = vmatpush1.bf16.msra.mxu0 %v5517_v61  ;;  %v5607_v61 = vld [vmem:[%s7731_s1 + $0x970] ss:$8 sps:$4 sm:$0xff]   ;;  %v5612_v62 = vld [vmem:[%s7731_s1 + $0x864] ss:$8 sps:$4 sm:$0xff]  }
  0xe3   : > { %3742 = vmatpush1.bf16.msra.mxu1 %v5520_v63  ;;  %3670 = vmatprep.subr.bf16.mxu0 %v5528_v0  ;;  %v5615_v63 = vld [vmem:[%s7731_s1 + $0x964] ss:$8 sps:$4 sm:$0xff]   ;;  %v6881_v0 = vrot.slane %v706_v52, %v714_v58  ;;  %v5646_v58 = vld [vmem:[%s7731_s1 + $0x820] ss:$8 sps:$4 sm:$0xff]  }
  0xe4   : > { %3743 = vmatprep.subr.bf16.mxu1 %v5531_v1  ;;  %3576 = vmatprep.mubr.bf16.mxu0 %v5532_v2  ;;  %v5616_v1 = vld [vmem:[%s6171_s6 + $0xfc] ss:$100 sps:$4 sm:$0xff]   ;;  %v5625_v2 = vld [vmem:[%s6171_s6 + $0x104] ss:$100 sps:$4 sm:$0xff]  }
  0xe5   : > { %3649 = vmatprep.mubr.bf16.mxu1 %v5541_v3 }
  0xe6   : > { %3671 = vmatpush1.bf16.msra.mxu0 %v5526_v4 }
  0xe7   : > { %3744 = vmatpush1.bf16.msra.mxu1 %v5529_v5  ;;  %3672 = vmatprep.subr.bf16.mxu0 %v5537_v6  ;;  %v5610_v5 = vld [vmem:[%s7731_s1 + $0x860] ss:$8 sps:$4 sm:$0xff]  }
  0xe8   : > { %3745 = vmatprep.subr.bf16.mxu1 %v5540_v7  ;;  %v5613_v7 = vld [vmem:[%s7731_s1 + $0x960] ss:$8 sps:$4 sm:$0xff]  }
  0xe9   : > { %3577 = vmatmul.mubr.bf16.gmra.mxu0 %v5534_v8 }
  0xea   : > { %3650 = vmatmul.mubr.bf16.gmra.mxu1 %v5543_v10  ;;  %3673 = vmatpush1.bf16.msra.mxu0 %v5535_v9  ;;  %v5621_v10 = vld [vmem:[%s7731_s1 + $0x854] ss:$8 sps:$4 sm:$0xff]  }
  0xeb   : > { %3746 = vmatpush1.bf16.msra.mxu1 %v5538_v11  ;;  %3674 = vmatprep.subr.bf16.mxu0 %v5546_v12  ;;  %v5624_v11 = vld [vmem:[%s7731_s1 + $0x954] ss:$8 sps:$4 sm:$0xff]  }
  0xec   : > { %3747 = vmatprep.subr.bf16.mxu1 %v5549_v13  ;;  %3692 = vmatprep.mubr.bf16.mxu0 %v5600_v14  ;;  %v5618_v14 = vld [vmem:[%s6171_s6 + $0xf8] ss:$100 sps:$4 sm:$0xff]  }
  0xed   : > { %3765 = vmatprep.mubr.bf16.mxu1 %v5603_v15  ;;  %v5619_v15 = vld [vmem:[%s7731_s1 + $0x850] ss:$8 sps:$4 sm:$0xff]  }
  0xee   : > { %3675 = vmatpush1.bf16.msra.mxu0 %v5544_v16 }
  0xef   : > { %3748 = vmatpush1.bf16.msra.mxu1 %v5547_v17  ;;  %3676 = vmatprep.subr.bf16.mxu0 %v5552_v18  ;;  %v5627_v18 = vld [vmem:[%s6171_s6 + $0x100] ss:$100 sps:$4 sm:$0xff]  }
  0xf0   : > { %3749 = vmatprep.subr.bf16.mxu1 %v5555_v19 }
  0xf2   : > { %3677 = vmatpush2.bf16.msra.mxu0 %v5550_v20 }
  0xf3   : > { %3750 = vmatpush2.bf16.msra.mxu1 %v5553_v21  ;;  %3678 = vmatprep.subr.bf16.mxu0 %v5558_v22  ;;  %v5622_v21 = vld [vmem:[%s7731_s1 + $0x950] ss:$8 sps:$4 sm:$0xff]  }
  0xf4   : > { %3751 = vmatprep.subr.bf16.mxu1 %v5561_v23 }
  0xf6   : > { %3679 = vmatpush2.bf16.msra.mxu0 %v5556_v24  ;;  %v5630_v24 = vld [vmem:[%s7731_s1 + $0x844] ss:$8 sps:$4 sm:$0xff]  }
  0xf7   : > { %3752 = vmatpush2.bf16.msra.mxu1 %v5559_v25  ;;  %3680 = vmatprep.subr.bf16.mxu0 %v5564_v26  ;;  %v5633_v25 = vld [vmem:[%s7731_s1 + $0x944] ss:$8 sps:$4 sm:$0xff]  }
  0xf8   : > { %3753 = vmatprep.subr.bf16.mxu1 %v5567_v27 }
  0xfa   : > { %3681 = vmatpush2.bf16.msra.mxu0 %v5562_v28  ;;  %v5634_v28 = vld [vmem:[%s6171_s6 + $0x1c4] ss:$100 sps:$4 sm:$0xff]  }
  0xfb   : > { %3754 = vmatpush2.bf16.msra.mxu1 %v5565_v29  ;;  %3682 = vmatprep.subr.bf16.mxu0 %v5570_v30  ;;  %v5643_v29 = vld [vmem:[%s6171_s6 + $0x1cc] ss:$100 sps:$4 sm:$0xff]   ;;  %v5628_v30 = vld [vmem:[%s7731_s1 + $0x840] ss:$8 sps:$4 sm:$0xff]  }
  0xfc   : > { %3755 = vmatprep.subr.bf16.mxu1 %v5573_v31 }
  0xfe   : > { %3683 = vmatpush2.bf16.msra.mxu0 %v5568_v32 }
  0xff   : > { %3756 = vmatpush2.bf16.msra.mxu1 %v5571_v33  ;;  %3684 = vmatprep.subr.bf16.mxu0 %v5576_v34  ;;  %v5631_v34 = vld [vmem:[%s7731_s1 + $0x940] ss:$8 sps:$4 sm:$0xff]  }
 0x100   : > { %3757 = vmatprep.subr.bf16.mxu1 %v5579_v35 }
 0x102   : > { %3685 = vmatpush2.bf16.msra.mxu0 %v5574_v36  ;;  %v5639_v36 = vld [vmem:[%s7731_s1 + $0x834] ss:$8 sps:$4 sm:$0xff]  }
 0x103   : > { %3758 = vmatpush2.bf16.msra.mxu1 %v5577_v37  ;;  %3686 = vmatprep.subr.bf16.mxu0 %v5582_v38  ;;  %v5642_v37 = vld [vmem:[%s7731_s1 + $0x934] ss:$8 sps:$4 sm:$0xff]  }
 0x104   : > { %3759 = vmatprep.subr.bf16.mxu1 %v5585_v39 }
 0x106   : > { %3687 = vmatpush2.bf16.msra.mxu0 %v5580_v40  ;;  %v5636_v40 = vld [vmem:[%s6171_s6 + $0x1c0] ss:$100 sps:$4 sm:$0xff]  }
 0x107   : > { %3760 = vmatpush2.bf16.msra.mxu1 %v5583_v41  ;;  %3688 = vmatprep.subr.bf16.mxu0 %v5588_v43  ;;  %v5637_v41 = vld [vmem:[%s7731_s1 + $0x830] ss:$8 sps:$4 sm:$0xff]  }
 0x108   : > { %3761 = vmatprep.subr.bf16.mxu1 %v5591_v44  ;;  %v5645_v44 = vld [vmem:[%s6171_s6 + $0x1c8] ss:$100 sps:$4 sm:$0xff]  }
 0x10a   : > { %3689 = vmatpush2.bf16.msra.mxu0 %v5586_v45 }
 0x10b   : > { %3762 = vmatpush2.bf16.msra.mxu1 %v5589_v46  ;;  %3690 = vmatprep.subr.bf16.mxu0 %v5594_v48 }
 0x10c   : > { %3763 = vmatprep.subr.bf16.mxu1 %v5597_v49 }
 0x10e   : > { %3691 = vmatpush2.bf16.msra.mxu0 %v5592_v50  ;;  %v5648_v50 = vld [vmem:[%s7731_s1 + $0x824] ss:$8 sps:$4 sm:$0xff]  }
 0x10f   : > { %3764 = vmatpush2.bf16.msra.mxu1 %v5595_v51  ;;  %3806 = vmatprep.subr.bf16.mxu0 %v5606_v54  ;;  %v5651_v51 = vld [vmem:[%s7731_s1 + $0x924] ss:$8 sps:$4 sm:$0xff]  }
 0x110   : > { %3879 = vmatprep.subr.bf16.mxu1 %v5609_v55  ;;  %v5652_v54 = vld [vmem:[%s6171_s6 + $0x28c] ss:$100 sps:$4 sm:$0xff]   ;;  %v5661_v55 = vld [vmem:[%s6171_s6 + $0x294] ss:$100 sps:$4 sm:$0xff]  }
 0x111   : > { %v3256_v3 = vpop.f32.mrf.mxu0  ;;  %3693 = vmatmul.mubr.bf16.vlgmr.msra.gmra.mxu0 %v5598_v56 }
 0x112   : > { %v3329_v4 = vpop.f32.mrf.mxu1  ;;  %3766 = vmatmul.mubr.bf16.vlgmr.msra.gmra.mxu1 %v5601_v57  ;;  %v3257_v6 = vadd.f32 %v3256_v3, %v6870_v60  ;;  %3807 = vmatpush1.bf16.msra.mxu0 %v5604_v59  ;;  %v5660_v3 = vld [vmem:[%s7731_s1 + $0x914] ss:$8 sps:$4 sm:$0xff]  }
 0x113   : > { %3880 = vmatpush1.bf16.msra.mxu1 %v5607_v61  ;;  %v3258_v8 = vpop.f32.mrf.mxu0  ;;  %3808 = vmatprep.subr.bf16.mxu0 %v5612_v62  ;;  %v5649_v62 = vld [vmem:[%s7731_s1 + $0x920] ss:$8 sps:$4 sm:$0xff]  }
 0x114   : > { %v3331_v9 = vpop.f32.mrf.mxu1  ;;  %3881 = vmatprep.subr.bf16.mxu1 %v5615_v63  ;;  %v6898_v12 = vadd.f32 %v3329_v4, %v3257_v6  ;;  %v3259_v13 = vadd.f32 %v3258_v8, %v6881_v0  ;;  %3702 = vmatprep.mubr.bf16.mxu0 %v5616_v1  ;;  %v5654_v6 = vld [vmem:[%s6171_s6 + $0x288] ss:$100 sps:$4 sm:$0xff]  }
 0x115   : > { %3775 = vmatprep.mubr.bf16.mxu1 %v5625_v2  ;;  %v3260_v16 = vpop.f32.mrf.mxu0  ;;  %v5657_v2 = vld [vmem:[%s7731_s1 + $0x814] ss:$8 sps:$4 sm:$0xff]  }
 0x116   : > { %v3333_v17 = vpop.f32.mrf.mxu1  ;;  %v6906_v19 = vadd.f32 %v3331_v9, %v3259_v13  ;;  %v3261_v20 = vadd.f32 %v3260_v16, %v6870_v60  ;;  %3809 = vmatpush1.bf16.msra.mxu0 %v5610_v5 }
 0x117   : > { %3882 = vmatpush1.bf16.msra.mxu1 %v5613_v7  ;;  %v3262_v22 = vpop.f32.mrf.mxu0  ;;  %3810 = vmatprep.subr.bf16.mxu0 %v5621_v10  ;;  %v5655_v7 = vld [vmem:[%s7731_s1 + $0x810] ss:$8 sps:$4 sm:$0xff]  }
 0x118   : > { %v3335_v23 = vpop.f32.mrf.mxu1  ;;  %3883 = vmatprep.subr.bf16.mxu1 %v5624_v11  ;;  %v6918_v26 = vadd.f32 %v3333_v17, %v3261_v20  ;;  %v3263_v27 = vadd.f32 %v3262_v22, %v6881_v0  ;;  %v5663_v10 = vld [vmem:[%s6171_s6 + $0x290] ss:$100 sps:$4 sm:$0xff]   ;;  %v5666_v17 = vld [vmem:[%s7731_s1 + $0x804] ss:$8 sps:$4 sm:$0xff]  }
 0x119   : > { %3703 = vmatmul.mubr.bf16.gmra.mxu0 %v5618_v14  ;;  %v3266_v31 = vpop.f32.mrf.mxu0  ;;  %v5658_v14 = vld [vmem:[%s7731_s1 + $0x910] ss:$8 sps:$4 sm:$0xff]  }
 0x11a   : > { %3776 = vmatmul.mubr.bf16.gmra.mxu1 %v5627_v18  ;;  %v3339_v32 = vpop.f32.mrf.mxu1  ;;  %v6926_v33 = vadd.f32 %v3335_v23, %v3263_v27  ;;  %3811 = vmatpush1.bf16.msra.mxu0 %v5619_v15  ;;  %v3267_v35 = vadd.f32 %v3266_v31, %v6870_v60  ;;  %v5669_v18 = vld [vmem:[%s7731_s1 + $0x904] ss:$8 sps:$4 sm:$0xff]   ;;  %v5664_v27 = vld [vmem:[%s7731_s1 + $0x800] ss:$8 sps:$4 sm:$0xff]  }
 0x11b   : > { %3884 = vmatpush1.bf16.msra.mxu1 %v5622_v21  ;;  %3812 = vmatprep.subr.bf16.mxu0 %v5630_v24  ;;  %v3268_v38 = vpop.f32.mrf.mxu0  ;;  %v5720_v24 = vld [vmem:[%s6171_s6 + $0x44] ss:$100 sps:$4 sm:$0xff]  }
 0x11c   : > { %3885 = vmatprep.subr.bf16.mxu1 %v5633_v25  ;;  %v3341_v39 = vpop.f32.mrf.mxu1  ;;  %3712 = vmatprep.mubr.bf16.mxu0 %v5634_v28  ;;  %v3269_v42 = vadd.f32 %v3268_v38, %v6881_v0  ;;  %v6943_v43 = vadd.f32 %v3339_v32, %v3267_v35  ;;  %v5723_v25 = vld [vmem:[%s6171_s6 + $0x4c] ss:$100 sps:$4 sm:$0xff]   ;;  %v5675_v35 = vld [vmem:[%s7731_s1 + $0x9f4] ss:$8 sps:$4 sm:$0xff]  }
 0x11d   : > { %3785 = vmatprep.mubr.bf16.mxu1 %v5643_v29  ;;  %v3270_v45 = vpop.f32.mrf.mxu0 }
 0x11e   : > { %v3343_v46 = vpop.f32.mrf.mxu1  ;;  %3813 = vmatpush1.bf16.msra.mxu0 %v5628_v30  ;;  %v3271_v48 = vadd.f32 %v3270_v45, %v6870_v60  ;;  %v6950_v49 = vadd.f32 %v3341_v39, %v3269_v42  ;;  %v5667_v30 = vld [vmem:[%s7731_s1 + $0x900] ss:$8 sps:$4 sm:$0xff]  }
 0x11f   : > { %3886 = vmatpush1.bf16.msra.mxu1 %v5631_v34  ;;  %3814 = vmatprep.subr.bf16.mxu0 %v5639_v36  ;;  %v3272_v52 = vpop.f32.mrf.mxu0  ;;  %v5672_v34 = vld [vmem:[%s7731_s1 + $0x8f4] ss:$8 sps:$4 sm:$0xff]  }
 0x120   : > { %3887 = vmatprep.subr.bf16.mxu1 %v5642_v37  ;;  %v3345_v53 = vpop.f32.mrf.mxu1  ;;  %v3273_v56 = vadd.f32 %v3272_v52, %v6881_v0  ;;  %v6961_v57 = vadd.f32 %v3343_v46, %v3271_v48  ;;  %v5681_v48 = vld [vmem:[%s7731_s1 + $0x9e4] ss:$8 sps:$4 sm:$0xff]  }
 0x121   : > { %3713 = vmatmul.mubr.bf16.gmra.mxu0 %v5636_v40  ;;  %v3276_v59 = vpop.f32.mrf.mxu0  ;;  %v5670_v40 = vld [vmem:[%s7731_s1 + $0x8f0] ss:$8 sps:$4 sm:$0xff]  }
 0x122   : > { %3786 = vmatmul.mubr.bf16.gmra.mxu1 %v5645_v44  ;;  %v3349_v61 = vpop.f32.mrf.mxu1  ;;  %3815 = vmatpush1.bf16.msra.mxu0 %v5637_v41  ;;  %v3277_v63 = vadd.f32 %v3276_v59, %v6870_v60  ;;  %v6970_v1 = vadd.f32 %v3345_v53, %v3273_v56  ;;  %v5673_v44 = vld [vmem:[%s7731_s1 + $0x9f0] ss:$8 sps:$4 sm:$0xff]   ;;  %v5687_v56 = vld [vmem:[%s7731_s1 + $0x9d4] ss:$8 sps:$4 sm:$0xff]  }
 0x123   : > { %3888 = vmatpush1.bf16.msra.mxu1 %v5640_v47  ;;  %3816 = vmatprep.subr.bf16.mxu0 %v5648_v50  ;;  %v3278_v4 = vpop.f32.mrf.mxu0  ;;  %v5678_v47 = vld [vmem:[%s7731_s1 + $0x8e4] ss:$8 sps:$4 sm:$0xff]   ;;  %v5685_v59 = vld [vmem:[%s7731_s1 + $0x9d0] ss:$8 sps:$4 sm:$0xff]  }
 0x124   : > { %3889 = vmatprep.subr.bf16.mxu1 %v5651_v51  ;;  %v3351_v5 = vpop.f32.mrf.mxu1  ;;  %3722 = vmatprep.mubr.bf16.mxu0 %v5652_v54  ;;  %v3279_v8 = vadd.f32 %v3278_v4, %v6881_v0  ;;  %v6983_v9 = vadd.f32 %v3349_v61, %v3277_v63  ;;  %v5679_v54 = vld [vmem:[%s7731_s1 + $0x9e0] ss:$8 sps:$4 sm:$0xff]   ;;  %v5690_v61 = vld [vmem:[%s7731_s1 + $0x8c4] ss:$8 sps:$4 sm:$0xff]   ;;  %v5699_v4 = vld [vmem:[%s7731_s1 + $0x9b4] ss:$8 sps:$4 sm:$0xff]  }
 0x125   : > { %3795 = vmatprep.mubr.bf16.mxu1 %v5661_v55  ;;  %v3280_v11 = vpop.f32.mrf.mxu0  ;;  %v5688_v63 = vld [vmem:[%s7731_s1 + $0x8c0] ss:$8 sps:$4 sm:$0xff]  }
 0x126   : > { %v3353_v13 = vpop.f32.mrf.mxu1  ;;  %3817 = vmatpush1.bf16.msra.mxu0 %v5646_v58  ;;  %v3281_v15 = vadd.f32 %v3280_v11, %v6870_v60  ;;  %v6990_v16 = vadd.f32 %v3351_v5, %v3279_v8  ;;  %v5682_v58 = vld [vmem:[%s7731_s1 + $0x8d0] ss:$8 sps:$4 sm:$0xff]   ;;  %v5705_v8 = vld [vmem:[%s7731_s1 + $0x9a4] ss:$8 sps:$4 sm:$0xff]   ;;  %v5703_v11 = vld [vmem:[%s7731_s1 + $0x9a0] ss:$8 sps:$4 sm:$0xff]  }
 0x127   : > { %3890 = vmatpush1.bf16.msra.mxu1 %v5649_v62  ;;  %3818 = vmatprep.subr.bf16.mxu0 %v5657_v2  ;;  %v3282_v20 = vpop.f32.mrf.mxu0  ;;  %v5693_v62 = vld [vmem:[%s7731_s1 + $0x9c4] ss:$8 sps:$4 sm:$0xff]   ;;  %v5691_v2 = vld [vmem:[%s7731_s1 + $0x9c0] ss:$8 sps:$4 sm:$0xff]   ;;  %v5694_v5 = vld [vmem:[%s7731_s1 + $0x8b0] ss:$8 sps:$4 sm:$0xff]  }
 0x128   : > { %3891 = vmatprep.subr.bf16.mxu1 %v5660_v3  ;;  %v3355_v21 = vpop.f32.mrf.mxu1  ;;  %v3283_v22 = vadd.f32 %v3282_v20, %v6881_v0  ;;  %v6999_v23 = vadd.f32 %v3353_v13, %v3281_v15  ;;  %v5696_v3 = vld [vmem:[%s7731_s1 + $0x8b4] ss:$8 sps:$4 sm:$0xff]   ;;  %v5706_v15 = vld [vmem:[%s7731_s1 + $0x890] ss:$8 sps:$4 sm:$0xff]   ;;  %v5717_v20 = vld [vmem:[%s7731_s1 + $0x984] ss:$8 sps:$4 sm:$0xff]  }
 0x129   : > { %3723 = vmatmul.mubr.bf16.gmra.mxu0 %v5654_v6  ;;  %v3286_v28 = vpop.f32.mrf.mxu0  ;;  %v5697_v6 = vld [vmem:[%s7731_s1 + $0x9b0] ss:$8 sps:$4 sm:$0xff]   ;;  %v5708_v13 = vld [vmem:[%s7731_s1 + $0x894] ss:$8 sps:$4 sm:$0xff]  }
 0x12a   : > { %3796 = vmatmul.mubr.bf16.gmra.mxu1 %v5663_v10  ;;  %v3359_v29 = vpop.f32.mrf.mxu1  ;;  %3819 = vmatpush1.bf16.msra.mxu0 %v5655_v7  ;;  %v3287_v31 = vadd.f32 %v3286_v28, %v6870_v60  ;;  %v7010_v32 = vadd.f32 %v3355_v21, %v3283_v22  ;;  %v5702_v7 = vld [vmem:[%s7731_s1 + $0x8a4] ss:$8 sps:$4 sm:$0xff]   ;;  %v5700_v10 = vld [vmem:[%s7731_s1 + $0x8a0] ss:$8 sps:$4 sm:$0xff]  }
 0x12b   : > { %3892 = vmatpush1.bf16.msra.mxu1 %v5658_v14  ;;  %3820 = vmatprep.subr.bf16.mxu0 %v5666_v17  ;;  %v3288_v36 = vpop.f32.mrf.mxu0  ;;  %v5711_v14 = vld [vmem:[%s7731_s1 + $0x994] ss:$8 sps:$4 sm:$0xff]   ;;  %v5709_v17 = vld [vmem:[%s7731_s1 + $0x990] ss:$8 sps:$4 sm:$0xff]   ;;  %v5712_v21 = vld [vmem:[%s7731_s1 + $0x880] ss:$8 sps:$4 sm:$0xff]  }
 0x12c   : > { %3893 = vmatprep.subr.bf16.mxu1 %v5669_v18  ;;  %v3361_v37 = vpop.f32.mrf.mxu1  ;;  %v3289_v38 = vadd.f32 %v3288_v36, %v6881_v0  ;;  %v7019_v39 = vadd.f32 %v3359_v29, %v3287_v31  ;;  %3838 = vmatprep.mubr.bf16.mxu0 %v5720_v24  ;;  %v5714_v18 = vld [vmem:[%s7731_s1 + $0x884] ss:$8 sps:$4 sm:$0xff]   ;;  %v5715_v22 = vld [vmem:[%s7731_s1 + $0x980] ss:$8 sps:$4 sm:$0xff]   ;;  %v5724_v29 = vld [vmem:[%s7731_s1 + $0xa70] ss:$8 sps:$4 sm:$0xff]  }
 0x12d   : > { %3911 = vmatprep.mubr.bf16.mxu1 %v5723_v25  ;;  %v3290_v41 = vpop.f32.mrf.mxu0  ;;  %v5718_v24 = vld [vmem:[%s6171_s6 + $0x40] ss:$100 sps:$4 sm:$0xff]   ;;  %v5726_v25 = vld [vmem:[%s7731_s1 + $0xa74] ss:$8 sps:$4 sm:$0xff]   ;;  %v5721_v28 = vld [vmem:[%s6171_s6 + $0x48] ss:$100 sps:$4 sm:$0xff]  }
 0x12e   : > { %v3363_v42 = vpop.f32.mrf.mxu1  ;;  %3821 = vmatpush1.bf16.msra.mxu0 %v5664_v27  ;;  %v3291_v45 = vadd.f32 %v3290_v41, %v6870_v60  ;;  %v7028_v46 = vadd.f32 %v3361_v37, %v3289_v38  ;;  %v5676_v60 = vld [vmem:[%s7731_s1 + $0x8e0] ss:$8 sps:$4 sm:$0xff]   ;;  %v5729_v27 = vld [vmem:[%s7731_s1 + $0xb74] ss:$8 sps:$4 sm:$0xff]   ;;  %v5732_v31 = vld [vmem:[%s7731_s1 + $0xa64] ss:$8 sps:$4 sm:$0xff]  }
 0x12f   : > { %3894 = vmatpush1.bf16.msra.mxu1 %v5667_v30  ;;  %3822 = vmatprep.subr.bf16.mxu0 %v5672_v34  ;;  %v3292_v50 = vpop.f32.mrf.mxu0  ;;  %v5727_v30 = vld [vmem:[%s7731_s1 + $0xb70] ss:$8 sps:$4 sm:$0xff]   ;;  %v5735_v34 = vld [vmem:[%s7731_s1 + $0xb64] ss:$8 sps:$4 sm:$0xff]  }
 0x130   : > { %3895 = vmatprep.subr.bf16.mxu1 %v5675_v35  ;;  %v3365_v51 = vpop.f32.mrf.mxu1  ;;  %v3293_v52 = vadd.f32 %v3292_v50, %v6881_v0  ;;  %v7037_v53 = vadd.f32 %v3363_v42, %v3291_v45  ;;  %v5684_v0 = vld [vmem:[%s7731_s1 + $0x8d4] ss:$8 sps:$4 sm:$0xff]   ;;  %v5736_v35 = vld [vmem:[%s6171_s6 + $0x10c] ss:$100 sps:$4 sm:$0xff]   ;;  %v5733_v42 = vld [vmem:[%s7731_s1 + $0xb60] ss:$8 sps:$4 sm:$0xff]  }
 0x131   : > { %v5745_v36 = vld [vmem:[%s6171_s6 + $0x114] ss:$100 sps:$4 sm:$0xff]  }
 0x132   : > { %3823 = vmatpush2.bf16.msra.mxu0 %v5670_v40  ;;  %v7045_v55 = vadd.f32 %v3365_v51, %v3293_v52  ;;  %v5730_v40 = vld [vmem:[%s7731_s1 + $0xa60] ss:$8 sps:$4 sm:$0xff]  }
 0x133   : > { %3896 = vmatpush2.bf16.msra.mxu1 %v5673_v44  ;;  %3824 = vmatprep.subr.bf16.mxu0 %v5678_v47  ;;  %v5741_v47 = vld [vmem:[%s7731_s1 + $0xa54] ss:$8 sps:$4 sm:$0xff]   ;;  %v5738_v51 = vld [vmem:[%s6171_s6 + $0x108] ss:$100 sps:$4 sm:$0xff]  }
 0x134   : > { %3897 = vmatprep.subr.bf16.mxu1 %v5681_v48  ;;  %v5744_v48 = vld [vmem:[%s7731_s1 + $0xb54] ss:$8 sps:$4 sm:$0xff]  }
 0x136   : > { %3825 = vmatpush2.bf16.msra.mxu0 %v5676_v60 }
 0x137   : > { %3898 = vmatpush2.bf16.msra.mxu1 %v5679_v54  ;;  %3826 = vmatprep.subr.bf16.mxu0 %v5684_v0  ;;  %v5739_v54 = vld [vmem:[%s7731_s1 + $0xa50] ss:$8 sps:$4 sm:$0xff]  }
 0x138   : > { %3899 = vmatprep.subr.bf16.mxu1 %v5687_v56  ;;  %v5747_v0 = vld [vmem:[%s6171_s6 + $0x110] ss:$100 sps:$4 sm:$0xff]  }
 0x13a   : > { %3827 = vmatpush2.bf16.msra.mxu0 %v5682_v58 }
 0x13b   : > { %3900 = vmatpush2.bf16.msra.mxu1 %v5685_v59  ;;  %3828 = vmatprep.subr.bf16.mxu0 %v5690_v61 }
 0x13c   : > { %3901 = vmatprep.subr.bf16.mxu1 %v5693_v62  ;;  %v5750_v62 = vld [vmem:[%s7731_s1 + $0xa44] ss:$8 sps:$4 sm:$0xff]  }
 0x13e   : > { %3829 = vmatpush2.bf16.msra.mxu0 %v5688_v63  ;;  %v5753_v63 = vld [vmem:[%s7731_s1 + $0xb44] ss:$8 sps:$4 sm:$0xff]  }
 0x13f   : > { %3902 = vmatpush2.bf16.msra.mxu1 %v5691_v2  ;;  %3830 = vmatprep.subr.bf16.mxu0 %v5696_v3  ;;  %v5748_v3 = vld [vmem:[%s7731_s1 + $0xa40] ss:$8 sps:$4 sm:$0xff]  }
 0x140   : > { %3903 = vmatprep.subr.bf16.mxu1 %v5699_v4  ;;  %v5754_v4 = vld [vmem:[%s6171_s6 + $0x1d4] ss:$100 sps:$4 sm:$0xff]  }
 0x142   : > { %3831 = vmatpush2.bf16.msra.mxu0 %v5694_v5  ;;  %v5763_v5 = vld [vmem:[%s6171_s6 + $0x1dc] ss:$100 sps:$4 sm:$0xff]  }
 0x143   : > { %3904 = vmatpush2.bf16.msra.mxu1 %v5697_v6  ;;  %3832 = vmatprep.subr.bf16.mxu0 %v5702_v7 }
 0x144   : > { %3905 = vmatprep.subr.bf16.mxu1 %v5705_v8  ;;  %v5751_v8 = vld [vmem:[%s7731_s1 + $0xb40] ss:$8 sps:$4 sm:$0xff]  }
 0x146   : > { %3833 = vmatpush2.bf16.msra.mxu0 %v5700_v10 }
 0x147   : > { %3906 = vmatpush2.bf16.msra.mxu1 %v5703_v11  ;;  %3834 = vmatprep.subr.bf16.mxu0 %v5708_v13 }
 0x148   : > { %3907 = vmatprep.subr.bf16.mxu1 %v5711_v14 }
 0x14a   : > { %3835 = vmatpush2.bf16.msra.mxu0 %v5706_v15  ;;  %v5762_v15 = vld [vmem:[%s7731_s1 + $0xb34] ss:$8 sps:$4 sm:$0xff]  }
 0x14b   : > { %3908 = vmatpush2.bf16.msra.mxu1 %v5709_v17  ;;  %3836 = vmatprep.subr.bf16.mxu0 %v5714_v18 }
 0x14c   : > { %3909 = vmatprep.subr.bf16.mxu1 %v5717_v20 }
 0x14e   : > { %3837 = vmatpush2.bf16.msra.mxu0 %v5712_v21  ;;  %v5756_v21 = vld [vmem:[%s6171_s6 + $0x1d0] ss:$100 sps:$4 sm:$0xff]  }
 0x14f   : > { %3910 = vmatpush2.bf16.msra.mxu1 %v5715_v22  ;;  %3952 = vmatprep.subr.bf16.mxu0 %v5726_v25  ;;  %v5765_v22 = vld [vmem:[%s6171_s6 + $0x1d8] ss:$100 sps:$4 sm:$0xff]  }
 0x150   : > { %4025 = vmatprep.subr.bf16.mxu1 %v5729_v27  ;;  %v5760_v27 = vld [vmem:[%s7731_s1 + $0xb30] ss:$8 sps:$4 sm:$0xff]  }
 0x151   : > { %v3402_v37 = vpop.f32.mrf.mxu0  ;;  %3839 = vmatmul.mubr.bf16.vlgmr.msra.gmra.mxu0 %v5718_v24 }
 0x152   : > { %v3475_v38 = vpop.f32.mrf.mxu1  ;;  %3912 = vmatmul.mubr.bf16.vlgmr.msra.gmra.mxu1 %v5721_v28  ;;  %v3403_v41 = vadd.f32 %v3402_v37, %v6898_v12  ;;  %3953 = vmatpush1.bf16.msra.mxu0 %v5724_v29 }
 0x153   : > { %4026 = vmatpush1.bf16.msra.mxu1 %v5727_v30  ;;  %v3404_v44 = vpop.f32.mrf.mxu0  ;;  %3954 = vmatprep.subr.bf16.mxu0 %v5732_v31  ;;  %v5771_v30 = vld [vmem:[%s7731_s1 + $0xb24] ss:$8 sps:$4 sm:$0xff]  }
 0x154   : > { %v3477_v45 = vpop.f32.mrf.mxu1  ;;  %4027 = vmatprep.subr.bf16.mxu1 %v5735_v34  ;;  %v7154_v12 = vadd.f32 %v3475_v38, %v3403_v41  ;;  %v3405_v50 = vadd.f32 %v3404_v44, %v6906_v19  ;;  %3848 = vmatprep.mubr.bf16.mxu0 %v5736_v35  ;;  %v5742_v19 = vld [vmem:[%s7731_s1 + $0xb50] ss:$8 sps:$4 sm:$0xff]   ;;  %v5772_v35 = vld [vmem:[%s6171_s6 + $0x29c] ss:$100 sps:$4 sm:$0xff]  }
 0x155   : > { %3921 = vmatprep.mubr.bf16.mxu1 %v5745_v36  ;;  %v3406_v52 = vpop.f32.mrf.mxu0  ;;  %v5781_v36 = vld [vmem:[%s6171_s6 + $0x2a4] ss:$100 sps:$4 sm:$0xff]  }
 0x156   : > { %v3479_v60 = vpop.f32.mrf.mxu1  ;;  %v7162_v56 = vadd.f32 %v3477_v45, %v3405_v50  ;;  %v3407_v58 = vadd.f32 %v3406_v52, %v6918_v26  ;;  %3955 = vmatpush1.bf16.msra.mxu0 %v5730_v40 }
 0x157   : > { %4028 = vmatpush1.bf16.msra.mxu1 %v5733_v42  ;;  %v3408_v59 = vpop.f32.mrf.mxu0  ;;  %3956 = vmatprep.subr.bf16.mxu0 %v5741_v47  ;;  %v5769_v42 = vld [vmem:[%s7731_s1 + $0xb20] ss:$8 sps:$4 sm:$0xff]   ;;  %v5780_v47 = vld [vmem:[%s7731_s1 + $0xb14] ss:$8 sps:$4 sm:$0xff]  }
 0x158   : > { %v3481_v61 = vpop.f32.mrf.mxu1  ;;  %4029 = vmatprep.subr.bf16.mxu1 %v5744_v48  ;;  %v7174_v2 = vadd.f32 %v3479_v60, %v3407_v58  ;;  %v3409_v26 = vadd.f32 %v3408_v59, %v6926_v33  ;;  %v5759_v33 = vld [vmem:[%s7731_s1 + $0xa34] ss:$8 sps:$4 sm:$0xff]  }
 0x159   : > { %v3412_v6 = vpop.f32.mrf.mxu0  ;;  %3849 = vmatmul.mubr.bf16.gmra.mxu0 %v5738_v51  ;;  %v5774_v60 = vld [vmem:[%s6171_s6 + $0x298] ss:$100 sps:$4 sm:$0xff]  }
 0x15a   : > { %v3485_v7 = vpop.f32.mrf.mxu1  ;;  %3922 = vmatmul.mubr.bf16.gmra.mxu1 %v5747_v0  ;;  %v7185_v10 = vadd.f32 %v3481_v61, %v3409_v26  ;;  %v3413_v11 = vadd.f32 %v3412_v6, %v6943_v43  ;;  %3957 = vmatpush1.bf16.msra.mxu0 %v5739_v54  ;;  %v5783_v54 = vld [vmem:[%s6171_s6 + $0x2a0] ss:$100 sps:$4 sm:$0xff]  }
 0x15b   : > { %4030 = vmatpush1.bf16.msra.mxu1 %v5742_v19  ;;  %v3414_v13 = vpop.f32.mrf.mxu0  ;;  %3958 = vmatprep.subr.bf16.mxu0 %v5750_v62  ;;  %v5778_v19 = vld [vmem:[%s7731_s1 + $0xb10] ss:$8 sps:$4 sm:$0xff]   ;;  %v5789_v62 = vld [vmem:[%s7731_s1 + $0xb04] ss:$8 sps:$4 sm:$0xff]  }
 0x15c   : > { %v3487_v14 = vpop.f32.mrf.mxu1  ;;  %4031 = vmatprep.subr.bf16.mxu1 %v5753_v63  ;;  %v3415_v17 = vadd.f32 %v3414_v13, %v6950_v49  ;;  %v7195_v18 = vadd.f32 %v3485_v7, %v3413_v11  ;;  %3858 = vmatprep.mubr.bf16.mxu0 %v5754_v4  ;;  %v5757_v49 = vld [vmem:[%s7731_s1 + $0xa30] ss:$8 sps:$4 sm:$0xff]   ;;  %v5843_v4 = vld [vmem:[%s6171_s6 + $0x5c] ss:$100 sps:$4 sm:$0xff]  }
 0x15d   : > { %3931 = vmatprep.mubr.bf16.mxu1 %v5763_v5  ;;  %v3416_v43 = vpop.f32.mrf.mxu0  ;;  %v5784_v11 = vld [vmem:[%s7731_s1 + $0xa00] ss:$8 sps:$4 sm:$0xff]  }
 0x15e   : > { %v3489_v20 = vpop.f32.mrf.mxu1  ;;  %v3417_v24 = vadd.f32 %v3416_v43, %v6961_v57  ;;  %v7200_v25 = vadd.f32 %v3487_v14, %v3415_v17  ;;  %3959 = vmatpush1.bf16.msra.mxu0 %v5748_v3  ;;  %v5768_v57 = vld [vmem:[%s7731_s1 + $0xa24] ss:$8 sps:$4 sm:$0xff]   ;;  %v5840_v3 = vld [vmem:[%s6171_s6 + $0x54] ss:$100 sps:$4 sm:$0xff]  }
 0x15f   : > { %4032 = vmatpush1.bf16.msra.mxu1 %v5751_v8  ;;  %v3418_v28 = vpop.f32.mrf.mxu0  ;;  %3960 = vmatprep.subr.bf16.mxu0 %v5759_v33  ;;  %v5795_v14 = vld [vmem:[%s7731_s1 + $0xbf4] ss:$8 sps:$4 sm:$0xff]  }
 0x160   : > { %v3491_v29 = vpop.f32.mrf.mxu1  ;;  %4033 = vmatprep.subr.bf16.mxu1 %v5762_v15  ;;  %v3419_v31 = vadd.f32 %v3418_v28, %v6970_v1  ;;  %v7215_v34 = vadd.f32 %v3489_v20, %v3417_v24  ;;  %v5766_v1 = vld [vmem:[%s7731_s1 + $0xa20] ss:$8 sps:$4 sm:$0xff]   ;;  %v5790_v24 = vld [vmem:[%s7731_s1 + $0xaf0] ss:$8 sps:$4 sm:$0xff]   ;;  %v5801_v28 = vld [vmem:[%s7731_s1 + $0xbe4] ss:$8 sps:$4 sm:$0xff]  }
 0x161   : > { %v3422_v37 = vpop.f32.mrf.mxu0  ;;  %3859 = vmatmul.mubr.bf16.gmra.mxu0 %v5756_v21 }
 0x162   : > { %v3495_v38 = vpop.f32.mrf.mxu1  ;;  %3932 = vmatmul.mubr.bf16.gmra.mxu1 %v5765_v22  ;;  %v3423_v40 = vadd.f32 %v3422_v37, %v6983_v9  ;;  %v7220_v41 = vadd.f32 %v3491_v29, %v3419_v31  ;;  %3961 = vmatpush1.bf16.msra.mxu0 %v5757_v49  ;;  %v5777_v9 = vld [vmem:[%s7731_s1 + $0xa14] ss:$8 sps:$4 sm:$0xff]   ;;  %v5796_v31 = vld [vmem:[%s7731_s1 + $0xae0] ss:$8 sps:$4 sm:$0xff]   ;;  %v5802_v37 = vld [vmem:[%s7731_s1 + $0xad0] ss:$8 sps:$4 sm:$0xff]  }
 0x163   : > { %4034 = vmatpush1.bf16.msra.mxu1 %v5760_v27  ;;  %v3424_v44 = vpop.f32.mrf.mxu0  ;;  %3962 = vmatprep.subr.bf16.mxu0 %v5768_v57 }
 0x164   : > { %v3497_v45 = vpop.f32.mrf.mxu1  ;;  %4035 = vmatprep.subr.bf16.mxu1 %v5771_v30  ;;  %v3425_v48 = vadd.f32 %v3424_v44, %v6990_v16  ;;  %v7235_v50 = vadd.f32 %v3495_v38, %v3423_v40  ;;  %3868 = vmatprep.mubr.bf16.mxu0 %v5772_v35  ;;  %v5775_v16 = vld [vmem:[%s7731_s1 + $0xa10] ss:$8 sps:$4 sm:$0xff]   ;;  %v5799_v35 = vld [vmem:[%s7731_s1 + $0xbe0] ss:$8 sps:$4 sm:$0xff]   ;;  %v5810_v40 = vld [vmem:[%s7731_s1 + $0xac4] ss:$8 sps:$4 sm:$0xff]  }
 0x165   : > { %3941 = vmatprep.mubr.bf16.mxu1 %v5781_v36  ;;  %v3426_v51 = vpop.f32.mrf.mxu0  ;;  %v5807_v36 = vld [vmem:[%s7731_s1 + $0xbd4] ss:$8 sps:$4 sm:$0xff]   ;;  %v5805_v38 = vld [vmem:[%s7731_s1 + $0xbd0] ss:$8 sps:$4 sm:$0xff]   ;;  %v5811_v44 = vld [vmem:[%s7731_s1 + $0xbc0] ss:$8 sps:$4 sm:$0xff]  }
 0x166   : > { %v3499_v52 = vpop.f32.mrf.mxu1  ;;  %v3427_v0 = vadd.f32 %v3426_v51, %v6999_v23  ;;  %v7240_v58 = vadd.f32 %v3497_v45, %v3425_v48  ;;  %3963 = vmatpush1.bf16.msra.mxu0 %v5766_v1  ;;  %v5786_v23 = vld [vmem:[%s7731_s1 + $0xa04] ss:$8 sps:$4 sm:$0xff]   ;;  %v5816_v45 = vld [vmem:[%s7731_s1 + $0xab4] ss:$8 sps:$4 sm:$0xff]   ;;  %v5817_v48 = vld [vmem:[%s7731_s1 + $0xbb0] ss:$8 sps:$4 sm:$0xff]  }
 0x167   : > { %4036 = vmatpush1.bf16.msra.mxu1 %v5769_v42  ;;  %v3428_v59 = vpop.f32.mrf.mxu0  ;;  %3964 = vmatprep.subr.bf16.mxu0 %v5777_v9  ;;  %v5813_v1 = vld [vmem:[%s7731_s1 + $0xbc4] ss:$8 sps:$4 sm:$0xff]   ;;  %v5808_v42 = vld [vmem:[%s7731_s1 + $0xac0] ss:$8 sps:$4 sm:$0xff]   ;;  %v5819_v9 = vld [vmem:[%s7731_s1 + $0xbb4] ss:$8 sps:$4 sm:$0xff]  }
 0x168   : > { %v3501_v61 = vpop.f32.mrf.mxu1  ;;  %4037 = vmatprep.subr.bf16.mxu1 %v5780_v47  ;;  %v3429_v63 = vadd.f32 %v3428_v59, %v7010_v32  ;;  %v7255_v26 = vadd.f32 %v3499_v52, %v3427_v0  ;;  %v5787_v32 = vld [vmem:[%s7731_s1 + $0xb00] ss:$8 sps:$4 sm:$0xff]   ;;  %v5814_v47 = vld [vmem:[%s7731_s1 + $0xab0] ss:$8 sps:$4 sm:$0xff]   ;;  %v5822_v51 = vld [vmem:[%s7731_s1 + $0xaa4] ss:$8 sps:$4 sm:$0xff]  }
 0x169   : > { %v3432_v5 = vpop.f32.mrf.mxu0  ;;  %3869 = vmatmul.mubr.bf16.gmra.mxu0 %v5774_v60  ;;  %v5825_v52 = vld [vmem:[%s7731_s1 + $0xba4] ss:$8 sps:$4 sm:$0xff]   ;;  %v5820_v60 = vld [vmem:[%s7731_s1 + $0xaa0] ss:$8 sps:$4 sm:$0xff]   ;;  %v5828_v0 = vld [vmem:[%s7731_s1 + $0xa94] ss:$8 sps:$4 sm:$0xff]  }
 0x16a   : > { %v3505_v6 = vpop.f32.mrf.mxu1  ;;  %3942 = vmatmul.mubr.bf16.gmra.mxu1 %v5783_v54  ;;  %v3433_v7 = vadd.f32 %v3432_v5, %v7019_v39  ;;  %v7260_v8 = vadd.f32 %v3501_v61, %v3429_v63  ;;  %3965 = vmatpush1.bf16.msra.mxu0 %v5775_v16  ;;  %v5792_v39 = vld [vmem:[%s7731_s1 + $0xaf4] ss:$8 sps:$4 sm:$0xff]   ;;  %v5823_v54 = vld [vmem:[%s7731_s1 + $0xba0] ss:$8 sps:$4 sm:$0xff]   ;;  %v5829_v59 = vld [vmem:[%s7731_s1 + $0xb90] ss:$8 sps:$4 sm:$0xff]  }
 0x16b   : > { %4038 = vmatpush1.bf16.msra.mxu1 %v5778_v19  ;;  %v3434_v33 = vpop.f32.mrf.mxu0  ;;  %3966 = vmatprep.subr.bf16.mxu0 %v5786_v23  ;;  %v5831_v16 = vld [vmem:[%s7731_s1 + $0xb94] ss:$8 sps:$4 sm:$0xff]   ;;  %v5826_v19 = vld [vmem:[%s7731_s1 + $0xa90] ss:$8 sps:$4 sm:$0xff]   ;;  %v5834_v61 = vld [vmem:[%s7731_s1 + $0xa84] ss:$8 sps:$4 sm:$0xff]  }
 0x16c   : > { %v3507_v13 = vpop.f32.mrf.mxu1  ;;  %4039 = vmatprep.subr.bf16.mxu1 %v5789_v62  ;;  %v3435_v15 = vadd.f32 %v3434_v33, %v7028_v46  ;;  %v7275_v17 = vadd.f32 %v3505_v6, %v3433_v7  ;;  %3984 = vmatprep.mubr.bf16.mxu0 %v5840_v3  ;;  %v5793_v46 = vld [vmem:[%s7731_s1 + $0xbf0] ss:$8 sps:$4 sm:$0xff]   ;;  %v5837_v23 = vld [vmem:[%s7731_s1 + $0xb84] ss:$8 sps:$4 sm:$0xff]   ;;  %v5832_v62 = vld [vmem:[%s7731_s1 + $0xa80] ss:$8 sps:$4 sm:$0xff]  }
 0x16d   : > { %4057 = vmatprep.mubr.bf16.mxu1 %v5843_v4  ;;  %v3436_v43 = vpop.f32.mrf.mxu0  ;;  %v5835_v63 = vld [vmem:[%s7731_s1 + $0xb80] ss:$8 sps:$4 sm:$0xff]   ;;  %v5846_v3 = vld [vmem:[%s7731_s1 + $0xc74] ss:$8 sps:$4 sm:$0xff]   ;;  %v5844_v6 = vld [vmem:[%s7731_s1 + $0xc70] ss:$8 sps:$4 sm:$0xff]  }
 0x16e   : > { %v3509_v20 = vpop.f32.mrf.mxu1  ;;  %v3437_v21 = vadd.f32 %v3436_v43, %v7037_v53  ;;  %v7278_v22 = vadd.f32 %v3507_v13, %v3435_v15  ;;  %3967 = vmatpush1.bf16.msra.mxu0 %v5784_v11  ;;  %v5798_v53 = vld [vmem:[%s7731_s1 + $0xae4] ss:$8 sps:$4 sm:$0xff]   ;;  %v5838_v4 = vld [vmem:[%s6171_s6 + $0x50] ss:$100 sps:$4 sm:$0xff]   ;;  %v5841_v5 = vld [vmem:[%s6171_s6 + $0x58] ss:$100 sps:$4 sm:$0xff]  }
 0x16f   : > { %4040 = vmatpush1.bf16.msra.mxu1 %v5787_v32  ;;  %v3438_v49 = vpop.f32.mrf.mxu0  ;;  %3968 = vmatprep.subr.bf16.mxu0 %v5792_v39  ;;  %v5849_v7 = vld [vmem:[%s7731_s1 + $0xc64] ss:$8 sps:$4 sm:$0xff]   ;;  %v5850_v11 = vld [vmem:[%s6171_s6 + $0x11c] ss:$100 sps:$4 sm:$0xff]  }
 0x170   : > { %v3511_v27 = vpop.f32.mrf.mxu1  ;;  %4041 = vmatprep.subr.bf16.mxu1 %v5795_v14  ;;  %v3439_v29 = vadd.f32 %v3438_v49, %v7045_v55  ;;  %v7293_v57 = vadd.f32 %v3509_v20, %v3437_v21  ;;  %v5804_v55 = vld [vmem:[%s7731_s1 + $0xad4] ss:$8 sps:$4 sm:$0xff]   ;;  %v5852_v32 = vld [vmem:[%s6171_s6 + $0x124] ss:$100 sps:$4 sm:$0xff]  }
 0x171   : > { %v5847_v14 = vld [vmem:[%s7731_s1 + $0xc60] ss:$8 sps:$4 sm:$0xff]   ;;  %v5858_v20 = vld [vmem:[%s7731_s1 + $0xc54] ss:$8 sps:$4 sm:$0xff]  }
 0x172   : > { %v7295_v30 = vadd.f32 %v3511_v27, %v3439_v29  ;;  %3969 = vmatpush2.bf16.msra.mxu0 %v5790_v24  ;;  %v5854_v49 = vld [vmem:[%s6171_s6 + $0x118] ss:$100 sps:$4 sm:$0xff]   ;;  %v5855_v27 = vld [vmem:[%s6171_s6 + $0x120] ss:$100 sps:$4 sm:$0xff]  }
 0x173   : > { %4042 = vmatpush2.bf16.msra.mxu1 %v5793_v46  ;;  %3970 = vmatprep.subr.bf16.mxu0 %v5798_v53  ;;  %v5856_v29 = vld [vmem:[%s7731_s1 + $0xc50] ss:$8 sps:$4 sm:$0xff]  }
 0x174   : > { %4043 = vmatprep.subr.bf16.mxu1 %v5801_v28 }
 0x176   : > { %3971 = vmatpush2.bf16.msra.mxu0 %v5796_v31 }
 0x177   : > { %4044 = vmatpush2.bf16.msra.mxu1 %v5799_v35  ;;  %3972 = vmatprep.subr.bf16.mxu0 %v5804_v55  ;;  %v5861_v35 = vld [vmem:[%s7731_s1 + $0xc44] ss:$8 sps:$4 sm:$0xff]  }
 0x178   : > { %4045 = vmatprep.subr.bf16.mxu1 %v5807_v36 }
 0x17a   : > { %3973 = vmatpush2.bf16.msra.mxu0 %v5802_v37  ;;  %v5862_v37 = vld [vmem:[%s6171_s6 + $0x1e4] ss:$100 sps:$4 sm:$0xff]  }
 0x17b   : > { %4046 = vmatpush2.bf16.msra.mxu1 %v5805_v38  ;;  %3974 = vmatprep.subr.bf16.mxu0 %v5810_v40 }
 0x17c   : > { %4047 = vmatprep.subr.bf16.mxu1 %v5813_v1 }
 0x17e   : > { %3975 = vmatpush2.bf16.msra.mxu0 %v5808_v42 }
 0x17f   : > { %4048 = vmatpush2.bf16.msra.mxu1 %v5811_v44  ;;  %3976 = vmatprep.subr.bf16.mxu0 %v5816_v45  ;;  %v5859_v44 = vld [vmem:[%s7731_s1 + $0xc40] ss:$8 sps:$4 sm:$0xff]  }
 0x180   : > { %4049 = vmatprep.subr.bf16.mxu1 %v5819_v9  ;;  %v5870_v9 = vld [vmem:[%s7731_s1 + $0xc34] ss:$8 sps:$4 sm:$0xff]  }
 0x182   : > { %3977 = vmatpush2.bf16.msra.mxu0 %v5814_v47 }
 0x183   : > { %4050 = vmatpush2.bf16.msra.mxu1 %v5817_v48  ;;  %3978 = vmatprep.subr.bf16.mxu0 %v5822_v51 }
 0x184   : > { %4051 = vmatprep.subr.bf16.mxu1 %v5825_v52  ;;  %v5866_v52 = vld [vmem:[%s6171_s6 + $0x1e0] ss:$100 sps:$4 sm:$0xff]  }
 0x186   : > { %3979 = vmatpush2.bf16.msra.mxu0 %v5820_v60  ;;  %v5867_v60 = vld [vmem:[%s6171_s6 + $0x1e8] ss:$100 sps:$4 sm:$0xff]  }
 0x187   : > { %4052 = vmatpush2.bf16.msra.mxu1 %v5823_v54  ;;  %3980 = vmatprep.subr.bf16.mxu0 %v5828_v0 }
 0x188   : > { %4053 = vmatprep.subr.bf16.mxu1 %v5831_v16 }
 0x18a   : > { %3981 = vmatpush2.bf16.msra.mxu0 %v5826_v19 }
 0x18b   : > { %4054 = vmatpush2.bf16.msra.mxu1 %v5829_v59  ;;  %3982 = vmatprep.subr.bf16.mxu0 %v5834_v61  ;;  %v5873_v59 = vld [vmem:[%s7731_s1 + $0xc24] ss:$8 sps:$4 sm:$0xff]  }
 0x18c   : > { %4055 = vmatprep.subr.bf16.mxu1 %v5837_v23 }
 0x18e   : > { %3983 = vmatpush2.bf16.msra.mxu0 %v5832_v62  ;;  %v5876_v62 = vld [vmem:[%s6171_s6 + $0x2b4] ss:$100 sps:$4 sm:$0xff]  }
 0x18f   : > { %4056 = vmatpush2.bf16.msra.mxu1 %v5835_v63  ;;  %4098 = vmatprep.subr.bf16.mxu0 %v5846_v3 }
 0x190   : > { %5036 = vmatprep.subr.bf16.mxu1 %v5846_v3 }
 0x191   : > { %v3548_v33 = vpop.f32.mrf.mxu0  ;;  %3985 = vmatmul.mubr.bf16.vlgmr.msra.gmra.mxu0 %v5838_v4 }
 0x192   : > { %v3621_v13 = vpop.f32.mrf.mxu1  ;;  %4058 = vmatmul.mubr.bf16.vlgmr.msra.gmra.mxu1 %v5841_v5  ;;  %v3549_v39 = vadd.f32 %v3548_v33, %v7154_v12  ;;  %4099 = vmatpush1.bf16.msra.mxu0 %v5844_v6 }
 0x193   : > { %5044 = vmatpush1.bf16.msra.mxu1 %v5844_v6  ;;  %v3550_v15 = vpop.f32.mrf.mxu0  ;;  %4100 = vmatprep.subr.bf16.mxu0 %v5849_v7 }
 0x194   : > { %v3623_v43 = vpop.f32.mrf.mxu1  ;;  %5037 = vmatprep.subr.bf16.mxu1 %v5849_v7  ;;  %v7395_v21 = vadd.f32 %v3621_v13, %v3549_v39  ;;  %v3551_v24 = vadd.f32 %v3550_v15, %v7162_v56  ;;  %3994 = vmatprep.mubr.bf16.mxu0 %v5850_v11  ;;  %v5882_v11 = vld [vmem:[%s7731_s1 + $0xc14] ss:$8 sps:$4 sm:$0xff]   ;;  %v5878_v39 = vld [vmem:[%s6171_s6 + $0x2a8] ss:$100 sps:$4 sm:$0xff]  }
 0x195   : > { %4067 = vmatprep.mubr.bf16.mxu1 %v5852_v32  ;;  %v3552_v12 = vpop.f32.mrf.mxu0 }
 0x196   : > { %v3625_v46 = vpop.f32.mrf.mxu1  ;;  %v7400_v53 = vadd.f32 %v3623_v43, %v3551_v24  ;;  %v3553_v28 = vadd.f32 %v3552_v12, %v7174_v2  ;;  %4101 = vmatpush1.bf16.msra.mxu0 %v5847_v14  ;;  %v5864_v2 = vld [vmem:[%s6171_s6 + $0x1ec] ss:$100 sps:$4 sm:$0xff]  }
 0x197   : > { %5045 = vmatpush1.bf16.msra.mxu1 %v5847_v14  ;;  %v3554_v31 = vpop.f32.mrf.mxu0  ;;  %4102 = vmatprep.subr.bf16.mxu0 %v5858_v20  ;;  %v5879_v14 = vld [vmem:[%s6171_s6 + $0x2b0] ss:$100 sps:$4 sm:$0xff]   ;;  %v5885_v12 = vld [vmem:[%s7731_s1 + $0xc04] ss:$8 sps:$4 sm:$0xff]  }
 0x198   : > { %v3627_v56 = vpop.f32.mrf.mxu1  ;;  %5038 = vmatprep.subr.bf16.mxu1 %v5858_v20  ;;  %v7409_v55 = vadd.f32 %v3625_v46, %v3553_v28  ;;  %v3555_v36 = vadd.f32 %v3554_v31, %v7185_v10  ;;  %v5880_v20 = vld [vmem:[%s7731_s1 + $0xc10] ss:$8 sps:$4 sm:$0xff]   ;;  %v5883_v31 = vld [vmem:[%s7731_s1 + $0xc00] ss:$8 sps:$4 sm:$0xff]  }
 0x199   : > { %v3558_v38 = vpop.f32.mrf.mxu0  ;;  %3995 = vmatmul.mubr.bf16.gmra.mxu0 %v5854_v49 }
 0x19a   : > { %4068 = vmatmul.mubr.bf16.gmra.mxu1 %v5855_v27  ;;  %v3631_v40 = vpop.f32.mrf.mxu1  ;;  %v7414_v1 = vadd.f32 %v3627_v56, %v3555_v36  ;;  %v3559_v42 = vadd.f32 %v3558_v38, %v7195_v18  ;;  %4103 = vmatpush1.bf16.msra.mxu0 %v5856_v29  ;;  %v5886_v38 = vld [vmem:[%s6171_s6 + $0x60] ss:$100 sps:$4 sm:$0xff]  }
 0x19b   : > { %5046 = vmatpush1.bf16.msra.mxu1 %v5856_v29  ;;  %v3560_v45 = vpop.f32.mrf.mxu0  ;;  %4104 = vmatprep.subr.bf16.mxu0 %v5861_v35 }
 0x19c   : > { %v3633_v10 = vpop.f32.mrf.mxu1  ;;  %5039 = vmatprep.subr.bf16.mxu1 %v5861_v35  ;;  %v3561_v47 = vadd.f32 %v3560_v45, %v7200_v25  ;;  %v7424_v48 = vadd.f32 %v3631_v40, %v3559_v42  ;;  %4004 = vmatprep.mubr.bf16.mxu0 %v5862_v37  ;;  %v5868_v25 = vld [vmem:[%s7731_s1 + $0xc30] ss:$8 sps:$4 sm:$0xff]   ;;  %v5978_v37 = vmov 0  }
 0x19d   : > { %4077 = vmatprep.mubr.bf16.mxu1 %v5864_v2  ;;  %v3562_v18 = vpop.f32.mrf.mxu0  ;;  %v5887_v40 = vld [vmem:[%s6171_s6 + $0x1f0] ss:$100 sps:$4 sm:$0xff]  }
 0x19e   : > { %v3635_v51 = vpop.f32.mrf.mxu1  ;;  %v3563_v54 = vadd.f32 %v3562_v18, %v7215_v34  ;;  %v7429_v0 = vadd.f32 %v3633_v10, %v3561_v47  ;;  %4105 = vmatpush1.bf16.msra.mxu0 %v5859_v44  ;;  %v5874_v34 = vld [vmem:[%s6171_s6 + $0x2ac] ss:$100 sps:$4 sm:$0xff]  }
 0x19f   : > { %5047 = vmatpush1.bf16.msra.mxu1 %v5859_v44  ;;  %v3564_v16 = vpop.f32.mrf.mxu0  ;;  %4106 = vmatprep.subr.bf16.mxu0 %v5870_v9  ;;  %v5888_v18 = vld [vmem:[%s6171_s6 + $0x128] ss:$100 sps:$4 sm:$0xff]  }
 0x1a0   : > { %v3637_v19 = vpop.f32.mrf.mxu1  ;;  %5040 = vmatprep.subr.bf16.mxu1 %v5870_v9  ;;  %v3565_v61 = vadd.f32 %v3564_v16, %v7220_v41  ;;  %v7438_v23 = vadd.f32 %v3635_v51, %v3563_v54  ;;  %v5871_v41 = vld [vmem:[%s7731_s1 + $0xc20] ss:$8 sps:$4 sm:$0xff]   ;;  %v5889_v51 = vld [vmem:[%s6171_s6 + $0x2b8] ss:$100 sps:$4 sm:$0xff]   ;;  %s175_s6 = sand.u32 1, %s5936_s12  }
 0x1a1   : > { %v3568_v63 = vpop.f32.mrf.mxu0  ;;  %4005 = vmatmul.mubr.bf16.gmra.mxu0 %v5866_v52  ;;  %s7643_s23 = sshll.u32 %s175_s6, 6 }
 0x1a2   : > { %4078 = vmatmul.mubr.bf16.gmra.mxu1 %v5867_v60  ;;  %v3641_v3 = vpop.f32.mrf.mxu1  ;;  %v3569_v4 = vadd.f32 %v3568_v63, %v7235_v50  ;;  %v7443_v5 = vadd.f32 %v3637_v19, %v3565_v61  ;;  %4107 = vmatpush1.bf16.msra.mxu0 %v5868_v25  ;;  %s7655_s12 = scalar_lea.vmem [#allocation2], %s7643_s23  }
 0x1a3   : > { %5048 = vmatpush1.bf16.msra.mxu1 %v5868_v25  ;;  %v3570_v6 = vpop.f32.mrf.mxu0  ;;  %4108 = vmatprep.subr.bf16.mxu0 %v5873_v59 }
 0x1a4   : > { %v3643_v7 = vpop.f32.mrf.mxu1  ;;  %5041 = vmatprep.subr.bf16.mxu1 %v5873_v59  ;;  %v3571_v50 = vadd.f32 %v3570_v6, %v7240_v58  ;;  %v7452_v32 = vadd.f32 %v3641_v3, %v3569_v4  ;;  %4014 = vmatprep.mubr.bf16.mxu0 %v5874_v34 }
 0x1a5   : > { %4087 = vmatprep.mubr.bf16.mxu1 %v5876_v62  ;;  %v3572_v33 = vpop.f32.mrf.mxu0 }
 0x1a6   : > { %v3645_v13 = vpop.f32.mrf.mxu1  ;;  %v3573_v15 = vadd.f32 %v3572_v33, %v7255_v26  ;;  %v7457_v43 = vadd.f32 %v3643_v7, %v3571_v50  ;;  %4109 = vmatpush1.bf16.msra.mxu0 %v5871_v41 }
 0x1a7   : > { %5049 = vmatpush1.bf16.msra.mxu1 %v5871_v41  ;;  %v3574_v24 = vpop.f32.mrf.mxu0  ;;  %4110 = vmatprep.subr.bf16.mxu0 %v5882_v11 }
 0x1a8   : > { %v3647_v58 = vpop.f32.mrf.mxu1  ;;  %5042 = vmatprep.subr.bf16.mxu1 %v5882_v11  ;;  %v3575_v46 = vadd.f32 %v3574_v24, %v7260_v8  ;;  %v7466_v49 = vadd.f32 %v3645_v13, %v3573_v15 }
 0x1a9   : > { %v3578_v26 = vpop.f32.mrf.mxu0  ;;  %4015 = vmatmul.mubr.bf16.gmra.mxu0 %v5878_v39 }
 0x1aa   : > { %4088 = vmatmul.mubr.bf16.gmra.mxu1 %v5879_v14  ;;  %v3651_v27 = vpop.f32.mrf.mxu1  ;;  %v3579_v28 = vadd.f32 %v3578_v26, %v7275_v17  ;;  %v7469_v29 = vadd.f32 %v3647_v58, %v3575_v46  ;;  %4111 = vmatpush1.bf16.msra.mxu0 %v5880_v20 }
 0x1ab   : > { %5050 = vmatpush1.bf16.msra.mxu1 %v5880_v20  ;;  %v3580_v56 = vpop.f32.mrf.mxu0  ;;  %4112 = vmatprep.subr.bf16.mxu0 %v5885_v12 }
 0x1ac   : > { %v3653_v8 = vpop.f32.mrf.mxu1  ;;  %5043 = vmatprep.subr.bf16.mxu1 %v5885_v12  ;;  %v3581_v35 = vadd.f32 %v3580_v56, %v7278_v22  ;;  %v7475_v36 = vadd.f32 %v3651_v27, %v3579_v28  ;;  %4130 = vmatprep.mubr.bf16.mxu0 %v5978_v37 }
 0x1ad   : > { %4150 = vmatprep.mubr.bf16.mxu1 %v5978_v37  ;;  %v3582_v17 = vpop.f32.mrf.mxu0 }
 0x1ae   : > { %v3655_v2 = vpop.f32.mrf.mxu1  ;;  %v3583_v42 = vadd.f32 %v3582_v17, %v7293_v57  ;;  %v7480_v44 = vadd.f32 %v3653_v8, %v3581_v35  ;;  %4113 = vmatpush1.bf16.msra.mxu0 %v5883_v31 }
 0x1af   : > { %5051 = vmatpush1.bf16.msra.mxu1 %v5883_v31  ;;  %v3584_v45 = vpop.f32.mrf.mxu0 }
 0x1b0   : > { %v3657_v10 = vpop.f32.mrf.mxu1  ;;  %v3585_v22 = vadd.f32 %v3584_v45, %v7295_v30  ;;  %v7483_v9 = vadd.f32 %v3655_v2, %v3583_v42 }
 0x1b1   : > { %4131 = vmatmul.mubr.bf16.vlgmr.msra.gmra.mxu0 %v5886_v38 }
 0x1b2   : > { %4151 = vmatmul.mubr.bf16.vlgmr.msra.gmra.mxu1 %v5887_v40  ;;  %v7485_v47 = vadd.f32 %v3657_v10, %v3585_v22  ;;  %4140 = vmatprep.mubr.bf16.mxu0 %v5978_v37 }
 0x1b3   : > { %4160 = vmatprep.mubr.bf16.mxu1 %v5978_v37 }
 0x1b9   : > { %4141 = vmatmul.mubr.bf16.gmra.mxu0 %v5888_v18 }
 0x1ba   : > { %4161 = vmatmul.mubr.bf16.gmra.mxu1 %v5889_v51 }
 0x1d1   : > { %v3694_v57 = vpop.f32.mrf.mxu0 }
 0x1d2   : > { %v3767_v52 = vpop.f32.mrf.mxu1  ;;  %v3695_v60 = vadd.f32 %v3694_v57, %v7395_v21 }
 0x1d3   : > { %v3696_v54 = vpop.f32.mrf.mxu0 }
 0x1d4   : > { %v3769_v25 = vpop.f32.mrf.mxu1  ;;  %v7490_v16 = vadd.f32 %v3767_v52, %v3695_v60  ;;  %v3697_v30 = vadd.f32 %v3696_v54, %v7400_v53 }
 0x1d5   : > { %v3698_v19 = vpop.f32.mrf.mxu0 }
 0x1d6   : > { %v3771_v59 = vpop.f32.mrf.mxu1  ;;  %v7493_v61 = vadd.f32 %v3769_v25, %v3697_v30  ;;  %v3699_v34 = vadd.f32 %v3698_v19, %v7409_v55 }
 0x1d7   : > { %v3700_v62 = vpop.f32.mrf.mxu0 }
 0x1d8   : > { %v3773_v63 = vpop.f32.mrf.mxu1  ;;  %v7496_v3 = vadd.f32 %v3771_v59, %v3699_v34  ;;  %v3701_v4 = vadd.f32 %v3700_v62, %v7414_v1 }
 0x1d9   : > { %v3704_v41 = vpop.f32.mrf.mxu0 }
 0x1da   : > { %v3777_v21 = vpop.f32.mrf.mxu1  ;;  %v7499_v6 = vadd.f32 %v3773_v63, %v3701_v4  ;;  %v3705_v7 = vadd.f32 %v3704_v41, %v7424_v48 }
 0x1db   : > { %v3706_v11 = vpop.f32.mrf.mxu0 }
 0x1dc   : > { %v3779_v53 = vpop.f32.mrf.mxu1  ;;  %v3707_v50 = vadd.f32 %v3706_v11, %v7429_v0  ;;  %v7503_v33 = vadd.f32 %v3777_v21, %v3705_v7 }
 0x1dd   : > { %v3708_v13 = vpop.f32.mrf.mxu0 }
 0x1de   : > { %v3781_v55 = vpop.f32.mrf.mxu1  ;;  %v3709_v39 = vadd.f32 %v3708_v13, %v7438_v23  ;;  %v7506_v14 = vadd.f32 %v3779_v53, %v3707_v50 }
 0x1df   : > { %v3710_v15 = vpop.f32.mrf.mxu0 }
 0x1e0   : > { %v3783_v1 = vpop.f32.mrf.mxu1  ;;  %v3711_v20 = vadd.f32 %v3710_v15, %v7443_v5  ;;  %v7509_v24 = vadd.f32 %v3781_v55, %v3709_v39 }
 0x1e1   : > { %v3714_v58 = vpop.f32.mrf.mxu0 }
 0x1e2   : > { %v3787_v48 = vpop.f32.mrf.mxu1  ;;  %v3715_v12 = vadd.f32 %v3714_v58, %v7452_v32  ;;  %v7512_v46 = vadd.f32 %v3783_v1, %v3711_v20 }
 0x1e3   : > { %v3716_v0 = vpop.f32.mrf.mxu0 }
 0x1e4   : > { %v3789_v26 = vpop.f32.mrf.mxu1  ;;  %v3717_v27 = vadd.f32 %v3716_v0, %v7457_v43  ;;  %v7515_v28 = vadd.f32 %v3787_v48, %v3715_v12 }
 0x1e5   : > { %v3718_v23 = vpop.f32.mrf.mxu0 }
 0x1e6   : > { %v3791_v31 = vpop.f32.mrf.mxu1  ;;  %v3719_v56 = vadd.f32 %v3718_v23, %v7466_v49  ;;  %v7518_v8 = vadd.f32 %v3789_v26, %v3717_v27 }
 0x1e7   : > { %v3720_v5 = vpop.f32.mrf.mxu0 }
 0x1e8   : > { %v3793_v35 = vpop.f32.mrf.mxu1  ;;  %v3721_v37 = vadd.f32 %v3720_v5, %v7469_v29  ;;  %v7521_v17 = vadd.f32 %v3791_v31, %v3719_v56 }
 0x1e9   : > { %v3724_v32 = vpop.f32.mrf.mxu0 }
 0x1ea   : > { %v3797_v2 = vpop.f32.mrf.mxu1  ;;  %v3725_v38 = vadd.f32 %v3724_v32, %v7475_v36  ;;  %v7524_v40 = vadd.f32 %v3793_v35, %v3721_v37 }
 0x1eb   : > { %v3726_v43 = vpop.f32.mrf.mxu0 }
 0x1ec   : > { %v3799_v42 = vpop.f32.mrf.mxu1  ;;  %v3727_v45 = vadd.f32 %v3726_v43, %v7480_v44  ;;  %v7527_v10 = vadd.f32 %v3797_v2, %v3725_v38 }
 0x1ed   : > { %v3728_v49 = vpop.f32.mrf.mxu0 }
 0x1ee   : > { %v3801_v22 = vpop.f32.mrf.mxu1  ;;  %v3729_v18 = vadd.f32 %v3728_v49, %v7483_v9  ;;  %v7530_v51 = vadd.f32 %v3799_v42, %v3727_v45 }
 0x1ef   : > { %v3730_v29 = vpop.f32.mrf.mxu0 }
 0x1f0   : > { %v3803_v57 = vpop.f32.mrf.mxu1  ;;  %v3731_v52 = vadd.f32 %v3730_v29, %v7485_v47  ;;  %v7533_v60 = vadd.f32 %v3801_v22, %v3729_v18 }
 0x1f2   : > { %v7535_v36 = vadd.f32 %v3803_v57, %v3731_v52 }
 0x211   : > { %v3840_v54 = vpop.f32.mrf.mxu0 }
 0x212   : > { %v7537_v25 = vpop.f32.mrf.mxu1 }
 0x213   : > { %v3842_v44 = vpop.f32.mrf.mxu0 }
 0x214   : > { %v7539_v30 = vpop.f32.mrf.mxu1 }
 0x215   : > { %v3844_v19 = vpop.f32.mrf.mxu0 }
 0x216   : > { %v7541_v59 = vpop.f32.mrf.mxu1 }
 0x217   : > { %v3846_v9 = vpop.f32.mrf.mxu0 }
 0x218   : > { %v7543_v34 = vpop.f32.mrf.mxu1 }
 0x219   : > { %v3850_v62 = vpop.f32.mrf.mxu0 }
 0x21a   : > { %v7545_v63 = vpop.f32.mrf.mxu1 }
 0x21b   : > { %v3852_v47 = vpop.f32.mrf.mxu0 }
 0x21c   : > { %v7547_v4 = vpop.f32.mrf.mxu1 }
 0x21d   : > { %v3854_v41 = vpop.f32.mrf.mxu0 }
 0x21e   : > { %v7549_v21 = vpop.f32.mrf.mxu1 }
 0x21f   : > { %v3856_v7 = vpop.f32.mrf.mxu0 }
 0x220   : > { %v7551_v11 = vpop.f32.mrf.mxu1 }
 0x221   : > { %v3860_v53 = vpop.f32.mrf.mxu0 }
 0x222   : > { %v3933_v50 = vpop.f32.mrf.mxu1 }
 0x223   : > { %v3862_v13 = vpop.f32.mrf.mxu0 }
 0x224   : > { %v3935_v55 = vpop.f32.mrf.mxu1 }
 0x225   : > { %v3864_v39 = vpop.f32.mrf.mxu0 }
 0x226   : > { %v7553_v15 = vpop.f32.mrf.mxu1 }
 0x227   : > { %v3866_v1 = vpop.f32.mrf.mxu0 }
 0x228   : > { %v7555_v20 = vpop.f32.mrf.mxu1 }
 0x229   : > { %v3870_v58 = vpop.f32.mrf.mxu0 }
 0x22a   : > { %v7557_v48 = vpop.f32.mrf.mxu1 }
 0x22b   : > { %7735 = vst [vmem:[#allocation3_spill] sm:$0xff] %v7557_v48  ;;  %v3872_v12 = vpop.f32.mrf.mxu0  ;;  %v3853_v48 = vadd.f32 %v3852_v47, %v7506_v14 }
 0x22c   : > { %v7559_v0 = vpop.f32.mrf.mxu1 }
 0x22d   : > { %7736 = vst [vmem:[#allocation4_spill] sm:$0xff] %v7559_v0  ;;  %v7561_v26 = vpop.f32.mrf.mxu0 }
 0x22e   : > { %v7563_v27 = vpop.f32.mrf.mxu1 }
 0x22f   : > { %7737 = vst [vmem:[#allocation5_spill] sm:$0xff] %v7563_v27  ;;  %v7565_v23 = vpop.f32.mrf.mxu0 }
 0x230   : > { %7738 = vst [vmem:[#allocation6_spill] sm:$0xff] %v7565_v23  ;;  %v7567_v31 = vpop.f32.mrf.mxu1 }
 0x231   : > { %7739 = vst [vmem:[#allocation7_spill] sm:$0xff] %v7567_v31 }
 0x251   : > { %v3986_v56 = vpop.f32.mrf.mxu0 }
 0x252   : > { %v7569_v5 = vpop.f32.mrf.mxu1 }
 0x253   : > { %7740 = vst [vmem:[#allocation8_spill] sm:$0xff] %v7569_v5  ;;  %v3988_v35 = vpop.f32.mrf.mxu0  ;;  %v3851_v5 = vadd.f32 %v3850_v62, %v7503_v33  ;;  %v3867_v33 = vadd.f32 %v3866_v1, %v7524_v40 }
 0x254   : > { %v7571_v37 = vpop.f32.mrf.mxu1 }
 0x255   : > { %7741 = vst [vmem:[#allocation9_spill] sm:$0xff] %v7571_v37  ;;  %v3990_v32 = vpop.f32.mrf.mxu0 }
 0x256   : > { %v7573_v2 = vpop.f32.mrf.mxu1 }
 0x257   : > { %7742 = vst [vmem:[#allocation10_spill] sm:$0xff] %v7573_v2  ;;  %v7575_v38 = vpop.f32.mrf.mxu0 }
 0x258   : > { %7743 = vst [vmem:[#allocation11_spill] sm:$0xff] %v7575_v38  ;;  %v7577_v43 = vpop.f32.mrf.mxu1 }
 0x259   : > { %7744 = vst [vmem:[#allocation12_spill] sm:$0xff] %v7577_v43  ;;  %v3996_v42 = vpop.f32.mrf.mxu0 }
 0x25a   : > { %v7579_v45 = vpop.f32.mrf.mxu1 }
 0x25b   : > { %7745 = vst [vmem:[#allocation13_spill] sm:$0xff] %v7579_v45  ;;  %v7581_v49 = vpop.f32.mrf.mxu0  ;;  %v3841_v45 = vadd.f32 %v3840_v54, %v7490_v16 }
 0x25c   : > { %7746 = vst [vmem:[#allocation14_spill] sm:$0xff] %v7581_v49  ;;  %v7583_v22 = vpop.f32.mrf.mxu1  ;;  %v3861_v49 = vadd.f32 %v3860_v53, %v7515_v28 }
 0x25d   : > { %7747 = vst [vmem:[#allocation15_spill] sm:$0xff] %v7583_v22  ;;  %v7585_v18 = vpop.f32.mrf.mxu0  ;;  %v3843_v22 = vadd.f32 %v3842_v44, %v7493_v61  ;;  %v3914_v16 = vadd.f32 %v7537_v25, %v3841_v45  ;;  %v3855_v61 = vadd.f32 %v3854_v41, %v7509_v24 }
 0x25e   : > { %7748 = vst [vmem:[#allocation16_spill] sm:$0xff] %v7585_v18  ;;  %v7587_v29 = vpop.f32.mrf.mxu1  ;;  %v3845_v18 = vadd.f32 %v3844_v19, %v7496_v3  ;;  %v3857_v3 = vadd.f32 %v3856_v7, %v7512_v46  ;;  %v3934_v28 = vadd.f32 %v3933_v50, %v3861_v49  ;;  %v3924_v46 = vadd.f32 %v7545_v63, %v3851_v5  ;;  %v7759_v49 = vld [vmem:[#allocation5_spill] sm:$0xff] }
 0x25f   : > { %7749 = vst [vmem:[#allocation17_spill] sm:$0xff] %v7587_v29  ;;  %v7589_v57 = vpop.f32.mrf.mxu0  ;;  %v3916_v54 = vadd.f32 %v7539_v30, %v3843_v22  ;;  %v3987_v25 = vadd.f32 %v3986_v56, %v3914_v16  ;;  %v3926_v30 = vadd.f32 %v7547_v4, %v3853_v48  ;;  %v3928_v40 = vadd.f32 %v7549_v21, %v3855_v61  ;;  %v7753_v4 = vld [vmem:[#allocation6_spill] sm:$0xff]  ;;  %v7756_v48 = vld [vmem:[#allocation4_spill] sm:$0xff] }
 0x260   : > { %7750 = vst [vmem:[#allocation18_spill] sm:$0xff] %v7589_v57  ;;  %v7591_v52 = vpop.f32.mrf.mxu1  ;;  %v3847_v57 = vadd.f32 %v3846_v9, %v7499_v6  ;;  %v3865_v6 = vadd.f32 %v3864_v39, %v7521_v17  ;;  %v3871_v9 = vadd.f32 %v3870_v58, %v7527_v10  ;;  %v3930_v41 = vadd.f32 %v7551_v11, %v3857_v3  ;;  %v7755_v39 = vld [vmem:[#allocation8_spill] sm:$0xff]  ;;  %v7762_v3 = vld [vmem:[#allocation10_spill] sm:$0xff] }
 0x261   : > { %7751 = vst [vmem:[#allocation19_spill] sm:$0xff] %v7591_v52  ;;  %v4006_v2 = vpop.f32.mrf.mxu0  ;;  %v3863_v52 = vadd.f32 %v3862_v13, %v7518_v8  ;;  %v3918_v8 = vadd.f32 %v7541_v59, %v3845_v18  ;;  %v3873_v59 = vadd.f32 %v3872_v12, %v7530_v51  ;;  %v3989_v7 = vadd.f32 %v3988_v35, %v3916_v54  ;;  %v7757_v12 = vld [vmem:[#allocation11_spill] sm:$0xff] }
 0x262   : > { %v4079_v31 = vpop.f32.mrf.mxu1  ;;  %v4007_v62 = vadd.f32 %v4006_v2, %v3934_v28  ;;  %v3920_v24 = vadd.f32 %v7543_v34, %v3847_v57  ;;  %v3938_v10 = vadd.f32 %v7553_v15, %v3865_v6  ;;  %v3940_v34 = vadd.f32 %v7555_v20, %v3867_v33  ;;  %v7760_v18 = vld [vmem:[#allocation7_spill] sm:$0xff]  ;;  %v7764_v6 = vld [vmem:[#allocation13_spill] sm:$0xff] }
 0x263   : > { %v4008_v27 = vpop.f32.mrf.mxu0  ;;  %v3936_v19 = vadd.f32 %v3935_v55, %v3863_v52  ;;  %v3875_v63 = vadd.f32 %v7561_v26, %v7533_v60  ;;  %v3877_v51 = vadd.f32 %v7753_v4, %v7535_v36  ;;  %v7754_v55 = vld [vmem:[#allocation3_spill] sm:$0xff]  ;;  %v4060_v11 = vadd.f32 %v7755_v39, %v3987_v25  ;;  %v7758_v26 = vld [vmem:[#allocation9_spill] sm:$0xff] }
 0x264   : > { %v4081_v37 = vpop.f32.mrf.mxu1  ;;  %v3944_v21 = vadd.f32 %v7754_v55, %v3871_v9  ;;  %v3991_v1 = vadd.f32 %v3990_v32, %v3918_v8  ;;  %v4080_v58 = vadd.f32 %v4079_v31, %v4007_v62  ;;  %v3946_v15 = vadd.f32 %v7756_v48, %v3873_v59  ;;  %v7761_v32 = vld [vmem:[#allocation14_spill] sm:$0xff]  ;;  %v7763_v8 = vld [vmem:[#allocation12_spill] sm:$0xff] }
 0x265   : > { %v4010_v43 = vpop.f32.mrf.mxu0  ;;  %v4009_v53 = vadd.f32 %v4008_v27, %v3936_v19  ;;  %v3993_v27 = vadd.f32 %v7757_v12, %v3920_v24  ;;  %v3997_v20 = vadd.f32 %v3996_v42, %v3924_v46  ;;  %v4062_v36 = vadd.f32 %v7758_v26, %v3989_v7  ;;  %v7766_v7 = vld [vmem:[#allocation15_spill] sm:$0xff] }
 0x266   : > { %v7593_v38 = vpop.f32.mrf.mxu1  ;;  %v4011_v56 = vadd.f32 %v4010_v43, %v3938_v10  ;;  %v3948_v22 = vadd.f32 %v7759_v49, %v3875_v63  ;;  %v3950_v57 = vadd.f32 %v7760_v18, %v3877_v51  ;;  %v3999_v31 = vadd.f32 %v7761_v32, %v3926_v30  ;;  %v7767_v51 = vld [vmem:[#allocation16_spill] sm:$0xff] }
 0x267   : > { %7752 = vst [vmem:[#allocation20_spill] sm:$0xff] %v7593_v38  ;;  %v4012_v29 = vpop.f32.mrf.mxu0  ;;  %v4082_v35 = vadd.f32 %v4081_v37, %v4009_v53  ;;  %v4064_v42 = vadd.f32 %v7762_v3, %v3991_v1  ;;  %v4066_v37 = vadd.f32 %v7763_v8, %v3993_v27  ;;  %v4070_v33 = vadd.f32 %v7764_v6, %v3997_v20 }
 0x268   : > { %v7599_v0 = vpop.f32.mrf.mxu1  ;;  %v4013_v52 = vadd.f32 %v4012_v29, %v3940_v34  ;;  %v4072_v53 = vadd.f32 %v7766_v7, %v3999_v31  ;;  %v4001_v55 = vadd.f32 %v7767_v51, %v3928_v40 }
 0x269   : > { %v4016_v38 = vpop.f32.mrf.mxu0 }
 0x26a   : > { %v7605_v23 = vpop.f32.mrf.mxu1  ;;  %v4017_v43 = vadd.f32 %v4016_v38, %v3944_v21  ;;  %v4086_v38 = vadd.f32 %v7599_v0, %v4013_v52 }
 0x26b   : > { %v4018_v44 = vpop.f32.mrf.mxu0 }
 0x26c   : > { %v7614_v14 = vpop.f32.mrf.mxu1  ;;  %v4019_v25 = vadd.f32 %v4018_v44, %v3946_v15  ;;  %v4090_v21 = vadd.f32 %v7605_v23, %v4017_v43 }
 0x26d   : > { %v4020_v47 = vpop.f32.mrf.mxu0 }
 0x26e   : > { %v7621_v17 = vpop.f32.mrf.mxu1  ;;  %v7765_v19 = vld [vmem:[#allocation20_spill] sm:$0xff]  ;;  %v4092_v0 = vadd.f32 %v7614_v14, %v4019_v25  ;;  %v7769_v14 = vld [vmem:[#allocation17_spill] sm:$0xff] }
 0x26f   : > { %v4022_v50 = vpop.f32.mrf.mxu0  ;;  %v4084_v9 = vadd.f32 %v7765_v19, %v4011_v56 }
 0x270   : > { %v7631_v13 = vpop.f32.mrf.mxu1  ;;  %v4023_v20 = vadd.f32 %v4022_v50, %v3950_v57  ;;  %v4074_v50 = vadd.f32 %v7769_v14, %v4001_v55 }
 0x271   : > { %v4132_v5 = vpop.f32.mrf.mxu0 }
 0x272   : > { %v4152_v60 = vpop.f32.mrf.mxu1  ;;  %v4133_v2 = vadd.f32 %v4132_v5, %v4060_v11  ;;  %v7768_v11 = vld [vmem:[#allocation18_spill] sm:$0xff]  ;;  %v4096_v3 = vadd.f32 %v7631_v13, %v4023_v20 }
 0x273   : > { %v4153_v45 = vadd.f32 %v4152_v60, %v4080_v58  ;;  %v4134_v16 = vpop.f32.mrf.mxu0  ;;  %v4003_v1 = vadd.f32 %v7768_v11, %v3930_v41  ;;  %v4021_v58 = vadd.f32 %v4020_v47, %v3948_v22 }
 0x274   : > { %v4154_v61 = vpop.f32.mrf.mxu1  ;;  %v4135_v28 = vadd.f32 %v4134_v16, %v4062_v36  ;;  %v4171_v46 = vmax.f32 %v4133_v2, 0.0  ;;  %v7770_v16 = vld [vmem:[#allocation19_spill] sm:$0xff] }
 0x275   : > { %v4155_v54 = vadd.f32 %v4154_v61, %v4082_v35  ;;  %v4136_v62 = vpop.f32.mrf.mxu0  ;;  %v4179_v29 = vmax.f32 %v4153_v45, 0.0  ;;  %v4094_v2 = vadd.f32 %v7621_v17, %v4021_v58  ;;  %v4076_v61 = vadd.f32 %v7770_v16, %v4003_v1 }
 0x276   : > { %v4156_v24 = vpop.f32.mrf.mxu1  ;;  %v4172_v30 = vmax.f32 %v4135_v28, 0.0  ;;  %v4137_v10 = vadd.f32 %v4136_v62, %v4064_v42 }
 0x277   : > { %v4180_v59 = vmax.f32 %v4155_v54, 0.0  ;;  %v4157_v34 = vadd.f32 %v4156_v24, %v4084_v9  ;;  %v4138_v63 = vpop.f32.mrf.mxu0 }
 0x278   : > { %v4158_v4 = vpop.f32.mrf.mxu1  ;;  %v5023_v44 = vpack.c.bf16 %v4172_v30, %v4171_v46  ;;  %v4139_v48 = vadd.f32 %v4138_v63, %v4066_v37  ;;  %v4173_v56 = vmax.f32 %v4137_v10, 0.0 }
 0x279   : > { %v5027_v39 = vpack.c.bf16 %v4180_v59, %v4179_v29  ;;  %v4159_v15 = vadd.f32 %v4158_v4, %v4086_v38  ;;  %v4142_v12 = vpop.f32.mrf.mxu0  ;;  %v4181_v5 = vmax.f32 %v4157_v34, 0.0 }
 0x27a   : > { %v4162_v27 = vpop.f32.mrf.mxu1  ;;  %4235 = vst [vmem:[%s7655_s12] sm:$0xff] %v5023_v44  ;;  %v4143_v40 = vadd.f32 %v4142_v12, %v4070_v33  ;;  %v4174_v60 = vmax.f32 %v4139_v48, 0.0 }
 0x27b   : > { %4239 = vst [vmem:[%s7655_s12 + $0x20] sm:$0xff] %v5027_v39  ;;  %v4163_v23 = vadd.f32 %v4162_v27, %v4090_v21  ;;  %v4182_v41 = vmax.f32 %v4159_v15, 0.0  ;;  %v4144_v47 = vpop.f32.mrf.mxu0 }
 0x27c   : > { %v4164_v26 = vpop.f32.mrf.mxu1  ;;  %v4145_v36 = vadd.f32 %v4144_v47, %v4072_v53  ;;  %v5024_v45 = vpack.c.bf16 %v4174_v60, %v4173_v56  ;;  %v4175_v57 = vmax.f32 %v4143_v40, 0.0 }
 0x27d   : > { %v4165_v35 = vadd.f32 %v4164_v26, %v4092_v0  ;;  %v5028_v49 = vpack.c.bf16 %v4182_v41, %v4181_v5  ;;  %v4146_v22 = vpop.f32.mrf.mxu0  ;;  %v4183_v32 = vmax.f32 %v4163_v23, 0.0 }
 0x27e   : > { %v4166_v18 = vpop.f32.mrf.mxu1  ;;  %v4176_v31 = vmax.f32 %v4145_v36, 0.0  ;;  %4236 = vst [vmem:[%s7655_s12 + $0x8] sm:$0xff] %v5024_v45  ;;  %v4147_v42 = vadd.f32 %v4146_v22, %v4074_v50 }
 0x27f   : > { %v4184_v52 = vmax.f32 %v4165_v35, 0.0  ;;  %4240 = vst [vmem:[%s7655_s12 + $0x28] sm:$0xff] %v5028_v49  ;;  %v4167_v43 = vadd.f32 %v4166_v18, %v4094_v2  ;;  %v4148_v17 = vpop.f32.mrf.mxu0 }
 0x280   : > { %v4168_v28 = vpop.f32.mrf.mxu1  ;;  %v5025_v54 = vpack.c.bf16 %v4176_v31, %v4175_v57  ;;  %v4149_v37 = vadd.f32 %v4148_v17, %v4076_v61  ;;  %v4177_v33 = vmax.f32 %v4147_v42, 0.0 }
 0x281   : > { %v5029_v8 = vpack.c.bf16 %v4184_v52, %v4183_v32  ;;  %v4169_v6 = vadd.f32 %v4168_v28, %v4096_v3  ;;  %v4185_v19 = vmax.f32 %v4167_v43, 0.0 }
 0x282   : > { %4237 = vst [vmem:[%s7655_s12 + $0x10] sm:$0xff] %v5025_v54  ;;  %v4178_v9 = vmax.f32 %v4149_v37, 0.0 }
 0x283   : > { %4241 = vst [vmem:[%s7655_s12 + $0x30] sm:$0xff] %v5029_v8  ;;  %v4186_v25 = vmax.f32 %v4169_v6, 0.0  ;;  %4249 = sbr.rel (!%p6024_p4) target bundleno = 687 (0x2af), region = 36 }
 0x284   : > { %v5026_v62 = vpack.c.bf16 %v4178_v9, %v4177_v33 }
 0x285   : > { %v5030_v13 = vpack.c.bf16 %v4186_v25, %v4185_v19 }
 0x286   : > { %4238 = vst [vmem:[%s7655_s12 + $0x18] sm:$0xff] %v5026_v62 }
 0x287   : > { %4242 = vst [vmem:[%s7655_s12 + $0x38] sm:$0xff] %v5030_v13 }
 0x288   : > { %s7778_s24 = smov (!%p4252_p8, %s4251_s24), 8 }
 0x289   : > { %s5031_s29 = sshll.u32 %s7778_s24, 7 }
 0x28a   : > { %p5011_p9 = scmp.eq.s32.totalorder %s5031_s29, 0 }
 0x28b   : > { %s7682_s30 = sshrl.u32 (!%p5011_p9), %s7778_s24, 3 }
 0x28c   : > { %4262 = sbr.rel (%p5011_p9) target bundleno = 687 (0x2af), region = 40  ;;  %p5012_p10 = scmp.le.s32.totalorder (!%p5011_p9), %s7682_s30, 0 }
 0x291   : > { %4445 = sbr.rel (%p5012_p10) target bundleno = 670 (0x29e), region = 116  ;;  %s7771_s15 = smov (!%p5012_p10), %s7676_s28 }
 0x292   : > { %s7772_s20 = smov (!%p5012_p10), %s7655_s12  ;;  %s7691_s14 = smov (!%p5012_p10), 0  }
 0x293   : > { %s7693_s4 = smov (!%p5012_p10), 0  }
 0x296 LB: >> { %v4339_v24 = vld [vmem:[%s5952_s20] sm:$0xff]  ;;  %v4341_v46 = vld [vmem:[%s5952_s20 + $0x8] sm:$0xff]  ;;  %v4343_v29 = vld [vmem:[%s5952_s20 + $0x10] sm:$0xff]  ;;  %s4355_s5 = sadd.s32 1, %s5956_s14  ;;  %s4333_s4 = sadd.s32 1, %s5960_s4   ;;  %s5960_s4 = sphi %s7693_s4, %s4333_s4   ;;  %s5956_s14 = sphi %s7691_s14, %s7773_s14   ;;  %s5952_s20 = sphi %s7772_s20, %s4360_s20   ;;  %s5948_s15 = sphi %s7771_s15, %s4361_s15  }
 0x297   : >> { %4340 = vst [vmem:[%s5948_s15] sm:$0xff] %v4339_v24  ;;  %4342 = vst [vmem:[%s5948_s15 + $0x8] sm:$0xff] %v4341_v46  ;;  %v4345_v30 = vld [vmem:[%s5952_s20 + $0x18] sm:$0xff]  ;;  %v4347_v59 = vld [vmem:[%s5952_s20 + $0x20] sm:$0xff]  ;;  %p4356_p11 = scmp.ge.s32.totalorder %s4355_s5, %s7682_s30  ;;  %p4332_p12 = scmp.ge.s32.totalorder %s4333_s4, %s7682_s30 }
 0x298   : >> { %4344 = vst [vmem:[%s5948_s15 + $0x10] sm:$0xff] %v4343_v29  ;;  %v4349_v7 = vld [vmem:[%s5952_s20 + $0x28] sm:$0xff]  ;;  %4346 = vst [vmem:[%s5948_s15 + $0x18] sm:$0xff] %v4345_v30  ;;  %v4351_v53 = vld [vmem:[%s5952_s20 + $0x30] sm:$0xff] }
 0x299   : >> { %4348 = vst [vmem:[%s5948_s15 + $0x20] sm:$0xff] %v4347_v59  ;;  %4350 = vst [vmem:[%s5948_s15 + $0x28] sm:$0xff] %v4349_v7  ;;  %v4353_v38 = vld [vmem:[%s5952_s20 + $0x38] sm:$0xff]  ;;  %s7780_s5 = smov (%p4356_p11, %s4355_s5), 0  ;;  %4335 = sbr.rel (!%p4332_p12) target bundleno = 662 (0x296), region = 122 }
 0x29a   : >> { %4352 = vst [vmem:[%s5948_s15 + $0x30] sm:$0xff] %v4351_v53  ;;  %4354 = vst [vmem:[%s5948_s15 + $0x38] sm:$0xff] %v4353_v38  ;;  %s5013_s7 = sshll.u32 %s7780_s5, 6  ;;  %s7773_s14 = smov %s7780_s5 }
 0x29b   : >> { %s4360_s20 = scalar_lea.vmem %s7655_s12, %s5013_s7 [#allocation2]   ;;  %s4361_s15 = scalar_lea.vmem %s7676_s28, %s5013_s7  }
 0x29e PF: > { %s7712_s8 = sand.u32 7, %s7778_s24   ;;  %s5034_s9 = sshll.u32 %s7682_s30, 6 }
 0x29f   : > { %s4366_s10 = scalar_lea.vmem %s7655_s12, %s5034_s9 [#allocation2]   ;;  %s4368_s11 = scalar_lea.vmem %s7676_s28, %s5034_s9  }
 0x2a0   : > { %p5018_p13 = scmp.le.s32.totalorder %s7712_s8, 0 }
 0x2a1   : > { %s5962_s17 = smov (!%p5018_p13), %s4368_s11   ;;  %s5966_s18 = smov (!%p5018_p13), %s4366_s10  }
 0x2a2   : > { %4459 = sbr.rel (%p5018_p13) target bundleno = 687 (0x2af), region = 127  ;;  %s5970_s21 = smov (!%p5018_p13), 0  }
 0x2a3   : > { %s5974_s22 = smov (!%p5018_p13), 0  }
 0x2a7 LB: >> { %v4378_v10 = vld [vmem:[%s5968_s18] sm:$0xff]  ;;  %s4380_s6 = sadd.s32 1, %s5972_s21  ;;  %s4372_s22 = sadd.s32 1, %s5976_s22   ;;  %s5976_s22 = sphi %s5974_s22, %s4372_s22   ;;  %s5972_s21 = sphi %s5970_s21, %s5971_s21   ;;  %s5968_s18 = sphi %s5966_s18, %s4385_s18   ;;  %s5964_s17 = sphi %s5962_s17, %s4386_s17  }
 0x2a8   : >> { %4379 = vst [vmem:[%s5964_s17] sm:$0xff] %v4378_v10  ;;  %p4381_p0 = scmp.ge.s32.totalorder %s4380_s6, %s7712_s8  ;;  %p4371_p1 = scmp.ge.s32.totalorder %s4372_s22, %s7712_s8 }
 0x2aa   : >> { %s7782_s6 = smov (%p4381_p0, %s4380_s6), 0  ;;  %4374 = sbr.rel (!%p4371_p1) target bundleno = 679 (0x2a7), region = 133 }
 0x2ab   : >> { %s5019_s23 = sshll.u32 %s7782_s6, 3  ;;  %s5971_s21 = smov %s7782_s6  }
 0x2ac   : >> { %s4385_s18 = scalar_lea.vmem %s4366_s10, %s5019_s23 [#allocation2]   ;;  %s4386_s17 = scalar_lea.vmem %s4368_s11, %s5019_s23  }
 0x2af PF: > { %p10_p2 = scmp.ge.s32.totalorder %s6014_s16, 4   ;;  %s7774_s12 = smov %s5940_s13 }
 0x2b0   : > { %s7775_s13 = smov %s6022_s19  ;;  %s7776_s14 = smov %s6014_s16 }
 0x2b1   :  { %12 = sbr.rel (!%p10_p2) target bundleno = 2 (0x2), region = 144 }

// kernel: _lambda_.12
= control target key start
LH: loop header
LB: loop body
LE: loop exit
PB: predicated region body
PF: predicated region fallthrough
CT: control target
= control target key end

     0   :  { %s5870_s12 = smov 0   ;;  %s5872_s13 = smov 0   ;;  %s7337_s0 = inlined_call_operand.vmem [shape: bf16[18,2304], index: 0, kind: input, shape index: {}]   ;;  %s7338_s1 = inlined_call_operand.vmem [shape: bf16[2304,384], index: 1, kind: input, shape index: {}]   ;;  %s7339_s2 = inlined_call_operand.vmem [shape: f32[1,384], index: 2, kind: input, shape index: {}]   ;;  %s7340_s3 = inlined_call_operand.vmem [shape: bf16[18,384], index: 3, kind: output, shape index: {}]  }
   0x1   :  { %s5874_s14 = smov 0  }
   0x2 LB: > { %s5883_s15 = sadd.s32 4294967295, %s5784_s14   ;;  %s5885_s16 = sadd.s32 1, %s5784_s14   ;;  %s5784_s14 = sphi %s5874_s14, %s7344_s14   ;;  %s5780_s13 = sphi %s5872_s13, %s7343_s13   ;;  %s5776_s12 = sphi %s5870_s12, %s7342_s12  }
   0x3   : > { %s85_s17 = ssub.s32 %s5784_s14, %s5885_s16  ;;  %s88_s18 = sadd.s32 1, %s5780_s13 }
   0x4   : > { %p86_p0 = scmp.eq.s32.totalorder %s85_s17, 0  ;;  %p98_p1 = scmp.ne.s32.totalorder %s5780_s13, %s5776_s12 }
   0x5   : > { %p99_p2 = scmp.eq.s32.totalorder %s5883_s15, 1  ;;  %p4248_p3 = scmp.ge.s32.totalorder %s5784_s14, 1 }
   0x6   : > { %s5893_s19 = scalar_select %p86_p0, %s5780_s13, %s88_s18  }
   0x7   : > { %p5895_p4 = por %p99_p2, %p98_p1  ;;  %p149_p5 = scmp.lt.s32.totalorder %s5784_s14, 3 }
   0x9   : > { %p150_p6 = pnand %p4248_p3, %p149_p5 }
   0xa   : > { %s5990_s14 = sshll.u32 (!%p150_p6), %s5883_s15, 1  ;;  %s175_s29 = sand.u32 (!%p150_p6), 1, %s5776_s12  }
   0xb   : > { %153 = sbr.rel (%p150_p6) target bundleno = 739 (0x2e3), region = 32  ;;  %p184_p7 = scmp.lt.s32.totalorder (!%p150_p6), %s5990_s14, 2 }
   0xc   : > { %s4923_s30 = smul.u32 (!%p150_p6), 24, %s175_s29 }
  0x10   : > { %v5078_v0 = vld [vmem:[%s7338_s1 + $0xac] ss:$12 sps:$4 sm:$0xff]   ;;  %v5082_v2 = vld [vmem:[%s7338_s1 + $0xa8] ss:$12 sps:$4 sm:$0xff]   ;;  %v5088_v6 = vld [vmem:[%s7338_s1 + $0x90] ss:$12 sps:$4 sm:$0xff]  }
  0x11   : > { %v5080_v1 = vld [vmem:[%s7338_s1 + $0x22c] ss:$12 sps:$4 sm:$0xff]   ;;  %3207 = vmatprep.subr.bf16.mxu0 %v5078_v0  ;;  %v5083_v3 = vld [vmem:[%s7338_s1 + $0x228] ss:$12 sps:$4 sm:$0xff]   ;;  %v5089_v7 = vld [vmem:[%s7338_s1 + $0x210] ss:$12 sps:$4 sm:$0xff]  }
  0x12   : > { %3250 = vmatprep.subr.bf16.mxu1 %v5080_v1  ;;  %v5084_v4 = vld [vmem:[%s7338_s1 + $0x94] ss:$12 sps:$4 sm:$0xff]   ;;  %3208 = vmatpush1.bf16.msra.mxu0 %v5082_v2  ;;  %v5090_v8 = vld [vmem:[%s7338_s1 + $0x7c] ss:$12 sps:$4 sm:$0xff]   ;;  %v5094_v10 = vld [vmem:[%s7338_s1 + $0x78] ss:$12 sps:$4 sm:$0xff]  }
  0x13   : > { %3251 = vmatpush1.bf16.msra.mxu1 %v5083_v3  ;;  %v5086_v5 = vld [vmem:[%s7338_s1 + $0x214] ss:$12 sps:$4 sm:$0xff]   ;;  %3209 = vmatprep.subr.bf16.mxu0 %v5084_v4  ;;  %v5092_v9 = vld [vmem:[%s7338_s1 + $0x1fc] ss:$12 sps:$4 sm:$0xff]   ;;  %v5095_v11 = vld [vmem:[%s7338_s1 + $0x1f8] ss:$12 sps:$4 sm:$0xff]  }
  0x14   : > { %3252 = vmatprep.subr.bf16.mxu1 %v5086_v5  ;;  %v5096_v12 = vld [vmem:[%s7338_s1 + $0x64] ss:$12 sps:$4 sm:$0xff]   ;;  %v5100_v14 = vld [vmem:[%s7338_s1 + $0x60] ss:$12 sps:$4 sm:$0xff]   ;;  %v5106_v18 = vld [vmem:[%s7338_s1 + $0x48] ss:$12 sps:$4 sm:$0xff]  }
  0x15   : > { %v5098_v13 = vld [vmem:[%s7338_s1 + $0x1e4] ss:$12 sps:$4 sm:$0xff]   ;;  %v5101_v15 = vld [vmem:[%s7338_s1 + $0x1e0] ss:$12 sps:$4 sm:$0xff]   ;;  %v5107_v19 = vld [vmem:[%s7338_s1 + $0x1c8] ss:$12 sps:$4 sm:$0xff]  }
  0x16   : > { %3210 = vmatpush1.bf16.msra.mxu0 %v5088_v6  ;;  %v5102_v16 = vld [vmem:[%s7338_s1 + $0x4c] ss:$12 sps:$4 sm:$0xff]   ;;  %v5108_v20 = vld [vmem:[%s7338_s1 + $0x34] ss:$12 sps:$4 sm:$0xff]   ;;  %v5112_v22 = vld [vmem:[%s7338_s1 + $0x30] ss:$12 sps:$4 sm:$0xff]  }
  0x17   : > { %3253 = vmatpush1.bf16.msra.mxu1 %v5089_v7  ;;  %3211 = vmatprep.subr.bf16.mxu0 %v5090_v8  ;;  %v5104_v17 = vld [vmem:[%s7338_s1 + $0x1cc] ss:$12 sps:$4 sm:$0xff]   ;;  %v5110_v21 = vld [vmem:[%s7338_s1 + $0x1b4] ss:$12 sps:$4 sm:$0xff]   ;;  %v5113_v23 = vld [vmem:[%s7338_s1 + $0x1b0] ss:$12 sps:$4 sm:$0xff]  }
  0x18   : > { %3254 = vmatprep.subr.bf16.mxu1 %v5092_v9  ;;  %v5114_v24 = vld [vmem:[%s7338_s1 + $0x1c] ss:$12 sps:$4 sm:$0xff]   ;;  %v5118_v26 = vld [vmem:[%s7338_s1 + $0x18] ss:$12 sps:$4 sm:$0xff]   ;;  %v5124_v30 = vld [vmem:[%s7338_s1] ss:$12 sps:$4 sm:$0xff]  }
  0x19   : > { %v5116_v25 = vld [vmem:[%s7338_s1 + $0x19c] ss:$12 sps:$4 sm:$0xff]   ;;  %v5119_v27 = vld [vmem:[%s7338_s1 + $0x198] ss:$12 sps:$4 sm:$0xff]   ;;  %v5125_v31 = vld [vmem:[%s7338_s1 + $0x180] ss:$12 sps:$4 sm:$0xff]  }
  0x1a   : > { %3212 = vmatpush1.bf16.msra.mxu0 %v5094_v10  ;;  %v5120_v28 = vld [vmem:[%s7338_s1 + $0x4] ss:$12 sps:$4 sm:$0xff]   ;;  %v5126_v32 = vld [vmem:[%s7338_s1 + $0x16c] ss:$12 sps:$4 sm:$0xff]   ;;  %v5130_v34 = vld [vmem:[%s7338_s1 + $0x168] ss:$12 sps:$4 sm:$0xff]  }
  0x1b   : > { %3255 = vmatpush1.bf16.msra.mxu1 %v5095_v11  ;;  %3213 = vmatprep.subr.bf16.mxu0 %v5096_v12  ;;  %v5122_v29 = vld [vmem:[%s7338_s1 + $0x184] ss:$12 sps:$4 sm:$0xff]   ;;  %v5128_v33 = vld [vmem:[%s7338_s1 + $0x2ec] ss:$12 sps:$4 sm:$0xff]   ;;  %v5131_v35 = vld [vmem:[%s7338_s1 + $0x2e8] ss:$12 sps:$4 sm:$0xff]  }
  0x1c   : > { %3256 = vmatprep.subr.bf16.mxu1 %v5098_v13  ;;  %v5132_v36 = vld [vmem:[%s7338_s1 + $0x154] ss:$12 sps:$4 sm:$0xff]   ;;  %s185_s6 = scalar_select %p184_p7, %s5990_s14, 2  ;;  %v5136_v38 = vld [vmem:[%s7338_s1 + $0x150] ss:$12 sps:$4 sm:$0xff]  }
  0x1d   : > { %v5134_v37 = vld [vmem:[%s7338_s1 + $0x2d4] ss:$12 sps:$4 sm:$0xff]   ;;  %v5137_v39 = vld [vmem:[%s7338_s1 + $0x2d0] ss:$12 sps:$4 sm:$0xff]   ;;  %v5142_v42 = vld [vmem:[%s7338_s1 + $0x138] ss:$12 sps:$4 sm:$0xff]  }
  0x1e   : > { %3214 = vmatpush1.bf16.msra.mxu0 %v5100_v14  ;;  %v5138_v40 = vld [vmem:[%s7338_s1 + $0x13c] ss:$12 sps:$4 sm:$0xff]   ;;  %s4924_s22 = smul.u32 72, %s185_s6  ;;  %v5143_v43 = vld [vmem:[%s7338_s1 + $0x2b8] ss:$12 sps:$4 sm:$0xff]   ;;  %s4001_s12 = ssub.s32 (%p5895_p4), 3, %s5990_s14 }
  0x1f   : > { %3257 = vmatpush1.bf16.msra.mxu1 %v5101_v15  ;;  %3215 = vmatprep.subr.bf16.mxu0 %v5102_v16  ;;  %v5140_v41 = vld [vmem:[%s7338_s1 + $0x2bc] ss:$12 sps:$4 sm:$0xff]   ;;  %v5144_v44 = vld [vmem:[%s7338_s1 + $0x124] ss:$12 sps:$4 sm:$0xff]   ;;  %v5148_v46 = vld [vmem:[%s7338_s1 + $0x120] ss:$12 sps:$4 sm:$0xff]  }
  0x20   : > { %3258 = vmatprep.subr.bf16.mxu1 %v5104_v17  ;;  %s6042_s6 = scalar_lea.vmem %s7337_s0, %s4924_s22  ;;  %v5146_v45 = vld [vmem:[%s7338_s1 + $0x2a4] ss:$12 sps:$4 sm:$0xff]   ;;  %v5149_v47 = vld [vmem:[%s7338_s1 + $0x2a0] ss:$12 sps:$4 sm:$0xff]   ;;  %v5154_v52 = vld [vmem:[%s7338_s1 + $0x108] ss:$12 sps:$4 sm:$0xff]  }
  0x21   : > { %v5150_v48 = vld [vmem:[%s7338_s1 + $0x10c] ss:$12 sps:$4 sm:$0xff]   ;;  %v5155_v53 = vld [vmem:[%s7338_s1 + $0x288] ss:$12 sps:$4 sm:$0xff]   ;;  %v5160_v56 = vld [vmem:[%s7338_s1 + $0xf0] ss:$12 sps:$4 sm:$0xff]  }
  0x22   : > { %3216 = vmatpush1.bf16.msra.mxu0 %v5106_v18  ;;  %v5176_v49 = vld [vmem:[%s6042_s6 + $0x4] ss:$72 sps:$4 sm:$0xff]   ;;  %v5156_v54 = vld [vmem:[%s7338_s1 + $0xf4] ss:$12 sps:$4 sm:$0xff]   ;;  %v5161_v57 = vld [vmem:[%s7338_s1 + $0x270] ss:$12 sps:$4 sm:$0xff]  }
  0x23   : > { %3259 = vmatpush1.bf16.msra.mxu1 %v5107_v19  ;;  %3217 = vmatprep.subr.bf16.mxu0 %v5108_v20  ;;  %v5152_v50 = vld [vmem:[%s7338_s1 + $0x28c] ss:$12 sps:$4 sm:$0xff]   ;;  %v5158_v55 = vld [vmem:[%s7338_s1 + $0x274] ss:$12 sps:$4 sm:$0xff]   ;;  %v5162_v58 = vld [vmem:[%s7338_s1 + $0xdc] ss:$12 sps:$4 sm:$0xff]  }
  0x24   : > { %3260 = vmatprep.subr.bf16.mxu1 %v5110_v21  ;;  %v5179_v51 = vld [vmem:[%s6042_s6 + $0xc] ss:$72 sps:$4 sm:$0xff]   ;;  %3239 = vmatprep.mubr.bf16.mxu0 %v5176_v49  ;;  %v5164_v59 = vld [vmem:[%s7338_s1 + $0x25c] ss:$12 sps:$4 sm:$0xff]   ;;  %v5166_v60 = vld [vmem:[%s7338_s1 + $0xd8] ss:$12 sps:$4 sm:$0xff]  }
  0x25   : > { %3282 = vmatprep.mubr.bf16.mxu1 %v5179_v51  ;;  %v5167_v61 = vld [vmem:[%s7338_s1 + $0x258] ss:$12 sps:$4 sm:$0xff]   ;;  %v5172_v0 = vld [vmem:[%s7338_s1 + $0xc0] ss:$12 sps:$4 sm:$0xff]   ;;  %v5177_v5 = vld [vmem:[%s6042_s6 + $0x8] ss:$72 sps:$4 sm:$0xff]  }
  0x26   : > { %3218 = vmatpush1.bf16.msra.mxu0 %v5112_v22  ;;  %v5168_v62 = vld [vmem:[%s7338_s1 + $0xc4] ss:$12 sps:$4 sm:$0xff]   ;;  %v5173_v1 = vld [vmem:[%s7338_s1 + $0x240] ss:$12 sps:$4 sm:$0xff]   ;;  %v5180_v6 = vld [vmem:[%s7338_s1 + $0x3a8] ss:$12 sps:$4 sm:$0xff]  }
  0x27   : > { %3261 = vmatpush1.bf16.msra.mxu1 %v5113_v23  ;;  %3219 = vmatprep.subr.bf16.mxu0 %v5114_v24  ;;  %v5170_v63 = vld [vmem:[%s7338_s1 + $0x244] ss:$12 sps:$4 sm:$0xff]   ;;  %v5182_v2 = vld [vmem:[%s7338_s1 + $0x3ac] ss:$12 sps:$4 sm:$0xff]   ;;  %v5174_v4 = vld [vmem:[%s6042_s6] ss:$72 sps:$4 sm:$0xff]  }
  0x28   : > { %3262 = vmatprep.subr.bf16.mxu1 %v5116_v25  ;;  %v5185_v3 = vld [vmem:[%s7338_s1 + $0x52c] ss:$12 sps:$4 sm:$0xff]   ;;  %v5183_v7 = vld [vmem:[%s7338_s1 + $0x528] ss:$12 sps:$4 sm:$0xff]   ;;  %v5186_v10 = vld [vmem:[%s7338_s1 + $0x390] ss:$12 sps:$4 sm:$0xff]  }
  0x29   : > { %v5188_v8 = vld [vmem:[%s7338_s1 + $0x394] ss:$12 sps:$4 sm:$0xff]   ;;  %v5189_v11 = vld [vmem:[%s7338_s1 + $0x510] ss:$12 sps:$4 sm:$0xff]   ;;  %v5192_v14 = vld [vmem:[%s7338_s1 + $0x378] ss:$12 sps:$4 sm:$0xff]  }
  0x2a   : > { %3220 = vmatpush1.bf16.msra.mxu0 %v5118_v26  ;;  %v5191_v9 = vld [vmem:[%s7338_s1 + $0x514] ss:$12 sps:$4 sm:$0xff]   ;;  %v5194_v12 = vld [vmem:[%s7338_s1 + $0x37c] ss:$12 sps:$4 sm:$0xff]   ;;  %v5195_v15 = vld [vmem:[%s7338_s1 + $0x4f8] ss:$12 sps:$4 sm:$0xff]  }
  0x2b   : > { %3263 = vmatpush1.bf16.msra.mxu1 %v5119_v27  ;;  %3221 = vmatprep.subr.bf16.mxu0 %v5120_v28  ;;  %v5197_v13 = vld [vmem:[%s7338_s1 + $0x4fc] ss:$12 sps:$4 sm:$0xff]   ;;  %v5200_v16 = vld [vmem:[%s7338_s1 + $0x364] ss:$12 sps:$4 sm:$0xff]   ;;  %v5198_v18 = vld [vmem:[%s7338_s1 + $0x360] ss:$12 sps:$4 sm:$0xff]  }
  0x2c   : > { %3264 = vmatprep.subr.bf16.mxu1 %v5122_v29  ;;  %v5203_v17 = vld [vmem:[%s7338_s1 + $0x4e4] ss:$12 sps:$4 sm:$0xff]   ;;  %v5201_v19 = vld [vmem:[%s7338_s1 + $0x4e0] ss:$12 sps:$4 sm:$0xff]   ;;  %v5204_v22 = vld [vmem:[%s7338_s1 + $0x348] ss:$12 sps:$4 sm:$0xff]  }
  0x2d   : > { %v5206_v20 = vld [vmem:[%s7338_s1 + $0x34c] ss:$12 sps:$4 sm:$0xff]   ;;  %v5207_v23 = vld [vmem:[%s7338_s1 + $0x4c8] ss:$12 sps:$4 sm:$0xff]   ;;  %v5210_v26 = vld [vmem:[%s7338_s1 + $0x330] ss:$12 sps:$4 sm:$0xff]  }
  0x2e   : > { %3222 = vmatpush1.bf16.msra.mxu0 %v5124_v30  ;;  %v5209_v21 = vld [vmem:[%s7338_s1 + $0x4cc] ss:$12 sps:$4 sm:$0xff]   ;;  %v5212_v24 = vld [vmem:[%s7338_s1 + $0x334] ss:$12 sps:$4 sm:$0xff]   ;;  %v5213_v27 = vld [vmem:[%s7338_s1 + $0x4b0] ss:$12 sps:$4 sm:$0xff]  }
  0x2f   : > { %3265 = vmatpush1.bf16.msra.mxu1 %v5125_v31  ;;  %3223 = vmatprep.subr.bf16.mxu0 %v5126_v32  ;;  %v5215_v25 = vld [vmem:[%s7338_s1 + $0x4b4] ss:$12 sps:$4 sm:$0xff]   ;;  %v5218_v28 = vld [vmem:[%s7338_s1 + $0x31c] ss:$12 sps:$4 sm:$0xff]   ;;  %v5216_v30 = vld [vmem:[%s7338_s1 + $0x318] ss:$12 sps:$4 sm:$0xff]  }
  0x30   : > { %3266 = vmatprep.subr.bf16.mxu1 %v5128_v33  ;;  %v5221_v29 = vld [vmem:[%s7338_s1 + $0x49c] ss:$12 sps:$4 sm:$0xff]   ;;  %v5219_v31 = vld [vmem:[%s7338_s1 + $0x498] ss:$12 sps:$4 sm:$0xff]   ;;  %s4925_s4 = smul.u32 (%p5895_p4), 24, %s5883_s15  ;;  %p4002_p8 = scmp.lt.s32.totalorder (%p5895_p4), %s4001_s12, 2 }
  0x31   : > { %v5224_v32 = vld [vmem:[%s7338_s1 + $0x304] ss:$12 sps:$4 sm:$0xff]  }
  0x32   : > { %3224 = vmatpush2.bf16.msra.mxu0 %v5130_v34  ;;  %v5227_v33 = vld [vmem:[%s7338_s1 + $0x484] ss:$12 sps:$4 sm:$0xff]   ;;  %v5278_v34 = vld [vmem:[%s6042_s6 + $0x14] ss:$72 sps:$4 sm:$0xff]   ;;  %s7271_s8 = scalar_lea.vmem (%p5895_p4), %s7340_s3, %s4925_s4  }
  0x33   : > { %3267 = vmatpush2.bf16.msra.mxu1 %v5131_v35  ;;  %3225 = vmatprep.subr.bf16.mxu0 %v5132_v36  ;;  %v5281_v35 = vld [vmem:[%s6042_s6 + $0x1c] ss:$72 sps:$4 sm:$0xff]   ;;  %v5222_v36 = vld [vmem:[%s7338_s1 + $0x300] ss:$12 sps:$4 sm:$0xff]  }
  0x34   : > { %3268 = vmatprep.subr.bf16.mxu1 %v5134_v37  ;;  %v5225_v37 = vld [vmem:[%s7338_s1 + $0x480] ss:$12 sps:$4 sm:$0xff]   ;;  %v5243_v49 = vld [vmem:[%s7338_s1 + $0x5b8] ss:$12 sps:$4 sm:$0xff]  }
  0x35   : > { %v5251_v51 = vld [vmem:[%s7338_s1 + $0x5a4] ss:$12 sps:$4 sm:$0xff]  }
  0x36   : > { %3226 = vmatpush2.bf16.msra.mxu0 %v5136_v38  ;;  %v5230_v38 = vld [vmem:[%s7338_s1 + $0x46c] ss:$12 sps:$4 sm:$0xff]  }
  0x37   : > { %3269 = vmatpush2.bf16.msra.mxu1 %v5137_v39  ;;  %3227 = vmatprep.subr.bf16.mxu0 %v5138_v40  ;;  %v5233_v39 = vld [vmem:[%s7338_s1 + $0x5ec] ss:$12 sps:$4 sm:$0xff]   ;;  %v5228_v40 = vld [vmem:[%s7338_s1 + $0x468] ss:$12 sps:$4 sm:$0xff]  }
  0x38   : > { %3270 = vmatprep.subr.bf16.mxu1 %v5140_v41  ;;  %v5231_v41 = vld [vmem:[%s7338_s1 + $0x5e8] ss:$12 sps:$4 sm:$0xff]  }
  0x3a   : > { %3228 = vmatpush2.bf16.msra.mxu0 %v5142_v42  ;;  %v5236_v42 = vld [vmem:[%s7338_s1 + $0x454] ss:$12 sps:$4 sm:$0xff]  }
  0x3b   : > { %3271 = vmatpush2.bf16.msra.mxu1 %v5143_v43  ;;  %3229 = vmatprep.subr.bf16.mxu0 %v5144_v44  ;;  %v5239_v43 = vld [vmem:[%s7338_s1 + $0x5d4] ss:$12 sps:$4 sm:$0xff]   ;;  %v5234_v44 = vld [vmem:[%s7338_s1 + $0x450] ss:$12 sps:$4 sm:$0xff]  }
  0x3c   : > { %3272 = vmatprep.subr.bf16.mxu1 %v5146_v45  ;;  %v5237_v45 = vld [vmem:[%s7338_s1 + $0x5d0] ss:$12 sps:$4 sm:$0xff]  }
  0x3e   : > { %3230 = vmatpush2.bf16.msra.mxu0 %v5148_v46  ;;  %v5242_v46 = vld [vmem:[%s7338_s1 + $0x43c] ss:$12 sps:$4 sm:$0xff]  }
  0x3f   : > { %3273 = vmatpush2.bf16.msra.mxu1 %v5149_v47  ;;  %3231 = vmatprep.subr.bf16.mxu0 %v5150_v48  ;;  %v5245_v47 = vld [vmem:[%s7338_s1 + $0x5bc] ss:$12 sps:$4 sm:$0xff]   ;;  %v5240_v48 = vld [vmem:[%s7338_s1 + $0x438] ss:$12 sps:$4 sm:$0xff]  }
  0x40   : > { %3274 = vmatprep.subr.bf16.mxu1 %v5152_v50  ;;  %v5248_v50 = vld [vmem:[%s7338_s1 + $0x424] ss:$12 sps:$4 sm:$0xff]  }
  0x42   : > { %3232 = vmatpush2.bf16.msra.mxu0 %v5154_v52  ;;  %v5246_v52 = vld [vmem:[%s7338_s1 + $0x420] ss:$12 sps:$4 sm:$0xff]  }
  0x43   : > { %3275 = vmatpush2.bf16.msra.mxu1 %v5155_v53  ;;  %3233 = vmatprep.subr.bf16.mxu0 %v5156_v54  ;;  %v5249_v53 = vld [vmem:[%s7338_s1 + $0x5a0] ss:$12 sps:$4 sm:$0xff]  }
  0x44   : > { %3276 = vmatprep.subr.bf16.mxu1 %v5158_v55  ;;  %v5254_v54 = vld [vmem:[%s7338_s1 + $0x40c] ss:$12 sps:$4 sm:$0xff]  }
  0x45   : > { %v5257_v55 = vld [vmem:[%s7338_s1 + $0x58c] ss:$12 sps:$4 sm:$0xff]  }
  0x46   : > { %3234 = vmatpush2.bf16.msra.mxu0 %v5160_v56  ;;  %v5252_v56 = vld [vmem:[%s7338_s1 + $0x408] ss:$12 sps:$4 sm:$0xff]  }
  0x47   : > { %3277 = vmatpush2.bf16.msra.mxu1 %v5161_v57  ;;  %3235 = vmatprep.subr.bf16.mxu0 %v5162_v58  ;;  %v5255_v57 = vld [vmem:[%s7338_s1 + $0x588] ss:$12 sps:$4 sm:$0xff]  }
  0x48   : > { %3278 = vmatprep.subr.bf16.mxu1 %v5164_v59  ;;  %v5260_v58 = vld [vmem:[%s7338_s1 + $0x3f4] ss:$12 sps:$4 sm:$0xff]  }
  0x49   : > { %v5263_v59 = vld [vmem:[%s7338_s1 + $0x574] ss:$12 sps:$4 sm:$0xff]  }
  0x4a   : > { %3236 = vmatpush2.bf16.msra.mxu0 %v5166_v60  ;;  %v5258_v60 = vld [vmem:[%s7338_s1 + $0x3f0] ss:$12 sps:$4 sm:$0xff]  }
  0x4b   : > { %3279 = vmatpush2.bf16.msra.mxu1 %v5167_v61  ;;  %3237 = vmatprep.subr.bf16.mxu0 %v5168_v62  ;;  %v5261_v61 = vld [vmem:[%s7338_s1 + $0x570] ss:$12 sps:$4 sm:$0xff]  }
  0x4c   : > { %3280 = vmatprep.subr.bf16.mxu1 %v5170_v63  ;;  %v5266_v62 = vld [vmem:[%s7338_s1 + $0x3dc] ss:$12 sps:$4 sm:$0xff]  }
  0x4d   : > { %v5269_v63 = vld [vmem:[%s7338_s1 + $0x55c] ss:$12 sps:$4 sm:$0xff]  }
  0x4e   : > { %3238 = vmatpush2.bf16.msra.mxu0 %v5172_v0  ;;  %v5264_v0 = vld [vmem:[%s7338_s1 + $0x3d8] ss:$12 sps:$4 sm:$0xff]  }
  0x4f   : > { %3281 = vmatpush2.bf16.msra.mxu1 %v5173_v1  ;;  %3293 = vmatprep.subr.bf16.mxu0 %v5182_v2  ;;  %v5267_v1 = vld [vmem:[%s7338_s1 + $0x558] ss:$12 sps:$4 sm:$0xff]  }
  0x50   : > { %3336 = vmatprep.subr.bf16.mxu1 %v5185_v3  ;;  %v5272_v2 = vld [vmem:[%s7338_s1 + $0x3c4] ss:$12 sps:$4 sm:$0xff]  }
  0x51   : > { %3240 = vmatmul.mubr.bf16.vlgmr.msra.gmra.mxu0 %v5174_v4  ;;  %v5275_v3 = vld [vmem:[%s7338_s1 + $0x544] ss:$12 sps:$4 sm:$0xff]   ;;  %v5270_v4 = vld [vmem:[%s7338_s1 + $0x3c0] ss:$12 sps:$4 sm:$0xff]  }
  0x52   : > { %3283 = vmatmul.mubr.bf16.vlgmr.msra.gmra.mxu1 %v5177_v5  ;;  %3294 = vmatpush1.bf16.msra.mxu0 %v5180_v6  ;;  %v5273_v5 = vld [vmem:[%s7338_s1 + $0x540] ss:$12 sps:$4 sm:$0xff]  }
  0x53   : > { %3337 = vmatpush1.bf16.msra.mxu1 %v5183_v7  ;;  %3295 = vmatprep.subr.bf16.mxu0 %v5188_v8  ;;  %v5284_v6 = vld [vmem:[%s7338_s1 + $0x6ac] ss:$12 sps:$4 sm:$0xff]  }
  0x54   : > { %3338 = vmatprep.subr.bf16.mxu1 %v5191_v9  ;;  %3325 = vmatprep.mubr.bf16.mxu0 %v5278_v34  ;;  %v5287_v7 = vld [vmem:[%s7338_s1 + $0x82c] ss:$12 sps:$4 sm:$0xff]   ;;  %v5320_v34 = vld [vmem:[%s7338_s1 + $0x61c] ss:$12 sps:$4 sm:$0xff]  }
  0x55   : > { %3368 = vmatprep.mubr.bf16.mxu1 %v5281_v35  ;;  %v5276_v8 = vld [vmem:[%s6042_s6 + $0x10] ss:$72 sps:$4 sm:$0xff]   ;;  %v5323_v35 = vld [vmem:[%s7338_s1 + $0x79c] ss:$12 sps:$4 sm:$0xff]  }
  0x56   : > { %3296 = vmatpush1.bf16.msra.mxu0 %v5186_v10  ;;  %v5279_v9 = vld [vmem:[%s6042_s6 + $0x18] ss:$72 sps:$4 sm:$0xff]   ;;  %v5282_v10 = vld [vmem:[%s7338_s1 + $0x6a8] ss:$12 sps:$4 sm:$0xff]  }
  0x57   : > { %3339 = vmatpush1.bf16.msra.mxu1 %v5189_v11  ;;  %3297 = vmatprep.subr.bf16.mxu0 %v5194_v12  ;;  %v5285_v11 = vld [vmem:[%s7338_s1 + $0x828] ss:$12 sps:$4 sm:$0xff]  }
  0x58   : > { %3340 = vmatprep.subr.bf16.mxu1 %v5197_v13  ;;  %v5290_v12 = vld [vmem:[%s7338_s1 + $0x694] ss:$12 sps:$4 sm:$0xff]  }
  0x59   : > { %v5293_v13 = vld [vmem:[%s7338_s1 + $0x814] ss:$12 sps:$4 sm:$0xff]  }
  0x5a   : > { %3298 = vmatpush1.bf16.msra.mxu0 %v5192_v14  ;;  %v5288_v14 = vld [vmem:[%s7338_s1 + $0x690] ss:$12 sps:$4 sm:$0xff]  }
  0x5b   : > { %3341 = vmatpush1.bf16.msra.mxu1 %v5195_v15  ;;  %3299 = vmatprep.subr.bf16.mxu0 %v5200_v16  ;;  %v5291_v15 = vld [vmem:[%s7338_s1 + $0x810] ss:$12 sps:$4 sm:$0xff]  }
  0x5c   : > { %3342 = vmatprep.subr.bf16.mxu1 %v5203_v17  ;;  %v5296_v16 = vld [vmem:[%s7338_s1 + $0x67c] ss:$12 sps:$4 sm:$0xff]  }
  0x5d   : > { %v5299_v17 = vld [vmem:[%s7338_s1 + $0x7fc] ss:$12 sps:$4 sm:$0xff]  }
  0x5e   : > { %3300 = vmatpush1.bf16.msra.mxu0 %v5198_v18  ;;  %v5294_v18 = vld [vmem:[%s7338_s1 + $0x678] ss:$12 sps:$4 sm:$0xff]  }
  0x5f   : > { %3343 = vmatpush1.bf16.msra.mxu1 %v5201_v19  ;;  %3301 = vmatprep.subr.bf16.mxu0 %v5206_v20  ;;  %v5380_v19 = vld [vmem:[%s6042_s6 + $0x24] ss:$72 sps:$4 sm:$0xff]  }
  0x60   : > { %3344 = vmatprep.subr.bf16.mxu1 %v5209_v21  ;;  %v5297_v20 = vld [vmem:[%s7338_s1 + $0x7f8] ss:$12 sps:$4 sm:$0xff]   ;;  %v5383_v21 = vld [vmem:[%s6042_s6 + $0x2c] ss:$72 sps:$4 sm:$0xff]  }
  0x62   : > { %3302 = vmatpush1.bf16.msra.mxu0 %v5204_v22  ;;  %v5302_v22 = vld [vmem:[%s7338_s1 + $0x664] ss:$12 sps:$4 sm:$0xff]  }
  0x63   : > { %3345 = vmatpush1.bf16.msra.mxu1 %v5207_v23  ;;  %3303 = vmatprep.subr.bf16.mxu0 %v5212_v24  ;;  %v5305_v23 = vld [vmem:[%s7338_s1 + $0x7e4] ss:$12 sps:$4 sm:$0xff]   ;;  %v5300_v24 = vld [vmem:[%s7338_s1 + $0x660] ss:$12 sps:$4 sm:$0xff]  }
  0x64   : > { %3346 = vmatprep.subr.bf16.mxu1 %v5215_v25  ;;  %v5303_v25 = vld [vmem:[%s7338_s1 + $0x7e0] ss:$12 sps:$4 sm:$0xff]  }
  0x66   : > { %3304 = vmatpush1.bf16.msra.mxu0 %v5210_v26  ;;  %v5308_v26 = vld [vmem:[%s7338_s1 + $0x64c] ss:$12 sps:$4 sm:$0xff]  }
  0x67   : > { %3347 = vmatpush1.bf16.msra.mxu1 %v5213_v27  ;;  %3305 = vmatprep.subr.bf16.mxu0 %v5218_v28  ;;  %v5311_v27 = vld [vmem:[%s7338_s1 + $0x7cc] ss:$12 sps:$4 sm:$0xff]   ;;  %v5306_v28 = vld [vmem:[%s7338_s1 + $0x648] ss:$12 sps:$4 sm:$0xff]  }
  0x68   : > { %3348 = vmatprep.subr.bf16.mxu1 %v5221_v29  ;;  %v5309_v29 = vld [vmem:[%s7338_s1 + $0x7c8] ss:$12 sps:$4 sm:$0xff]  }
  0x6a   : > { %3306 = vmatpush1.bf16.msra.mxu0 %v5216_v30  ;;  %v5314_v30 = vld [vmem:[%s7338_s1 + $0x634] ss:$12 sps:$4 sm:$0xff]  }
  0x6b   : > { %3349 = vmatpush1.bf16.msra.mxu1 %v5219_v31  ;;  %3307 = vmatprep.subr.bf16.mxu0 %v5224_v32  ;;  %v5317_v31 = vld [vmem:[%s7338_s1 + $0x7b4] ss:$12 sps:$4 sm:$0xff]   ;;  %v5312_v32 = vld [vmem:[%s7338_s1 + $0x630] ss:$12 sps:$4 sm:$0xff]  }
  0x6c   : > { %3350 = vmatprep.subr.bf16.mxu1 %v5227_v33  ;;  %v5315_v33 = vld [vmem:[%s7338_s1 + $0x7b0] ss:$12 sps:$4 sm:$0xff]  }
  0x6e   : > { %3308 = vmatpush1.bf16.msra.mxu0 %v5222_v36  ;;  %v5318_v36 = vld [vmem:[%s7338_s1 + $0x618] ss:$12 sps:$4 sm:$0xff]  }
  0x6f   : > { %3351 = vmatpush1.bf16.msra.mxu1 %v5225_v37  ;;  %3309 = vmatprep.subr.bf16.mxu0 %v5230_v38  ;;  %v5321_v37 = vld [vmem:[%s7338_s1 + $0x798] ss:$12 sps:$4 sm:$0xff]  }
  0x70   : > { %3352 = vmatprep.subr.bf16.mxu1 %v5233_v39  ;;  %v5326_v38 = vld [vmem:[%s7338_s1 + $0x604] ss:$12 sps:$4 sm:$0xff]  }
  0x71   : > { %v5329_v39 = vld [vmem:[%s7338_s1 + $0x784] ss:$12 sps:$4 sm:$0xff]  }
  0x72   : > { %3310 = vmatpush2.bf16.msra.mxu0 %v5228_v40  ;;  %v5324_v40 = vld [vmem:[%s7338_s1 + $0x600] ss:$12 sps:$4 sm:$0xff]  }
  0x73   : > { %3353 = vmatpush2.bf16.msra.mxu1 %v5231_v41  ;;  %3311 = vmatprep.subr.bf16.mxu0 %v5236_v42  ;;  %v5327_v41 = vld [vmem:[%s7338_s1 + $0x780] ss:$12 sps:$4 sm:$0xff]  }
  0x74   : > { %3354 = vmatprep.subr.bf16.mxu1 %v5239_v43  ;;  %v5332_v42 = vld [vmem:[%s7338_s1 + $0x76c] ss:$12 sps:$4 sm:$0xff]  }
  0x75   : > { %v5335_v43 = vld [vmem:[%s7338_s1 + $0x8ec] ss:$12 sps:$4 sm:$0xff]  }
  0x76   : > { %3312 = vmatpush2.bf16.msra.mxu0 %v5234_v44  ;;  %v5330_v44 = vld [vmem:[%s7338_s1 + $0x768] ss:$12 sps:$4 sm:$0xff]  }
  0x77   : > { %3355 = vmatpush2.bf16.msra.mxu1 %v5237_v45  ;;  %3313 = vmatprep.subr.bf16.mxu0 %v5242_v46  ;;  %v5333_v45 = vld [vmem:[%s7338_s1 + $0x8e8] ss:$12 sps:$4 sm:$0xff]  }
  0x78   : > { %3356 = vmatprep.subr.bf16.mxu1 %v5245_v47  ;;  %v5338_v46 = vld [vmem:[%s7338_s1 + $0x754] ss:$12 sps:$4 sm:$0xff]  }
  0x79   : > { %v5341_v47 = vld [vmem:[%s7338_s1 + $0x8d4] ss:$12 sps:$4 sm:$0xff]  }
  0x7a   : > { %3314 = vmatpush2.bf16.msra.mxu0 %v5240_v48  ;;  %v5336_v48 = vld [vmem:[%s7338_s1 + $0x750] ss:$12 sps:$4 sm:$0xff]  }
  0x7b   : > { %3357 = vmatpush2.bf16.msra.mxu1 %v5243_v49  ;;  %3315 = vmatprep.subr.bf16.mxu0 %v5248_v50  ;;  %v5339_v49 = vld [vmem:[%s7338_s1 + $0x8d0] ss:$12 sps:$4 sm:$0xff]  }
  0x7c   : > { %3358 = vmatprep.subr.bf16.mxu1 %v5251_v51  ;;  %v5344_v50 = vld [vmem:[%s7338_s1 + $0x73c] ss:$12 sps:$4 sm:$0xff]  }
  0x7d   : > { %v5347_v51 = vld [vmem:[%s7338_s1 + $0x8bc] ss:$12 sps:$4 sm:$0xff]  }
  0x7e   : > { %3316 = vmatpush2.bf16.msra.mxu0 %v5246_v52  ;;  %v5342_v52 = vld [vmem:[%s7338_s1 + $0x738] ss:$12 sps:$4 sm:$0xff]  }
  0x7f   : > { %3359 = vmatpush2.bf16.msra.mxu1 %v5249_v53  ;;  %3317 = vmatprep.subr.bf16.mxu0 %v5254_v54  ;;  %v5345_v53 = vld [vmem:[%s7338_s1 + $0x8b8] ss:$12 sps:$4 sm:$0xff]  }
  0x80   : > { %3360 = vmatprep.subr.bf16.mxu1 %v5257_v55  ;;  %v5350_v54 = vld [vmem:[%s7338_s1 + $0x724] ss:$12 sps:$4 sm:$0xff]  }
  0x81   : > { %v5353_v55 = vld [vmem:[%s7338_s1 + $0x8a4] ss:$12 sps:$4 sm:$0xff]  }
  0x82   : > { %3318 = vmatpush2.bf16.msra.mxu0 %v5252_v56  ;;  %v5348_v56 = vld [vmem:[%s7338_s1 + $0x720] ss:$12 sps:$4 sm:$0xff]  }
  0x83   : > { %3361 = vmatpush2.bf16.msra.mxu1 %v5255_v57  ;;  %3319 = vmatprep.subr.bf16.mxu0 %v5260_v58  ;;  %v5351_v57 = vld [vmem:[%s7338_s1 + $0x8a0] ss:$12 sps:$4 sm:$0xff]  }
  0x84   : > { %3362 = vmatprep.subr.bf16.mxu1 %v5263_v59  ;;  %v5356_v58 = vld [vmem:[%s7338_s1 + $0x70c] ss:$12 sps:$4 sm:$0xff]  }
  0x85   : > { %v5359_v59 = vld [vmem:[%s7338_s1 + $0x88c] ss:$12 sps:$4 sm:$0xff]  }
  0x86   : > { %3320 = vmatpush2.bf16.msra.mxu0 %v5258_v60  ;;  %v5354_v60 = vld [vmem:[%s7338_s1 + $0x708] ss:$12 sps:$4 sm:$0xff]  }
  0x87   : > { %3363 = vmatpush2.bf16.msra.mxu1 %v5261_v61  ;;  %3321 = vmatprep.subr.bf16.mxu0 %v5266_v62  ;;  %v5357_v61 = vld [vmem:[%s7338_s1 + $0x888] ss:$12 sps:$4 sm:$0xff]  }
  0x88   : > { %3364 = vmatprep.subr.bf16.mxu1 %v5269_v63  ;;  %v5362_v62 = vld [vmem:[%s7338_s1 + $0x6f4] ss:$12 sps:$4 sm:$0xff]  }
  0x89   : > { %v5365_v63 = vld [vmem:[%s7338_s1 + $0x874] ss:$12 sps:$4 sm:$0xff]  }
  0x8a   : > { %3322 = vmatpush2.bf16.msra.mxu0 %v5264_v0  ;;  %v5360_v0 = vld [vmem:[%s7338_s1 + $0x6f0] ss:$12 sps:$4 sm:$0xff]  }
  0x8b   : > { %3365 = vmatpush2.bf16.msra.mxu1 %v5267_v1  ;;  %3323 = vmatprep.subr.bf16.mxu0 %v5272_v2  ;;  %v5363_v1 = vld [vmem:[%s7338_s1 + $0x870] ss:$12 sps:$4 sm:$0xff]  }
  0x8c   : > { %3366 = vmatprep.subr.bf16.mxu1 %v5275_v3  ;;  %v5368_v2 = vld [vmem:[%s7338_s1 + $0x6dc] ss:$12 sps:$4 sm:$0xff]  }
  0x8d   : > { %v5371_v3 = vld [vmem:[%s7338_s1 + $0x85c] ss:$12 sps:$4 sm:$0xff]  }
  0x8e   : > { %3324 = vmatpush2.bf16.msra.mxu0 %v5270_v4  ;;  %v5366_v4 = vld [vmem:[%s7338_s1 + $0x6d8] ss:$12 sps:$4 sm:$0xff]  }
  0x8f   : > { %3367 = vmatpush2.bf16.msra.mxu1 %v5273_v5  ;;  %3379 = vmatprep.subr.bf16.mxu0 %v5284_v6  ;;  %v5369_v5 = vld [vmem:[%s7338_s1 + $0x858] ss:$12 sps:$4 sm:$0xff]  }
  0x90   : > { %3422 = vmatprep.subr.bf16.mxu1 %v5287_v7  ;;  %v5374_v6 = vld [vmem:[%s7338_s1 + $0x6c4] ss:$12 sps:$4 sm:$0xff]  }
  0x91   : > { %3326 = vmatmul.mubr.bf16.vlgmr.msra.gmra.mxu0 %v5276_v8  ;;  %v5377_v7 = vld [vmem:[%s7338_s1 + $0x844] ss:$12 sps:$4 sm:$0xff]   ;;  %v5372_v8 = vld [vmem:[%s7338_s1 + $0x6c0] ss:$12 sps:$4 sm:$0xff]  }
  0x92   : > { %3369 = vmatmul.mubr.bf16.vlgmr.msra.gmra.mxu1 %v5279_v9  ;;  %3380 = vmatpush1.bf16.msra.mxu0 %v5282_v10  ;;  %v5375_v9 = vld [vmem:[%s7338_s1 + $0x840] ss:$12 sps:$4 sm:$0xff]  }
  0x93   : > { %3423 = vmatpush1.bf16.msra.mxu1 %v5285_v11  ;;  %3381 = vmatprep.subr.bf16.mxu0 %v5290_v12  ;;  %v5378_v10 = vld [vmem:[%s6042_s6 + $0x20] ss:$72 sps:$4 sm:$0xff]   ;;  %v5386_v12 = vld [vmem:[%s7338_s1 + $0x9ac] ss:$12 sps:$4 sm:$0xff]  }
  0x94   : > { %3424 = vmatprep.subr.bf16.mxu1 %v5293_v13  ;;  %3411 = vmatprep.mubr.bf16.mxu0 %v5380_v19  ;;  %v5381_v11 = vld [vmem:[%s6042_s6 + $0x28] ss:$72 sps:$4 sm:$0xff]   ;;  %v5389_v13 = vld [vmem:[%s7338_s1 + $0xb2c] ss:$12 sps:$4 sm:$0xff]  }
  0x95   : > { %3454 = vmatprep.mubr.bf16.mxu1 %v5383_v21  ;;  %v5390_v19 = vld [vmem:[%s7338_s1 + $0x990] ss:$12 sps:$4 sm:$0xff]  }
  0x96   : > { %3382 = vmatpush1.bf16.msra.mxu0 %v5288_v14  ;;  %v5384_v14 = vld [vmem:[%s7338_s1 + $0x9a8] ss:$12 sps:$4 sm:$0xff]   ;;  %v5393_v21 = vld [vmem:[%s7338_s1 + $0xb10] ss:$12 sps:$4 sm:$0xff]  }
  0x97   : > { %3425 = vmatpush1.bf16.msra.mxu1 %v5291_v15  ;;  %3383 = vmatprep.subr.bf16.mxu0 %v5296_v16  ;;  %v5387_v15 = vld [vmem:[%s7338_s1 + $0xb28] ss:$12 sps:$4 sm:$0xff]  }
  0x98   : > { %3426 = vmatprep.subr.bf16.mxu1 %v5299_v17  ;;  %v5392_v16 = vld [vmem:[%s7338_s1 + $0x994] ss:$12 sps:$4 sm:$0xff]  }
  0x99   : > { %v5395_v17 = vld [vmem:[%s7338_s1 + $0xb14] ss:$12 sps:$4 sm:$0xff]  }
  0x9a   : > { %3384 = vmatpush1.bf16.msra.mxu0 %v5294_v18  ;;  %v5482_v18 = vld [vmem:[%s6042_s6 + $0x34] ss:$72 sps:$4 sm:$0xff]  }
  0x9b   : > { %3427 = vmatpush1.bf16.msra.mxu1 %v5297_v20  ;;  %3385 = vmatprep.subr.bf16.mxu0 %v5302_v22  ;;  %v5485_v20 = vld [vmem:[%s6042_s6 + $0x3c] ss:$72 sps:$4 sm:$0xff]  }
  0x9c   : > { %3428 = vmatprep.subr.bf16.mxu1 %v5305_v23  ;;  %v5398_v22 = vld [vmem:[%s7338_s1 + $0x97c] ss:$12 sps:$4 sm:$0xff]  }
  0x9d   : > { %v5401_v23 = vld [vmem:[%s7338_s1 + $0xafc] ss:$12 sps:$4 sm:$0xff]  }
  0x9e   : > { %3386 = vmatpush1.bf16.msra.mxu0 %v5300_v24  ;;  %v5396_v24 = vld [vmem:[%s7338_s1 + $0x978] ss:$12 sps:$4 sm:$0xff]  }
  0x9f   : > { %3429 = vmatpush1.bf16.msra.mxu1 %v5303_v25  ;;  %3387 = vmatprep.subr.bf16.mxu0 %v5308_v26  ;;  %v5399_v25 = vld [vmem:[%s7338_s1 + $0xaf8] ss:$12 sps:$4 sm:$0xff]  }
  0xa0   : > { %3430 = vmatprep.subr.bf16.mxu1 %v5311_v27  ;;  %v5404_v26 = vld [vmem:[%s7338_s1 + $0x964] ss:$12 sps:$4 sm:$0xff]  }
  0xa1   : > { %v5407_v27 = vld [vmem:[%s7338_s1 + $0xae4] ss:$12 sps:$4 sm:$0xff]  }
  0xa2   : > { %3388 = vmatpush1.bf16.msra.mxu0 %v5306_v28  ;;  %v5402_v28 = vld [vmem:[%s7338_s1 + $0x960] ss:$12 sps:$4 sm:$0xff]  }
  0xa3   : > { %3431 = vmatpush1.bf16.msra.mxu1 %v5309_v29  ;;  %3389 = vmatprep.subr.bf16.mxu0 %v5314_v30  ;;  %v5405_v29 = vld [vmem:[%s7338_s1 + $0xae0] ss:$12 sps:$4 sm:$0xff]  }
  0xa4   : > { %3432 = vmatprep.subr.bf16.mxu1 %v5317_v31  ;;  %v5410_v30 = vld [vmem:[%s7338_s1 + $0x94c] ss:$12 sps:$4 sm:$0xff]  }
  0xa5   : > { %v5413_v31 = vld [vmem:[%s7338_s1 + $0xacc] ss:$12 sps:$4 sm:$0xff]  }
  0xa6   : > { %3390 = vmatpush1.bf16.msra.mxu0 %v5312_v32  ;;  %v5408_v32 = vld [vmem:[%s7338_s1 + $0x948] ss:$12 sps:$4 sm:$0xff]  }
  0xa7   : > { %3433 = vmatpush1.bf16.msra.mxu1 %v5315_v33  ;;  %3391 = vmatprep.subr.bf16.mxu0 %v5320_v34  ;;  %v5411_v33 = vld [vmem:[%s7338_s1 + $0xac8] ss:$12 sps:$4 sm:$0xff]  }
  0xa8   : > { %3434 = vmatprep.subr.bf16.mxu1 %v5323_v35  ;;  %v5416_v34 = vld [vmem:[%s7338_s1 + $0x934] ss:$12 sps:$4 sm:$0xff]  }
  0xa9   : > { %v5419_v35 = vld [vmem:[%s7338_s1 + $0xab4] ss:$12 sps:$4 sm:$0xff]  }
  0xaa   : > { %3392 = vmatpush1.bf16.msra.mxu0 %v5318_v36  ;;  %v5414_v36 = vld [vmem:[%s7338_s1 + $0x930] ss:$12 sps:$4 sm:$0xff]  }
  0xab   : > { %3435 = vmatpush1.bf16.msra.mxu1 %v5321_v37  ;;  %3393 = vmatprep.subr.bf16.mxu0 %v5326_v38  ;;  %v5417_v37 = vld [vmem:[%s7338_s1 + $0xab0] ss:$12 sps:$4 sm:$0xff]  }
  0xac   : > { %3436 = vmatprep.subr.bf16.mxu1 %v5329_v39  ;;  %v5422_v38 = vld [vmem:[%s7338_s1 + $0x91c] ss:$12 sps:$4 sm:$0xff]  }
  0xad   : > { %v5425_v39 = vld [vmem:[%s7338_s1 + $0xa9c] ss:$12 sps:$4 sm:$0xff]  }
  0xae   : > { %3394 = vmatpush1.bf16.msra.mxu0 %v5324_v40  ;;  %v5420_v40 = vld [vmem:[%s7338_s1 + $0x918] ss:$12 sps:$4 sm:$0xff]  }
  0xaf   : > { %3437 = vmatpush1.bf16.msra.mxu1 %v5327_v41  ;;  %3395 = vmatprep.subr.bf16.mxu0 %v5332_v42  ;;  %v5423_v41 = vld [vmem:[%s7338_s1 + $0xa98] ss:$12 sps:$4 sm:$0xff]  }
  0xb0   : > { %3438 = vmatprep.subr.bf16.mxu1 %v5335_v43  ;;  %v5428_v42 = vld [vmem:[%s7338_s1 + $0x904] ss:$12 sps:$4 sm:$0xff]  }
  0xb1   : > { %v5431_v43 = vld [vmem:[%s7338_s1 + $0xa84] ss:$12 sps:$4 sm:$0xff]  }
  0xb2   : > { %3396 = vmatpush2.bf16.msra.mxu0 %v5330_v44  ;;  %v5426_v44 = vld [vmem:[%s7338_s1 + $0x900] ss:$12 sps:$4 sm:$0xff]  }
  0xb3   : > { %3439 = vmatpush2.bf16.msra.mxu1 %v5333_v45  ;;  %3397 = vmatprep.subr.bf16.mxu0 %v5338_v46  ;;  %v5429_v45 = vld [vmem:[%s7338_s1 + $0xa80] ss:$12 sps:$4 sm:$0xff]  }
  0xb4   : > { %3440 = vmatprep.subr.bf16.mxu1 %v5341_v47  ;;  %v5434_v46 = vld [vmem:[%s7338_s1 + $0xa6c] ss:$12 sps:$4 sm:$0xff]  }
  0xb5   : > { %v5437_v47 = vld [vmem:[%s7338_s1 + $0xbec] ss:$12 sps:$4 sm:$0xff]  }
  0xb6   : > { %3398 = vmatpush2.bf16.msra.mxu0 %v5336_v48  ;;  %v5432_v48 = vld [vmem:[%s7338_s1 + $0xa68] ss:$12 sps:$4 sm:$0xff]  }
  0xb7   : > { %3441 = vmatpush2.bf16.msra.mxu1 %v5339_v49  ;;  %3399 = vmatprep.subr.bf16.mxu0 %v5344_v50  ;;  %v5435_v49 = vld [vmem:[%s7338_s1 + $0xbe8] ss:$12 sps:$4 sm:$0xff]  }
  0xb8   : > { %3442 = vmatprep.subr.bf16.mxu1 %v5347_v51  ;;  %v5440_v50 = vld [vmem:[%s7338_s1 + $0xa54] ss:$12 sps:$4 sm:$0xff]  }
  0xb9   : > { %v5443_v51 = vld [vmem:[%s7338_s1 + $0xbd4] ss:$12 sps:$4 sm:$0xff]  }
  0xba   : > { %3400 = vmatpush2.bf16.msra.mxu0 %v5342_v52  ;;  %v5438_v52 = vld [vmem:[%s7338_s1 + $0xa50] ss:$12 sps:$4 sm:$0xff]  }
  0xbb   : > { %3443 = vmatpush2.bf16.msra.mxu1 %v5345_v53  ;;  %3401 = vmatprep.subr.bf16.mxu0 %v5350_v54  ;;  %v5441_v53 = vld [vmem:[%s7338_s1 + $0xbd0] ss:$12 sps:$4 sm:$0xff]  }
  0xbc   : > { %3444 = vmatprep.subr.bf16.mxu1 %v5353_v55  ;;  %v5446_v54 = vld [vmem:[%s7338_s1 + $0xa3c] ss:$12 sps:$4 sm:$0xff]  }
  0xbd   : > { %v5449_v55 = vld [vmem:[%s7338_s1 + $0xbbc] ss:$12 sps:$4 sm:$0xff]  }
  0xbe   : > { %3402 = vmatpush2.bf16.msra.mxu0 %v5348_v56  ;;  %v5444_v56 = vld [vmem:[%s7338_s1 + $0xa38] ss:$12 sps:$4 sm:$0xff]  }
  0xbf   : > { %3445 = vmatpush2.bf16.msra.mxu1 %v5351_v57  ;;  %3403 = vmatprep.subr.bf16.mxu0 %v5356_v58  ;;  %v5447_v57 = vld [vmem:[%s7338_s1 + $0xbb8] ss:$12 sps:$4 sm:$0xff]  }
  0xc0   : > { %3446 = vmatprep.subr.bf16.mxu1 %v5359_v59  ;;  %v5452_v58 = vld [vmem:[%s7338_s1 + $0xa24] ss:$12 sps:$4 sm:$0xff]  }
  0xc1   : > { %v5455_v59 = vld [vmem:[%s7338_s1 + $0xba4] ss:$12 sps:$4 sm:$0xff]  }
  0xc2   : > { %3404 = vmatpush2.bf16.msra.mxu0 %v5354_v60  ;;  %v5450_v60 = vld [vmem:[%s7338_s1 + $0xa20] ss:$12 sps:$4 sm:$0xff]  }
  0xc3   : > { %3447 = vmatpush2.bf16.msra.mxu1 %v5357_v61  ;;  %3405 = vmatprep.subr.bf16.mxu0 %v5362_v62  ;;  %v5453_v61 = vld [vmem:[%s7338_s1 + $0xba0] ss:$12 sps:$4 sm:$0xff]  }
  0xc4   : > { %3448 = vmatprep.subr.bf16.mxu1 %v5365_v63  ;;  %v5458_v62 = vld [vmem:[%s7338_s1 + $0xa0c] ss:$12 sps:$4 sm:$0xff]  }
  0xc5   : > { %v5461_v63 = vld [vmem:[%s7338_s1 + $0xb8c] ss:$12 sps:$4 sm:$0xff]  }
  0xc6   : > { %3406 = vmatpush2.bf16.msra.mxu0 %v5360_v0  ;;  %v5456_v0 = vld [vmem:[%s7338_s1 + $0xa08] ss:$12 sps:$4 sm:$0xff]  }
  0xc7   : > { %3449 = vmatpush2.bf16.msra.mxu1 %v5363_v1  ;;  %3407 = vmatprep.subr.bf16.mxu0 %v5368_v2  ;;  %v5459_v1 = vld [vmem:[%s7338_s1 + $0xb88] ss:$12 sps:$4 sm:$0xff]  }
  0xc8   : > { %3450 = vmatprep.subr.bf16.mxu1 %v5371_v3  ;;  %v5464_v2 = vld [vmem:[%s7338_s1 + $0x9f4] ss:$12 sps:$4 sm:$0xff]  }
  0xc9   : > { %v5467_v3 = vld [vmem:[%s7338_s1 + $0xb74] ss:$12 sps:$4 sm:$0xff]  }
  0xca   : > { %3408 = vmatpush2.bf16.msra.mxu0 %v5366_v4  ;;  %v5462_v4 = vld [vmem:[%s7338_s1 + $0x9f0] ss:$12 sps:$4 sm:$0xff]  }
  0xcb   : > { %3451 = vmatpush2.bf16.msra.mxu1 %v5369_v5  ;;  %3409 = vmatprep.subr.bf16.mxu0 %v5374_v6  ;;  %v5465_v5 = vld [vmem:[%s7338_s1 + $0xb70] ss:$12 sps:$4 sm:$0xff]  }
  0xcc   : > { %3452 = vmatprep.subr.bf16.mxu1 %v5377_v7  ;;  %v5470_v6 = vld [vmem:[%s7338_s1 + $0x9dc] ss:$12 sps:$4 sm:$0xff]  }
  0xcd   : > { %v5473_v7 = vld [vmem:[%s7338_s1 + $0xb5c] ss:$12 sps:$4 sm:$0xff]  }
  0xce   : > { %3410 = vmatpush2.bf16.msra.mxu0 %v5372_v8  ;;  %v5468_v8 = vld [vmem:[%s7338_s1 + $0x9d8] ss:$12 sps:$4 sm:$0xff]  }
  0xcf   : > { %3453 = vmatpush2.bf16.msra.mxu1 %v5375_v9  ;;  %3465 = vmatprep.subr.bf16.mxu0 %v5386_v12  ;;  %v5471_v9 = vld [vmem:[%s7338_s1 + $0xb58] ss:$12 sps:$4 sm:$0xff]   ;;  %v5474_v12 = vld [vmem:[%s7338_s1 + $0x9c0] ss:$12 sps:$4 sm:$0xff]  }
  0xd0   : > { %3508 = vmatprep.subr.bf16.mxu1 %v5389_v13  ;;  %v5477_v13 = vld [vmem:[%s7338_s1 + $0xb40] ss:$12 sps:$4 sm:$0xff]  }
  0xd1   : > { %3412 = vmatmul.mubr.bf16.vlgmr.msra.gmra.mxu0 %v5378_v10  ;;  %v5476_v10 = vld [vmem:[%s7338_s1 + $0x9c4] ss:$12 sps:$4 sm:$0xff]  }
  0xd2   : > { %3455 = vmatmul.mubr.bf16.vlgmr.msra.gmra.mxu1 %v5381_v11  ;;  %3466 = vmatpush1.bf16.msra.mxu0 %v5384_v14  ;;  %v5479_v11 = vld [vmem:[%s7338_s1 + $0xb44] ss:$12 sps:$4 sm:$0xff]   ;;  %v5488_v14 = vld [vmem:[%s7338_s1 + $0xcac] ss:$12 sps:$4 sm:$0xff]  }
  0xd3   : > { %3509 = vmatpush1.bf16.msra.mxu1 %v5387_v15  ;;  %3467 = vmatprep.subr.bf16.mxu0 %v5392_v16  ;;  %v5480_v15 = vld [vmem:[%s6042_s6 + $0x30] ss:$72 sps:$4 sm:$0xff]  }
  0xd4   : > { %3510 = vmatprep.subr.bf16.mxu1 %v5395_v17  ;;  %3497 = vmatprep.mubr.bf16.mxu0 %v5482_v18  ;;  %v5483_v16 = vld [vmem:[%s6042_s6 + $0x38] ss:$72 sps:$4 sm:$0xff]   ;;  %v5489_v17 = vld [vmem:[%s7338_s1 + $0x170] ss:$12 sps:$4 sm:$0xff]   ;;  %v5486_v18 = vld [vmem:[%s7338_s1 + $0xca8] ss:$12 sps:$4 sm:$0xff]  }
  0xd5   : > { %3540 = vmatprep.mubr.bf16.mxu1 %v5485_v20  ;;  %v5493_v20 = vld [vmem:[%s7338_s1 + $0xc94] ss:$12 sps:$4 sm:$0xff]  }
  0xd6   : > { %3468 = vmatpush1.bf16.msra.mxu0 %v5390_v19  ;;  %v5490_v19 = vld [vmem:[%s7338_s1 + $0xb0] ss:$12 sps:$4 sm:$0xff]  }
  0xd7   : > { %3511 = vmatpush1.bf16.msra.mxu1 %v5393_v21  ;;  %3469 = vmatprep.subr.bf16.mxu0 %v5398_v22  ;;  %v5494_v21 = vld [vmem:[%s7338_s1 + $0x158] ss:$12 sps:$4 sm:$0xff]   ;;  %v5491_v22 = vld [vmem:[%s7338_s1 + $0xc90] ss:$12 sps:$4 sm:$0xff]  }
  0xd8   : > { %3512 = vmatprep.subr.bf16.mxu1 %v5401_v23  ;;  %v5568_v23 = vld [vmem:[%s6042_s6 + $0x44] ss:$72 sps:$4 sm:$0xff]  }
  0xda   : > { %3470 = vmatpush1.bf16.msra.mxu0 %v5396_v24  ;;  %v5495_v24 = vld [vmem:[%s7338_s1 + $0x98] ss:$12 sps:$4 sm:$0xff]  }
  0xdb   : > { %3513 = vmatpush1.bf16.msra.mxu1 %v5399_v25  ;;  %3471 = vmatprep.subr.bf16.mxu0 %v5404_v26  ;;  %v5498_v25 = vld [vmem:[%s7338_s1 + $0xc7c] ss:$12 sps:$4 sm:$0xff]   ;;  %v5499_v26 = vld [vmem:[%s7338_s1 + $0x140] ss:$12 sps:$4 sm:$0xff]  }
  0xdc   : > { %3514 = vmatprep.subr.bf16.mxu1 %v5407_v27  ;;  %v5496_v27 = vld [vmem:[%s7338_s1 + $0xc78] ss:$12 sps:$4 sm:$0xff]  }
  0xde   : > { %3472 = vmatpush1.bf16.msra.mxu0 %v5402_v28  ;;  %v5681_v28 = vld [vmem:[%s6042_s6 + $0x4] ss:$72 sps:$4 sm:$0xff]  }
  0xdf   : > { %3515 = vmatpush1.bf16.msra.mxu1 %v5405_v29  ;;  %3473 = vmatprep.subr.bf16.mxu0 %v5410_v30  ;;  %v5500_v29 = vld [vmem:[%s7338_s1 + $0x80] ss:$12 sps:$4 sm:$0xff]   ;;  %v5503_v30 = vld [vmem:[%s7338_s1 + $0xc64] ss:$12 sps:$4 sm:$0xff]  }
  0xe0   : > { %3516 = vmatprep.subr.bf16.mxu1 %v5413_v31  ;;  %v5504_v31 = vld [vmem:[%s7338_s1 + $0x128] ss:$12 sps:$4 sm:$0xff]  }
  0xe2   : > { %3474 = vmatpush1.bf16.msra.mxu0 %v5408_v32  ;;  %v5501_v32 = vld [vmem:[%s7338_s1 + $0xc60] ss:$12 sps:$4 sm:$0xff]  }
  0xe3   : > { %3517 = vmatpush1.bf16.msra.mxu1 %v5411_v33  ;;  %3475 = vmatprep.subr.bf16.mxu0 %v5416_v34  ;;  %v5505_v33 = vld [vmem:[%s7338_s1 + $0x68] ss:$12 sps:$4 sm:$0xff]   ;;  %v5508_v34 = vld [vmem:[%s7338_s1 + $0xc4c] ss:$12 sps:$4 sm:$0xff]  }
  0xe4   : > { %3518 = vmatprep.subr.bf16.mxu1 %v5419_v35  ;;  %v5509_v35 = vld [vmem:[%s7338_s1 + $0x110] ss:$12 sps:$4 sm:$0xff]  }
  0xe6   : > { %3476 = vmatpush1.bf16.msra.mxu0 %v5414_v36  ;;  %v5506_v36 = vld [vmem:[%s7338_s1 + $0xc48] ss:$12 sps:$4 sm:$0xff]  }
  0xe7   : > { %3519 = vmatpush1.bf16.msra.mxu1 %v5417_v37  ;;  %3477 = vmatprep.subr.bf16.mxu0 %v5422_v38  ;;  %v5510_v37 = vld [vmem:[%s7338_s1 + $0x50] ss:$12 sps:$4 sm:$0xff]   ;;  %v5513_v38 = vld [vmem:[%s7338_s1 + $0xc34] ss:$12 sps:$4 sm:$0xff]  }
  0xe8   : > { %3520 = vmatprep.subr.bf16.mxu1 %v5425_v39  ;;  %v5514_v39 = vld [vmem:[%s7338_s1 + $0xf8] ss:$12 sps:$4 sm:$0xff]  }
  0xea   : > { %3478 = vmatpush1.bf16.msra.mxu0 %v5420_v40  ;;  %v5511_v40 = vld [vmem:[%s7338_s1 + $0xc30] ss:$12 sps:$4 sm:$0xff]  }
  0xeb   : > { %3521 = vmatpush1.bf16.msra.mxu1 %v5423_v41  ;;  %3479 = vmatprep.subr.bf16.mxu0 %v5428_v42  ;;  %v5515_v41 = vld [vmem:[%s7338_s1 + $0x38] ss:$12 sps:$4 sm:$0xff]   ;;  %v5518_v42 = vld [vmem:[%s7338_s1 + $0xc1c] ss:$12 sps:$4 sm:$0xff]  }
  0xec   : > { %3522 = vmatprep.subr.bf16.mxu1 %v5431_v43  ;;  %v5519_v43 = vld [vmem:[%s7338_s1 + $0xe0] ss:$12 sps:$4 sm:$0xff]  }
  0xee   : > { %3480 = vmatpush1.bf16.msra.mxu0 %v5426_v44  ;;  %v5516_v44 = vld [vmem:[%s7338_s1 + $0xc18] ss:$12 sps:$4 sm:$0xff]  }
  0xef   : > { %3523 = vmatpush1.bf16.msra.mxu1 %v5429_v45  ;;  %3481 = vmatprep.subr.bf16.mxu0 %v5434_v46  ;;  %v5520_v45 = vld [vmem:[%s7338_s1 + $0x20] ss:$12 sps:$4 sm:$0xff]   ;;  %v5523_v46 = vld [vmem:[%s7338_s1 + $0xc04] ss:$12 sps:$4 sm:$0xff]  }
  0xf0   : > { %3524 = vmatprep.subr.bf16.mxu1 %v5437_v47  ;;  %v5524_v47 = vld [vmem:[%s7338_s1 + $0xc8] ss:$12 sps:$4 sm:$0xff]  }
  0xf2   : > { %3482 = vmatpush2.bf16.msra.mxu0 %v5432_v48  ;;  %v5521_v48 = vld [vmem:[%s7338_s1 + $0xc00] ss:$12 sps:$4 sm:$0xff]  }
  0xf3   : > { %3525 = vmatpush2.bf16.msra.mxu1 %v5435_v49  ;;  %3483 = vmatprep.subr.bf16.mxu0 %v5440_v50  ;;  %v5525_v49 = vld [vmem:[%s7338_s1 + $0x8] ss:$12 sps:$4 sm:$0xff]   ;;  %v5528_v50 = vld [vmem:[%s7338_s1 + $0xd6c] ss:$12 sps:$4 sm:$0xff]  }
  0xf4   : > { %3526 = vmatprep.subr.bf16.mxu1 %v5443_v51  ;;  %v5529_v51 = vld [vmem:[%s7338_s1 + $0x2f0] ss:$12 sps:$4 sm:$0xff]  }
  0xf6   : > { %3484 = vmatpush2.bf16.msra.mxu0 %v5438_v52  ;;  %v5526_v52 = vld [vmem:[%s7338_s1 + $0xd68] ss:$12 sps:$4 sm:$0xff]  }
  0xf7   : > { %3527 = vmatpush2.bf16.msra.mxu1 %v5441_v53  ;;  %3485 = vmatprep.subr.bf16.mxu0 %v5446_v54  ;;  %v5530_v53 = vld [vmem:[%s7338_s1 + $0x230] ss:$12 sps:$4 sm:$0xff]   ;;  %v5533_v54 = vld [vmem:[%s7338_s1 + $0xd54] ss:$12 sps:$4 sm:$0xff]  }
  0xf8   : > { %3528 = vmatprep.subr.bf16.mxu1 %v5449_v55  ;;  %v5534_v55 = vld [vmem:[%s7338_s1 + $0x2d8] ss:$12 sps:$4 sm:$0xff]  }
  0xfa   : > { %3486 = vmatpush2.bf16.msra.mxu0 %v5444_v56  ;;  %v5531_v56 = vld [vmem:[%s7338_s1 + $0xd50] ss:$12 sps:$4 sm:$0xff]  }
  0xfb   : > { %3529 = vmatpush2.bf16.msra.mxu1 %v5447_v57  ;;  %3487 = vmatprep.subr.bf16.mxu0 %v5452_v58  ;;  %v5682_v57 = vld [vmem:[%s6042_s6] ss:$72 sps:$4 sm:$0xff]   ;;  %v5535_v58 = vld [vmem:[%s7338_s1 + $0x218] ss:$12 sps:$4 sm:$0xff]  }
  0xfc   : > { %3530 = vmatprep.subr.bf16.mxu1 %v5455_v59  ;;  %v5538_v59 = vld [vmem:[%s7338_s1 + $0xd3c] ss:$12 sps:$4 sm:$0xff]  }
  0xfe   : > { %3488 = vmatpush2.bf16.msra.mxu0 %v5450_v60  ;;  %v5539_v60 = vld [vmem:[%s7338_s1 + $0x2c0] ss:$12 sps:$4 sm:$0xff]  }
  0xff   : > { %3531 = vmatpush2.bf16.msra.mxu1 %v5453_v61  ;;  %3489 = vmatprep.subr.bf16.mxu0 %v5458_v62  ;;  %v5536_v61 = vld [vmem:[%s7338_s1 + $0xd38] ss:$12 sps:$4 sm:$0xff]   ;;  %v5683_v62 = vld [vmem:[%s6042_s6 + $0xc] ss:$72 sps:$4 sm:$0xff]  }
 0x100   : > { %3532 = vmatprep.subr.bf16.mxu1 %v5461_v63  ;;  %v5540_v63 = vld [vmem:[%s7338_s1 + $0x200] ss:$12 sps:$4 sm:$0xff]  }
 0x102   : > { %3490 = vmatpush2.bf16.msra.mxu0 %v5456_v0  ;;  %v5543_v0 = vld [vmem:[%s7338_s1 + $0xd24] ss:$12 sps:$4 sm:$0xff]  }
 0x103   : > { %3533 = vmatpush2.bf16.msra.mxu1 %v5459_v1  ;;  %3491 = vmatprep.subr.bf16.mxu0 %v5464_v2  ;;  %v5544_v1 = vld [vmem:[%s7338_s1 + $0x2a8] ss:$12 sps:$4 sm:$0xff]   ;;  %v5541_v2 = vld [vmem:[%s7338_s1 + $0xd20] ss:$12 sps:$4 sm:$0xff]  }
 0x104   : > { %3534 = vmatprep.subr.bf16.mxu1 %v5467_v3  ;;  %v5545_v3 = vld [vmem:[%s7338_s1 + $0x1e8] ss:$12 sps:$4 sm:$0xff]  }
 0x106   : > { %3492 = vmatpush2.bf16.msra.mxu0 %v5462_v4  ;;  %v5548_v4 = vld [vmem:[%s7338_s1 + $0xd0c] ss:$12 sps:$4 sm:$0xff]  }
 0x107   : > { %3535 = vmatpush2.bf16.msra.mxu1 %v5465_v5  ;;  %3493 = vmatprep.subr.bf16.mxu0 %v5470_v6  ;;  %v5549_v5 = vld [vmem:[%s7338_s1 + $0x290] ss:$12 sps:$4 sm:$0xff]   ;;  %v5546_v6 = vld [vmem:[%s7338_s1 + $0xd08] ss:$12 sps:$4 sm:$0xff]  }
 0x108   : > { %3536 = vmatprep.subr.bf16.mxu1 %v5473_v7  ;;  %v5550_v7 = vld [vmem:[%s7338_s1 + $0x1d0] ss:$12 sps:$4 sm:$0xff]  }
 0x10a   : > { %3494 = vmatpush2.bf16.msra.mxu0 %v5468_v8  ;;  %v5553_v8 = vld [vmem:[%s7338_s1 + $0xcf4] ss:$12 sps:$4 sm:$0xff]  }
 0x10b   : > { %3537 = vmatpush2.bf16.msra.mxu1 %v5471_v9  ;;  %3495 = vmatprep.subr.bf16.mxu0 %v5476_v10  ;;  %v5554_v9 = vld [vmem:[%s7338_s1 + $0x278] ss:$12 sps:$4 sm:$0xff]   ;;  %v5551_v10 = vld [vmem:[%s7338_s1 + $0xcf0] ss:$12 sps:$4 sm:$0xff]  }
 0x10c   : > { %3538 = vmatprep.subr.bf16.mxu1 %v5479_v11  ;;  %v5555_v11 = vld [vmem:[%s7338_s1 + $0x1b8] ss:$12 sps:$4 sm:$0xff]  }
 0x10e   : > { %3496 = vmatpush2.bf16.msra.mxu0 %v5474_v12  ;;  %v5558_v12 = vld [vmem:[%s7338_s1 + $0xcdc] ss:$12 sps:$4 sm:$0xff]  }
 0x10f   : > { %3539 = vmatpush2.bf16.msra.mxu1 %v5477_v13  ;;  %3551 = vmatprep.subr.bf16.mxu0 %v5488_v14  ;;  %v5559_v13 = vld [vmem:[%s7338_s1 + $0x260] ss:$12 sps:$4 sm:$0xff]   ;;  %v5556_v14 = vld [vmem:[%s7338_s1 + $0xcd8] ss:$12 sps:$4 sm:$0xff]  }
 0x110   : > { %4725 = vmatprep.subr.bf16.mxu1 %v5489_v17  ;;  %v5564_v17 = vld [vmem:[%s7338_s1 + $0x248] ss:$12 sps:$4 sm:$0xff]  }
 0x111   : > { %3498 = vmatmul.mubr.bf16.vlgmr.msra.gmra.mxu0 %v5480_v15  ;;  %v5560_v15 = vld [vmem:[%s7338_s1 + $0x1a0] ss:$12 sps:$4 sm:$0xff]  }
 0x112   : > { %3541 = vmatmul.mubr.bf16.vlgmr.msra.gmra.mxu1 %v5483_v16  ;;  %3552 = vmatpush1.bf16.msra.mxu0 %v5486_v18  ;;  %v5563_v16 = vld [vmem:[%s7338_s1 + $0xcc4] ss:$12 sps:$4 sm:$0xff]   ;;  %v5561_v18 = vld [vmem:[%s7338_s1 + $0xcc0] ss:$12 sps:$4 sm:$0xff]  }
 0x113   : > { %4726 = vmatpush3.bf16.msra.mxu1 %v5490_v19  ;;  %3553 = vmatprep.subr.bf16.mxu0 %v5493_v20  ;;  %v5565_v19 = vld [vmem:[%s7338_s1 + $0x188] ss:$12 sps:$4 sm:$0xff]   ;;  %v5569_v20 = vld [vmem:[%s7338_s1 + $0x470] ss:$12 sps:$4 sm:$0xff]  }
 0x114   : > { %4727 = vmatprep.subr.bf16.mxu1 %v5494_v21  ;;  %3626 = vmatprep.mubr.bf16.mxu1 %v5681_v28  ;;  %v6893_v21 = vld [vmem:[%s6042_s6 + $0x40] ss:$72 sps:$4 sm:$0xff]  }
 0x115   : > { %3583 = vmatprep.mubr.bf16.mxu0 %v5568_v23  ;;  %v5570_v23 = vld [vmem:[%s7338_s1 + $0x3b0] ss:$12 sps:$4 sm:$0xff]  }
 0x116   : > { %3554 = vmatpush1.bf16.msra.mxu0 %v5491_v22  ;;  %v5571_v22 = vld [vmem:[%s7338_s1 + $0x5f0] ss:$12 sps:$4 sm:$0xff]  }
 0x117   : > { %4728 = vmatpush3.bf16.msra.mxu1 %v5495_v24  ;;  %3555 = vmatprep.subr.bf16.mxu0 %v5498_v25  ;;  %v5572_v24 = vld [vmem:[%s7338_s1 + $0x530] ss:$12 sps:$4 sm:$0xff]   ;;  %v5573_v25 = vld [vmem:[%s7338_s1 + $0x458] ss:$12 sps:$4 sm:$0xff]  }
 0x118   : > { %4729 = vmatprep.subr.bf16.mxu1 %v5499_v26  ;;  %v5575_v26 = vld [vmem:[%s7338_s1 + $0x5d8] ss:$12 sps:$4 sm:$0xff]   ;;  %v5684_v28 = vld [vmem:[%s6042_s6 + $0x8] ss:$72 sps:$4 sm:$0xff]  }
 0x11a   : > { %3556 = vmatpush1.bf16.msra.mxu0 %v5496_v27  ;;  %v5574_v27 = vld [vmem:[%s7338_s1 + $0x398] ss:$12 sps:$4 sm:$0xff]  }
 0x11b   : > { %4730 = vmatpush3.bf16.msra.mxu1 %v5500_v29  ;;  %3557 = vmatprep.subr.bf16.mxu0 %v5503_v30  ;;  %v5576_v29 = vld [vmem:[%s7338_s1 + $0x518] ss:$12 sps:$4 sm:$0xff]   ;;  %v5577_v30 = vld [vmem:[%s7338_s1 + $0x440] ss:$12 sps:$4 sm:$0xff]  }
 0x11c   : > { %4731 = vmatprep.subr.bf16.mxu1 %v5504_v31  ;;  %v5579_v31 = vld [vmem:[%s7338_s1 + $0x5c0] ss:$12 sps:$4 sm:$0xff]  }
 0x11e   : > { %3558 = vmatpush1.bf16.msra.mxu0 %v5501_v32  ;;  %v5578_v32 = vld [vmem:[%s7338_s1 + $0x380] ss:$12 sps:$4 sm:$0xff]  }
 0x11f   : > { %4732 = vmatpush3.bf16.msra.mxu1 %v5505_v33  ;;  %3559 = vmatprep.subr.bf16.mxu0 %v5508_v34  ;;  %v5685_v33 = vld [vmem:[%s6042_s6 + $0x14] ss:$72 sps:$4 sm:$0xff]  }
 0x120   : > { %4733 = vmatprep.subr.bf16.mxu1 %v5509_v35  ;;  %v5686_v34 = vld [vmem:[%s6042_s6 + $0x1c] ss:$72 sps:$4 sm:$0xff]   ;;  %v5580_v35 = vld [vmem:[%s7338_s1 + $0x500] ss:$12 sps:$4 sm:$0xff]  }
 0x122   : > { %3560 = vmatpush1.bf16.msra.mxu0 %v5506_v36  ;;  %v5581_v36 = vld [vmem:[%s7338_s1 + $0x428] ss:$12 sps:$4 sm:$0xff]  }
 0x123   : > { %4734 = vmatpush3.bf16.msra.mxu1 %v5510_v37  ;;  %3561 = vmatprep.subr.bf16.mxu0 %v5513_v38  ;;  %v5583_v37 = vld [vmem:[%s7338_s1 + $0x5a8] ss:$12 sps:$4 sm:$0xff]  }
 0x124   : > { %4735 = vmatprep.subr.bf16.mxu1 %v5514_v39  ;;  %v5582_v38 = vld [vmem:[%s7338_s1 + $0x368] ss:$12 sps:$4 sm:$0xff]  }
 0x125   : > { %v5584_v39 = vld [vmem:[%s7338_s1 + $0x4e8] ss:$12 sps:$4 sm:$0xff]  }
 0x126   : > { %3562 = vmatpush1.bf16.msra.mxu0 %v5511_v40  ;;  %v5585_v40 = vld [vmem:[%s7338_s1 + $0x410] ss:$12 sps:$4 sm:$0xff]  }
 0x127   : > { %4736 = vmatpush3.bf16.msra.mxu1 %v5515_v41  ;;  %3563 = vmatprep.subr.bf16.mxu0 %v5518_v42  ;;  %v5587_v41 = vld [vmem:[%s7338_s1 + $0x590] ss:$12 sps:$4 sm:$0xff]  }
 0x128   : > { %4737 = vmatprep.subr.bf16.mxu1 %v5519_v43  ;;  %v5586_v42 = vld [vmem:[%s7338_s1 + $0x350] ss:$12 sps:$4 sm:$0xff]  }
 0x129   : > { %v5588_v43 = vld [vmem:[%s7338_s1 + $0x4d0] ss:$12 sps:$4 sm:$0xff]  }
 0x12a   : > { %3564 = vmatpush1.bf16.msra.mxu0 %v5516_v44  ;;  %v5589_v44 = vld [vmem:[%s7338_s1 + $0x3f8] ss:$12 sps:$4 sm:$0xff]  }
 0x12b   : > { %4738 = vmatpush3.bf16.msra.mxu1 %v5520_v45  ;;  %3565 = vmatprep.subr.bf16.mxu0 %v5523_v46  ;;  %v5591_v45 = vld [vmem:[%s7338_s1 + $0x578] ss:$12 sps:$4 sm:$0xff]  }
 0x12c   : > { %4739 = vmatprep.subr.bf16.mxu1 %v5524_v47  ;;  %v5590_v46 = vld [vmem:[%s7338_s1 + $0x338] ss:$12 sps:$4 sm:$0xff]  }
 0x12d   : > { %v5592_v47 = vld [vmem:[%s7338_s1 + $0x4b8] ss:$12 sps:$4 sm:$0xff]  }
 0x12e   : > { %3566 = vmatpush1.bf16.msra.mxu0 %v5521_v48  ;;  %v5593_v48 = vld [vmem:[%s7338_s1 + $0x3e0] ss:$12 sps:$4 sm:$0xff]  }
 0x12f   : > { %4740 = vmatpush3.bf16.msra.mxu1 %v5525_v49  ;;  %3567 = vmatprep.subr.bf16.mxu0 %v5528_v50  ;;  %v5595_v49 = vld [vmem:[%s7338_s1 + $0x560] ss:$12 sps:$4 sm:$0xff]  }
 0x130   : > { %4747 = vmatprep.subr.bf16.mxu1 %v5529_v51  ;;  %v5594_v50 = vld [vmem:[%s7338_s1 + $0x320] ss:$12 sps:$4 sm:$0xff]  }
 0x131   : > { %v5596_v51 = vld [vmem:[%s7338_s1 + $0x4a0] ss:$12 sps:$4 sm:$0xff]  }
 0x132   : > { %3627 = vmatmul.mubr.bf16.vlgmr.msra.gmra.mxu1 %v5682_v57  ;;  %3568 = vmatpush2.bf16.msra.mxu0 %v5526_v52  ;;  %v5597_v52 = vld [vmem:[%s7338_s1 + $0x3c8] ss:$12 sps:$4 sm:$0xff]   ;;  %v5603_v57 = vld [vmem:[%s7338_s1 + $0x8f0] ss:$12 sps:$4 sm:$0xff]  }
 0x133   : > { %4748 = vmatpush3.bf16.msra.mxu1 %v5530_v53  ;;  %3569 = vmatprep.subr.bf16.mxu0 %v5533_v54  ;;  %v5599_v53 = vld [vmem:[%s7338_s1 + $0x548] ss:$12 sps:$4 sm:$0xff]  }
 0x134   : > { %4749 = vmatprep.subr.bf16.mxu1 %v5534_v55  ;;  %3667 = vmatprep.mubr.bf16.mxu1 %v5683_v62  ;;  %v5598_v54 = vld [vmem:[%s7338_s1 + $0x308] ss:$12 sps:$4 sm:$0xff]   ;;  %v5687_v62 = vld [vmem:[%s6042_s6 + $0x10] ss:$72 sps:$4 sm:$0xff]  }
 0x135   : > { %v5600_v55 = vld [vmem:[%s7338_s1 + $0x488] ss:$12 sps:$4 sm:$0xff]  }
 0x136   : > { %3570 = vmatpush2.bf16.msra.mxu0 %v5531_v56  ;;  %v5601_v56 = vld [vmem:[%s7338_s1 + $0x770] ss:$12 sps:$4 sm:$0xff]  }
 0x137   : > { %4750 = vmatpush3.bf16.msra.mxu1 %v5535_v58  ;;  %3571 = vmatprep.subr.bf16.mxu0 %v5538_v59  ;;  %v5602_v58 = vld [vmem:[%s7338_s1 + $0x6b0] ss:$12 sps:$4 sm:$0xff]  }
 0x138   : > { %4751 = vmatprep.subr.bf16.mxu1 %v5539_v60  ;;  %v5604_v59 = vld [vmem:[%s7338_s1 + $0x830] ss:$12 sps:$4 sm:$0xff]   ;;  %v5605_v60 = vld [vmem:[%s7338_s1 + $0x758] ss:$12 sps:$4 sm:$0xff]  }
 0x13a   : > { %3572 = vmatpush2.bf16.msra.mxu0 %v5536_v61  ;;  %v5607_v61 = vld [vmem:[%s7338_s1 + $0x8d8] ss:$12 sps:$4 sm:$0xff]  }
 0x13b   : > { %4752 = vmatpush3.bf16.msra.mxu1 %v5540_v63  ;;  %3573 = vmatprep.subr.bf16.mxu0 %v5543_v0  ;;  %v5688_v63 = vld [vmem:[%s6042_s6 + $0x18] ss:$72 sps:$4 sm:$0xff]  }
 0x13c   : > { %4753 = vmatprep.subr.bf16.mxu1 %v5544_v1  ;;  %v5606_v0 = vld [vmem:[%s7338_s1 + $0x698] ss:$12 sps:$4 sm:$0xff]  }
 0x13d   : > { %v5608_v1 = vld [vmem:[%s7338_s1 + $0x818] ss:$12 sps:$4 sm:$0xff]  }
 0x13e   : > { %3574 = vmatpush2.bf16.msra.mxu0 %v5541_v2  ;;  %v5609_v2 = vld [vmem:[%s7338_s1 + $0x740] ss:$12 sps:$4 sm:$0xff]  }
 0x13f   : > { %4754 = vmatpush3.bf16.msra.mxu1 %v5545_v3  ;;  %3575 = vmatprep.subr.bf16.mxu0 %v5548_v4  ;;  %v5611_v3 = vld [vmem:[%s7338_s1 + $0x8c0] ss:$12 sps:$4 sm:$0xff]  }
 0x140   : > { %4755 = vmatprep.subr.bf16.mxu1 %v5549_v5  ;;  %v5689_v4 = vld [vmem:[%s6042_s6 + $0x24] ss:$72 sps:$4 sm:$0xff]  }
 0x141   : > { %v5690_v5 = vld [vmem:[%s6042_s6 + $0x2c] ss:$72 sps:$4 sm:$0xff]  }
 0x142   : > { %3576 = vmatpush2.bf16.msra.mxu0 %v5546_v6  ;;  %v5610_v6 = vld [vmem:[%s7338_s1 + $0x680] ss:$12 sps:$4 sm:$0xff]  }
 0x143   : > { %4756 = vmatpush3.bf16.msra.mxu1 %v5550_v7  ;;  %3577 = vmatprep.subr.bf16.mxu0 %v5553_v8  ;;  %v5612_v7 = vld [vmem:[%s7338_s1 + $0x800] ss:$12 sps:$4 sm:$0xff]   ;;  %v5613_v8 = vld [vmem:[%s7338_s1 + $0x728] ss:$12 sps:$4 sm:$0xff]  }
 0x144   : > { %4757 = vmatprep.subr.bf16.mxu1 %v5554_v9  ;;  %v5615_v9 = vld [vmem:[%s7338_s1 + $0x8a8] ss:$12 sps:$4 sm:$0xff]  }
 0x146   : > { %3578 = vmatpush2.bf16.msra.mxu0 %v5551_v10  ;;  %v5614_v10 = vld [vmem:[%s7338_s1 + $0x668] ss:$12 sps:$4 sm:$0xff]  }
 0x147   : > { %4758 = vmatpush3.bf16.msra.mxu1 %v5555_v11  ;;  %3579 = vmatprep.subr.bf16.mxu0 %v5558_v12  ;;  %v5616_v11 = vld [vmem:[%s7338_s1 + $0x7e8] ss:$12 sps:$4 sm:$0xff]   ;;  %v5617_v12 = vld [vmem:[%s7338_s1 + $0x710] ss:$12 sps:$4 sm:$0xff]  }
 0x148   : > { %4759 = vmatprep.subr.bf16.mxu1 %v5559_v13  ;;  %v5619_v13 = vld [vmem:[%s7338_s1 + $0x890] ss:$12 sps:$4 sm:$0xff]  }
 0x14a   : > { %3580 = vmatpush2.bf16.msra.mxu0 %v5556_v14  ;;  %v5618_v14 = vld [vmem:[%s7338_s1 + $0x650] ss:$12 sps:$4 sm:$0xff]  }
 0x14b   : > { %4760 = vmatpush3.bf16.msra.mxu1 %v5560_v15  ;;  %3581 = vmatprep.subr.bf16.mxu0 %v5563_v16  ;;  %v5620_v15 = vld [vmem:[%s7338_s1 + $0x7d0] ss:$12 sps:$4 sm:$0xff]   ;;  %v5621_v16 = vld [vmem:[%s7338_s1 + $0x6f8] ss:$12 sps:$4 sm:$0xff]  }
 0x14c   : > { %4761 = vmatprep.subr.bf16.mxu1 %v5564_v17  ;;  %v5623_v17 = vld [vmem:[%s7338_s1 + $0x878] ss:$12 sps:$4 sm:$0xff]  }
 0x14e   : > { %3582 = vmatpush2.bf16.msra.mxu0 %v5561_v18  ;;  %v5622_v18 = vld [vmem:[%s7338_s1 + $0x638] ss:$12 sps:$4 sm:$0xff]  }
 0x14f   : > { %4762 = vmatpush3.bf16.msra.mxu1 %v5565_v19  ;;  %4769 = vmatprep.subr.bf16.mxu0 %v5569_v20  ;;  %v5624_v19 = vld [vmem:[%s7338_s1 + $0x7b8] ss:$12 sps:$4 sm:$0xff]   ;;  %v5625_v20 = vld [vmem:[%s7338_s1 + $0x6e0] ss:$12 sps:$4 sm:$0xff]  }
 0x150   : > { %4791 = vmatprep.subr.bf16.mxu1 %v5571_v22  ;;  %v5627_v22 = vld [vmem:[%s7338_s1 + $0x860] ss:$12 sps:$4 sm:$0xff]  }
 0x151   : > { %3584 = vmatmul.mubr.bf16.vlgmr.msra.gmra.mxu0 %v6893_v21 }
 0x152   : > { %3668 = vmatmul.mubr.bf16.vlgmr.msra.gmra.mxu1 %v5684_v28  ;;  %4770 = vmatpush3.bf16.msra.mxu0 %v5570_v23  ;;  %v5626_v23 = vld [vmem:[%s7338_s1 + $0x620] ss:$12 sps:$4 sm:$0xff]   ;;  %v5632_v28 = vld [vmem:[%s7338_s1 + $0x788] ss:$12 sps:$4 sm:$0xff]  }
 0x153   : > { %4792 = vmatpush3.bf16.msra.mxu1 %v5572_v24  ;;  %4771 = vmatprep.subr.bf16.mxu0 %v5573_v25  ;;  %v5628_v24 = vld [vmem:[%s7338_s1 + $0x7a0] ss:$12 sps:$4 sm:$0xff]   ;;  %v5629_v25 = vld [vmem:[%s7338_s1 + $0x6c8] ss:$12 sps:$4 sm:$0xff]  }
 0x154   : > { %4793 = vmatprep.subr.bf16.mxu1 %v5575_v26  ;;  %3708 = vmatprep.mubr.bf16.mxu0 %v5685_v33  ;;  %v5631_v26 = vld [vmem:[%s7338_s1 + $0x848] ss:$12 sps:$4 sm:$0xff]   ;;  %v5637_v33 = vld [vmem:[%s7338_s1 + $0xa58] ss:$12 sps:$4 sm:$0xff]  }
 0x155   : > { %3749 = vmatprep.mubr.bf16.mxu1 %v5686_v34  ;;  %v5639_v34 = vld [vmem:[%s7338_s1 + $0xbd8] ss:$12 sps:$4 sm:$0xff]  }
 0x156   : > { %4772 = vmatpush3.bf16.msra.mxu0 %v5574_v27  ;;  %v5630_v27 = vld [vmem:[%s7338_s1 + $0x608] ss:$12 sps:$4 sm:$0xff]  }
 0x157   : > { %4794 = vmatpush3.bf16.msra.mxu1 %v5576_v29  ;;  %4773 = vmatprep.subr.bf16.mxu0 %v5577_v30  ;;  %v5633_v29 = vld [vmem:[%s7338_s1 + $0xa70] ss:$12 sps:$4 sm:$0xff]  }
 0x158   : > { %4795 = vmatprep.subr.bf16.mxu1 %v5579_v31  ;;  %v5635_v30 = vld [vmem:[%s7338_s1 + $0xbf0] ss:$12 sps:$4 sm:$0xff]  }
 0x159   : > { %v5634_v31 = vld [vmem:[%s7338_s1 + $0x9b0] ss:$12 sps:$4 sm:$0xff]  }
 0x15a   : > { %4774 = vmatpush3.bf16.msra.mxu0 %v5578_v32  ;;  %v5636_v32 = vld [vmem:[%s7338_s1 + $0xb30] ss:$12 sps:$4 sm:$0xff]  }
 0x15b   : > { %4796 = vmatpush3.bf16.msra.mxu1 %v5580_v35  ;;  %4775 = vmatprep.subr.bf16.mxu0 %v5581_v36  ;;  %v5691_v35 = vld [vmem:[%s6042_s6 + $0x20] ss:$72 sps:$4 sm:$0xff]  }
 0x15c   : > { %4797 = vmatprep.subr.bf16.mxu1 %v5583_v37  ;;  %v5692_v36 = vld [vmem:[%s6042_s6 + $0x28] ss:$72 sps:$4 sm:$0xff]   ;;  %v5638_v37 = vld [vmem:[%s7338_s1 + $0x998] ss:$12 sps:$4 sm:$0xff]  }
 0x15e   : > { %4776 = vmatpush3.bf16.msra.mxu0 %v5582_v38  ;;  %v5640_v38 = vld [vmem:[%s7338_s1 + $0xb18] ss:$12 sps:$4 sm:$0xff]  }
 0x15f   : > { %4798 = vmatpush3.bf16.msra.mxu1 %v5584_v39  ;;  %4777 = vmatprep.subr.bf16.mxu0 %v5585_v40  ;;  %v5641_v39 = vld [vmem:[%s7338_s1 + $0xa40] ss:$12 sps:$4 sm:$0xff]  }
 0x160   : > { %4799 = vmatprep.subr.bf16.mxu1 %v5587_v41  ;;  %v5643_v40 = vld [vmem:[%s7338_s1 + $0xbc0] ss:$12 sps:$4 sm:$0xff]   ;;  %v5693_v41 = vld [vmem:[%s6042_s6 + $0x34] ss:$72 sps:$4 sm:$0xff]  }
 0x162   : > { %4778 = vmatpush3.bf16.msra.mxu0 %v5586_v42  ;;  %v5694_v42 = vld [vmem:[%s6042_s6 + $0x3c] ss:$72 sps:$4 sm:$0xff]  }
 0x163   : > { %4800 = vmatpush3.bf16.msra.mxu1 %v5588_v43  ;;  %4779 = vmatprep.subr.bf16.mxu0 %v5589_v44  ;;  %v5642_v43 = vld [vmem:[%s7338_s1 + $0x980] ss:$12 sps:$4 sm:$0xff]  }
 0x164   : > { %4801 = vmatprep.subr.bf16.mxu1 %v5591_v45  ;;  %v5644_v44 = vld [vmem:[%s7338_s1 + $0xb00] ss:$12 sps:$4 sm:$0xff]   ;;  %v5645_v45 = vld [vmem:[%s7338_s1 + $0xa28] ss:$12 sps:$4 sm:$0xff]  }
 0x166   : > { %4780 = vmatpush3.bf16.msra.mxu0 %v5590_v46  ;;  %v5647_v46 = vld [vmem:[%s7338_s1 + $0xba8] ss:$12 sps:$4 sm:$0xff]  }
 0x167   : > { %4802 = vmatpush3.bf16.msra.mxu1 %v5592_v47  ;;  %4781 = vmatprep.subr.bf16.mxu0 %v5593_v48  ;;  %v5646_v47 = vld [vmem:[%s7338_s1 + $0x968] ss:$12 sps:$4 sm:$0xff]  }
 0x168   : > { %4803 = vmatprep.subr.bf16.mxu1 %v5595_v49  ;;  %v5648_v48 = vld [vmem:[%s7338_s1 + $0xae8] ss:$12 sps:$4 sm:$0xff]   ;;  %v5649_v49 = vld [vmem:[%s7338_s1 + $0xa10] ss:$12 sps:$4 sm:$0xff]  }
 0x16a   : > { %4782 = vmatpush3.bf16.msra.mxu0 %v5594_v50  ;;  %v5651_v50 = vld [vmem:[%s7338_s1 + $0xb90] ss:$12 sps:$4 sm:$0xff]  }
 0x16b   : > { %4804 = vmatpush3.bf16.msra.mxu1 %v5596_v51  ;;  %4783 = vmatprep.subr.bf16.mxu0 %v5597_v52  ;;  %v5650_v51 = vld [vmem:[%s7338_s1 + $0x950] ss:$12 sps:$4 sm:$0xff]  }
 0x16c   : > { %4805 = vmatprep.subr.bf16.mxu1 %v5599_v53  ;;  %v5652_v52 = vld [vmem:[%s7338_s1 + $0xad0] ss:$12 sps:$4 sm:$0xff]   ;;  %v5653_v53 = vld [vmem:[%s7338_s1 + $0x9f8] ss:$12 sps:$4 sm:$0xff]  }
 0x16e   : > { %4784 = vmatpush3.bf16.msra.mxu0 %v5598_v54  ;;  %v5655_v54 = vld [vmem:[%s7338_s1 + $0xb78] ss:$12 sps:$4 sm:$0xff]  }
 0x16f   : > { %4806 = vmatpush3.bf16.msra.mxu1 %v5600_v55  ;;  %4813 = vmatprep.subr.bf16.mxu0 %v5601_v56  ;;  %v5654_v55 = vld [vmem:[%s7338_s1 + $0x938] ss:$12 sps:$4 sm:$0xff]  }
 0x170   : > { %4835 = vmatprep.subr.bf16.mxu1 %v5603_v57  ;;  %v5656_v56 = vld [vmem:[%s7338_s1 + $0xab8] ss:$12 sps:$4 sm:$0xff]   ;;  %v5657_v57 = vld [vmem:[%s7338_s1 + $0x9e0] ss:$12 sps:$4 sm:$0xff]  }
 0x171   : > { %3709 = vmatmul.mubr.bf16.vlgmr.msra.gmra.mxu0 %v5687_v62  ;;  %v5663_v62 = vld [vmem:[%s7338_s1 + $0xb48] ss:$12 sps:$4 sm:$0xff]  }
 0x172   : > { %3750 = vmatmul.mubr.bf16.vlgmr.msra.gmra.mxu1 %v5688_v63  ;;  %4814 = vmatpush3.bf16.msra.mxu0 %v5602_v58  ;;  %v5659_v58 = vld [vmem:[%s7338_s1 + $0xb60] ss:$12 sps:$4 sm:$0xff]   ;;  %v5662_v63 = vld [vmem:[%s7338_s1 + $0x908] ss:$12 sps:$4 sm:$0xff]  }
 0x173   : > { %4836 = vmatpush3.bf16.msra.mxu1 %v5604_v59  ;;  %4815 = vmatprep.subr.bf16.mxu0 %v5605_v60  ;;  %v5658_v59 = vld [vmem:[%s7338_s1 + $0x920] ss:$12 sps:$4 sm:$0xff]  }
 0x174   : > { %4837 = vmatprep.subr.bf16.mxu1 %v5607_v61  ;;  %3790 = vmatprep.mubr.bf16.mxu0 %v5689_v4  ;;  %v5660_v60 = vld [vmem:[%s7338_s1 + $0xaa0] ss:$12 sps:$4 sm:$0xff]   ;;  %v5661_v61 = vld [vmem:[%s7338_s1 + $0x9c8] ss:$12 sps:$4 sm:$0xff]   ;;  %v5695_v4 = vld [vmem:[%s6042_s6 + $0x30] ss:$72 sps:$4 sm:$0xff]  }
 0x175   : > { %3831 = vmatprep.mubr.bf16.mxu1 %v5690_v5  ;;  %v5696_v5 = vld [vmem:[%s6042_s6 + $0x38] ss:$72 sps:$4 sm:$0xff]  }
 0x176   : > { %4816 = vmatpush3.bf16.msra.mxu0 %v5606_v0  ;;  %v5664_v0 = vld [vmem:[%s7338_s1 + $0xa88] ss:$12 sps:$4 sm:$0xff]  }
 0x177   : > { %4838 = vmatpush3.bf16.msra.mxu1 %v5608_v1  ;;  %4817 = vmatprep.subr.bf16.mxu0 %v5609_v2  ;;  %v5665_v1 = vld [vmem:[%s7338_s1 + $0xd70] ss:$12 sps:$4 sm:$0xff]  }
 0x178   : > { %4839 = vmatprep.subr.bf16.mxu1 %v5611_v3  ;;  %v5666_v2 = vld [vmem:[%s7338_s1 + $0xcb0] ss:$12 sps:$4 sm:$0xff]   ;;  %v5667_v3 = vld [vmem:[%s7338_s1 + $0xd58] ss:$12 sps:$4 sm:$0xff]  }
 0x17a   : > { %4818 = vmatpush3.bf16.msra.mxu0 %v5610_v6  ;;  %v5668_v6 = vld [vmem:[%s7338_s1 + $0xc98] ss:$12 sps:$4 sm:$0xff]  }
 0x17b   : > { %4840 = vmatpush3.bf16.msra.mxu1 %v5612_v7  ;;  %4819 = vmatprep.subr.bf16.mxu0 %v5613_v8  ;;  %v5697_v7 = vld [vmem:[%s6042_s6 + $0x44] ss:$72 sps:$4 sm:$0xff]   ;;  %s7256_s6 = scalar_lea.vmem [#allocation2], %s4923_s30  }
 0x17c   : > { %4841 = vmatprep.subr.bf16.mxu1 %v5615_v9  ;;  %v5669_v8 = vld [vmem:[%s7338_s1 + $0xd40] ss:$12 sps:$4 sm:$0xff]  }
 0x17d   : > { %v5670_v9 = vld [vmem:[%s7338_s1 + $0xc80] ss:$12 sps:$4 sm:$0xff]  }
 0x17e   : > { %4820 = vmatpush3.bf16.msra.mxu0 %v5614_v10  ;;  %v5671_v10 = vld [vmem:[%s7338_s1 + $0xd28] ss:$12 sps:$4 sm:$0xff]  }
 0x17f   : > { %4842 = vmatpush3.bf16.msra.mxu1 %v5616_v11  ;;  %4821 = vmatprep.subr.bf16.mxu0 %v5617_v12  ;;  %v5672_v11 = vld [vmem:[%s7338_s1 + $0xc68] ss:$12 sps:$4 sm:$0xff]   ;;  %v5673_v12 = vld [vmem:[%s7338_s1 + $0xd10] ss:$12 sps:$4 sm:$0xff]  }
 0x180   : > { %4843 = vmatprep.subr.bf16.mxu1 %v5619_v13  ;;  %v5674_v13 = vld [vmem:[%s7338_s1 + $0xc50] ss:$12 sps:$4 sm:$0xff]  }
 0x182   : > { %4822 = vmatpush3.bf16.msra.mxu0 %v5618_v14  ;;  %v5675_v14 = vld [vmem:[%s7338_s1 + $0xcf8] ss:$12 sps:$4 sm:$0xff]  }
 0x183   : > { %4844 = vmatpush3.bf16.msra.mxu1 %v5620_v15  ;;  %4823 = vmatprep.subr.bf16.mxu0 %v5621_v16  ;;  %v5676_v15 = vld [vmem:[%s7338_s1 + $0xc38] ss:$12 sps:$4 sm:$0xff]   ;;  %v5677_v16 = vld [vmem:[%s7338_s1 + $0xce0] ss:$12 sps:$4 sm:$0xff]  }
 0x184   : > { %4845 = vmatprep.subr.bf16.mxu1 %v5623_v17  ;;  %v5678_v17 = vld [vmem:[%s7338_s1 + $0xc20] ss:$12 sps:$4 sm:$0xff]  }
 0x186   : > { %4824 = vmatpush3.bf16.msra.mxu0 %v5622_v18  ;;  %v5679_v18 = vld [vmem:[%s7338_s1 + $0xcc8] ss:$12 sps:$4 sm:$0xff]  }
 0x187   : > { %4846 = vmatpush3.bf16.msra.mxu1 %v5624_v19  ;;  %4825 = vmatprep.subr.bf16.mxu0 %v5625_v20  ;;  %v5680_v19 = vld [vmem:[%s7338_s1 + $0xc08] ss:$12 sps:$4 sm:$0xff]   ;;  %v3241_v20 = vpop.f32.mrf.mxu0 }
 0x188   : > { %4847 = vmatprep.subr.bf16.mxu1 %v5627_v22 }
 0x189   : > { %v3243_v22 = vpop.f32.mrf.mxu0 }
 0x18a   : > { %4826 = vmatpush3.bf16.msra.mxu0 %v5626_v23  ;;  %v3284_v23 = vpop.f32.mrf.mxu1 }
 0x18b   : > { %4848 = vmatpush3.bf16.msra.mxu1 %v5628_v24  ;;  %4827 = vmatprep.subr.bf16.mxu0 %v5629_v25  ;;  %v3245_v24 = vpop.f32.mrf.mxu0 }
 0x18c   : > { %4849 = vmatprep.subr.bf16.mxu1 %v5631_v26  ;;  %v3286_v25 = vpop.f32.mrf.mxu1 }
 0x18d   : > { %v3247_v26 = vpop.f32.mrf.mxu0 }
 0x18e   : > { %4828 = vmatpush3.bf16.msra.mxu0 %v5630_v27  ;;  %v3288_v27 = vpop.f32.mrf.mxu1 }
 0x18f   : > { %4850 = vmatpush3.bf16.msra.mxu1 %v5632_v28  ;;  %4857 = vmatprep.subr.bf16.mxu0 %v5633_v29  ;;  %v3327_v28 = vpop.f32.mrf.mxu0 }
 0x190   : > { %4879 = vmatprep.subr.bf16.mxu1 %v5635_v30  ;;  %v3290_v29 = vpop.f32.mrf.mxu1  ;;  %v798_v30 = vlaneseq }
 0x191   : > { %3791 = vmatmul.mubr.bf16.vlgmr.msra.gmra.mxu0 %v5691_v35 }
 0x192   : > { %3832 = vmatmul.mubr.bf16.vlgmr.msra.gmra.mxu1 %v5692_v36  ;;  %4858 = vmatpush3.bf16.msra.mxu0 %v5634_v31  ;;  %v3329_v31 = vpop.f32.mrf.mxu0 }
 0x193   : > { %4880 = vmatpush3.bf16.msra.mxu1 %v5636_v32  ;;  %4859 = vmatprep.subr.bf16.mxu0 %v5637_v33  ;;  %v3370_v32 = vpop.f32.mrf.mxu1  ;;  %v7244_v33 = vshrl.u32 %v798_v30, 7 }
 0x194   : > { %4881 = vmatprep.subr.bf16.mxu1 %v5639_v34  ;;  %3872 = vmatprep.mubr.bf16.mxu0 %v5693_v41  ;;  %v3331_v34 = vpop.f32.mrf.mxu0 }
 0x195   : > { %3913 = vmatprep.mubr.bf16.mxu1 %v5694_v42  ;;  %v3372_v35 = vpop.f32.mrf.mxu1  ;;  %v800_v36 = vsub.s32 0, %v7244_v33 }
 0x196   : > { %4860 = vmatpush3.bf16.msra.mxu0 %v5638_v37  ;;  %v3333_v37 = vpop.f32.mrf.mxu0 }
 0x197   : > { %4882 = vmatpush3.bf16.msra.mxu1 %v5640_v38  ;;  %4861 = vmatprep.subr.bf16.mxu0 %v5641_v39  ;;  %v3374_v38 = vpop.f32.mrf.mxu1  ;;  %v804_v39 = vsub.s32 1, %v7244_v33 }
 0x198   : > { %4883 = vmatprep.subr.bf16.mxu1 %v5643_v40  ;;  %v3413_v40 = vpop.f32.mrf.mxu0 }
 0x199   : > { %v3376_v42 = vpop.f32.mrf.mxu1 }
 0x19a   : > { %4862 = vmatpush3.bf16.msra.mxu0 %v5642_v43 }
 0x19b   : > { %4884 = vmatpush3.bf16.msra.mxu1 %v5644_v44  ;;  %4863 = vmatprep.subr.bf16.mxu0 %v5645_v45  ;;  %v3415_v44 = vpop.f32.mrf.mxu0  ;;  %v3456_v45 = vpop.f32.mrf.mxu1 }
 0x19c   : > { %4885 = vmatprep.subr.bf16.mxu1 %v5647_v46 }
 0x19e   : > { %4864 = vmatpush3.bf16.msra.mxu0 %v5646_v47 }
 0x19f   : > { %4886 = vmatpush3.bf16.msra.mxu1 %v5648_v48  ;;  %4865 = vmatprep.subr.bf16.mxu0 %v5649_v49  ;;  %v3417_v48 = vpop.f32.mrf.mxu0  ;;  %v3458_v49 = vpop.f32.mrf.mxu1 }
 0x1a0   : > { %4887 = vmatprep.subr.bf16.mxu1 %v5651_v50 }
 0x1a2   : > { %4866 = vmatpush3.bf16.msra.mxu0 %v5650_v51 }
 0x1a3   : > { %4888 = vmatpush3.bf16.msra.mxu1 %v5652_v52  ;;  %4867 = vmatprep.subr.bf16.mxu0 %v5653_v53 }
 0x1a4   : > { %4889 = vmatprep.subr.bf16.mxu1 %v5655_v54 }
 0x1a6   : > { %4868 = vmatpush3.bf16.msra.mxu0 %v5654_v55  ;;  %v3419_v55 = vpop.f32.mrf.mxu0 }
 0x1a7   : > { %4890 = vmatpush3.bf16.msra.mxu1 %v5656_v56  ;;  %4869 = vmatprep.subr.bf16.mxu0 %v5657_v57  ;;  %v3460_v56 = vpop.f32.mrf.mxu1 }
 0x1a8   : > { %4891 = vmatprep.subr.bf16.mxu1 %v5659_v58 }
 0x1aa   : > { %4870 = vmatpush3.bf16.msra.mxu0 %v5658_v59 }
 0x1ab   : > { %4892 = vmatpush3.bf16.msra.mxu1 %v5660_v60  ;;  %4871 = vmatprep.subr.bf16.mxu0 %v5661_v61 }
 0x1ac   : > { %4893 = vmatprep.subr.bf16.mxu1 %v5663_v62 }
 0x1ae   : > { %4872 = vmatpush3.bf16.msra.mxu0 %v5662_v63  ;;  %v3462_v63 = vpop.f32.mrf.mxu1 }
 0x1af   : > { %4894 = vmatpush3.bf16.msra.mxu1 %v5664_v0  ;;  %4901 = vmatprep.subr.bf16.mxu0 %v5665_v1 }
 0x1b1   : > { %3873 = vmatmul.mubr.bf16.vlgmr.msra.gmra.mxu0 %v5695_v4 }
 0x1b2   : > { %3914 = vmatmul.mubr.bf16.vlgmr.msra.gmra.mxu1 %v5696_v5  ;;  %4902 = vmatpush3.bf16.msra.mxu0 %v5666_v2 }
 0x1b3   : > { %3954 = vmatprep.mubr.bf16.mxu0 %v5697_v7  ;;  %4903 = vmatprep.subr.bf16.mxu0 %v5667_v3 }
 0x1b6   : > { %4904 = vmatpush3.bf16.msra.mxu0 %v5668_v6 }
 0x1b7   : > { %4905 = vmatprep.subr.bf16.mxu0 %v5669_v8 }
 0x1ba   : > { %4906 = vmatpush3.bf16.msra.mxu0 %v5670_v9 }
 0x1bb   : > { %4907 = vmatprep.subr.bf16.mxu0 %v5671_v10 }
 0x1be   : > { %4908 = vmatpush3.bf16.msra.mxu0 %v5672_v11 }
 0x1bf   : > { %4909 = vmatprep.subr.bf16.mxu0 %v5673_v12 }
 0x1c2   : > { %4910 = vmatpush3.bf16.msra.mxu0 %v5674_v13 }
 0x1c3   : > { %4911 = vmatprep.subr.bf16.mxu0 %v5675_v14 }
 0x1c6   : > { %4912 = vmatpush3.bf16.msra.mxu0 %v5676_v15 }
 0x1c7   : > { %4913 = vmatprep.subr.bf16.mxu0 %v5677_v16 }
 0x1ca   : > { %4914 = vmatpush3.bf16.msra.mxu0 %v5678_v17 }
 0x1cb   : > { %4915 = vmatprep.subr.bf16.mxu0 %v5679_v18 }
 0x1ce   : > { %4916 = vmatpush3.bf16.msra.mxu0 %v5680_v19 }
 0x1d1   : > { %3955 = vmatmul.mubr.bf16.vlgmr.msra.gmra.mxu0 %v6893_v21  ;;  %v7250_v21 = vld [vmem:[%s7339_s2] sm:$0x7]  ;;  %v3499_v59 = vpop.f32.mrf.mxu0 }
 0x1d2   : > { %v801_v41 = vrot.slane %v7250_v21, %v800_v36  ;;  %v805_v43 = vrot.slane %v7250_v21, %v804_v39  ;;  %v3542_v4 = vpop.f32.mrf.mxu1 }
 0x1d3   : > { %v3501_v3 = vpop.f32.mrf.mxu0 }
 0x1d4   : > { %v3242_v46 = vadd.f32 %v3241_v20, %v801_v41  ;;  %v3244_v47 = vadd.f32 %v3243_v22, %v805_v43  ;;  %v3246_v51 = vadd.f32 %v3245_v24, %v801_v41  ;;  %v3248_v53 = vadd.f32 %v3247_v26, %v805_v43  ;;  %v3544_v11 = vpop.f32.mrf.mxu1 }
 0x1d5   : > { %v3503_v10 = vpop.f32.mrf.mxu0 }
 0x1d6   : > { %v3285_v50 = vadd.f32 %v3284_v23, %v3242_v46  ;;  %v3287_v52 = vadd.f32 %v3286_v25, %v3244_v47  ;;  %v3289_v57 = vadd.f32 %v3288_v27, %v3246_v51  ;;  %v3291_v60 = vadd.f32 %v3290_v29, %v3248_v53  ;;  %v3546_v18 = vpop.f32.mrf.mxu1 }
 0x1d7   : > { %v3505_v17 = vpop.f32.mrf.mxu0 }
 0x1d8   : > { %v3328_v54 = vadd.f32 %v3327_v28, %v3285_v50  ;;  %v3330_v58 = vadd.f32 %v3329_v31, %v3287_v52  ;;  %v3332_v62 = vadd.f32 %v3331_v34, %v3289_v57  ;;  %v3334_v1 = vadd.f32 %v3333_v37, %v3291_v60  ;;  %v3548_v27 = vpop.f32.mrf.mxu1 }
 0x1d9   : > { %v808_v60 = vsub.s32 2, %v7244_v33 }
 0x1da   : > { %v3371_v61 = vadd.f32 %v3370_v32, %v3328_v54  ;;  %v3373_v0 = vadd.f32 %v3372_v35, %v3330_v58  ;;  %v3375_v5 = vadd.f32 %v3374_v38, %v3332_v62  ;;  %v3377_v7 = vadd.f32 %v3376_v42, %v3334_v1 }
 0x1dc   : > { %v3414_v2 = vadd.f32 %v3413_v40, %v3371_v61  ;;  %v3416_v6 = vadd.f32 %v3415_v44, %v3373_v0  ;;  %v3418_v9 = vadd.f32 %v3417_v48, %v3375_v5  ;;  %v3420_v13 = vadd.f32 %v3419_v55, %v3377_v7 }
 0x1de   : > { %v3457_v8 = vadd.f32 %v3456_v45, %v3414_v2  ;;  %v3459_v12 = vadd.f32 %v3458_v49, %v3416_v6  ;;  %v3461_v15 = vadd.f32 %v3460_v56, %v3418_v9  ;;  %v3463_v19 = vadd.f32 %v3462_v63, %v3420_v13 }
 0x1df   : > { %v809_v63 = vrot.slane %v7250_v21, %v808_v60 }
 0x1e0   : > { %v3500_v14 = vadd.f32 %v3499_v59, %v3457_v8  ;;  %v3502_v16 = vadd.f32 %v3501_v3, %v3459_v12  ;;  %v3504_v22 = vadd.f32 %v3503_v10, %v3461_v15  ;;  %v3506_v25 = vadd.f32 %v3505_v17, %v3463_v19 }
 0x1e2   : > { %v3543_v20 = vadd.f32 %v3542_v4, %v3500_v14  ;;  %v3545_v24 = vadd.f32 %v3544_v11, %v3502_v16  ;;  %v3547_v29 = vadd.f32 %v3546_v18, %v3504_v22  ;;  %v3549_v32 = vadd.f32 %v3548_v27, %v3506_v25 }
 0x1f2   : > { %v4741_v43 = vpop.f32.mrf.mxu1 }
 0x1f4   : > { %v4742_v44 = vpop.f32.mrf.mxu1 }
 0x1f5   : > { %v4743_v0 = vadd.f32 %v4742_v44, %v4741_v43 }
 0x1f6   : > { %v4744_v45 = vpop.f32.mrf.mxu1 }
 0x1f7   : > { %v3629_v3 = vadd.f32 %v4743_v0, %v809_v63 }
 0x1f8   : > { %v4745_v46 = vpop.f32.mrf.mxu1 }
 0x1f9   : > { %v4746_v7 = vadd.f32 %v4745_v46, %v4744_v45 }
 0x1fb   : > { %v3632_v13 = vadd.f32 %v4746_v7, %v809_v63 }
 0x211   : > { %v3585_v23 = vpop.f32.mrf.mxu0 }
 0x212   : > { %v3586_v26 = vadd.f32 %v3585_v23, %v3543_v20  ;;  %v4763_v47 = vpop.f32.mrf.mxu1 }
 0x213   : > { %v3587_v28 = vpop.f32.mrf.mxu0 }
 0x214   : > { %v3588_v30 = vadd.f32 %v3587_v28, %v3545_v24  ;;  %v3963_v34 = vmax.f32 %v3586_v26, 0.0  ;;  %v4764_v48 = vpop.f32.mrf.mxu1 }
 0x215   : > { %v3589_v31 = vpop.f32.mrf.mxu0  ;;  %v4765_v4 = vadd.f32 %v4764_v48, %v4763_v47 }
 0x216   : > { %v3964_v35 = vmax.f32 %v3588_v30, 0.0  ;;  %v3590_v36 = vadd.f32 %v3589_v31, %v3547_v29  ;;  %v4766_v49 = vpop.f32.mrf.mxu1 }
 0x217   : > { %v3591_v37 = vpop.f32.mrf.mxu0  ;;  %v3670_v10 = vadd.f32 %v4765_v4, %v3629_v3 }
 0x218   : > { %v4721_v38 = vpack.c.bf16 %v3964_v35, %v3963_v34  ;;  %v3592_v39 = vadd.f32 %v3591_v37, %v3549_v32  ;;  %v3966_v40 = vmax.f32 %v3590_v36, 0.0  ;;  %v4767_v51 = vpop.f32.mrf.mxu1 }
 0x219   : > { %v4768_v11 = vadd.f32 %v4767_v51, %v4766_v49 }
 0x21a   : > { %3989 = vst [vmem:[%s7256_s6] sm:$0xff] %v4721_v38  ;;  %v3967_v41 = vmax.f32 %v3592_v39, 0.0 }
 0x21b   : > { %v3673_v21 = vadd.f32 %v4768_v11, %v3632_v13 }
 0x21c   : > { %v4723_v42 = vpack.c.bf16 %v3967_v41, %v3966_v40 }
 0x21e   : > { %3991 = vst [vmem:[%s7256_s6 + $0xc] sm:$0xff] %v4723_v42 }
 0x231   : > { %v4785_v50 = vpop.f32.mrf.mxu0 }
 0x232   : > { %v4807_v53 = vpop.f32.mrf.mxu1 }
 0x233   : > { %v4786_v52 = vpop.f32.mrf.mxu0 }
 0x234   : > { %v4808_v55 = vpop.f32.mrf.mxu1  ;;  %v4787_v8 = vadd.f32 %v4786_v52, %v4785_v50 }
 0x235   : > { %v4788_v54 = vpop.f32.mrf.mxu0  ;;  %v4809_v33 = vadd.f32 %v4808_v55, %v4807_v53 }
 0x236   : > { %v4810_v57 = vpop.f32.mrf.mxu1  ;;  %v3711_v14 = vadd.f32 %v4787_v8, %v3670_v10 }
 0x237   : > { %v4789_v56 = vpop.f32.mrf.mxu0 }
 0x238   : > { %v4811_v59 = vpop.f32.mrf.mxu1  ;;  %v4790_v15 = vadd.f32 %v4789_v56, %v4788_v54  ;;  %v3752_v19 = vadd.f32 %v4809_v33, %v3711_v14 }
 0x239   : > { %v4812_v22 = vadd.f32 %v4811_v59, %v4810_v57 }
 0x23a   : > { %v3714_v20 = vadd.f32 %v4790_v15, %v3673_v21 }
 0x23c   : > { %v3755_v28 = vadd.f32 %v4812_v22, %v3714_v20 }
 0x251   : > { %v4829_v58 = vpop.f32.mrf.mxu0 }
 0x252   : > { %v4851_v62 = vpop.f32.mrf.mxu1 }
 0x253   : > { %v4830_v61 = vpop.f32.mrf.mxu0 }
 0x254   : > { %v4852_v2 = vpop.f32.mrf.mxu1  ;;  %v4831_v18 = vadd.f32 %v4830_v61, %v4829_v58 }
 0x255   : > { %v4832_v1 = vpop.f32.mrf.mxu0  ;;  %v4853_v26 = vadd.f32 %v4852_v2, %v4851_v62 }
 0x256   : > { %v4854_v6 = vpop.f32.mrf.mxu1  ;;  %v3793_v25 = vadd.f32 %v4831_v18, %v3752_v19 }
 0x257   : > { %v4833_v5 = vpop.f32.mrf.mxu0 }
 0x258   : > { %v4855_v12 = vpop.f32.mrf.mxu1  ;;  %v4834_v27 = vadd.f32 %v4833_v5, %v4832_v1  ;;  %v3834_v32 = vadd.f32 %v4853_v26, %v3793_v25 }
 0x259   : > { %v4856_v35 = vadd.f32 %v4855_v12, %v4854_v6 }
 0x25a   : > { %v3796_v34 = vadd.f32 %v4834_v27, %v3755_v28 }
 0x25c   : > { %v3837_v41 = vadd.f32 %v4856_v35, %v3796_v34 }
 0x271   : > { %v4873_v9 = vpop.f32.mrf.mxu0 }
 0x272   : > { %v4895_v17 = vpop.f32.mrf.mxu1 }
 0x273   : > { %v4874_v16 = vpop.f32.mrf.mxu0 }
 0x274   : > { %v4896_v24 = vpop.f32.mrf.mxu1  ;;  %v4875_v29 = vadd.f32 %v4874_v16, %v4873_v9 }
 0x275   : > { %v4876_v23 = vpop.f32.mrf.mxu0  ;;  %v4897_v37 = vadd.f32 %v4896_v24, %v4895_v17 }
 0x276   : > { %v4898_v31 = vpop.f32.mrf.mxu1  ;;  %v3875_v36 = vadd.f32 %v4875_v29, %v3834_v32 }
 0x277   : > { %v4877_v30 = vpop.f32.mrf.mxu0 }
 0x278   : > { %v4878_v38 = vadd.f32 %v4877_v30, %v4876_v23  ;;  %v4899_v39 = vpop.f32.mrf.mxu1  ;;  %v3916_v43 = vadd.f32 %v4897_v37, %v3875_v36 }
 0x279   : > { %v4900_v45 = vadd.f32 %v4899_v39, %v4898_v31 }
 0x27a   : > { %v3878_v44 = vadd.f32 %v4878_v38, %v3837_v41 }
 0x27c   : > { %v3919_v50 = vadd.f32 %v4900_v45, %v3878_v44 }
 0x291   : > { %v4917_v40 = vpop.f32.mrf.mxu0 }
 0x293   : > { %v4918_v42 = vpop.f32.mrf.mxu0 }
 0x294   : > { %v4919_v46 = vadd.f32 %v4918_v42, %v4917_v40 }
 0x295   : > { %v4920_v47 = vpop.f32.mrf.mxu0 }
 0x296   : > { %v3957_v48 = vadd.f32 %v4919_v46, %v3916_v43 }
 0x297   : > { %v4921_v49 = vpop.f32.mrf.mxu0 }
 0x298   : > { %v3965_v51 = vmax.f32 %v3957_v48, 0.0  ;;  %v4922_v52 = vadd.f32 %v4921_v49, %v4920_v47 }
 0x29a   : > { %v4722_v53 = vpack.c.bf16 %v3965_v51, %v3965_v51  ;;  %v3960_v54 = vadd.f32 %v4922_v52, %v3919_v50 }
 0x29c   : > { %3990 = vst [vmem:[%s7256_s6 + $0x8] sm:$0xf] %v4722_v53  ;;  %v3968_v55 = vmax.f32 %v3960_v54, 0.0  ;;  %3999 = sbr.rel (!%p5895_p4) target bundleno = 739 (0x2e3), region = 36 }
 0x29e   : > { %v4724_v56 = vpack.c.bf16 %v3968_v55, %v3968_v55 }
 0x2a0   : > { %3992 = vst [vmem:[%s7256_s6 + $0x14] sm:$0xf] %v4724_v56 }
 0x2a1   : > { %s7346_s12 = smov (!%p4002_p8, %s4001_s12), 2 }
 0x2a2   : > { %s4707_s9 = smul.u32 192, %s7346_s12 }
 0x2a4   : > { %p4711_p9 = scmp.eq.s32.totalorder %s4707_s9, 0 }
 0x2a5   : > { %s4015_s20 = scalar_lea.vmem (!%p4711_p9), %s7256_s6, 8 [#allocation2]   ;;  %s4016_s10 = scalar_lea.vmem (!%p4711_p9), %s7271_s8, 8  }
 0x2a6   : > { %4012 = sbr.rel (%p4711_p9) target bundleno = 739 (0x2e3), region = 40  ;;  %s7279_s11 = sshrl.u32 (!%p4711_p9), %s7346_s12, 1 }
 0x2a7   : > { %p4712_p10 = scmp.le.s32.totalorder (!%p4711_p9), %s7279_s11, 0 }
 0x2ab   : > { %4173 = sbr.rel (%p4712_p10) target bundleno = 696 (0x2b8), region = 106  ;;  %s5786_s15 = smov (!%p4712_p10), %s7271_s8  }
 0x2ac   : > { %s5790_s14 = smov (!%p4712_p10), %s7256_s6   ;;  %s5794_s17 = smov (!%p4712_p10), 0  }
 0x2ad   : > { %s5798_s18 = smov (!%p4712_p10), 0  }
 0x2b0 LB: >> { %v4027_v57 = vld [vmem:[%s5792_s14] sm:$0xff]  ;;  %v4029_v58 = vld [vmem:[%s5792_s14 + $0xc] sm:$0xff]  ;;  %s4031_s21 = sadd.s32 1, %s5796_s17  ;;  %s4021_s18 = sadd.s32 1, %s5800_s18   ;;  %s5800_s18 = sphi %s5798_s18, %s4021_s18   ;;  %s5796_s17 = sphi %s5794_s17, %s5795_s17   ;;  %s5792_s14 = sphi %s5790_s14, %s4036_s14   ;;  %s5788_s15 = sphi %s5786_s15, %s4037_s15  }
 0x2b1   : >> { %4028 = vst [vmem:[%s5788_s15] sm:$0xff] %v4027_v57  ;;  %4030 = vst [vmem:[%s5788_s15 + $0xc] sm:$0xff] %v4029_v58  ;;  %p4032_p11 = scmp.ge.s32.totalorder %s4031_s21, %s7279_s11  ;;  %p4020_p12 = scmp.ge.s32.totalorder %s4021_s18, %s7279_s11 }
 0x2b3   : >> { %s7348_s21 = smov (%p4032_p11, %s4031_s21), 0  ;;  %4023 = sbr.rel (!%p4020_p12) target bundleno = 688 (0x2b0), region = 112 }
 0x2b4   : >> { %s4034_s22 = smul.u32 24, %s7348_s21  ;;  %s5795_s17 = smov %s7348_s21  }
 0x2b6   : >> { %s4036_s14 = scalar_lea.vmem %s7256_s6, %s4034_s22 [#allocation2]   ;;  %s4037_s15 = scalar_lea.vmem %s7271_s8, %s4034_s22  }
 0x2b8 PF: > { %s7291_s23 = sand.u32 1, %s7346_s12   ;;  %s4714_s24 = smul.u32 24, %s7279_s11 }
 0x2b9   : > { %p4716_p13 = scmp.le.s32.totalorder %s7291_s23, 0 }
 0x2ba   : > { %s7295_s25 = scalar_lea.vmem %s7256_s6, %s4714_s24 [#allocation2]   ;;  %s7298_s26 = scalar_lea.vmem %s7271_s8, %s4714_s24  }
 0x2bb   : > { %4187 = sbr.rel (%p4716_p13) target bundleno = 712 (0x2c8), region = 117  ;;  %s5802_s27 = smov (!%p4716_p13), %s7298_s26  }
 0x2bc   : > { %s5806_s28 = smov (!%p4716_p13), %s7295_s25   ;;  %s5810_s29 = smov (!%p4716_p13), 0  }
 0x2bd   : > { %s5814_s30 = smov (!%p4716_p13), 0  }
 0x2c0 LB: >> { %v4054_v59 = vld [vmem:[%s5808_s28] sm:$0xff]  ;;  %s4056_s12 = sadd.s32 1, %s5812_s29  ;;  %s4048_s30 = sadd.s32 1, %s5816_s30   ;;  %s5816_s30 = sphi %s5814_s30, %s4048_s30   ;;  %s5812_s29 = sphi %s5810_s29, %s5811_s29   ;;  %s5808_s28 = sphi %s5806_s28, %s4061_s28   ;;  %s5804_s27 = sphi %s5802_s27, %s4062_s27  }
 0x2c1   : >> { %4055 = vst [vmem:[%s5804_s27] sm:$0xff] %v4054_v59  ;;  %p4057_p0 = scmp.ge.s32.totalorder %s4056_s12, %s7291_s23  ;;  %p4047_p1 = scmp.ge.s32.totalorder %s4048_s30, %s7291_s23 }
 0x2c3   : >> { %s7350_s12 = smov (%p4057_p0, %s4056_s12), 0  ;;  %4050 = sbr.rel (!%p4047_p1) target bundleno = 704 (0x2c0), region = 123 }
 0x2c4   : >> { %s4059_s4 = smul.u32 12, %s7350_s12  ;;  %s5811_s29 = smov %s7350_s12  }
 0x2c6   : >> { %s4061_s28 = scalar_lea.vmem %s7295_s25, %s4059_s4 [#allocation2]   ;;  %s4062_s27 = scalar_lea.vmem %s7298_s26, %s4059_s4  }
 0x2c8 PF: > { %4201 = sbr.rel (%p4712_p10) target bundleno = 725 (0x2d5), region = 128  ;;  %s5818_s5 = smov (!%p4712_p10), %s4016_s10  }
 0x2c9   : > { %s5822_s7 = smov (!%p4712_p10), %s4015_s20   ;;  %s5826_s9 = smov (!%p4712_p10), 0  }
 0x2ca   : > { %s5830_s15 = smov (!%p4712_p10), 0  }
 0x2cd LB: >> { %v4075_v60 = vld [vmem:[%s5824_s7] sm:$0xf]  ;;  %v4077_v61 = vld [vmem:[%s5824_s7 + $0xc] sm:$0xf]  ;;  %s4079_s14 = sadd.s32 1, %s5828_s9  ;;  %s4069_s15 = sadd.s32 1, %s5832_s15   ;;  %s5832_s15 = sphi %s5830_s15, %s4069_s15   ;;  %s5828_s9 = sphi %s5826_s9, %s5827_s9   ;;  %s5824_s7 = sphi %s5822_s7, %s4150_s7   ;;  %s5820_s5 = sphi %s5818_s5, %s4153_s5  }
 0x2ce   : >> { %4076 = vst [vmem:[%s5820_s5] sm:$0xf] %v4075_v60  ;;  %4078 = vst [vmem:[%s5820_s5 + $0xc] sm:$0xf] %v4077_v61  ;;  %p4080_p2 = scmp.ge.s32.totalorder %s4079_s14, %s7279_s11  ;;  %p4068_p3 = scmp.ge.s32.totalorder %s4069_s15, %s7279_s11 }
 0x2d0   : >> { %s7352_s14 = smov (%p4080_p2, %s4079_s14), 0  ;;  %4071 = sbr.rel (!%p4068_p3) target bundleno = 717 (0x2cd), region = 134 }
 0x2d1   : >> { %s4148_s10 = smul.u32 24, %s7352_s14  ;;  %s5827_s9 = smov %s7352_s14  }
 0x2d3   : >> { %s4149_s20 = scalar_lea.vmem %s7256_s6, %s4148_s10 [#allocation2]  ;;  %s4152_s17 = scalar_lea.vmem %s7271_s8, %s4148_s10 }
 0x2d4   : >> { %s4150_s7 = scalar_lea.vmem %s4149_s20, 8 [#allocation2]   ;;  %s4153_s5 = scalar_lea.vmem %s4152_s17, 8  }
 0x2d5 PF: > { %s4156_s18 = scalar_lea.vmem %s7295_s25, 8 [#allocation2]   ;;  %s4159_s21 = scalar_lea.vmem %s7298_s26, 8  }
 0x2d6   : > { %4215 = sbr.rel (%p4716_p13) target bundleno = 739 (0x2e3), region = 139  ;;  %s5834_s22 = smov (!%p4716_p13), %s4159_s21  }
 0x2d7   : > { %s5838_s24 = smov (!%p4716_p13), %s4156_s18   ;;  %s5842_s27 = smov (!%p4716_p13), 0  }
 0x2d8   : > { %s5846_s28 = smov (!%p4716_p13), 0  }
 0x2db LB: >> { %v4102_v62 = vld [vmem:[%s5840_s24] sm:$0xf]  ;;  %s4104_s6 = sadd.s32 1, %s5844_s27  ;;  %s4096_s28 = sadd.s32 1, %s5848_s28   ;;  %s5848_s28 = sphi %s5846_s28, %s4096_s28   ;;  %s5844_s27 = sphi %s5842_s27, %s5843_s27   ;;  %s5840_s24 = sphi %s5838_s24, %s4162_s24   ;;  %s5836_s22 = sphi %s5834_s22, %s4165_s22  }
 0x2dc   : >> { %4103 = vst [vmem:[%s5836_s22] sm:$0xf] %v4102_v62  ;;  %p4105_p4 = scmp.ge.s32.totalorder %s4104_s6, %s7291_s23  ;;  %p4095_p5 = scmp.ge.s32.totalorder %s4096_s28, %s7291_s23 }
 0x2de   : >> { %s7354_s6 = smov (%p4105_p4, %s4104_s6), 0  ;;  %4098 = sbr.rel (!%p4095_p5) target bundleno = 731 (0x2db), region = 145 }
 0x2df   : >> { %s4160_s8 = smul.u32 12, %s7354_s6  ;;  %s5843_s27 = smov %s7354_s6  }
 0x2e1   : >> { %s4161_s11 = scalar_lea.vmem %s7295_s25, %s4160_s8 [#allocation2]  ;;  %s4164_s29 = scalar_lea.vmem %s7298_s26, %s4160_s8 }
 0x2e2   : >> { %s4162_s24 = scalar_lea.vmem %s4161_s11, 8 [#allocation2]   ;;  %s4165_s22 = scalar_lea.vmem %s4164_s29, 8  }
 0x2e3 PF: > { %p10_p6 = scmp.ge.s32.totalorder %s5885_s16, 4   ;;  %s7342_s12 = smov %s5780_s13 }
 0x2e4   : > { %s7343_s13 = smov %s5893_s19  ;;  %s7344_s14 = smov %s5885_s16 }
 0x2e5   :  { %12 = sbr.rel (!%p10_p6) target bundleno = 2 (0x2), region = 156 }

// kernel: _lambda_.17
= control target key start
LH: loop header
LB: loop body
LE: loop exit
PB: predicated region body
PF: predicated region fallthrough
CT: control target
= control target key end

     0   :  { %vm49_vm0 = vcmask 1040384   ;;  %s308_s0 = inlined_call_operand.vmem [shape: bf16[2,9,384], index: 0, kind: input, shape index: {}]   ;;  %s309_s1 = inlined_call_operand.vmem [shape: f32[1,1,384], index: 1, kind: input, shape index: {}]   ;;  %s310_s2 = inlined_call_operand.hbm [shape: f32[1,1], index: 2, kind: output, shape index: {}]  }
   0x1   :  { %v18_v0 = vld [vmem:[%s308_s0] sm:$0xff]  ;;  %v20_v2 = vld [vmem:[%s308_s0 + $0xc] sm:$0x11]  ;;  %v21_v6 = vld [vmem:[%s308_s0 + $0x14] sm:$0x1] }
   0x2   :  { %v19_v1 = vld [vmem:[%s308_s0 + $0x8] ss:$24 sps:$4 sm:$0xff]   ;;  %v241_v3 = vunpack.c.l.bf16 %v18_v0  ;;  %v243_v4 = vunpack.c.h.bf16 %v18_v0  ;;  %v250_v7 = vunpack.c.l.bf16 %v20_v2  ;;  %v22_v8 = vld [vmem:[%s308_s0 + $0x18] sm:$0xff]  ;;  %v255_v9 = vunpack.c.h.bf16 %v20_v2 }
   0x3   :  { %v245_v5 = vunpack.c.l.bf16 %v19_v1  ;;  %v257_v10 = vunpack.c.l.bf16 %v21_v6  ;;  %v259_v11 = vunpack.c.l.bf16 %v22_v8  ;;  %v261_v12 = vunpack.c.h.bf16 %v22_v8  ;;  %v24_v13 = vld [vmem:[%s308_s0 + $0x24] sm:$0x11] }
   0x4   :  { %7 = vsyncpa [#allocation3], 0  ;;  %v39_v14 = vmul.f32 %v241_v3, %v241_v3  ;;  %v40_v15 = vmul.f32 %v243_v4, %v243_v4  ;;  %v42_v17 = vmul.f32 %v250_v7, %v250_v7  ;;  %v43_v18 = vmul.f32 %v255_v9, %v255_v9  ;;  %v25_v22 = vld [vmem:[%s308_s0 + $0x2c] sm:$0x1]  ;;  %v38_v60 = vld [vmem:[%s309_s1] sm:$0x7] }
   0x5   :  { %v41_v16 = vmul.f32 %v245_v5, %v245_v5  ;;  %v44_v19 = vmul.f32 %v257_v10, %v257_v10  ;;  %v34_v20 = vunpack.c.h.bf16 %v19_v1  ;;  %v61_v21 = vmul.f32 %v259_v11, %v259_v11  ;;  %s216_s1 = smov [#allocation2]  }
   0x6   :  { %v45_v23 = vadd.f32 %v40_v15, %v39_v14  ;;  %v50_v24 = vsel %vm49_vm0, %v42_v17, 0.0  ;;  %v62_v25 = vmul.f32 %v261_v12, %v261_v12  ;;  %v35_v26 = vunpack.c.l.bf16 %v24_v13  ;;  %s175_s24 = sshll.u32 %s216_s1, 4  ;;  %s176_s24 = int_to_ptr.vmem [resolvable:$true] %s175_s24 }
   0x7   :  { %v51_v27 = vsel %vm49_vm0, %v43_v18, 0.0  ;;  %v53_v28 = vsel %vm49_vm0, %v44_v19, 0.0  ;;  %v63_v29 = vmul.f32 %v34_v20, %v34_v20  ;;  %v36_v30 = vunpack.c.h.bf16 %v24_v13  ;;  %s193_s25 = scalar_lea.vmem %s176_s24, 16  ;;  %s197_s26 = scalar_lea.vmem %s176_s24, 32 }
   0x8   :  { %v46_v31 = vadd.f32 %v45_v23, %v41_v16  ;;  %v52_v32 = vadd.f32 %v51_v27, %v50_v24  ;;  %v67_v33 = vadd.f32 %v62_v25, %v61_v21  ;;  %v37_v34 = vunpack.c.l.bf16 %v25_v22  ;;  %p194_p0 = scmp.ne.s32.totalorder %s176_s24, %s193_s25  ;;  %p198_p1 = scmp.lt.s32.totalorder %s176_s24, %s176_s24 }
   0x9   :  { %v64_v35 = vmul.f32 %v35_v26, %v35_v26  ;;  %v65_v36 = vmul.f32 %v36_v30, %v36_v30  ;;  %v107_v53 = vlaneseq  ;;  %vm156_vm1 = vcmask 130112   ;;  %p199_p2 = scmp.lt.s32.totalorder %s197_s26, %s193_s25 }
   0xa   :  { %47 = vadd.xlane.f32.xlu1 %v46_v31  ;;  %v54_v37 = vadd.f32 %v53_v28, %v52_v32  ;;  %v68_v38 = vadd.f32 %v67_v33, %v63_v29  ;;  %v66_v39 = vmul.f32 %v37_v34, %v37_v34  ;;  %vm161_vm3 = vcmask 65536  }
   0xb   :  { %v71_v40 = vsel %vm49_vm0, %v64_v35, 0.0  ;;  %v72_v41 = vsel %vm49_vm0, %v65_v36, 0.0  ;;  %v108_v54 = vshrl.u32 %v107_v53, 7  ;;  %vm16_vm4 = vcmask 0   ;;  %p200_p3 = por %p199_p2, %p198_p1 }
   0xc   :  { %55 = vadd.xlane.f32.xlu0 %v54_v37  ;;  %v73_v42 = vadd.f32 %v72_v41, %v71_v40  ;;  %v74_v43 = vsel %vm49_vm0, %v66_v39, 0.0  ;;  %v141_v39 = vand.u32 127, %v107_v53 }
   0xd   :  { %v109_v56 = vsub.s32 0, %v108_v54  ;;  %v113_v57 = vsub.s32 1, %v108_v54  ;;  %v117_v58 = vsub.s32 2, %v108_v54  ;;  %p201_p4 = pnand %p200_p3, %p194_p0 }
   0xe   :  { %69 = vadd.xlane.f32.xlu1 %v68_v38  ;;  %v75_v44 = vadd.f32 %v74_v43, %v73_v42  ;;  %v151_v40 = vadd.s32 4294967288, %v141_v39  ;;  %v149_v41 = vsub.s32 %v141_v39, %v108_v54  ;;  %vm144_vm2 = vcmp.lt.s32.totalorder %v141_v39, 9 }
   0xf   :  { %v110_v13 = vrot.slane %v38_v60, %v109_v56  ;;  %v114_v14 = vrot.slane %v38_v60, %v113_v57  ;;  %v118_v15 = vrot.slane %v38_v60, %v117_v58 }
  0x10   :  { %76 = vadd.xlane.f32.xlu0 %v75_v44  ;;  %v154_v42 = vsub.s32 %v151_v40, %v108_v54 }
  0x93   :  { %v48_v45 = vpop.xlane.xlu1 %47 }
  0x94   :  { %v57_v46 = vadd.f32 1e-20, %v48_v45 }
  0x95   :  { %v56_v47 = vpop.xlane.xlu0 %55 }
  0x96   :  { %v58_v48 = vadd.f32 1e-20, %v56_v47  ;;  %185 = vrsqrt.f32 %v57_v46 }
  0x97   :  { %v70_v49 = vpop.xlane.xlu1 %69 }
  0x98   :  { %v78_v50 = vadd.f32 1e-20, %v70_v49  ;;  %187 = vrsqrt.f32 %v58_v48 }
  0x99   :  { %v77_v51 = vpop.xlane.xlu0 %76 }
  0x9a   :  { %189 = vrsqrt.f32 %v78_v50  ;;  %v79_v52 = vadd.f32 1e-20, %v77_v51  ;;  %v215_v50 = vmov 0.0  }
  0x9b   :  { %17 = vst.msk [vmem:[#allocation2] sm:$0x1] %vm16_vm4, %v215_v50 }
  0x9c   :  { %191 = vrsqrt.f32 %v79_v52 }
  0xa2   :  { %v160_v52 = vld [vmem:[#allocation2] sm:$0x1] }
  0xa3   :  { %v186_v55 = vpop.eup %185 }
  0xa4   :  { %v82_v62 = vmul.f32 %v186_v55, %v241_v3  ;;  %v83_v63 = vmul.f32 %v186_v55, %v243_v4  ;;  %v84_v0 = vmul.f32 %v186_v55, %v245_v5 }
  0xa5   :  { %v188_v59 = vpop.eup %187 }
  0xa6   :  { %v85_v16 = vmul.f32 %v188_v59, %v250_v7  ;;  %v86_v3 = vmul.f32 %v188_v59, %v255_v9  ;;  %v87_v4 = vmul.f32 %v188_v59, %v257_v10 }
  0xa7   :  { %v190_v61 = vpop.eup %189 }
  0xa8   :  { %v88_v1 = vmul.f32 %v190_v61, %v259_v11  ;;  %v89_v2 = vmul.f32 %v190_v61, %v261_v12  ;;  %v90_v6 = vmul.f32 %v190_v61, %v34_v20 }
  0xa9   :  { %v192_v8 = vpop.eup %191 }
  0xaa   :  { %v94_v17 = vsub.f32 %v82_v62, %v88_v1  ;;  %v95_v18 = vsub.f32 %v83_v63, %v89_v2  ;;  %v96_v19 = vsub.f32 %v84_v0, %v90_v6  ;;  %v91_v21 = vmul.f32 %v192_v8, %v35_v26 }
  0xab   :  { %v92_v5 = vmul.f32 %v192_v8, %v36_v30  ;;  %v93_v22 = vmul.f32 %v192_v8, %v37_v34 }
  0xac   :  { %v100_v11 = vmul.f32 %v94_v17, %v94_v17  ;;  %v101_v23 = vmul.f32 %v95_v18, %v95_v18  ;;  %v102_v12 = vmul.f32 %v96_v19, %v96_v19  ;;  %v97_v20 = vsub.f32 %v85_v16, %v91_v21 }
  0xad   :  { %v98_v24 = vsub.f32 %v86_v3, %v92_v5  ;;  %v99_v25 = vsub.f32 %v87_v4, %v93_v22 }
  0xae   :  { %v122_v27 = vmul.f32 %v110_v13, %v100_v11  ;;  %v123_v28 = vmul.f32 %v114_v14, %v101_v23  ;;  %v103_v29 = vmul.f32 %v97_v20, %v97_v20  ;;  %v124_v32 = vmul.f32 %v118_v15, %v102_v12 }
  0xaf   :  { %v104_v7 = vmul.f32 %v98_v24, %v98_v24  ;;  %v105_v31 = vmul.f32 %v99_v25, %v99_v25 }
  0xb0   :  { %v128_v33 = vadd.f32 %v123_v28, %v122_v27  ;;  %v125_v26 = vmul.f32 %v110_v13, %v103_v29 }
  0xb1   :  { %v126_v35 = vmul.f32 %v114_v14, %v104_v7  ;;  %v127_v9 = vmul.f32 %v118_v15, %v105_v31 }
  0xb2   :  { %v129_v36 = vadd.f32 %v128_v33, %v124_v32  ;;  %v132_v10 = vsel %vm49_vm0, %v125_v26, 0.0 }
  0xb3   :  { %v133_v30 = vsel %vm49_vm0, %v126_v35, 0.0  ;;  %v135_v37 = vsel %vm49_vm0, %v127_v9, 0.0 }
  0xb4   :  { %130 = vadd.xlane.f32.xlu0 %v129_v36  ;;  %v134_v34 = vadd.f32 %v133_v30, %v132_v10 }
  0xb6   :  { %v136_v38 = vadd.f32 %v135_v37, %v134_v34 }
  0xb8   :  { %137 = vadd.xlane.f32.xlu1 %v136_v38 }
 0x13d   :  { %v131_v43 = vpop.xlane.xlu0 %130 }
 0x13e   :  { %v150_v45 = vrot.slane %v131_v43, %v149_v41 }
 0x141   :  { %v138_v44 = vpop.xlane.xlu1 %137 }
 0x142   :  { %v155_v46 = vrot.slane %v138_v44, %v154_v42 }
 0x144   :  { %v157_v47 = vsel %vm156_vm1, %v155_v46, %v150_v45 }
 0x145   :  { %v159_v48 = vsel %vm144_vm2, %v157_v47, 0.0 }
 0x146   :  { %v162_v49 = vsel %vm161_vm3, %v159_v48, 0.0 }
 0x147   :  { %163 = vadd.xlane.f32.xlu0 %v162_v49 }
 0x1d0   :  { %v164_v51 = vpop.xlane.xlu0 %163 }
 0x1d1   :  { %v165_v53 = vmul.f32 0.11111111, %v164_v51 }
 0x1d3   :  { %v166_v54 = vadd.f32 %v165_v53, %v160_v52 }
 0x1d5   :  { %168 = vst.msk [vmem:[#allocation2] sm:$0x1] %vm16_vm4, %v166_v54 }
 0x1d6   :  { %204 = shalt.err (!%p201_p4)
}
 0x1d7   :  { %178 = dma.vmem_to_hbm [thread:$0]  %s176_s24, 16, %s310_s2, [#allocation3]  }
 0x1d8   :  { %213 = dma.done.wait [#allocation3], 16  }
 0x1d9   :  { %214 = vsyncadd [#allocation3], 4294967280 }
 0x1da   :  { %182 = vsyncpa [#allocation3], 1 }

// kernel: _lambda_.13
= control target key start
LH: loop header
LB: loop body
LE: loop exit
PB: predicated region body
PF: predicated region fallthrough
CT: control target
= control target key end

     0   :  { %s5193_s12 = smov 0   ;;  %s5195_s13 = smov 0   ;;  %s6604_s0 = inlined_call_operand.vmem [shape: bf16[18,3456], index: 0, kind: input, shape index: {}]   ;;  %s6605_s1 = inlined_call_operand.vmem [shape: bf16[3456,256], index: 1, kind: input, shape index: {}]   ;;  %s6606_s2 = inlined_call_operand.vmem [shape: f32[1,256], index: 2, kind: input, shape index: {}]   ;;  %s6607_s3 = inlined_call_operand.vmem [shape: bf16[18,256], index: 3, kind: output, shape index: {}]  }
   0x1   :  { %s5197_s14 = smov 0  }
   0x2 LB: > { %s5206_s15 = sadd.s32 4294967295, %s5138_s14   ;;  %s5208_s16 = sadd.s32 1, %s5138_s14   ;;  %s5138_s14 = sphi %s5197_s14, %s6611_s14   ;;  %s5134_s13 = sphi %s5195_s13, %s6610_s13   ;;  %s5130_s12 = sphi %s5193_s12, %s6609_s12  }
   0x3   : > { %s85_s17 = ssub.s32 %s5138_s14, %s5208_s16  ;;  %s88_s18 = sadd.s32 1, %s5134_s13 }
   0x4   : > { %p86_p0 = scmp.eq.s32.totalorder %s85_s17, 0  ;;  %p98_p1 = scmp.ne.s32.totalorder %s5134_s13, %s5130_s12 }
   0x5   : > { %p99_p2 = scmp.eq.s32.totalorder %s5206_s15, 1  ;;  %p3815_p3 = scmp.ge.s32.totalorder %s5138_s14, 1 }
   0x6   : > { %s5216_s19 = scalar_select %p86_p0, %s5134_s13, %s88_s18  }
   0x7   : > { %p5218_p4 = por %p99_p2, %p98_p1  ;;  %p149_p5 = scmp.lt.s32.totalorder %s5138_s14, 3 }
   0x9   : > { %p150_p6 = pnand %p3815_p3, %p149_p5 }
   0xa   : > { %s5310_s10 = sshll.u32 (!%p150_p6), %s5206_s15, 1  ;;  %s175_s29 = sand.u32 (!%p150_p6), 1, %s5130_s12  }
   0xb   : > { %153 = sbr.rel (%p150_p6) target bundleno = 712 (0x2c8), region = 32  ;;  %p184_p7 = scmp.lt.s32.totalorder (!%p150_p6), %s5310_s10, 2 }
   0xc   : > { %s3816_s30 = sshll.u32 (!%p150_p6), %s175_s29, 4 }
   0xd   : > { %s6559_s5 = scalar_lea.vmem (!%p150_p6), [#allocation2], %s3816_s30  }
  0x10   : > { %v4396_v0 = vld [vmem:[%s6605_s1 + $0x74] ss:$8 sps:$4 sm:$0xff]   ;;  %v4398_v1 = vld [vmem:[%s6605_s1 + $0x70] ss:$8 sps:$4 sm:$0xff]   ;;  %v4402_v4 = vld [vmem:[%s6605_s1 + $0x64] ss:$8 sps:$4 sm:$0xff]  }
  0x11   : > { %2970 = vmatprep.subr.bf16.mxu0 %v4396_v0  ;;  %v4399_v2 = vld [vmem:[%s6605_s1 + $0x174] ss:$8 sps:$4 sm:$0xff]   ;;  %v4401_v3 = vld [vmem:[%s6605_s1 + $0x170] ss:$8 sps:$4 sm:$0xff]   ;;  %v4404_v5 = vld [vmem:[%s6605_s1 + $0x60] ss:$8 sps:$4 sm:$0xff]  }
  0x12   : > { %2971 = vmatpush1.bf16.msra.mxu0 %v4398_v1  ;;  %3013 = vmatprep.subr.bf16.mxu1 %v4399_v2  ;;  %v4405_v6 = vld [vmem:[%s6605_s1 + $0x164] ss:$8 sps:$4 sm:$0xff]   ;;  %v4407_v7 = vld [vmem:[%s6605_s1 + $0x160] ss:$8 sps:$4 sm:$0xff]   ;;  %v4408_v8 = vld [vmem:[%s6605_s1 + $0x54] ss:$8 sps:$4 sm:$0xff]  }
  0x13   : > { %3014 = vmatpush1.bf16.msra.mxu1 %v4401_v3  ;;  %2972 = vmatprep.subr.bf16.mxu0 %v4402_v4  ;;  %v4410_v9 = vld [vmem:[%s6605_s1 + $0x50] ss:$8 sps:$4 sm:$0xff]   ;;  %v4411_v10 = vld [vmem:[%s6605_s1 + $0x154] ss:$8 sps:$4 sm:$0xff]   ;;  %v4414_v11 = vld [vmem:[%s6605_s1 + $0x44] ss:$8 sps:$4 sm:$0xff]  }
  0x14   : > { %3015 = vmatprep.subr.bf16.mxu1 %v4405_v6  ;;  %v4413_v12 = vld [vmem:[%s6605_s1 + $0x150] ss:$8 sps:$4 sm:$0xff]   ;;  %v4417_v13 = vld [vmem:[%s6605_s1 + $0x144] ss:$8 sps:$4 sm:$0xff]   ;;  %v4416_v14 = vld [vmem:[%s6605_s1 + $0x40] ss:$8 sps:$4 sm:$0xff]  }
  0x15   : > { %v4420_v15 = vld [vmem:[%s6605_s1 + $0x34] ss:$8 sps:$4 sm:$0xff]   ;;  %v4419_v16 = vld [vmem:[%s6605_s1 + $0x140] ss:$8 sps:$4 sm:$0xff]   ;;  %v4422_v18 = vld [vmem:[%s6605_s1 + $0x30] ss:$8 sps:$4 sm:$0xff]  }
  0x16   : > { %2973 = vmatpush1.bf16.msra.mxu0 %v4404_v5  ;;  %v4423_v17 = vld [vmem:[%s6605_s1 + $0x134] ss:$8 sps:$4 sm:$0xff]   ;;  %v4426_v19 = vld [vmem:[%s6605_s1 + $0x24] ss:$8 sps:$4 sm:$0xff]   ;;  %v4425_v20 = vld [vmem:[%s6605_s1 + $0x130] ss:$8 sps:$4 sm:$0xff]  }
  0x17   : > { %2974 = vmatprep.subr.bf16.mxu0 %v4408_v8  ;;  %3016 = vmatpush1.bf16.msra.mxu1 %v4407_v7  ;;  %v4429_v21 = vld [vmem:[%s6605_s1 + $0x124] ss:$8 sps:$4 sm:$0xff]   ;;  %v4428_v22 = vld [vmem:[%s6605_s1 + $0x20] ss:$8 sps:$4 sm:$0xff]   ;;  %v4432_v23 = vld [vmem:[%s6605_s1 + $0x14] ss:$8 sps:$4 sm:$0xff]  }
  0x18   : > { %3017 = vmatprep.subr.bf16.mxu1 %v4411_v10  ;;  %v4431_v24 = vld [vmem:[%s6605_s1 + $0x120] ss:$8 sps:$4 sm:$0xff]   ;;  %v4435_v25 = vld [vmem:[%s6605_s1 + $0x114] ss:$8 sps:$4 sm:$0xff]   ;;  %v4434_v26 = vld [vmem:[%s6605_s1 + $0x10] ss:$8 sps:$4 sm:$0xff]  }
  0x19   : > { %v4438_v27 = vld [vmem:[%s6605_s1 + $0x4] ss:$8 sps:$4 sm:$0xff]   ;;  %v4437_v28 = vld [vmem:[%s6605_s1 + $0x110] ss:$8 sps:$4 sm:$0xff]   ;;  %v4440_v30 = vld [vmem:[%s6605_s1] ss:$8 sps:$4 sm:$0xff]  }
  0x1a   : > { %2975 = vmatpush1.bf16.msra.mxu0 %v4410_v9  ;;  %v4441_v29 = vld [vmem:[%s6605_s1 + $0x104] ss:$8 sps:$4 sm:$0xff]   ;;  %v4444_v31 = vld [vmem:[%s6605_s1 + $0xf4] ss:$8 sps:$4 sm:$0xff]   ;;  %v4443_v32 = vld [vmem:[%s6605_s1 + $0x100] ss:$8 sps:$4 sm:$0xff]  }
  0x1b   : > { %2976 = vmatprep.subr.bf16.mxu0 %v4414_v11  ;;  %3018 = vmatpush1.bf16.msra.mxu1 %v4413_v12  ;;  %v4447_v33 = vld [vmem:[%s6605_s1 + $0x1f4] ss:$8 sps:$4 sm:$0xff]   ;;  %v4446_v34 = vld [vmem:[%s6605_s1 + $0xf0] ss:$8 sps:$4 sm:$0xff]   ;;  %v4450_v35 = vld [vmem:[%s6605_s1 + $0xe4] ss:$8 sps:$4 sm:$0xff]  }
  0x1c   : > { %3019 = vmatprep.subr.bf16.mxu1 %v4417_v13  ;;  %s185_s4 = scalar_select %p184_p7, %s5310_s10, 2  ;;  %v4449_v36 = vld [vmem:[%s6605_s1 + $0x1f0] ss:$8 sps:$4 sm:$0xff]   ;;  %v4453_v37 = vld [vmem:[%s6605_s1 + $0x1e4] ss:$8 sps:$4 sm:$0xff]  }
  0x1d   : > { %v4452_v38 = vld [vmem:[%s6605_s1 + $0xe0] ss:$8 sps:$4 sm:$0xff]   ;;  %v4456_v39 = vld [vmem:[%s6605_s1 + $0xd4] ss:$8 sps:$4 sm:$0xff]   ;;  %v4458_v42 = vld [vmem:[%s6605_s1 + $0xd0] ss:$8 sps:$4 sm:$0xff]  }
  0x1e   : > { %2977 = vmatpush1.bf16.msra.mxu0 %v4416_v14  ;;  %s4306_s18 = smul.u32 108, %s185_s4  ;;  %v4455_v40 = vld [vmem:[%s6605_s1 + $0x1e0] ss:$8 sps:$4 sm:$0xff]   ;;  %v4459_v41 = vld [vmem:[%s6605_s1 + $0x1d4] ss:$8 sps:$4 sm:$0xff]   ;;  %s3598_s12 = ssub.s32 (%p5218_p4), 3, %s5310_s10 }
  0x1f   : > { %2978 = vmatprep.subr.bf16.mxu0 %v4420_v15  ;;  %3020 = vmatpush1.bf16.msra.mxu1 %v4419_v16  ;;  %v4462_v43 = vld [vmem:[%s6605_s1 + $0xc4] ss:$8 sps:$4 sm:$0xff]   ;;  %v4461_v44 = vld [vmem:[%s6605_s1 + $0x1d0] ss:$8 sps:$4 sm:$0xff]   ;;  %v4464_v46 = vld [vmem:[%s6605_s1 + $0xc0] ss:$8 sps:$4 sm:$0xff]  }
  0x20   : > { %3021 = vmatprep.subr.bf16.mxu1 %v4423_v17  ;;  %s5362_s4 = scalar_lea.vmem %s6604_s0, %s4306_s18  ;;  %v4465_v45 = vld [vmem:[%s6605_s1 + $0x1c4] ss:$8 sps:$4 sm:$0xff]   ;;  %v4468_v48 = vld [vmem:[%s6605_s1 + $0xb4] ss:$8 sps:$4 sm:$0xff]   ;;  %v4467_v49 = vld [vmem:[%s6605_s1 + $0x1c0] ss:$8 sps:$4 sm:$0xff]  }
  0x21   : > { %v4493_v47 = vld [vmem:[%s5362_s4 + $0x4] ss:$108 sps:$4 sm:$0xff]   ;;  %v4471_v50 = vld [vmem:[%s6605_s1 + $0x1b4] ss:$8 sps:$4 sm:$0xff]   ;;  %v4500_v51 = vld [vmem:[%s5362_s4 + $0xc] ss:$108 sps:$4 sm:$0xff]  }
  0x22   : > { %2979 = vmatpush1.bf16.msra.mxu0 %v4422_v18  ;;  %3002 = vmatprep.mubr.bf16.mxu0 %v4493_v47  ;;  %v4470_v52 = vld [vmem:[%s6605_s1 + $0xb0] ss:$8 sps:$4 sm:$0xff]   ;;  %v4474_v53 = vld [vmem:[%s6605_s1 + $0xa4] ss:$8 sps:$4 sm:$0xff]   ;;  %v4476_v56 = vld [vmem:[%s6605_s1 + $0xa0] ss:$8 sps:$4 sm:$0xff]  }
  0x23   : > { %2980 = vmatprep.subr.bf16.mxu0 %v4426_v19  ;;  %3022 = vmatpush1.bf16.msra.mxu1 %v4425_v20  ;;  %v4473_v54 = vld [vmem:[%s6605_s1 + $0x1b0] ss:$8 sps:$4 sm:$0xff]   ;;  %v4477_v55 = vld [vmem:[%s6605_s1 + $0x1a4] ss:$8 sps:$4 sm:$0xff]   ;;  %v4480_v57 = vld [vmem:[%s6605_s1 + $0x94] ss:$8 sps:$4 sm:$0xff]  }
  0x24   : > { %3023 = vmatprep.subr.bf16.mxu1 %v4429_v21  ;;  %3045 = vmatprep.mubr.bf16.mxu1 %v4500_v51  ;;  %v4479_v58 = vld [vmem:[%s6605_s1 + $0x1a0] ss:$8 sps:$4 sm:$0xff]   ;;  %v4483_v59 = vld [vmem:[%s6605_s1 + $0x194] ss:$8 sps:$4 sm:$0xff]   ;;  %v4482_v60 = vld [vmem:[%s6605_s1 + $0x90] ss:$8 sps:$4 sm:$0xff]  }
  0x25   : > { %v4486_v61 = vld [vmem:[%s6605_s1 + $0x84] ss:$8 sps:$4 sm:$0xff]   ;;  %v4485_v62 = vld [vmem:[%s6605_s1 + $0x190] ss:$8 sps:$4 sm:$0xff]   ;;  %v4488_v0 = vld [vmem:[%s6605_s1 + $0x80] ss:$8 sps:$4 sm:$0xff]  }
  0x26   : > { %2981 = vmatpush1.bf16.msra.mxu0 %v4428_v22  ;;  %v4489_v63 = vld [vmem:[%s6605_s1 + $0x184] ss:$8 sps:$4 sm:$0xff]   ;;  %v4497_v1 = vld [vmem:[%s6605_s1 + $0x274] ss:$8 sps:$4 sm:$0xff]   ;;  %v4494_v2 = vld [vmem:[%s6605_s1 + $0x180] ss:$8 sps:$4 sm:$0xff]  }
  0x27   : > { %2982 = vmatprep.subr.bf16.mxu0 %v4432_v23  ;;  %3024 = vmatpush1.bf16.msra.mxu1 %v4431_v24  ;;  %v4491_v3 = vld [vmem:[%s5362_s4] ss:$108 sps:$4 sm:$0xff]   ;;  %v4503_v4 = vld [vmem:[%s6605_s1 + $0x374] ss:$8 sps:$4 sm:$0xff]   ;;  %v4495_v5 = vld [vmem:[%s6605_s1 + $0x270] ss:$8 sps:$4 sm:$0xff]  }
  0x28   : > { %3025 = vmatprep.subr.bf16.mxu1 %v4435_v25  ;;  %v4498_v6 = vld [vmem:[%s5362_s4 + $0x8] ss:$108 sps:$4 sm:$0xff]   ;;  %v4506_v7 = vld [vmem:[%s6605_s1 + $0x264] ss:$8 sps:$4 sm:$0xff]   ;;  %v4501_v8 = vld [vmem:[%s6605_s1 + $0x370] ss:$8 sps:$4 sm:$0xff]  }
  0x29   : > { %v4509_v9 = vld [vmem:[%s6605_s1 + $0x364] ss:$8 sps:$4 sm:$0xff]   ;;  %v4504_v10 = vld [vmem:[%s6605_s1 + $0x260] ss:$8 sps:$4 sm:$0xff]   ;;  %v4512_v11 = vld [vmem:[%s6605_s1 + $0x254] ss:$8 sps:$4 sm:$0xff]  }
  0x2a   : > { %2983 = vmatpush1.bf16.msra.mxu0 %v4434_v26  ;;  %v4507_v12 = vld [vmem:[%s6605_s1 + $0x360] ss:$8 sps:$4 sm:$0xff]   ;;  %v4515_v13 = vld [vmem:[%s6605_s1 + $0x354] ss:$8 sps:$4 sm:$0xff]   ;;  %v4510_v14 = vld [vmem:[%s6605_s1 + $0x250] ss:$8 sps:$4 sm:$0xff]  }
  0x2b   : > { %2984 = vmatprep.subr.bf16.mxu0 %v4438_v27  ;;  %3026 = vmatpush1.bf16.msra.mxu1 %v4437_v28  ;;  %v4518_v15 = vld [vmem:[%s6605_s1 + $0x244] ss:$8 sps:$4 sm:$0xff]   ;;  %v4513_v16 = vld [vmem:[%s6605_s1 + $0x350] ss:$8 sps:$4 sm:$0xff]   ;;  %v4516_v18 = vld [vmem:[%s6605_s1 + $0x240] ss:$8 sps:$4 sm:$0xff]  }
  0x2c   : > { %3027 = vmatprep.subr.bf16.mxu1 %v4441_v29  ;;  %v4521_v17 = vld [vmem:[%s6605_s1 + $0x344] ss:$8 sps:$4 sm:$0xff]   ;;  %v4524_v19 = vld [vmem:[%s6605_s1 + $0x234] ss:$8 sps:$4 sm:$0xff]   ;;  %v4519_v20 = vld [vmem:[%s6605_s1 + $0x340] ss:$8 sps:$4 sm:$0xff]  }
  0x2d   : > { %v4527_v21 = vld [vmem:[%s6605_s1 + $0x334] ss:$8 sps:$4 sm:$0xff]   ;;  %v4522_v22 = vld [vmem:[%s6605_s1 + $0x230] ss:$8 sps:$4 sm:$0xff]   ;;  %v4530_v23 = vld [vmem:[%s6605_s1 + $0x224] ss:$8 sps:$4 sm:$0xff]  }
  0x2e   : > { %2985 = vmatpush1.bf16.msra.mxu0 %v4440_v30  ;;  %v4525_v24 = vld [vmem:[%s6605_s1 + $0x330] ss:$8 sps:$4 sm:$0xff]   ;;  %v4533_v25 = vld [vmem:[%s6605_s1 + $0x324] ss:$8 sps:$4 sm:$0xff]   ;;  %v4528_v26 = vld [vmem:[%s6605_s1 + $0x220] ss:$8 sps:$4 sm:$0xff]  }
  0x2f   : > { %2986 = vmatprep.subr.bf16.mxu0 %v4444_v31  ;;  %3028 = vmatpush1.bf16.msra.mxu1 %v4443_v32  ;;  %v4536_v27 = vld [vmem:[%s6605_s1 + $0x214] ss:$8 sps:$4 sm:$0xff]   ;;  %v4531_v28 = vld [vmem:[%s6605_s1 + $0x320] ss:$8 sps:$4 sm:$0xff]   ;;  %v4534_v30 = vld [vmem:[%s6605_s1 + $0x210] ss:$8 sps:$4 sm:$0xff]  }
  0x30   : > { %3029 = vmatprep.subr.bf16.mxu1 %v4447_v33  ;;  %v4539_v29 = vld [vmem:[%s6605_s1 + $0x314] ss:$8 sps:$4 sm:$0xff]   ;;  %v4537_v31 = vld [vmem:[%s6605_s1 + $0x310] ss:$8 sps:$4 sm:$0xff]   ;;  %v4542_v32 = vld [vmem:[%s6605_s1 + $0x204] ss:$8 sps:$4 sm:$0xff]  }
  0x31   : > { %v4596_v33 = vld [vmem:[%s5362_s4 + $0x14] ss:$108 sps:$4 sm:$0xff]   ;;  %v4569_v51 = vld [vmem:[%s6605_s1 + $0x3c4] ss:$8 sps:$4 sm:$0xff]   ;;  %s4303_s6 = sshll.u32 (%p5218_p4), %s5206_s15, 4  ;;  %p3599_p8 = scmp.lt.s32.totalorder (%p5218_p4), %s3598_s12, 2 }
  0x32   : > { %2987 = vmatpush2.bf16.msra.mxu0 %v4446_v34  ;;  %v4545_v34 = vld [vmem:[%s6605_s1 + $0x304] ss:$8 sps:$4 sm:$0xff]   ;;  %v4563_v47 = vld [vmem:[%s6605_s1 + $0x3d4] ss:$8 sps:$4 sm:$0xff]   ;;  %s6570_s9 = scalar_lea.vmem (%p5218_p4), %s6607_s3, %s4303_s6  }
  0x33   : > { %2988 = vmatprep.subr.bf16.mxu0 %v4450_v35  ;;  %3030 = vmatpush2.bf16.msra.mxu1 %v4449_v36  ;;  %v4540_v35 = vld [vmem:[%s6605_s1 + $0x200] ss:$8 sps:$4 sm:$0xff]  }
  0x34   : > { %3031 = vmatprep.subr.bf16.mxu1 %v4453_v37  ;;  %v4602_v36 = vld [vmem:[%s5362_s4 + $0x1c] ss:$108 sps:$4 sm:$0xff]  }
  0x35   : > { %v4548_v37 = vld [vmem:[%s6605_s1 + $0x2f4] ss:$8 sps:$4 sm:$0xff]  }
  0x36   : > { %2989 = vmatpush2.bf16.msra.mxu0 %v4452_v38  ;;  %v4543_v38 = vld [vmem:[%s6605_s1 + $0x300] ss:$8 sps:$4 sm:$0xff]  }
  0x37   : > { %2990 = vmatprep.subr.bf16.mxu0 %v4456_v39  ;;  %3032 = vmatpush2.bf16.msra.mxu1 %v4455_v40  ;;  %v4551_v39 = vld [vmem:[%s6605_s1 + $0x3f4] ss:$8 sps:$4 sm:$0xff]   ;;  %v4546_v40 = vld [vmem:[%s6605_s1 + $0x2f0] ss:$8 sps:$4 sm:$0xff]  }
  0x38   : > { %3033 = vmatprep.subr.bf16.mxu1 %v4459_v41  ;;  %v4554_v41 = vld [vmem:[%s6605_s1 + $0x2e4] ss:$8 sps:$4 sm:$0xff]  }
  0x3a   : > { %2991 = vmatpush2.bf16.msra.mxu0 %v4458_v42  ;;  %v4549_v42 = vld [vmem:[%s6605_s1 + $0x3f0] ss:$8 sps:$4 sm:$0xff]  }
  0x3b   : > { %2992 = vmatprep.subr.bf16.mxu0 %v4462_v43  ;;  %3034 = vmatpush2.bf16.msra.mxu1 %v4461_v44  ;;  %v4557_v43 = vld [vmem:[%s6605_s1 + $0x3e4] ss:$8 sps:$4 sm:$0xff]   ;;  %v4552_v44 = vld [vmem:[%s6605_s1 + $0x2e0] ss:$8 sps:$4 sm:$0xff]  }
  0x3c   : > { %3035 = vmatprep.subr.bf16.mxu1 %v4465_v45  ;;  %v4560_v45 = vld [vmem:[%s6605_s1 + $0x2d4] ss:$8 sps:$4 sm:$0xff]  }
  0x3e   : > { %2993 = vmatpush2.bf16.msra.mxu0 %v4464_v46  ;;  %v4555_v46 = vld [vmem:[%s6605_s1 + $0x3e0] ss:$8 sps:$4 sm:$0xff]  }
  0x3f   : > { %2994 = vmatprep.subr.bf16.mxu0 %v4468_v48  ;;  %3036 = vmatpush2.bf16.msra.mxu1 %v4467_v49  ;;  %v4558_v48 = vld [vmem:[%s6605_s1 + $0x2d0] ss:$8 sps:$4 sm:$0xff]   ;;  %v4566_v49 = vld [vmem:[%s6605_s1 + $0x2c4] ss:$8 sps:$4 sm:$0xff]  }
  0x40   : > { %3037 = vmatprep.subr.bf16.mxu1 %v4471_v50  ;;  %v4561_v50 = vld [vmem:[%s6605_s1 + $0x3d0] ss:$8 sps:$4 sm:$0xff]  }
  0x42   : > { %2995 = vmatpush2.bf16.msra.mxu0 %v4470_v52  ;;  %v4564_v52 = vld [vmem:[%s6605_s1 + $0x2c0] ss:$8 sps:$4 sm:$0xff]  }
  0x43   : > { %2996 = vmatprep.subr.bf16.mxu0 %v4474_v53  ;;  %3038 = vmatpush2.bf16.msra.mxu1 %v4473_v54  ;;  %v4572_v53 = vld [vmem:[%s6605_s1 + $0x2b4] ss:$8 sps:$4 sm:$0xff]   ;;  %v4567_v54 = vld [vmem:[%s6605_s1 + $0x3c0] ss:$8 sps:$4 sm:$0xff]  }
  0x44   : > { %3039 = vmatprep.subr.bf16.mxu1 %v4477_v55  ;;  %v4575_v55 = vld [vmem:[%s6605_s1 + $0x3b4] ss:$8 sps:$4 sm:$0xff]  }
  0x46   : > { %2997 = vmatpush2.bf16.msra.mxu0 %v4476_v56  ;;  %v4570_v56 = vld [vmem:[%s6605_s1 + $0x2b0] ss:$8 sps:$4 sm:$0xff]  }
  0x47   : > { %2998 = vmatprep.subr.bf16.mxu0 %v4480_v57  ;;  %3040 = vmatpush2.bf16.msra.mxu1 %v4479_v58  ;;  %v4578_v57 = vld [vmem:[%s6605_s1 + $0x2a4] ss:$8 sps:$4 sm:$0xff]   ;;  %v4573_v58 = vld [vmem:[%s6605_s1 + $0x3b0] ss:$8 sps:$4 sm:$0xff]  }
  0x48   : > { %3041 = vmatprep.subr.bf16.mxu1 %v4483_v59  ;;  %v4581_v59 = vld [vmem:[%s6605_s1 + $0x3a4] ss:$8 sps:$4 sm:$0xff]  }
  0x4a   : > { %2999 = vmatpush2.bf16.msra.mxu0 %v4482_v60  ;;  %v4576_v60 = vld [vmem:[%s6605_s1 + $0x2a0] ss:$8 sps:$4 sm:$0xff]  }
  0x4b   : > { %3000 = vmatprep.subr.bf16.mxu0 %v4486_v61  ;;  %3042 = vmatpush2.bf16.msra.mxu1 %v4485_v62  ;;  %v4584_v61 = vld [vmem:[%s6605_s1 + $0x294] ss:$8 sps:$4 sm:$0xff]   ;;  %v4579_v62 = vld [vmem:[%s6605_s1 + $0x3a0] ss:$8 sps:$4 sm:$0xff]  }
  0x4c   : > { %3043 = vmatprep.subr.bf16.mxu1 %v4489_v63  ;;  %v4587_v63 = vld [vmem:[%s6605_s1 + $0x394] ss:$8 sps:$4 sm:$0xff]  }
  0x4e   : > { %3001 = vmatpush2.bf16.msra.mxu0 %v4488_v0  ;;  %v4582_v0 = vld [vmem:[%s6605_s1 + $0x290] ss:$8 sps:$4 sm:$0xff]  }
  0x4f   : > { %3056 = vmatprep.subr.bf16.mxu0 %v4497_v1  ;;  %3044 = vmatpush2.bf16.msra.mxu1 %v4494_v2  ;;  %v4590_v1 = vld [vmem:[%s6605_s1 + $0x284] ss:$8 sps:$4 sm:$0xff]   ;;  %v4585_v2 = vld [vmem:[%s6605_s1 + $0x390] ss:$8 sps:$4 sm:$0xff]  }
  0x50   : > { %3099 = vmatprep.subr.bf16.mxu1 %v4503_v4  ;;  %v4588_v4 = vld [vmem:[%s6605_s1 + $0x280] ss:$8 sps:$4 sm:$0xff]  }
  0x51   : > { %3003 = vmatmul.mubr.bf16.vlgmr.msra.gmra.mxu0 %v4491_v3  ;;  %v4593_v3 = vld [vmem:[%s6605_s1 + $0x384] ss:$8 sps:$4 sm:$0xff]  }
  0x52   : > { %3057 = vmatpush1.bf16.msra.mxu0 %v4495_v5  ;;  %3046 = vmatmul.mubr.bf16.vlgmr.msra.gmra.mxu1 %v4498_v6  ;;  %v4599_v5 = vld [vmem:[%s6605_s1 + $0x474] ss:$8 sps:$4 sm:$0xff]   ;;  %v4591_v6 = vld [vmem:[%s6605_s1 + $0x380] ss:$8 sps:$4 sm:$0xff]  }
  0x53   : > { %3058 = vmatprep.subr.bf16.mxu0 %v4506_v7  ;;  %3100 = vmatpush1.bf16.msra.mxu1 %v4501_v8  ;;  %v4594_v7 = vld [vmem:[%s5362_s4 + $0x10] ss:$108 sps:$4 sm:$0xff]  }
  0x54   : > { %3101 = vmatprep.subr.bf16.mxu1 %v4509_v9  ;;  %3088 = vmatprep.mubr.bf16.mxu0 %v4596_v33  ;;  %v4605_v8 = vld [vmem:[%s6605_s1 + $0x574] ss:$8 sps:$4 sm:$0xff]   ;;  %v4597_v9 = vld [vmem:[%s6605_s1 + $0x470] ss:$8 sps:$4 sm:$0xff]  }
  0x55   : > { %3131 = vmatprep.mubr.bf16.mxu1 %v4602_v36  ;;  %v4638_v33 = vld [vmem:[%s6605_s1 + $0x414] ss:$8 sps:$4 sm:$0xff]   ;;  %v4636_v36 = vld [vmem:[%s6605_s1 + $0x410] ss:$8 sps:$4 sm:$0xff]  }
  0x56   : > { %3059 = vmatpush1.bf16.msra.mxu0 %v4504_v10  ;;  %v4600_v10 = vld [vmem:[%s5362_s4 + $0x18] ss:$108 sps:$4 sm:$0xff]  }
  0x57   : > { %3060 = vmatprep.subr.bf16.mxu0 %v4512_v11  ;;  %3102 = vmatpush1.bf16.msra.mxu1 %v4507_v12  ;;  %v4608_v11 = vld [vmem:[%s6605_s1 + $0x464] ss:$8 sps:$4 sm:$0xff]   ;;  %v4603_v12 = vld [vmem:[%s6605_s1 + $0x570] ss:$8 sps:$4 sm:$0xff]  }
  0x58   : > { %3103 = vmatprep.subr.bf16.mxu1 %v4515_v13  ;;  %v4611_v13 = vld [vmem:[%s6605_s1 + $0x564] ss:$8 sps:$4 sm:$0xff]  }
  0x5a   : > { %3061 = vmatpush1.bf16.msra.mxu0 %v4510_v14  ;;  %v4606_v14 = vld [vmem:[%s6605_s1 + $0x460] ss:$8 sps:$4 sm:$0xff]  }
  0x5b   : > { %3062 = vmatprep.subr.bf16.mxu0 %v4518_v15  ;;  %3104 = vmatpush1.bf16.msra.mxu1 %v4513_v16  ;;  %v4614_v15 = vld [vmem:[%s6605_s1 + $0x454] ss:$8 sps:$4 sm:$0xff]   ;;  %v4609_v16 = vld [vmem:[%s6605_s1 + $0x560] ss:$8 sps:$4 sm:$0xff]  }
  0x5c   : > { %3105 = vmatprep.subr.bf16.mxu1 %v4521_v17  ;;  %v4617_v17 = vld [vmem:[%s6605_s1 + $0x554] ss:$8 sps:$4 sm:$0xff]  }
  0x5e   : > { %3063 = vmatpush1.bf16.msra.mxu0 %v4516_v18  ;;  %v4698_v18 = vld [vmem:[%s5362_s4 + $0x24] ss:$108 sps:$4 sm:$0xff]  }
  0x5f   : > { %3064 = vmatprep.subr.bf16.mxu0 %v4524_v19  ;;  %3106 = vmatpush1.bf16.msra.mxu1 %v4519_v20  ;;  %v4612_v19 = vld [vmem:[%s6605_s1 + $0x450] ss:$8 sps:$4 sm:$0xff]  }
  0x60   : > { %3107 = vmatprep.subr.bf16.mxu1 %v4527_v21  ;;  %v4615_v20 = vld [vmem:[%s6605_s1 + $0x550] ss:$8 sps:$4 sm:$0xff]   ;;  %v4620_v21 = vld [vmem:[%s6605_s1 + $0x444] ss:$8 sps:$4 sm:$0xff]  }
  0x62   : > { %3065 = vmatpush1.bf16.msra.mxu0 %v4522_v22  ;;  %v4704_v22 = vld [vmem:[%s5362_s4 + $0x2c] ss:$108 sps:$4 sm:$0xff]  }
  0x63   : > { %3066 = vmatprep.subr.bf16.mxu0 %v4530_v23  ;;  %3108 = vmatpush1.bf16.msra.mxu1 %v4525_v24  ;;  %v4623_v23 = vld [vmem:[%s6605_s1 + $0x544] ss:$8 sps:$4 sm:$0xff]   ;;  %v4618_v24 = vld [vmem:[%s6605_s1 + $0x440] ss:$8 sps:$4 sm:$0xff]  }
  0x64   : > { %3109 = vmatprep.subr.bf16.mxu1 %v4533_v25  ;;  %v4626_v25 = vld [vmem:[%s6605_s1 + $0x434] ss:$8 sps:$4 sm:$0xff]  }
  0x66   : > { %3067 = vmatpush1.bf16.msra.mxu0 %v4528_v26  ;;  %v4621_v26 = vld [vmem:[%s6605_s1 + $0x540] ss:$8 sps:$4 sm:$0xff]  }
  0x67   : > { %3068 = vmatprep.subr.bf16.mxu0 %v4536_v27  ;;  %3110 = vmatpush1.bf16.msra.mxu1 %v4531_v28  ;;  %v4629_v27 = vld [vmem:[%s6605_s1 + $0x534] ss:$8 sps:$4 sm:$0xff]   ;;  %v4624_v28 = vld [vmem:[%s6605_s1 + $0x430] ss:$8 sps:$4 sm:$0xff]  }
  0x68   : > { %3111 = vmatprep.subr.bf16.mxu1 %v4539_v29  ;;  %v4632_v29 = vld [vmem:[%s6605_s1 + $0x424] ss:$8 sps:$4 sm:$0xff]  }
  0x6a   : > { %3069 = vmatpush1.bf16.msra.mxu0 %v4534_v30  ;;  %v4627_v30 = vld [vmem:[%s6605_s1 + $0x530] ss:$8 sps:$4 sm:$0xff]  }
  0x6b   : > { %3070 = vmatprep.subr.bf16.mxu0 %v4542_v32  ;;  %3112 = vmatpush1.bf16.msra.mxu1 %v4537_v31  ;;  %v4635_v31 = vld [vmem:[%s6605_s1 + $0x524] ss:$8 sps:$4 sm:$0xff]   ;;  %v4630_v32 = vld [vmem:[%s6605_s1 + $0x420] ss:$8 sps:$4 sm:$0xff]  }
  0x6c   : > { %3113 = vmatprep.subr.bf16.mxu1 %v4545_v34  ;;  %v4633_v34 = vld [vmem:[%s6605_s1 + $0x520] ss:$8 sps:$4 sm:$0xff]  }
  0x6e   : > { %3071 = vmatpush1.bf16.msra.mxu0 %v4540_v35  ;;  %v4641_v35 = vld [vmem:[%s6605_s1 + $0x514] ss:$8 sps:$4 sm:$0xff]  }
  0x6f   : > { %3072 = vmatprep.subr.bf16.mxu0 %v4548_v37  ;;  %3114 = vmatpush1.bf16.msra.mxu1 %v4543_v38  ;;  %v4644_v37 = vld [vmem:[%s6605_s1 + $0x404] ss:$8 sps:$4 sm:$0xff]   ;;  %v4639_v38 = vld [vmem:[%s6605_s1 + $0x510] ss:$8 sps:$4 sm:$0xff]  }
  0x70   : > { %3115 = vmatprep.subr.bf16.mxu1 %v4551_v39  ;;  %v4647_v39 = vld [vmem:[%s6605_s1 + $0x504] ss:$8 sps:$4 sm:$0xff]  }
  0x72   : > { %3073 = vmatpush2.bf16.msra.mxu0 %v4546_v40  ;;  %v4642_v40 = vld [vmem:[%s6605_s1 + $0x400] ss:$8 sps:$4 sm:$0xff]  }
  0x73   : > { %3074 = vmatprep.subr.bf16.mxu0 %v4554_v41  ;;  %3116 = vmatpush2.bf16.msra.mxu1 %v4549_v42  ;;  %v4650_v41 = vld [vmem:[%s6605_s1 + $0x4f4] ss:$8 sps:$4 sm:$0xff]   ;;  %v4645_v42 = vld [vmem:[%s6605_s1 + $0x500] ss:$8 sps:$4 sm:$0xff]  }
  0x74   : > { %3117 = vmatprep.subr.bf16.mxu1 %v4557_v43  ;;  %v4653_v43 = vld [vmem:[%s6605_s1 + $0x5f4] ss:$8 sps:$4 sm:$0xff]  }
  0x76   : > { %3075 = vmatpush2.bf16.msra.mxu0 %v4552_v44  ;;  %v4648_v44 = vld [vmem:[%s6605_s1 + $0x4f0] ss:$8 sps:$4 sm:$0xff]  }
  0x77   : > { %3076 = vmatprep.subr.bf16.mxu0 %v4560_v45  ;;  %3118 = vmatpush2.bf16.msra.mxu1 %v4555_v46  ;;  %v4656_v45 = vld [vmem:[%s6605_s1 + $0x4e4] ss:$8 sps:$4 sm:$0xff]   ;;  %v4651_v46 = vld [vmem:[%s6605_s1 + $0x5f0] ss:$8 sps:$4 sm:$0xff]  }
  0x78   : > { %3119 = vmatprep.subr.bf16.mxu1 %v4563_v47  ;;  %v4659_v47 = vld [vmem:[%s6605_s1 + $0x5e4] ss:$8 sps:$4 sm:$0xff]  }
  0x7a   : > { %3077 = vmatpush2.bf16.msra.mxu0 %v4558_v48  ;;  %v4654_v48 = vld [vmem:[%s6605_s1 + $0x4e0] ss:$8 sps:$4 sm:$0xff]  }
  0x7b   : > { %3078 = vmatprep.subr.bf16.mxu0 %v4566_v49  ;;  %3120 = vmatpush2.bf16.msra.mxu1 %v4561_v50  ;;  %v4662_v49 = vld [vmem:[%s6605_s1 + $0x4d4] ss:$8 sps:$4 sm:$0xff]   ;;  %v4657_v50 = vld [vmem:[%s6605_s1 + $0x5e0] ss:$8 sps:$4 sm:$0xff]  }
  0x7c   : > { %3121 = vmatprep.subr.bf16.mxu1 %v4569_v51  ;;  %v4665_v51 = vld [vmem:[%s6605_s1 + $0x5d4] ss:$8 sps:$4 sm:$0xff]  }
  0x7e   : > { %3079 = vmatpush2.bf16.msra.mxu0 %v4564_v52  ;;  %v4660_v52 = vld [vmem:[%s6605_s1 + $0x4d0] ss:$8 sps:$4 sm:$0xff]  }
  0x7f   : > { %3080 = vmatprep.subr.bf16.mxu0 %v4572_v53  ;;  %3122 = vmatpush2.bf16.msra.mxu1 %v4567_v54  ;;  %v4668_v53 = vld [vmem:[%s6605_s1 + $0x4c4] ss:$8 sps:$4 sm:$0xff]   ;;  %v4663_v54 = vld [vmem:[%s6605_s1 + $0x5d0] ss:$8 sps:$4 sm:$0xff]  }
  0x80   : > { %3123 = vmatprep.subr.bf16.mxu1 %v4575_v55  ;;  %v4671_v55 = vld [vmem:[%s6605_s1 + $0x5c4] ss:$8 sps:$4 sm:$0xff]  }
  0x82   : > { %3081 = vmatpush2.bf16.msra.mxu0 %v4570_v56  ;;  %v4666_v56 = vld [vmem:[%s6605_s1 + $0x4c0] ss:$8 sps:$4 sm:$0xff]  }
  0x83   : > { %3082 = vmatprep.subr.bf16.mxu0 %v4578_v57  ;;  %3124 = vmatpush2.bf16.msra.mxu1 %v4573_v58  ;;  %v4674_v57 = vld [vmem:[%s6605_s1 + $0x4b4] ss:$8 sps:$4 sm:$0xff]   ;;  %v4669_v58 = vld [vmem:[%s6605_s1 + $0x5c0] ss:$8 sps:$4 sm:$0xff]  }
  0x84   : > { %3125 = vmatprep.subr.bf16.mxu1 %v4581_v59  ;;  %v4677_v59 = vld [vmem:[%s6605_s1 + $0x5b4] ss:$8 sps:$4 sm:$0xff]  }
  0x86   : > { %3083 = vmatpush2.bf16.msra.mxu0 %v4576_v60  ;;  %v4672_v60 = vld [vmem:[%s6605_s1 + $0x4b0] ss:$8 sps:$4 sm:$0xff]  }
  0x87   : > { %3084 = vmatprep.subr.bf16.mxu0 %v4584_v61  ;;  %3126 = vmatpush2.bf16.msra.mxu1 %v4579_v62  ;;  %v4680_v61 = vld [vmem:[%s6605_s1 + $0x4a4] ss:$8 sps:$4 sm:$0xff]   ;;  %v4675_v62 = vld [vmem:[%s6605_s1 + $0x5b0] ss:$8 sps:$4 sm:$0xff]  }
  0x88   : > { %3127 = vmatprep.subr.bf16.mxu1 %v4587_v63  ;;  %v4683_v63 = vld [vmem:[%s6605_s1 + $0x5a4] ss:$8 sps:$4 sm:$0xff]  }
  0x8a   : > { %3085 = vmatpush2.bf16.msra.mxu0 %v4582_v0  ;;  %v4678_v0 = vld [vmem:[%s6605_s1 + $0x4a0] ss:$8 sps:$4 sm:$0xff]  }
  0x8b   : > { %3086 = vmatprep.subr.bf16.mxu0 %v4590_v1  ;;  %3128 = vmatpush2.bf16.msra.mxu1 %v4585_v2  ;;  %v4686_v1 = vld [vmem:[%s6605_s1 + $0x494] ss:$8 sps:$4 sm:$0xff]   ;;  %v4681_v2 = vld [vmem:[%s6605_s1 + $0x5a0] ss:$8 sps:$4 sm:$0xff]  }
  0x8c   : > { %3129 = vmatprep.subr.bf16.mxu1 %v4593_v3  ;;  %v4689_v3 = vld [vmem:[%s6605_s1 + $0x594] ss:$8 sps:$4 sm:$0xff]  }
  0x8e   : > { %3087 = vmatpush2.bf16.msra.mxu0 %v4588_v4  ;;  %v4684_v4 = vld [vmem:[%s6605_s1 + $0x490] ss:$8 sps:$4 sm:$0xff]  }
  0x8f   : > { %3142 = vmatprep.subr.bf16.mxu0 %v4599_v5  ;;  %3130 = vmatpush2.bf16.msra.mxu1 %v4591_v6  ;;  %v4692_v5 = vld [vmem:[%s6605_s1 + $0x484] ss:$8 sps:$4 sm:$0xff]   ;;  %v4687_v6 = vld [vmem:[%s6605_s1 + $0x590] ss:$8 sps:$4 sm:$0xff]  }
  0x90   : > { %3185 = vmatprep.subr.bf16.mxu1 %v4605_v8  ;;  %v4695_v8 = vld [vmem:[%s6605_s1 + $0x584] ss:$8 sps:$4 sm:$0xff]  }
  0x91   : > { %3089 = vmatmul.mubr.bf16.vlgmr.msra.gmra.mxu0 %v4594_v7  ;;  %v4690_v7 = vld [vmem:[%s6605_s1 + $0x480] ss:$8 sps:$4 sm:$0xff]  }
  0x92   : > { %3143 = vmatpush1.bf16.msra.mxu0 %v4597_v9  ;;  %3132 = vmatmul.mubr.bf16.vlgmr.msra.gmra.mxu1 %v4600_v10  ;;  %v4693_v9 = vld [vmem:[%s6605_s1 + $0x580] ss:$8 sps:$4 sm:$0xff]   ;;  %v4701_v10 = vld [vmem:[%s6605_s1 + $0x674] ss:$8 sps:$4 sm:$0xff]  }
  0x93   : > { %3144 = vmatprep.subr.bf16.mxu0 %v4608_v11  ;;  %3186 = vmatpush1.bf16.msra.mxu1 %v4603_v12  ;;  %v4696_v11 = vld [vmem:[%s5362_s4 + $0x20] ss:$108 sps:$4 sm:$0xff]   ;;  %v4699_v12 = vld [vmem:[%s6605_s1 + $0x670] ss:$8 sps:$4 sm:$0xff]  }
  0x94   : > { %3187 = vmatprep.subr.bf16.mxu1 %v4611_v13  ;;  %3174 = vmatprep.mubr.bf16.mxu0 %v4698_v18  ;;  %v4702_v13 = vld [vmem:[%s5362_s4 + $0x28] ss:$108 sps:$4 sm:$0xff]  }
  0x95   : > { %3217 = vmatprep.mubr.bf16.mxu1 %v4704_v22  ;;  %v4806_v18 = vld [vmem:[%s5362_s4 + $0x3c] ss:$108 sps:$4 sm:$0xff]  }
  0x96   : > { %3145 = vmatpush1.bf16.msra.mxu0 %v4606_v14  ;;  %v4707_v14 = vld [vmem:[%s6605_s1 + $0x774] ss:$8 sps:$4 sm:$0xff]   ;;  %v4711_v22 = vld [vmem:[%s6605_s1 + $0x760] ss:$8 sps:$4 sm:$0xff]  }
  0x97   : > { %3146 = vmatprep.subr.bf16.mxu0 %v4614_v15  ;;  %3188 = vmatpush1.bf16.msra.mxu1 %v4609_v16  ;;  %v4800_v15 = vld [vmem:[%s5362_s4 + $0x34] ss:$108 sps:$4 sm:$0xff]   ;;  %v4710_v16 = vld [vmem:[%s6605_s1 + $0x664] ss:$8 sps:$4 sm:$0xff]  }
  0x98   : > { %3189 = vmatprep.subr.bf16.mxu1 %v4617_v17  ;;  %v4705_v17 = vld [vmem:[%s6605_s1 + $0x770] ss:$8 sps:$4 sm:$0xff]  }
  0x9a   : > { %3147 = vmatpush1.bf16.msra.mxu0 %v4612_v19  ;;  %v4713_v19 = vld [vmem:[%s6605_s1 + $0x764] ss:$8 sps:$4 sm:$0xff]  }
  0x9b   : > { %3148 = vmatprep.subr.bf16.mxu0 %v4620_v21  ;;  %3190 = vmatpush1.bf16.msra.mxu1 %v4615_v20  ;;  %v4708_v20 = vld [vmem:[%s6605_s1 + $0x660] ss:$8 sps:$4 sm:$0xff]   ;;  %v4716_v21 = vld [vmem:[%s6605_s1 + $0x654] ss:$8 sps:$4 sm:$0xff]  }
  0x9c   : > { %3191 = vmatprep.subr.bf16.mxu1 %v4623_v23  ;;  %v4719_v23 = vld [vmem:[%s6605_s1 + $0x754] ss:$8 sps:$4 sm:$0xff]  }
  0x9e   : > { %3149 = vmatpush1.bf16.msra.mxu0 %v4618_v24  ;;  %v4714_v24 = vld [vmem:[%s6605_s1 + $0x650] ss:$8 sps:$4 sm:$0xff]  }
  0x9f   : > { %3150 = vmatprep.subr.bf16.mxu0 %v4626_v25  ;;  %3192 = vmatpush1.bf16.msra.mxu1 %v4621_v26  ;;  %v4722_v25 = vld [vmem:[%s6605_s1 + $0x644] ss:$8 sps:$4 sm:$0xff]   ;;  %v4717_v26 = vld [vmem:[%s6605_s1 + $0x750] ss:$8 sps:$4 sm:$0xff]  }
  0xa0   : > { %3193 = vmatprep.subr.bf16.mxu1 %v4629_v27  ;;  %v4725_v27 = vld [vmem:[%s6605_s1 + $0x744] ss:$8 sps:$4 sm:$0xff]  }
  0xa2   : > { %3151 = vmatpush1.bf16.msra.mxu0 %v4624_v28  ;;  %v4720_v28 = vld [vmem:[%s6605_s1 + $0x640] ss:$8 sps:$4 sm:$0xff]  }
  0xa3   : > { %3152 = vmatprep.subr.bf16.mxu0 %v4632_v29  ;;  %3194 = vmatpush1.bf16.msra.mxu1 %v4627_v30  ;;  %v4728_v29 = vld [vmem:[%s6605_s1 + $0x634] ss:$8 sps:$4 sm:$0xff]   ;;  %v4723_v30 = vld [vmem:[%s6605_s1 + $0x740] ss:$8 sps:$4 sm:$0xff]  }
  0xa4   : > { %3195 = vmatprep.subr.bf16.mxu1 %v4635_v31  ;;  %v4731_v31 = vld [vmem:[%s6605_s1 + $0x734] ss:$8 sps:$4 sm:$0xff]  }
  0xa6   : > { %3153 = vmatpush1.bf16.msra.mxu0 %v4630_v32  ;;  %v4726_v32 = vld [vmem:[%s6605_s1 + $0x630] ss:$8 sps:$4 sm:$0xff]  }
  0xa7   : > { %3154 = vmatprep.subr.bf16.mxu0 %v4638_v33  ;;  %3196 = vmatpush1.bf16.msra.mxu1 %v4633_v34  ;;  %v4734_v33 = vld [vmem:[%s6605_s1 + $0x624] ss:$8 sps:$4 sm:$0xff]   ;;  %v4729_v34 = vld [vmem:[%s6605_s1 + $0x730] ss:$8 sps:$4 sm:$0xff]  }
  0xa8   : > { %3197 = vmatprep.subr.bf16.mxu1 %v4641_v35  ;;  %v4737_v35 = vld [vmem:[%s6605_s1 + $0x724] ss:$8 sps:$4 sm:$0xff]  }
  0xaa   : > { %3155 = vmatpush1.bf16.msra.mxu0 %v4636_v36  ;;  %v4732_v36 = vld [vmem:[%s6605_s1 + $0x620] ss:$8 sps:$4 sm:$0xff]  }
  0xab   : > { %3156 = vmatprep.subr.bf16.mxu0 %v4644_v37  ;;  %3198 = vmatpush1.bf16.msra.mxu1 %v4639_v38  ;;  %v4740_v37 = vld [vmem:[%s6605_s1 + $0x614] ss:$8 sps:$4 sm:$0xff]   ;;  %v4735_v38 = vld [vmem:[%s6605_s1 + $0x720] ss:$8 sps:$4 sm:$0xff]  }
  0xac   : > { %3199 = vmatprep.subr.bf16.mxu1 %v4647_v39  ;;  %v4743_v39 = vld [vmem:[%s6605_s1 + $0x714] ss:$8 sps:$4 sm:$0xff]  }
  0xae   : > { %3157 = vmatpush1.bf16.msra.mxu0 %v4642_v40  ;;  %v4738_v40 = vld [vmem:[%s6605_s1 + $0x610] ss:$8 sps:$4 sm:$0xff]  }
  0xaf   : > { %3158 = vmatprep.subr.bf16.mxu0 %v4650_v41  ;;  %3200 = vmatpush1.bf16.msra.mxu1 %v4645_v42  ;;  %v4746_v41 = vld [vmem:[%s6605_s1 + $0x604] ss:$8 sps:$4 sm:$0xff]   ;;  %v4741_v42 = vld [vmem:[%s6605_s1 + $0x710] ss:$8 sps:$4 sm:$0xff]  }
  0xb0   : > { %3201 = vmatprep.subr.bf16.mxu1 %v4653_v43  ;;  %v4749_v43 = vld [vmem:[%s6605_s1 + $0x704] ss:$8 sps:$4 sm:$0xff]  }
  0xb2   : > { %3159 = vmatpush2.bf16.msra.mxu0 %v4648_v44  ;;  %v4744_v44 = vld [vmem:[%s6605_s1 + $0x600] ss:$8 sps:$4 sm:$0xff]  }
  0xb3   : > { %3160 = vmatprep.subr.bf16.mxu0 %v4656_v45  ;;  %3202 = vmatpush2.bf16.msra.mxu1 %v4651_v46  ;;  %v4752_v45 = vld [vmem:[%s6605_s1 + $0x6f4] ss:$8 sps:$4 sm:$0xff]   ;;  %v4747_v46 = vld [vmem:[%s6605_s1 + $0x700] ss:$8 sps:$4 sm:$0xff]  }
  0xb4   : > { %3203 = vmatprep.subr.bf16.mxu1 %v4659_v47  ;;  %v4755_v47 = vld [vmem:[%s6605_s1 + $0x7f4] ss:$8 sps:$4 sm:$0xff]  }
  0xb6   : > { %3161 = vmatpush2.bf16.msra.mxu0 %v4654_v48  ;;  %v4750_v48 = vld [vmem:[%s6605_s1 + $0x6f0] ss:$8 sps:$4 sm:$0xff]  }
  0xb7   : > { %3162 = vmatprep.subr.bf16.mxu0 %v4662_v49  ;;  %3204 = vmatpush2.bf16.msra.mxu1 %v4657_v50  ;;  %v4758_v49 = vld [vmem:[%s6605_s1 + $0x6e4] ss:$8 sps:$4 sm:$0xff]   ;;  %v4753_v50 = vld [vmem:[%s6605_s1 + $0x7f0] ss:$8 sps:$4 sm:$0xff]  }
  0xb8   : > { %3205 = vmatprep.subr.bf16.mxu1 %v4665_v51  ;;  %v4761_v51 = vld [vmem:[%s6605_s1 + $0x7e4] ss:$8 sps:$4 sm:$0xff]  }
  0xba   : > { %3163 = vmatpush2.bf16.msra.mxu0 %v4660_v52  ;;  %v4756_v52 = vld [vmem:[%s6605_s1 + $0x6e0] ss:$8 sps:$4 sm:$0xff]  }
  0xbb   : > { %3164 = vmatprep.subr.bf16.mxu0 %v4668_v53  ;;  %3206 = vmatpush2.bf16.msra.mxu1 %v4663_v54  ;;  %v4764_v53 = vld [vmem:[%s6605_s1 + $0x6d4] ss:$8 sps:$4 sm:$0xff]   ;;  %v4759_v54 = vld [vmem:[%s6605_s1 + $0x7e0] ss:$8 sps:$4 sm:$0xff]  }
  0xbc   : > { %3207 = vmatprep.subr.bf16.mxu1 %v4671_v55  ;;  %v4767_v55 = vld [vmem:[%s6605_s1 + $0x7d4] ss:$8 sps:$4 sm:$0xff]  }
  0xbe   : > { %3165 = vmatpush2.bf16.msra.mxu0 %v4666_v56  ;;  %v4762_v56 = vld [vmem:[%s6605_s1 + $0x6d0] ss:$8 sps:$4 sm:$0xff]  }
  0xbf   : > { %3166 = vmatprep.subr.bf16.mxu0 %v4674_v57  ;;  %3208 = vmatpush2.bf16.msra.mxu1 %v4669_v58  ;;  %v4770_v57 = vld [vmem:[%s6605_s1 + $0x6c4] ss:$8 sps:$4 sm:$0xff]   ;;  %v4765_v58 = vld [vmem:[%s6605_s1 + $0x7d0] ss:$8 sps:$4 sm:$0xff]  }
  0xc0   : > { %3209 = vmatprep.subr.bf16.mxu1 %v4677_v59  ;;  %v4773_v59 = vld [vmem:[%s6605_s1 + $0x7c4] ss:$8 sps:$4 sm:$0xff]  }
  0xc2   : > { %3167 = vmatpush2.bf16.msra.mxu0 %v4672_v60  ;;  %v4768_v60 = vld [vmem:[%s6605_s1 + $0x6c0] ss:$8 sps:$4 sm:$0xff]  }
  0xc3   : > { %3168 = vmatprep.subr.bf16.mxu0 %v4680_v61  ;;  %3210 = vmatpush2.bf16.msra.mxu1 %v4675_v62  ;;  %v4776_v61 = vld [vmem:[%s6605_s1 + $0x6b4] ss:$8 sps:$4 sm:$0xff]   ;;  %v4771_v62 = vld [vmem:[%s6605_s1 + $0x7c0] ss:$8 sps:$4 sm:$0xff]  }
  0xc4   : > { %3211 = vmatprep.subr.bf16.mxu1 %v4683_v63  ;;  %v4779_v63 = vld [vmem:[%s6605_s1 + $0x7b4] ss:$8 sps:$4 sm:$0xff]  }
  0xc6   : > { %3169 = vmatpush2.bf16.msra.mxu0 %v4678_v0  ;;  %v4774_v0 = vld [vmem:[%s6605_s1 + $0x6b0] ss:$8 sps:$4 sm:$0xff]  }
  0xc7   : > { %3170 = vmatprep.subr.bf16.mxu0 %v4686_v1  ;;  %3212 = vmatpush2.bf16.msra.mxu1 %v4681_v2  ;;  %v4782_v1 = vld [vmem:[%s6605_s1 + $0x6a4] ss:$8 sps:$4 sm:$0xff]   ;;  %v4777_v2 = vld [vmem:[%s6605_s1 + $0x7b0] ss:$8 sps:$4 sm:$0xff]  }
  0xc8   : > { %3213 = vmatprep.subr.bf16.mxu1 %v4689_v3  ;;  %v4785_v3 = vld [vmem:[%s6605_s1 + $0x7a4] ss:$8 sps:$4 sm:$0xff]  }
  0xca   : > { %3171 = vmatpush2.bf16.msra.mxu0 %v4684_v4  ;;  %v4780_v4 = vld [vmem:[%s6605_s1 + $0x6a0] ss:$8 sps:$4 sm:$0xff]  }
  0xcb   : > { %3172 = vmatprep.subr.bf16.mxu0 %v4692_v5  ;;  %3214 = vmatpush2.bf16.msra.mxu1 %v4687_v6  ;;  %v4788_v5 = vld [vmem:[%s6605_s1 + $0x694] ss:$8 sps:$4 sm:$0xff]   ;;  %v4783_v6 = vld [vmem:[%s6605_s1 + $0x7a0] ss:$8 sps:$4 sm:$0xff]  }
  0xcc   : > { %3215 = vmatprep.subr.bf16.mxu1 %v4695_v8  ;;  %v4786_v8 = vld [vmem:[%s6605_s1 + $0x690] ss:$8 sps:$4 sm:$0xff]  }
  0xce   : > { %3173 = vmatpush2.bf16.msra.mxu0 %v4690_v7  ;;  %v4791_v7 = vld [vmem:[%s6605_s1 + $0x794] ss:$8 sps:$4 sm:$0xff]  }
  0xcf   : > { %3228 = vmatprep.subr.bf16.mxu0 %v4701_v10  ;;  %3216 = vmatpush2.bf16.msra.mxu1 %v4693_v9  ;;  %v4794_v9 = vld [vmem:[%s6605_s1 + $0x684] ss:$8 sps:$4 sm:$0xff]   ;;  %v4789_v10 = vld [vmem:[%s6605_s1 + $0x790] ss:$8 sps:$4 sm:$0xff]  }
  0xd0   : > { %3271 = vmatprep.subr.bf16.mxu1 %v4707_v14  ;;  %v4803_v14 = vld [vmem:[%s6605_s1 + $0x874] ss:$8 sps:$4 sm:$0xff]  }
  0xd1   : > { %3175 = vmatmul.mubr.bf16.vlgmr.msra.gmra.mxu0 %v4696_v11  ;;  %v4792_v11 = vld [vmem:[%s6605_s1 + $0x680] ss:$8 sps:$4 sm:$0xff]  }
  0xd2   : > { %3229 = vmatpush1.bf16.msra.mxu0 %v4699_v12  ;;  %3260 = vmatprep.mubr.bf16.mxu0 %v4800_v15  ;;  %v4797_v12 = vld [vmem:[%s6605_s1 + $0x784] ss:$8 sps:$4 sm:$0xff]   ;;  %v4798_v15 = vld [vmem:[%s5362_s4 + $0x30] ss:$108 sps:$4 sm:$0xff]  }
  0xd3   : > { %3218 = vmatmul.mubr.bf16.vlgmr.msra.gmra.mxu1 %v4702_v13  ;;  %3230 = vmatprep.subr.bf16.mxu0 %v4710_v16  ;;  %v4795_v13 = vld [vmem:[%s6605_s1 + $0x780] ss:$8 sps:$4 sm:$0xff]   ;;  %v4801_v16 = vld [vmem:[%s6605_s1 + $0x870] ss:$8 sps:$4 sm:$0xff]  }
  0xd4   : > { %3272 = vmatpush1.bf16.msra.mxu1 %v4705_v17  ;;  %3303 = vmatprep.mubr.bf16.mxu1 %v4806_v18  ;;  %v4804_v17 = vld [vmem:[%s5362_s4 + $0x38] ss:$108 sps:$4 sm:$0xff]   ;;  %v4809_v18 = vld [vmem:[%s6605_s1 + $0x974] ss:$8 sps:$4 sm:$0xff]  }
  0xd5   : > { %3273 = vmatprep.subr.bf16.mxu1 %v4713_v19  ;;  %v4902_v19 = vld [vmem:[%s5362_s4 + $0x44] ss:$108 sps:$4 sm:$0xff]  }
  0xd6   : > { %3231 = vmatpush1.bf16.msra.mxu0 %v4708_v20  ;;  %v4812_v20 = vld [vmem:[%s6605_s1 + $0x864] ss:$8 sps:$4 sm:$0xff]  }
  0xd7   : > { %3232 = vmatprep.subr.bf16.mxu0 %v4716_v21  ;;  %v4807_v21 = vld [vmem:[%s6605_s1 + $0x970] ss:$8 sps:$4 sm:$0xff]  }
  0xd8   : > { %3274 = vmatpush1.bf16.msra.mxu1 %v4711_v22  ;;  %v4908_v22 = vld [vmem:[%s5362_s4 + $0x4c] ss:$108 sps:$4 sm:$0xff]  }
  0xd9   : > { %3275 = vmatprep.subr.bf16.mxu1 %v4719_v23  ;;  %v4815_v23 = vld [vmem:[%s6605_s1 + $0x964] ss:$8 sps:$4 sm:$0xff]  }
  0xda   : > { %3233 = vmatpush1.bf16.msra.mxu0 %v4714_v24  ;;  %v4810_v24 = vld [vmem:[%s6605_s1 + $0x860] ss:$8 sps:$4 sm:$0xff]  }
  0xdb   : > { %3234 = vmatprep.subr.bf16.mxu0 %v4722_v25  ;;  %v4818_v25 = vld [vmem:[%s6605_s1 + $0x854] ss:$8 sps:$4 sm:$0xff]  }
  0xdc   : > { %3276 = vmatpush1.bf16.msra.mxu1 %v4717_v26  ;;  %v4813_v26 = vld [vmem:[%s6605_s1 + $0x960] ss:$8 sps:$4 sm:$0xff]  }
  0xdd   : > { %3277 = vmatprep.subr.bf16.mxu1 %v4725_v27  ;;  %v4821_v27 = vld [vmem:[%s6605_s1 + $0x954] ss:$8 sps:$4 sm:$0xff]  }
  0xde   : > { %3235 = vmatpush1.bf16.msra.mxu0 %v4720_v28  ;;  %v4816_v28 = vld [vmem:[%s6605_s1 + $0x850] ss:$8 sps:$4 sm:$0xff]  }
  0xdf   : > { %3236 = vmatprep.subr.bf16.mxu0 %v4728_v29  ;;  %v4824_v29 = vld [vmem:[%s6605_s1 + $0x844] ss:$8 sps:$4 sm:$0xff]  }
  0xe0   : > { %3278 = vmatpush1.bf16.msra.mxu1 %v4723_v30  ;;  %v4819_v30 = vld [vmem:[%s6605_s1 + $0x950] ss:$8 sps:$4 sm:$0xff]  }
  0xe1   : > { %3279 = vmatprep.subr.bf16.mxu1 %v4731_v31  ;;  %v4827_v31 = vld [vmem:[%s6605_s1 + $0x944] ss:$8 sps:$4 sm:$0xff]  }
  0xe2   : > { %3237 = vmatpush1.bf16.msra.mxu0 %v4726_v32  ;;  %v4822_v32 = vld [vmem:[%s6605_s1 + $0x840] ss:$8 sps:$4 sm:$0xff]  }
  0xe3   : > { %3238 = vmatprep.subr.bf16.mxu0 %v4734_v33  ;;  %v4830_v33 = vld [vmem:[%s6605_s1 + $0x834] ss:$8 sps:$4 sm:$0xff]  }
  0xe4   : > { %3280 = vmatpush1.bf16.msra.mxu1 %v4729_v34  ;;  %v4825_v34 = vld [vmem:[%s6605_s1 + $0x940] ss:$8 sps:$4 sm:$0xff]  }
  0xe5   : > { %3281 = vmatprep.subr.bf16.mxu1 %v4737_v35  ;;  %v4833_v35 = vld [vmem:[%s6605_s1 + $0x934] ss:$8 sps:$4 sm:$0xff]  }
  0xe6   : > { %3239 = vmatpush1.bf16.msra.mxu0 %v4732_v36  ;;  %v4828_v36 = vld [vmem:[%s6605_s1 + $0x830] ss:$8 sps:$4 sm:$0xff]  }
  0xe7   : > { %3240 = vmatprep.subr.bf16.mxu0 %v4740_v37  ;;  %v4836_v37 = vld [vmem:[%s6605_s1 + $0x824] ss:$8 sps:$4 sm:$0xff]  }
  0xe8   : > { %3282 = vmatpush1.bf16.msra.mxu1 %v4735_v38  ;;  %v4831_v38 = vld [vmem:[%s6605_s1 + $0x930] ss:$8 sps:$4 sm:$0xff]  }
  0xe9   : > { %3283 = vmatprep.subr.bf16.mxu1 %v4743_v39  ;;  %v4839_v39 = vld [vmem:[%s6605_s1 + $0x924] ss:$8 sps:$4 sm:$0xff]  }
  0xea   : > { %3241 = vmatpush1.bf16.msra.mxu0 %v4738_v40  ;;  %v4834_v40 = vld [vmem:[%s6605_s1 + $0x820] ss:$8 sps:$4 sm:$0xff]  }
  0xeb   : > { %3242 = vmatprep.subr.bf16.mxu0 %v4746_v41  ;;  %v4842_v41 = vld [vmem:[%s6605_s1 + $0x814] ss:$8 sps:$4 sm:$0xff]  }
  0xec   : > { %3284 = vmatpush1.bf16.msra.mxu1 %v4741_v42  ;;  %v4837_v42 = vld [vmem:[%s6605_s1 + $0x920] ss:$8 sps:$4 sm:$0xff]  }
  0xed   : > { %3285 = vmatprep.subr.bf16.mxu1 %v4749_v43  ;;  %v4845_v43 = vld [vmem:[%s6605_s1 + $0x914] ss:$8 sps:$4 sm:$0xff]  }
  0xee   : > { %3243 = vmatpush1.bf16.msra.mxu0 %v4744_v44  ;;  %v4840_v44 = vld [vmem:[%s6605_s1 + $0x810] ss:$8 sps:$4 sm:$0xff]  }
  0xef   : > { %3244 = vmatprep.subr.bf16.mxu0 %v4752_v45  ;;  %v4848_v45 = vld [vmem:[%s6605_s1 + $0x804] ss:$8 sps:$4 sm:$0xff]  }
  0xf0   : > { %3286 = vmatpush1.bf16.msra.mxu1 %v4747_v46  ;;  %v4843_v46 = vld [vmem:[%s6605_s1 + $0x910] ss:$8 sps:$4 sm:$0xff]  }
  0xf1   : > { %3287 = vmatprep.subr.bf16.mxu1 %v4755_v47  ;;  %v4851_v47 = vld [vmem:[%s6605_s1 + $0x904] ss:$8 sps:$4 sm:$0xff]  }
  0xf2   : > { %3245 = vmatpush2.bf16.msra.mxu0 %v4750_v48  ;;  %v4846_v48 = vld [vmem:[%s6605_s1 + $0x800] ss:$8 sps:$4 sm:$0xff]  }
  0xf3   : > { %3246 = vmatprep.subr.bf16.mxu0 %v4758_v49  ;;  %v4849_v49 = vld [vmem:[%s6605_s1 + $0x900] ss:$8 sps:$4 sm:$0xff]  }
  0xf4   : > { %3288 = vmatpush2.bf16.msra.mxu1 %v4753_v50  ;;  %v4854_v50 = vld [vmem:[%s6605_s1 + $0x8f4] ss:$8 sps:$4 sm:$0xff]  }
  0xf5   : > { %3289 = vmatprep.subr.bf16.mxu1 %v4761_v51  ;;  %v4857_v51 = vld [vmem:[%s6605_s1 + $0x9f4] ss:$8 sps:$4 sm:$0xff]  }
  0xf6   : > { %3247 = vmatpush2.bf16.msra.mxu0 %v4756_v52  ;;  %v4852_v52 = vld [vmem:[%s6605_s1 + $0x8f0] ss:$8 sps:$4 sm:$0xff]  }
  0xf7   : > { %3248 = vmatprep.subr.bf16.mxu0 %v4764_v53  ;;  %v4855_v53 = vld [vmem:[%s6605_s1 + $0x9f0] ss:$8 sps:$4 sm:$0xff]  }
  0xf8   : > { %3290 = vmatpush2.bf16.msra.mxu1 %v4759_v54  ;;  %v4860_v54 = vld [vmem:[%s6605_s1 + $0x8e4] ss:$8 sps:$4 sm:$0xff]  }
  0xf9   : > { %3291 = vmatprep.subr.bf16.mxu1 %v4767_v55  ;;  %v4863_v55 = vld [vmem:[%s6605_s1 + $0x9e4] ss:$8 sps:$4 sm:$0xff]  }
  0xfa   : > { %3249 = vmatpush2.bf16.msra.mxu0 %v4762_v56  ;;  %v4858_v56 = vld [vmem:[%s6605_s1 + $0x8e0] ss:$8 sps:$4 sm:$0xff]  }
  0xfb   : > { %3250 = vmatprep.subr.bf16.mxu0 %v4770_v57  ;;  %v4861_v57 = vld [vmem:[%s6605_s1 + $0x9e0] ss:$8 sps:$4 sm:$0xff]  }
  0xfc   : > { %3292 = vmatpush2.bf16.msra.mxu1 %v4765_v58  ;;  %v4866_v58 = vld [vmem:[%s6605_s1 + $0x8d4] ss:$8 sps:$4 sm:$0xff]  }
  0xfd   : > { %3293 = vmatprep.subr.bf16.mxu1 %v4773_v59  ;;  %v4869_v59 = vld [vmem:[%s6605_s1 + $0x9d4] ss:$8 sps:$4 sm:$0xff]  }
  0xfe   : > { %3251 = vmatpush2.bf16.msra.mxu0 %v4768_v60  ;;  %v4864_v60 = vld [vmem:[%s6605_s1 + $0x8d0] ss:$8 sps:$4 sm:$0xff]  }
  0xff   : > { %3252 = vmatprep.subr.bf16.mxu0 %v4776_v61  ;;  %v4867_v61 = vld [vmem:[%s6605_s1 + $0x9d0] ss:$8 sps:$4 sm:$0xff]  }
 0x100   : > { %3294 = vmatpush2.bf16.msra.mxu1 %v4771_v62  ;;  %v4872_v62 = vld [vmem:[%s6605_s1 + $0x8c4] ss:$8 sps:$4 sm:$0xff]  }
 0x101   : > { %3295 = vmatprep.subr.bf16.mxu1 %v4779_v63  ;;  %v4875_v63 = vld [vmem:[%s6605_s1 + $0x9c4] ss:$8 sps:$4 sm:$0xff]  }
 0x102   : > { %3253 = vmatpush2.bf16.msra.mxu0 %v4774_v0  ;;  %v4870_v0 = vld [vmem:[%s6605_s1 + $0x8c0] ss:$8 sps:$4 sm:$0xff]  }
 0x103   : > { %3254 = vmatprep.subr.bf16.mxu0 %v4782_v1  ;;  %v4878_v1 = vld [vmem:[%s6605_s1 + $0x8b4] ss:$8 sps:$4 sm:$0xff]  }
 0x104   : > { %3296 = vmatpush2.bf16.msra.mxu1 %v4777_v2  ;;  %v4873_v2 = vld [vmem:[%s6605_s1 + $0x9c0] ss:$8 sps:$4 sm:$0xff]  }
 0x105   : > { %3297 = vmatprep.subr.bf16.mxu1 %v4785_v3  ;;  %v4881_v3 = vld [vmem:[%s6605_s1 + $0x9b4] ss:$8 sps:$4 sm:$0xff]  }
 0x106   : > { %3255 = vmatpush2.bf16.msra.mxu0 %v4780_v4  ;;  %v4876_v4 = vld [vmem:[%s6605_s1 + $0x8b0] ss:$8 sps:$4 sm:$0xff]  }
 0x107   : > { %3256 = vmatprep.subr.bf16.mxu0 %v4788_v5  ;;  %v4884_v5 = vld [vmem:[%s6605_s1 + $0x8a4] ss:$8 sps:$4 sm:$0xff]  }
 0x108   : > { %3298 = vmatpush2.bf16.msra.mxu1 %v4783_v6  ;;  %v4879_v6 = vld [vmem:[%s6605_s1 + $0x9b0] ss:$8 sps:$4 sm:$0xff]  }
 0x109   : > { %3299 = vmatprep.subr.bf16.mxu1 %v4791_v7  ;;  %v4887_v7 = vld [vmem:[%s6605_s1 + $0x9a4] ss:$8 sps:$4 sm:$0xff]  }
 0x10a   : > { %3257 = vmatpush2.bf16.msra.mxu0 %v4786_v8  ;;  %v4882_v8 = vld [vmem:[%s6605_s1 + $0x8a0] ss:$8 sps:$4 sm:$0xff]  }
 0x10b   : > { %3258 = vmatprep.subr.bf16.mxu0 %v4794_v9  ;;  %v4890_v9 = vld [vmem:[%s6605_s1 + $0x894] ss:$8 sps:$4 sm:$0xff]  }
 0x10c   : > { %3300 = vmatpush2.bf16.msra.mxu1 %v4789_v10  ;;  %v4885_v10 = vld [vmem:[%s6605_s1 + $0x9a0] ss:$8 sps:$4 sm:$0xff]  }
 0x10d   : > { %3301 = vmatprep.subr.bf16.mxu1 %v4797_v12  ;;  %v4888_v12 = vld [vmem:[%s6605_s1 + $0x890] ss:$8 sps:$4 sm:$0xff]  }
 0x10e   : > { %3259 = vmatpush2.bf16.msra.mxu0 %v4792_v11  ;;  %v4893_v11 = vld [vmem:[%s6605_s1 + $0x994] ss:$8 sps:$4 sm:$0xff]  }
 0x10f   : > { %3314 = vmatprep.subr.bf16.mxu0 %v4803_v14  ;;  %v4891_v14 = vld [vmem:[%s6605_s1 + $0x990] ss:$8 sps:$4 sm:$0xff]  }
 0x110   : > { %3302 = vmatpush2.bf16.msra.mxu1 %v4795_v13  ;;  %v4896_v13 = vld [vmem:[%s6605_s1 + $0x884] ss:$8 sps:$4 sm:$0xff]  }
 0x111   : > { %3261 = vmatmul.mubr.bf16.vlgmr.msra.gmra.mxu0 %v4798_v15  ;;  %3357 = vmatprep.subr.bf16.mxu1 %v4809_v18  ;;  %v4899_v15 = vld [vmem:[%s6605_s1 + $0x984] ss:$8 sps:$4 sm:$0xff]   ;;  %v4897_v18 = vld [vmem:[%s6605_s1 + $0x980] ss:$8 sps:$4 sm:$0xff]  }
 0x112   : > { %3315 = vmatpush1.bf16.msra.mxu0 %v4801_v16  ;;  %3346 = vmatprep.mubr.bf16.mxu0 %v4902_v19  ;;  %v4894_v16 = vld [vmem:[%s6605_s1 + $0x880] ss:$8 sps:$4 sm:$0xff]  }
 0x113   : > { %3304 = vmatmul.mubr.bf16.vlgmr.msra.gmra.mxu1 %v4804_v17  ;;  %3316 = vmatprep.subr.bf16.mxu0 %v4812_v20  ;;  %v4905_v17 = vld [vmem:[%s6605_s1 + $0xa74] ss:$8 sps:$4 sm:$0xff]   ;;  %v4900_v19 = vld [vmem:[%s5362_s4 + $0x40] ss:$108 sps:$4 sm:$0xff]  }
 0x114   : > { %3358 = vmatpush1.bf16.msra.mxu1 %v4807_v21  ;;  %3389 = vmatprep.mubr.bf16.mxu1 %v4908_v22  ;;  %v4911_v20 = vld [vmem:[%s6605_s1 + $0xb74] ss:$8 sps:$4 sm:$0xff]   ;;  %v4903_v21 = vld [vmem:[%s6605_s1 + $0xa70] ss:$8 sps:$4 sm:$0xff]  }
 0x115   : > { %3359 = vmatprep.subr.bf16.mxu1 %v4815_v23  ;;  %v5004_v22 = vld [vmem:[%s5362_s4 + $0x54] ss:$108 sps:$4 sm:$0xff]  }
 0x116   : > { %3317 = vmatpush1.bf16.msra.mxu0 %v4810_v24  ;;  %v4906_v23 = vld [vmem:[%s5362_s4 + $0x48] ss:$108 sps:$4 sm:$0xff]   ;;  %v4914_v24 = vld [vmem:[%s6605_s1 + $0xa64] ss:$8 sps:$4 sm:$0xff]  }
 0x117   : > { %3318 = vmatprep.subr.bf16.mxu0 %v4818_v25  ;;  %v4909_v25 = vld [vmem:[%s6605_s1 + $0xb70] ss:$8 sps:$4 sm:$0xff]  }
 0x118   : > { %3360 = vmatpush1.bf16.msra.mxu1 %v4813_v26  ;;  %v5010_v26 = vld [vmem:[%s5362_s4 + $0x5c] ss:$108 sps:$4 sm:$0xff]  }
 0x119   : > { %3361 = vmatprep.subr.bf16.mxu1 %v4821_v27  ;;  %v4917_v27 = vld [vmem:[%s6605_s1 + $0xb64] ss:$8 sps:$4 sm:$0xff]  }
 0x11a   : > { %3319 = vmatpush1.bf16.msra.mxu0 %v4816_v28  ;;  %v4912_v28 = vld [vmem:[%s6605_s1 + $0xa60] ss:$8 sps:$4 sm:$0xff]  }
 0x11b   : > { %3320 = vmatprep.subr.bf16.mxu0 %v4824_v29  ;;  %v4920_v29 = vld [vmem:[%s6605_s1 + $0xa54] ss:$8 sps:$4 sm:$0xff]  }
 0x11c   : > { %3362 = vmatpush1.bf16.msra.mxu1 %v4819_v30  ;;  %v4915_v30 = vld [vmem:[%s6605_s1 + $0xb60] ss:$8 sps:$4 sm:$0xff]  }
 0x11d   : > { %3363 = vmatprep.subr.bf16.mxu1 %v4827_v31  ;;  %v4923_v31 = vld [vmem:[%s6605_s1 + $0xb54] ss:$8 sps:$4 sm:$0xff]  }
 0x11e   : > { %3321 = vmatpush1.bf16.msra.mxu0 %v4822_v32  ;;  %v4918_v32 = vld [vmem:[%s6605_s1 + $0xa50] ss:$8 sps:$4 sm:$0xff]  }
 0x11f   : > { %3322 = vmatprep.subr.bf16.mxu0 %v4830_v33  ;;  %v4926_v33 = vld [vmem:[%s6605_s1 + $0xa44] ss:$8 sps:$4 sm:$0xff]  }
 0x120   : > { %3364 = vmatpush1.bf16.msra.mxu1 %v4825_v34  ;;  %v4921_v34 = vld [vmem:[%s6605_s1 + $0xb50] ss:$8 sps:$4 sm:$0xff]  }
 0x121   : > { %3365 = vmatprep.subr.bf16.mxu1 %v4833_v35  ;;  %v4929_v35 = vld [vmem:[%s6605_s1 + $0xb44] ss:$8 sps:$4 sm:$0xff]  }
 0x122   : > { %3323 = vmatpush1.bf16.msra.mxu0 %v4828_v36  ;;  %v4924_v36 = vld [vmem:[%s6605_s1 + $0xa40] ss:$8 sps:$4 sm:$0xff]  }
 0x123   : > { %3324 = vmatprep.subr.bf16.mxu0 %v4836_v37  ;;  %v4932_v37 = vld [vmem:[%s6605_s1 + $0xa34] ss:$8 sps:$4 sm:$0xff]  }
 0x124   : > { %3366 = vmatpush1.bf16.msra.mxu1 %v4831_v38  ;;  %v4927_v38 = vld [vmem:[%s6605_s1 + $0xb40] ss:$8 sps:$4 sm:$0xff]  }
 0x125   : > { %3367 = vmatprep.subr.bf16.mxu1 %v4839_v39  ;;  %v4935_v39 = vld [vmem:[%s6605_s1 + $0xb34] ss:$8 sps:$4 sm:$0xff]  }
 0x126   : > { %3325 = vmatpush1.bf16.msra.mxu0 %v4834_v40  ;;  %v4930_v40 = vld [vmem:[%s6605_s1 + $0xa30] ss:$8 sps:$4 sm:$0xff]  }
 0x127   : > { %3326 = vmatprep.subr.bf16.mxu0 %v4842_v41  ;;  %v4938_v41 = vld [vmem:[%s6605_s1 + $0xa24] ss:$8 sps:$4 sm:$0xff]  }
 0x128   : > { %3368 = vmatpush1.bf16.msra.mxu1 %v4837_v42  ;;  %v4933_v42 = vld [vmem:[%s6605_s1 + $0xb30] ss:$8 sps:$4 sm:$0xff]  }
 0x129   : > { %3369 = vmatprep.subr.bf16.mxu1 %v4845_v43  ;;  %v4941_v43 = vld [vmem:[%s6605_s1 + $0xb24] ss:$8 sps:$4 sm:$0xff]  }
 0x12a   : > { %3327 = vmatpush1.bf16.msra.mxu0 %v4840_v44  ;;  %v4936_v44 = vld [vmem:[%s6605_s1 + $0xa20] ss:$8 sps:$4 sm:$0xff]  }
 0x12b   : > { %3328 = vmatprep.subr.bf16.mxu0 %v4848_v45  ;;  %v4944_v45 = vld [vmem:[%s6605_s1 + $0xa14] ss:$8 sps:$4 sm:$0xff]  }
 0x12c   : > { %3370 = vmatpush1.bf16.msra.mxu1 %v4843_v46  ;;  %v4939_v46 = vld [vmem:[%s6605_s1 + $0xb20] ss:$8 sps:$4 sm:$0xff]  }
 0x12d   : > { %3371 = vmatprep.subr.bf16.mxu1 %v4851_v47  ;;  %v4947_v47 = vld [vmem:[%s6605_s1 + $0xb14] ss:$8 sps:$4 sm:$0xff]  }
 0x12e   : > { %3329 = vmatpush1.bf16.msra.mxu0 %v4846_v48  ;;  %v4942_v48 = vld [vmem:[%s6605_s1 + $0xa10] ss:$8 sps:$4 sm:$0xff]  }
 0x12f   : > { %3330 = vmatprep.subr.bf16.mxu0 %v4854_v50  ;;  %v4945_v50 = vld [vmem:[%s6605_s1 + $0xb10] ss:$8 sps:$4 sm:$0xff]  }
 0x130   : > { %3372 = vmatpush1.bf16.msra.mxu1 %v4849_v49  ;;  %v4950_v49 = vld [vmem:[%s6605_s1 + $0xa04] ss:$8 sps:$4 sm:$0xff]  }
 0x131   : > { %3373 = vmatprep.subr.bf16.mxu1 %v4857_v51  ;;  %v4953_v51 = vld [vmem:[%s6605_s1 + $0xb04] ss:$8 sps:$4 sm:$0xff]  }
 0x132   : > { %3331 = vmatpush2.bf16.msra.mxu0 %v4852_v52  ;;  %v4948_v52 = vld [vmem:[%s6605_s1 + $0xa00] ss:$8 sps:$4 sm:$0xff]  }
 0x133   : > { %3332 = vmatprep.subr.bf16.mxu0 %v4860_v54  ;;  %v4951_v54 = vld [vmem:[%s6605_s1 + $0xb00] ss:$8 sps:$4 sm:$0xff]  }
 0x134   : > { %3374 = vmatpush2.bf16.msra.mxu1 %v4855_v53  ;;  %v4956_v53 = vld [vmem:[%s6605_s1 + $0xaf4] ss:$8 sps:$4 sm:$0xff]  }
 0x135   : > { %3375 = vmatprep.subr.bf16.mxu1 %v4863_v55  ;;  %v4959_v55 = vld [vmem:[%s6605_s1 + $0xbf4] ss:$8 sps:$4 sm:$0xff]  }
 0x136   : > { %3333 = vmatpush2.bf16.msra.mxu0 %v4858_v56  ;;  %v4954_v56 = vld [vmem:[%s6605_s1 + $0xaf0] ss:$8 sps:$4 sm:$0xff]  }
 0x137   : > { %3334 = vmatprep.subr.bf16.mxu0 %v4866_v58  ;;  %v4957_v58 = vld [vmem:[%s6605_s1 + $0xbf0] ss:$8 sps:$4 sm:$0xff]  }
 0x138   : > { %3376 = vmatpush2.bf16.msra.mxu1 %v4861_v57  ;;  %v4962_v57 = vld [vmem:[%s6605_s1 + $0xae4] ss:$8 sps:$4 sm:$0xff]  }
 0x139   : > { %3377 = vmatprep.subr.bf16.mxu1 %v4869_v59  ;;  %v4965_v59 = vld [vmem:[%s6605_s1 + $0xbe4] ss:$8 sps:$4 sm:$0xff]  }
 0x13a   : > { %3335 = vmatpush2.bf16.msra.mxu0 %v4864_v60  ;;  %v4960_v60 = vld [vmem:[%s6605_s1 + $0xae0] ss:$8 sps:$4 sm:$0xff]  }
 0x13b   : > { %3336 = vmatprep.subr.bf16.mxu0 %v4872_v62  ;;  %v4963_v62 = vld [vmem:[%s6605_s1 + $0xbe0] ss:$8 sps:$4 sm:$0xff]  }
 0x13c   : > { %3378 = vmatpush2.bf16.msra.mxu1 %v4867_v61  ;;  %v4968_v61 = vld [vmem:[%s6605_s1 + $0xad4] ss:$8 sps:$4 sm:$0xff]  }
 0x13d   : > { %3379 = vmatprep.subr.bf16.mxu1 %v4875_v63  ;;  %v4971_v63 = vld [vmem:[%s6605_s1 + $0xbd4] ss:$8 sps:$4 sm:$0xff]  }
 0x13e   : > { %3337 = vmatpush2.bf16.msra.mxu0 %v4870_v0  ;;  %v4966_v0 = vld [vmem:[%s6605_s1 + $0xad0] ss:$8 sps:$4 sm:$0xff]  }
 0x13f   : > { %3338 = vmatprep.subr.bf16.mxu0 %v4878_v1  ;;  %v4974_v1 = vld [vmem:[%s6605_s1 + $0xac4] ss:$8 sps:$4 sm:$0xff]  }
 0x140   : > { %3380 = vmatpush2.bf16.msra.mxu1 %v4873_v2  ;;  %v4969_v2 = vld [vmem:[%s6605_s1 + $0xbd0] ss:$8 sps:$4 sm:$0xff]  }
 0x141   : > { %3381 = vmatprep.subr.bf16.mxu1 %v4881_v3  ;;  %v4977_v3 = vld [vmem:[%s6605_s1 + $0xbc4] ss:$8 sps:$4 sm:$0xff]  }
 0x142   : > { %3339 = vmatpush2.bf16.msra.mxu0 %v4876_v4  ;;  %v4972_v4 = vld [vmem:[%s6605_s1 + $0xac0] ss:$8 sps:$4 sm:$0xff]  }
 0x143   : > { %3340 = vmatprep.subr.bf16.mxu0 %v4884_v5  ;;  %v4980_v5 = vld [vmem:[%s6605_s1 + $0xab4] ss:$8 sps:$4 sm:$0xff]  }
 0x144   : > { %3382 = vmatpush2.bf16.msra.mxu1 %v4879_v6  ;;  %v4975_v6 = vld [vmem:[%s6605_s1 + $0xbc0] ss:$8 sps:$4 sm:$0xff]  }
 0x145   : > { %3383 = vmatprep.subr.bf16.mxu1 %v4887_v7  ;;  %v4983_v7 = vld [vmem:[%s6605_s1 + $0xbb4] ss:$8 sps:$4 sm:$0xff]  }
 0x146   : > { %3341 = vmatpush2.bf16.msra.mxu0 %v4882_v8  ;;  %v4978_v8 = vld [vmem:[%s6605_s1 + $0xab0] ss:$8 sps:$4 sm:$0xff]  }
 0x147   : > { %3342 = vmatprep.subr.bf16.mxu0 %v4890_v9  ;;  %v4986_v9 = vld [vmem:[%s6605_s1 + $0xaa4] ss:$8 sps:$4 sm:$0xff]  }
 0x148   : > { %3384 = vmatpush2.bf16.msra.mxu1 %v4885_v10  ;;  %v4981_v10 = vld [vmem:[%s6605_s1 + $0xbb0] ss:$8 sps:$4 sm:$0xff]  }
 0x149   : > { %3385 = vmatprep.subr.bf16.mxu1 %v4893_v11  ;;  %v4989_v11 = vld [vmem:[%s6605_s1 + $0xba4] ss:$8 sps:$4 sm:$0xff]  }
 0x14a   : > { %3343 = vmatpush2.bf16.msra.mxu0 %v4888_v12  ;;  %v4984_v12 = vld [vmem:[%s6605_s1 + $0xaa0] ss:$8 sps:$4 sm:$0xff]  }
 0x14b   : > { %3344 = vmatprep.subr.bf16.mxu0 %v4896_v13  ;;  %v4992_v13 = vld [vmem:[%s6605_s1 + $0xa94] ss:$8 sps:$4 sm:$0xff]  }
 0x14c   : > { %3386 = vmatpush2.bf16.msra.mxu1 %v4891_v14  ;;  %v4987_v14 = vld [vmem:[%s6605_s1 + $0xba0] ss:$8 sps:$4 sm:$0xff]  }
 0x14d   : > { %3387 = vmatprep.subr.bf16.mxu1 %v4899_v15  ;;  %v4995_v15 = vld [vmem:[%s6605_s1 + $0xb94] ss:$8 sps:$4 sm:$0xff]  }
 0x14e   : > { %3345 = vmatpush2.bf16.msra.mxu0 %v4894_v16  ;;  %v4990_v16 = vld [vmem:[%s6605_s1 + $0xa90] ss:$8 sps:$4 sm:$0xff]  }
 0x14f   : > { %3400 = vmatprep.subr.bf16.mxu0 %v4905_v17  ;;  %v4998_v17 = vld [vmem:[%s6605_s1 + $0xa84] ss:$8 sps:$4 sm:$0xff]  }
 0x150   : > { %3388 = vmatpush2.bf16.msra.mxu1 %v4897_v18  ;;  %v4993_v18 = vld [vmem:[%s6605_s1 + $0xb90] ss:$8 sps:$4 sm:$0xff]  }
 0x151   : > { %3347 = vmatmul.mubr.bf16.vlgmr.msra.gmra.mxu0 %v4900_v19  ;;  %3443 = vmatprep.subr.bf16.mxu1 %v4911_v20  ;;  %v5001_v19 = vld [vmem:[%s6605_s1 + $0xb84] ss:$8 sps:$4 sm:$0xff]   ;;  %v4996_v20 = vld [vmem:[%s6605_s1 + $0xa80] ss:$8 sps:$4 sm:$0xff]  }
 0x152   : > { %3401 = vmatpush1.bf16.msra.mxu0 %v4903_v21  ;;  %3432 = vmatprep.mubr.bf16.mxu0 %v5004_v22  ;;  %v5007_v21 = vld [vmem:[%s6605_s1 + $0xc74] ss:$8 sps:$4 sm:$0xff]   ;;  %v4999_v22 = vld [vmem:[%s6605_s1 + $0xb80] ss:$8 sps:$4 sm:$0xff]  }
 0x153   : > { %3390 = vmatmul.mubr.bf16.vlgmr.msra.gmra.mxu1 %v4906_v23  ;;  %3402 = vmatprep.subr.bf16.mxu0 %v4914_v24  ;;  %v5002_v23 = vld [vmem:[%s5362_s4 + $0x50] ss:$108 sps:$4 sm:$0xff]  }
 0x154   : > { %3444 = vmatpush1.bf16.msra.mxu1 %v4909_v25  ;;  %3475 = vmatprep.mubr.bf16.mxu1 %v5010_v26  ;;  %v5034_v24 = vld [vmem:[%s6605_s1 + $0xd74] ss:$8 sps:$4 sm:$0xff]   ;;  %v5005_v25 = vld [vmem:[%s6605_s1 + $0xc70] ss:$8 sps:$4 sm:$0xff]  }
 0x155   : > { %3445 = vmatprep.subr.bf16.mxu1 %v4917_v27  ;;  %v5083_v26 = vld [vmem:[%s5362_s4 + $0x64] ss:$108 sps:$4 sm:$0xff]  }
 0x156   : > { %3403 = vmatpush1.bf16.msra.mxu0 %v4912_v28  ;;  %v5008_v27 = vld [vmem:[%s5362_s4 + $0x58] ss:$108 sps:$4 sm:$0xff]  }
 0x157   : > { %3404 = vmatprep.subr.bf16.mxu0 %v4920_v29  ;;  %v5013_v28 = vld [vmem:[%s6605_s1 + $0xc64] ss:$8 sps:$4 sm:$0xff]   ;;  %v5032_v29 = vld [vmem:[%s6605_s1 + $0xd70] ss:$8 sps:$4 sm:$0xff]  }
 0x158   : > { %3446 = vmatpush1.bf16.msra.mxu1 %v4915_v30  ;;  %v5040_v30 = vld [vmem:[%s6605_s1 + $0xd64] ss:$8 sps:$4 sm:$0xff]  }
 0x159   : > { %3447 = vmatprep.subr.bf16.mxu1 %v4923_v31  ;;  %v5011_v31 = vld [vmem:[%s6605_s1 + $0xc60] ss:$8 sps:$4 sm:$0xff]  }
 0x15a   : > { %3405 = vmatpush1.bf16.msra.mxu0 %v4918_v32  ;;  %v5016_v32 = vld [vmem:[%s6605_s1 + $0xc54] ss:$8 sps:$4 sm:$0xff]  }
 0x15b   : > { %3406 = vmatprep.subr.bf16.mxu0 %v4926_v33  ;;  %v5038_v33 = vld [vmem:[%s6605_s1 + $0xd60] ss:$8 sps:$4 sm:$0xff]  }
 0x15c   : > { %3448 = vmatpush1.bf16.msra.mxu1 %v4921_v34  ;;  %v5172_v34 = vmov 0  }
 0x15d   : > { %3449 = vmatprep.subr.bf16.mxu1 %v4929_v35  ;;  %v5046_v35 = vld [vmem:[%s6605_s1 + $0xd54] ss:$8 sps:$4 sm:$0xff]  }
 0x15e   : > { %3407 = vmatpush1.bf16.msra.mxu0 %v4924_v36  ;;  %v5014_v36 = vld [vmem:[%s6605_s1 + $0xc50] ss:$8 sps:$4 sm:$0xff]  }
 0x15f   : > { %3408 = vmatprep.subr.bf16.mxu0 %v4932_v37  ;;  %v5019_v37 = vld [vmem:[%s6605_s1 + $0xc44] ss:$8 sps:$4 sm:$0xff]  }
 0x160   : > { %3450 = vmatpush1.bf16.msra.mxu1 %v4927_v38  ;;  %v5044_v38 = vld [vmem:[%s6605_s1 + $0xd50] ss:$8 sps:$4 sm:$0xff]  }
 0x161   : > { %3451 = vmatprep.subr.bf16.mxu1 %v4935_v39  ;;  %v5052_v39 = vld [vmem:[%s6605_s1 + $0xd44] ss:$8 sps:$4 sm:$0xff]  }
 0x162   : > { %3409 = vmatpush1.bf16.msra.mxu0 %v4930_v40  ;;  %v5017_v40 = vld [vmem:[%s6605_s1 + $0xc40] ss:$8 sps:$4 sm:$0xff]  }
 0x163   : > { %3410 = vmatprep.subr.bf16.mxu0 %v4938_v41  ;;  %v5022_v41 = vld [vmem:[%s6605_s1 + $0xc34] ss:$8 sps:$4 sm:$0xff]  }
 0x164   : > { %3452 = vmatpush1.bf16.msra.mxu1 %v4933_v42  ;;  %v5050_v42 = vld [vmem:[%s6605_s1 + $0xd40] ss:$8 sps:$4 sm:$0xff]  }
 0x165   : > { %3453 = vmatprep.subr.bf16.mxu1 %v4941_v43  ;;  %v5058_v43 = vld [vmem:[%s6605_s1 + $0xd34] ss:$8 sps:$4 sm:$0xff]  }
 0x166   : > { %3411 = vmatpush1.bf16.msra.mxu0 %v4936_v44  ;;  %v5020_v44 = vld [vmem:[%s6605_s1 + $0xc30] ss:$8 sps:$4 sm:$0xff]  }
 0x167   : > { %3412 = vmatprep.subr.bf16.mxu0 %v4944_v45  ;;  %v5025_v45 = vld [vmem:[%s6605_s1 + $0xc24] ss:$8 sps:$4 sm:$0xff]  }
 0x168   : > { %3454 = vmatpush1.bf16.msra.mxu1 %v4939_v46  ;;  %v5056_v46 = vld [vmem:[%s6605_s1 + $0xd30] ss:$8 sps:$4 sm:$0xff]  }
 0x169   : > { %3455 = vmatprep.subr.bf16.mxu1 %v4947_v47  ;;  %v5064_v47 = vld [vmem:[%s6605_s1 + $0xd24] ss:$8 sps:$4 sm:$0xff]  }
 0x16a   : > { %3413 = vmatpush1.bf16.msra.mxu0 %v4942_v48  ;;  %v5023_v48 = vld [vmem:[%s6605_s1 + $0xc20] ss:$8 sps:$4 sm:$0xff]  }
 0x16b   : > { %3414 = vmatprep.subr.bf16.mxu0 %v4950_v49  ;;  %v5028_v49 = vld [vmem:[%s6605_s1 + $0xc14] ss:$8 sps:$4 sm:$0xff]  }
 0x16c   : > { %3456 = vmatpush1.bf16.msra.mxu1 %v4945_v50  ;;  %v5062_v50 = vld [vmem:[%s6605_s1 + $0xd20] ss:$8 sps:$4 sm:$0xff]  }
 0x16d   : > { %3457 = vmatprep.subr.bf16.mxu1 %v4953_v51  ;;  %v5070_v51 = vld [vmem:[%s6605_s1 + $0xd14] ss:$8 sps:$4 sm:$0xff]  }
 0x16e   : > { %3415 = vmatpush1.bf16.msra.mxu0 %v4948_v52  ;;  %v5026_v52 = vld [vmem:[%s6605_s1 + $0xc10] ss:$8 sps:$4 sm:$0xff]  }
 0x16f   : > { %3416 = vmatprep.subr.bf16.mxu0 %v4956_v53  ;;  %v5031_v53 = vld [vmem:[%s6605_s1 + $0xc04] ss:$8 sps:$4 sm:$0xff]  }
 0x170   : > { %3458 = vmatpush1.bf16.msra.mxu1 %v4951_v54  ;;  %v5068_v54 = vld [vmem:[%s6605_s1 + $0xd10] ss:$8 sps:$4 sm:$0xff]  }
 0x171   : > { %3459 = vmatprep.subr.bf16.mxu1 %v4959_v55  ;;  %v5076_v55 = vld [vmem:[%s6605_s1 + $0xd04] ss:$8 sps:$4 sm:$0xff]  }
 0x172   : > { %3417 = vmatpush2.bf16.msra.mxu0 %v4954_v56  ;;  %v5029_v56 = vld [vmem:[%s6605_s1 + $0xc00] ss:$8 sps:$4 sm:$0xff]  }
 0x173   : > { %3418 = vmatprep.subr.bf16.mxu0 %v4962_v57  ;;  %v5037_v57 = vld [vmem:[%s6605_s1 + $0xcf4] ss:$8 sps:$4 sm:$0xff]  }
 0x174   : > { %3460 = vmatpush2.bf16.msra.mxu1 %v4957_v58  ;;  %v5074_v58 = vld [vmem:[%s6605_s1 + $0xd00] ss:$8 sps:$4 sm:$0xff]  }
 0x175   : > { %3461 = vmatprep.subr.bf16.mxu1 %v4965_v59  ;;  %v5035_v59 = vld [vmem:[%s6605_s1 + $0xcf0] ss:$8 sps:$4 sm:$0xff]  }
 0x176   : > { %3419 = vmatpush2.bf16.msra.mxu0 %v4960_v60  ;;  %v5043_v60 = vld [vmem:[%s6605_s1 + $0xce4] ss:$8 sps:$4 sm:$0xff]  }
 0x177   : > { %3420 = vmatprep.subr.bf16.mxu0 %v4968_v61  ;;  %v5080_v61 = vld [vmem:[%s5362_s4 + $0x68] ss:$108 sps:$4 sm:$0xff]  }
 0x178   : > { %3462 = vmatpush2.bf16.msra.mxu1 %v4963_v62  ;;  %v5041_v62 = vld [vmem:[%s6605_s1 + $0xce0] ss:$8 sps:$4 sm:$0xff]  }
 0x179   : > { %3463 = vmatprep.subr.bf16.mxu1 %v4971_v63  ;;  %v5049_v63 = vld [vmem:[%s6605_s1 + $0xcd4] ss:$8 sps:$4 sm:$0xff]  }
 0x17a   : > { %3421 = vmatpush2.bf16.msra.mxu0 %v4966_v0  ;;  %v5047_v0 = vld [vmem:[%s6605_s1 + $0xcd0] ss:$8 sps:$4 sm:$0xff]  }
 0x17b   : > { %3422 = vmatprep.subr.bf16.mxu0 %v4974_v1  ;;  %v5055_v1 = vld [vmem:[%s6605_s1 + $0xcc4] ss:$8 sps:$4 sm:$0xff]  }
 0x17c   : > { %3464 = vmatpush2.bf16.msra.mxu1 %v4969_v2  ;;  %v5053_v2 = vld [vmem:[%s6605_s1 + $0xcc0] ss:$8 sps:$4 sm:$0xff]  }
 0x17d   : > { %3465 = vmatprep.subr.bf16.mxu1 %v4977_v3  ;;  %v5061_v3 = vld [vmem:[%s6605_s1 + $0xcb4] ss:$8 sps:$4 sm:$0xff]  }
 0x17e   : > { %3423 = vmatpush2.bf16.msra.mxu0 %v4972_v4  ;;  %v5059_v4 = vld [vmem:[%s6605_s1 + $0xcb0] ss:$8 sps:$4 sm:$0xff]  }
 0x17f   : > { %3424 = vmatprep.subr.bf16.mxu0 %v4980_v5  ;;  %v5067_v5 = vld [vmem:[%s6605_s1 + $0xca4] ss:$8 sps:$4 sm:$0xff]  }
 0x180   : > { %3466 = vmatpush2.bf16.msra.mxu1 %v4975_v6  ;;  %v5065_v6 = vld [vmem:[%s6605_s1 + $0xca0] ss:$8 sps:$4 sm:$0xff]  }
 0x181   : > { %3467 = vmatprep.subr.bf16.mxu1 %v4983_v7  ;;  %v5073_v7 = vld [vmem:[%s6605_s1 + $0xc94] ss:$8 sps:$4 sm:$0xff]  }
 0x182   : > { %3425 = vmatpush2.bf16.msra.mxu0 %v4978_v8  ;;  %v5071_v8 = vld [vmem:[%s6605_s1 + $0xc90] ss:$8 sps:$4 sm:$0xff]  }
 0x183   : > { %3426 = vmatprep.subr.bf16.mxu0 %v4986_v9  ;;  %v5079_v9 = vld [vmem:[%s6605_s1 + $0xc84] ss:$8 sps:$4 sm:$0xff]  }
 0x184   : > { %3468 = vmatpush2.bf16.msra.mxu1 %v4981_v10  ;;  %v5077_v10 = vld [vmem:[%s6605_s1 + $0xc80] ss:$8 sps:$4 sm:$0xff]  }
 0x185   : > { %3469 = vmatprep.subr.bf16.mxu1 %v4989_v11  ;;  %v5081_v11 = vld [vmem:[%s5362_s4 + $0x60] ss:$108 sps:$4 sm:$0xff]  }
 0x186   : > { %3427 = vmatpush2.bf16.msra.mxu0 %v4984_v12  ;;  %v3047_v12 = vpop.f32.mrf.mxu1 }
 0x187   : > { %3428 = vmatprep.subr.bf16.mxu0 %v4992_v13  ;;  %v3004_v13 = vpop.f32.mrf.mxu0 }
 0x188   : > { %3470 = vmatpush2.bf16.msra.mxu1 %v4987_v14  ;;  %v3049_v14 = vpop.f32.mrf.mxu1 }
 0x189   : > { %3471 = vmatprep.subr.bf16.mxu1 %v4995_v15  ;;  %v3006_v15 = vpop.f32.mrf.mxu0 }
 0x18a   : > { %3429 = vmatpush2.bf16.msra.mxu0 %v4990_v16  ;;  %v3051_v16 = vpop.f32.mrf.mxu1 }
 0x18b   : > { %3430 = vmatprep.subr.bf16.mxu0 %v4998_v17  ;;  %v3008_v17 = vpop.f32.mrf.mxu0 }
 0x18c   : > { %3472 = vmatpush2.bf16.msra.mxu1 %v4993_v18  ;;  %v3053_v18 = vpop.f32.mrf.mxu1 }
 0x18d   : > { %3473 = vmatprep.subr.bf16.mxu1 %v5001_v19 }
 0x18e   : > { %3431 = vmatpush2.bf16.msra.mxu0 %v4996_v20  ;;  %v3133_v19 = vpop.f32.mrf.mxu1  ;;  %v3010_v20 = vpop.f32.mrf.mxu0 }
 0x18f   : > { %3486 = vmatprep.subr.bf16.mxu0 %v5007_v21 }
 0x190   : > { %3474 = vmatpush2.bf16.msra.mxu1 %v4999_v22  ;;  %v3090_v21 = vpop.f32.mrf.mxu0  ;;  %v3135_v22 = vpop.f32.mrf.mxu1 }
 0x191   : > { %3433 = vmatmul.mubr.bf16.vlgmr.msra.gmra.mxu0 %v5002_v23  ;;  %3529 = vmatprep.subr.bf16.mxu1 %v5034_v24 }
 0x192   : > { %3487 = vmatpush1.bf16.msra.mxu0 %v5005_v25  ;;  %3518 = vmatprep.mubr.bf16.mxu0 %v5083_v26  ;;  %v3092_v23 = vpop.f32.mrf.mxu0  ;;  %v3137_v24 = vpop.f32.mrf.mxu1 }
 0x193   : > { %3476 = vmatmul.mubr.bf16.vlgmr.msra.gmra.mxu1 %v5008_v27  ;;  %3488 = vmatprep.subr.bf16.mxu0 %v5013_v28 }
 0x194   : > { %3530 = vmatpush1.bf16.msra.mxu1 %v5032_v29  ;;  %3561 = vmatprep.mubr.bf16.mxu1 %v5172_v34  ;;  %v3094_v25 = vpop.f32.mrf.mxu0  ;;  %v3139_v26 = vpop.f32.mrf.mxu1 }
 0x195   : > { %3531 = vmatprep.subr.bf16.mxu1 %v5040_v30 }
 0x196   : > { %3489 = vmatpush1.bf16.msra.mxu0 %v5011_v31  ;;  %v3219_v27 = vpop.f32.mrf.mxu1  ;;  %v3096_v28 = vpop.f32.mrf.mxu0 }
 0x197   : > { %3490 = vmatprep.subr.bf16.mxu0 %v5016_v32 }
 0x198   : > { %3532 = vmatpush1.bf16.msra.mxu1 %v5038_v33  ;;  %v3176_v29 = vpop.f32.mrf.mxu0  ;;  %v3221_v30 = vpop.f32.mrf.mxu1  ;;  %v664_v33 = vlaneseq }
 0x199   : > { %3533 = vmatprep.subr.bf16.mxu1 %v5046_v35 }
 0x19a   : > { %3491 = vmatpush1.bf16.msra.mxu0 %v5014_v36  ;;  %v3178_v31 = vpop.f32.mrf.mxu0  ;;  %v3223_v32 = vpop.f32.mrf.mxu1  ;;  %v665_v36 = vshrl.u32 %v664_v33, 7 }
 0x19b   : > { %3492 = vmatprep.subr.bf16.mxu0 %v5019_v37 }
 0x19c   : > { %3534 = vmatpush1.bf16.msra.mxu1 %v5044_v38  ;;  %v3180_v34 = vpop.f32.mrf.mxu0  ;;  %v3225_v35 = vpop.f32.mrf.mxu1 }
 0x19d   : > { %3535 = vmatprep.subr.bf16.mxu1 %v5052_v39  ;;  %v666_v39 = vsub.s32 0, %v665_v36 }
 0x19e   : > { %3493 = vmatpush1.bf16.msra.mxu0 %v5017_v40  ;;  %v3182_v38 = vpop.f32.mrf.mxu0  ;;  %v662_v40 = vld [vmem:[%s6606_s2] sm:$0x3] }
 0x19f   : > { %3494 = vmatprep.subr.bf16.mxu0 %v5022_v41 }
 0x1a0   : > { %3536 = vmatpush1.bf16.msra.mxu1 %v5050_v42 }
 0x1a1   : > { %3537 = vmatprep.subr.bf16.mxu1 %v5058_v43  ;;  %v670_v43 = vsub.s32 1, %v665_v36 }
 0x1a2   : > { %3495 = vmatpush1.bf16.msra.mxu0 %v5020_v44  ;;  %v667_v44 = vrot.slane %v662_v40, %v666_v39 }
 0x1a3   : > { %3496 = vmatprep.subr.bf16.mxu0 %v5025_v45 }
 0x1a4   : > { %3538 = vmatpush1.bf16.msra.mxu1 %v5056_v46 }
 0x1a5   : > { %3539 = vmatprep.subr.bf16.mxu1 %v5064_v47  ;;  %v671_v47 = vrot.slane %v662_v40, %v670_v43 }
 0x1a6   : > { %3497 = vmatpush1.bf16.msra.mxu0 %v5023_v48  ;;  %v3005_v48 = vadd.f32 %v3004_v13, %v667_v44 }
 0x1a7   : > { %3498 = vmatprep.subr.bf16.mxu0 %v5028_v49 }
 0x1a8   : > { %3540 = vmatpush1.bf16.msra.mxu1 %v5062_v50 }
 0x1a9   : > { %3541 = vmatprep.subr.bf16.mxu1 %v5070_v51  ;;  %v3007_v51 = vadd.f32 %v3006_v15, %v671_v47 }
 0x1aa   : > { %3499 = vmatpush1.bf16.msra.mxu0 %v5026_v52 }
 0x1ab   : > { %3500 = vmatprep.subr.bf16.mxu0 %v5031_v53  ;;  %v3048_v53 = vadd.f32 %v3047_v12, %v3005_v48 }
 0x1ac   : > { %3542 = vmatpush1.bf16.msra.mxu1 %v5068_v54  ;;  %v3009_v54 = vadd.f32 %v3008_v17, %v667_v44 }
 0x1ad   : > { %3543 = vmatprep.subr.bf16.mxu1 %v5076_v55 }
 0x1ae   : > { %3501 = vmatpush1.bf16.msra.mxu0 %v5029_v56  ;;  %v3050_v56 = vadd.f32 %v3049_v14, %v3007_v51 }
 0x1af   : > { %3502 = vmatprep.subr.bf16.mxu0 %v5037_v57  ;;  %v3011_v57 = vadd.f32 %v3010_v20, %v671_v47 }
 0x1b0   : > { %3544 = vmatpush1.bf16.msra.mxu1 %v5074_v58  ;;  %v3091_v58 = vadd.f32 %v3090_v21, %v3048_v53 }
 0x1b2   : > { %3503 = vmatpush2.bf16.msra.mxu0 %v5035_v59 }
 0x1b3   : > { %3504 = vmatprep.subr.bf16.mxu0 %v5043_v60  ;;  %3562 = vmatmul.mubr.bf16.vlgmr.msra.gmra.mxu1 %v5080_v61  ;;  %v3052_v61 = vadd.f32 %v3051_v16, %v3009_v54 }
 0x1b6   : > { %3505 = vmatpush2.bf16.msra.mxu0 %v5041_v62  ;;  %v3093_v62 = vadd.f32 %v3092_v23, %v3050_v56 }
 0x1b7   : > { %3506 = vmatprep.subr.bf16.mxu0 %v5049_v63  ;;  %v3054_v63 = vadd.f32 %v3053_v18, %v3011_v57 }
 0x1ba   : > { %3507 = vmatpush2.bf16.msra.mxu0 %v5047_v0  ;;  %v3134_v0 = vadd.f32 %v3133_v19, %v3091_v58 }
 0x1bb   : > { %3508 = vmatprep.subr.bf16.mxu0 %v5055_v1  ;;  %v3095_v1 = vadd.f32 %v3094_v25, %v3052_v61 }
 0x1be   : > { %3509 = vmatpush2.bf16.msra.mxu0 %v5053_v2 }
 0x1bf   : > { %3510 = vmatprep.subr.bf16.mxu0 %v5061_v3 }
 0x1c2   : > { %3511 = vmatpush2.bf16.msra.mxu0 %v5059_v4  ;;  %v3136_v4 = vadd.f32 %v3135_v22, %v3093_v62 }
 0x1c3   : > { %3512 = vmatprep.subr.bf16.mxu0 %v5067_v5  ;;  %v3097_v5 = vadd.f32 %v3096_v28, %v3054_v63 }
 0x1c6   : > { %3513 = vmatpush2.bf16.msra.mxu0 %v5065_v6  ;;  %v3177_v6 = vadd.f32 %v3176_v29, %v3134_v0 }
 0x1c7   : > { %3514 = vmatprep.subr.bf16.mxu0 %v5073_v7  ;;  %v3138_v7 = vadd.f32 %v3137_v24, %v3095_v1 }
 0x1c8   : > { %v3220_v12 = vadd.f32 %v3219_v27, %v3177_v6 }
 0x1c9   : > { %v3181_v13 = vadd.f32 %v3180_v34, %v3138_v7 }
 0x1ca   : > { %3515 = vmatpush2.bf16.msra.mxu0 %v5071_v8  ;;  %v3179_v8 = vadd.f32 %v3178_v31, %v3136_v4 }
 0x1cb   : > { %3516 = vmatprep.subr.bf16.mxu0 %v5079_v9  ;;  %v3224_v18 = vadd.f32 %v3223_v32, %v3181_v13 }
 0x1cc   : > { %v3222_v15 = vadd.f32 %v3221_v30, %v3179_v8 }
 0x1ce   : > { %3517 = vmatpush2.bf16.msra.mxu0 %v5077_v10 }
 0x1d1   : > { %3519 = vmatmul.mubr.bf16.vlgmr.msra.gmra.mxu0 %v5081_v11  ;;  %v3262_v41 = vpop.f32.mrf.mxu0  ;;  %v3140_v11 = vadd.f32 %v3139_v26, %v3097_v5 }
 0x1d2   : > { %v3263_v16 = vadd.f32 %v3262_v41, %v3220_v12 }
 0x1d3   : > { %v3305_v37 = vpop.f32.mrf.mxu1  ;;  %v3264_v45 = vpop.f32.mrf.mxu0  ;;  %v3183_v17 = vadd.f32 %v3182_v38, %v3140_v11 }
 0x1d4   : > { %v3265_v19 = vadd.f32 %v3264_v45, %v3222_v15  ;;  %v3306_v22 = vadd.f32 %v3305_v37, %v3263_v16 }
 0x1d5   : > { %v3307_v42 = vpop.f32.mrf.mxu1  ;;  %v3266_v49 = vpop.f32.mrf.mxu0  ;;  %v3226_v25 = vadd.f32 %v3225_v35, %v3183_v17 }
 0x1d6   : > { %v3267_v28 = vadd.f32 %v3266_v49, %v3224_v18  ;;  %v3308_v29 = vadd.f32 %v3307_v42, %v3265_v19 }
 0x1d7   : > { %v3309_v46 = vpop.f32.mrf.mxu1  ;;  %v3268_v55 = vpop.f32.mrf.mxu0 }
 0x1d8   : > { %v3269_v24 = vadd.f32 %v3268_v55, %v3226_v25  ;;  %v3310_v26 = vadd.f32 %v3309_v46, %v3267_v28 }
 0x1d9   : > { %v3311_v50 = vpop.f32.mrf.mxu1 }
 0x1da   : > { %v3312_v34 = vadd.f32 %v3311_v50, %v3269_v24 }
 0x211   : > { %v3348_v59 = vpop.f32.mrf.mxu0 }
 0x212   : > { %v3349_v31 = vadd.f32 %v3348_v59, %v3306_v22 }
 0x213   : > { %v3391_v52 = vpop.f32.mrf.mxu1  ;;  %v3350_v2 = vpop.f32.mrf.mxu0 }
 0x214   : > { %v3351_v27 = vadd.f32 %v3350_v2, %v3308_v29  ;;  %v3392_v39 = vadd.f32 %v3391_v52, %v3349_v31 }
 0x215   : > { %v3393_v60 = vpop.f32.mrf.mxu1  ;;  %v3352_v9 = vpop.f32.mrf.mxu0 }
 0x216   : > { %v3353_v30 = vadd.f32 %v3352_v9, %v3310_v26  ;;  %v3394_v32 = vadd.f32 %v3393_v60, %v3351_v27 }
 0x217   : > { %v3395_v3 = vpop.f32.mrf.mxu1  ;;  %v3354_v20 = vpop.f32.mrf.mxu0 }
 0x218   : > { %v3355_v41 = vadd.f32 %v3354_v20, %v3312_v34  ;;  %v3396_v35 = vadd.f32 %v3395_v3, %v3353_v30 }
 0x219   : > { %v3397_v10 = vpop.f32.mrf.mxu1 }
 0x21a   : > { %v3398_v42 = vadd.f32 %v3397_v10, %v3355_v41 }
 0x251   : > { %v3434_v21 = vpop.f32.mrf.mxu0 }
 0x252   : > { %v3435_v43 = vadd.f32 %v3434_v21, %v3392_v39 }
 0x253   : > { %v3477_v14 = vpop.f32.mrf.mxu1  ;;  %v3436_v33 = vpop.f32.mrf.mxu0 }
 0x254   : > { %v3437_v37 = vadd.f32 %v3436_v33, %v3394_v32  ;;  %v3478_v47 = vadd.f32 %v3477_v14, %v3435_v43 }
 0x255   : > { %v3479_v23 = vpop.f32.mrf.mxu1  ;;  %v3438_v38 = vpop.f32.mrf.mxu0 }
 0x256   : > { %v3439_v48 = vadd.f32 %v3438_v38, %v3396_v35  ;;  %v3480_v46 = vadd.f32 %v3479_v23, %v3437_v37 }
 0x257   : > { %v3481_v36 = vpop.f32.mrf.mxu1  ;;  %v3440_v45 = vpop.f32.mrf.mxu0 }
 0x258   : > { %v3441_v53 = vadd.f32 %v3440_v45, %v3398_v42  ;;  %v3482_v54 = vadd.f32 %v3481_v36, %v3439_v48 }
 0x259   : > { %v3483_v40 = vpop.f32.mrf.mxu1 }
 0x25a   : > { %v3484_v59 = vadd.f32 %v3483_v40, %v3441_v53 }
 0x273   : > { %v3563_v44 = vpop.f32.mrf.mxu1 }
 0x275   : > { %v3565_v49 = vpop.f32.mrf.mxu1 }
 0x277   : > { %v3567_v57 = vpop.f32.mrf.mxu1 }
 0x279   : > { %v3569_v3 = vpop.f32.mrf.mxu1 }
 0x291   : > { %v3520_v51 = vpop.f32.mrf.mxu0 }
 0x292   : > { %v3521_v50 = vadd.f32 %v3520_v51, %v3478_v47 }
 0x293   : > { %v3522_v52 = vpop.f32.mrf.mxu0 }
 0x294   : > { %v3564_v55 = vadd.f32 %v3563_v44, %v3521_v50  ;;  %v3523_v56 = vadd.f32 %v3522_v52, %v3480_v46 }
 0x295   : > { %v3524_v58 = vpop.f32.mrf.mxu0 }
 0x296   : > { %v3566_v60 = vadd.f32 %v3565_v49, %v3523_v56  ;;  %v3525_v61 = vadd.f32 %v3524_v58, %v3482_v54  ;;  %v3572_v63 = vmax.f32 %v3564_v55, 0.0 }
 0x297   : > { %v3526_v62 = vpop.f32.mrf.mxu0 }
 0x298   : > { %v3573_v0 = vmax.f32 %v3566_v60, 0.0  ;;  %v3568_v1 = vadd.f32 %v3567_v57, %v3525_v61  ;;  %v3527_v2 = vadd.f32 %v3526_v62, %v3484_v59 }
 0x29a   : > { %v4299_v4 = vpack.c.bf16 %v3573_v0, %v3572_v63  ;;  %v3570_v5 = vadd.f32 %v3569_v3, %v3527_v2  ;;  %v3574_v6 = vmax.f32 %v3568_v1, 0.0 }
 0x29c   : > { %3588 = vst [vmem:[%s6559_s5] sm:$0xff] %v4299_v4  ;;  %v3575_v7 = vmax.f32 %v3570_v5, 0.0  ;;  %3596 = sbr.rel (!%p5218_p4) target bundleno = 712 (0x2c8), region = 36 }
 0x29e   : > { %v4300_v8 = vpack.c.bf16 %v3575_v7, %v3574_v6 }
 0x2a0   : > { %3589 = vst [vmem:[%s6559_s5 + $0x8] sm:$0xff] %v4300_v8 }
 0x2a1   : > { %s6613_s12 = smov (!%p3599_p8, %s3598_s12), 2 }
 0x2a2   : > { %s4301_s11 = sshll.u32 %s6613_s12, 7 }
 0x2a3   : > { %p4287_p9 = scmp.eq.s32.totalorder %s4301_s11, 0 }
 0x2a4   : > { %s6576_s14 = sshrl.u32 (!%p4287_p9), %s6613_s12, 1 }
 0x2a5   : > { %3609 = sbr.rel (%p4287_p9) target bundleno = 712 (0x2c8), region = 40  ;;  %p4288_p10 = scmp.le.s32.totalorder (!%p4287_p9), %s6576_s14, 0 }
 0x2aa   : > { %3768 = sbr.rel (%p4288_p10) target bundleno = 695 (0x2b7), region = 116  ;;  %s5140_s15 = smov (!%p4288_p10), %s6570_s9  }
 0x2ab   : > { %s5144_s20 = smov (!%p4288_p10), %s6559_s5   ;;  %s5148_s10 = smov (!%p4288_p10), 0  }
 0x2ac   : > { %s5152_s17 = smov (!%p4288_p10), 0  }
 0x2af LB: >> { %v3674_v9 = vld [vmem:[%s5146_s20] sm:$0xff]  ;;  %v3676_v10 = vld [vmem:[%s5146_s20 + $0x8] sm:$0xff]  ;;  %s3678_s18 = sadd.s32 1, %s5150_s10  ;;  %s3668_s17 = sadd.s32 1, %s5154_s17   ;;  %s5154_s17 = sphi %s5152_s17, %s3668_s17   ;;  %s5150_s10 = sphi %s5148_s10, %s5149_s10   ;;  %s5146_s20 = sphi %s5144_s20, %s3683_s20   ;;  %s5142_s15 = sphi %s5140_s15, %s3684_s15  }
 0x2b0   : >> { %3675 = vst [vmem:[%s5142_s15] sm:$0xff] %v3674_v9  ;;  %3677 = vst [vmem:[%s5142_s15 + $0x8] sm:$0xff] %v3676_v10  ;;  %p3679_p11 = scmp.ge.s32.totalorder %s3678_s18, %s6576_s14  ;;  %p3667_p12 = scmp.ge.s32.totalorder %s3668_s17, %s6576_s14 }
 0x2b2   : >> { %s6615_s18 = smov (%p3679_p11, %s3678_s18), 0  ;;  %3670 = sbr.rel (!%p3667_p12) target bundleno = 687 (0x2af), region = 122 }
 0x2b3   : >> { %s4289_s21 = sshll.u32 %s6615_s18, 4  ;;  %s5149_s10 = smov %s6615_s18  }
 0x2b4   : >> { %s3683_s20 = scalar_lea.vmem %s6559_s5, %s4289_s21 [#allocation2]   ;;  %s3684_s15 = scalar_lea.vmem %s6570_s9, %s4289_s21  }
 0x2b7 PF: > { %s6586_s22 = sand.u32 1, %s6613_s12   ;;  %s4304_s23 = sshll.u32 %s6576_s14, 4 }
 0x2b8   : > { %s3689_s24 = scalar_lea.vmem %s6559_s5, %s4304_s23 [#allocation2]   ;;  %s3691_s25 = scalar_lea.vmem %s6570_s9, %s4304_s23  }
 0x2b9   : > { %p4294_p13 = scmp.le.s32.totalorder %s6586_s22, 0 }
 0x2ba   : > { %s5156_s26 = smov (!%p4294_p13), %s3691_s25   ;;  %s5160_s27 = smov (!%p4294_p13), %s3689_s24  }
 0x2bb   : > { %3782 = sbr.rel (%p4294_p13) target bundleno = 712 (0x2c8), region = 127  ;;  %s5164_s4 = smov (!%p4294_p13), 0  }
 0x2bc   : > { %s5168_s28 = smov (!%p4294_p13), 0  }
 0x2c0 LB: >> { %v3701_v11 = vld [vmem:[%s5162_s27] sm:$0xff]  ;;  %s3703_s29 = sadd.s32 1, %s5166_s4  ;;  %s3695_s28 = sadd.s32 1, %s5170_s28   ;;  %s5170_s28 = sphi %s5168_s28, %s3695_s28   ;;  %s5166_s4 = sphi %s5164_s4, %s5165_s4   ;;  %s5162_s27 = sphi %s5160_s27, %s3708_s27   ;;  %s5158_s26 = sphi %s5156_s26, %s3709_s26  }
 0x2c1   : >> { %3702 = vst [vmem:[%s5158_s26] sm:$0xff] %v3701_v11  ;;  %p3704_p0 = scmp.ge.s32.totalorder %s3703_s29, %s6586_s22  ;;  %p3694_p1 = scmp.ge.s32.totalorder %s3695_s28, %s6586_s22 }
 0x2c3   : >> { %s6617_s29 = smov (%p3704_p0, %s3703_s29), 0  ;;  %3697 = sbr.rel (!%p3694_p1) target bundleno = 704 (0x2c0), region = 133 }
 0x2c4   : >> { %s4295_s30 = sshll.u32 %s6617_s29, 3  ;;  %s5165_s4 = smov %s6617_s29  }
 0x2c5   : >> { %s3708_s27 = scalar_lea.vmem %s3689_s24, %s4295_s30 [#allocation2]   ;;  %s3709_s26 = scalar_lea.vmem %s3691_s25, %s4295_s30  }
 0x2c8 PF: > { %p10_p2 = scmp.ge.s32.totalorder %s5208_s16, 4   ;;  %s6609_s12 = smov %s5134_s13 }
 0x2c9   : > { %s6610_s13 = smov %s5216_s19  ;;  %s6611_s14 = smov %s5208_s16 }
 0x2ca   :  { %12 = sbr.rel (!%p10_p2) target bundleno = 2 (0x2), region = 144 }

// kernel: _lambda_.18
= control target key start
LH: loop header
LB: loop body
LE: loop exit
PB: predicated region body
PF: predicated region fallthrough
CT: control target
= control target key end

     0   :  { %vm38_vm0 = vcmask 1040384   ;;  %s220_s0 = inlined_call_operand.vmem [shape: bf16[2,9,256], index: 0, kind: input, shape index: {}]   ;;  %s221_s1 = inlined_call_operand.vmem [shape: f32[1,1,256], index: 1, kind: input, shape index: {}]   ;;  %s222_s2 = inlined_call_operand.hbm [shape: f32[1,1], index: 2, kind: output, shape index: {}]  }
   0x1   :  { %v18_v0 = vld [vmem:[%s220_s0] sm:$0xff]  ;;  %v19_v1 = vld [vmem:[%s220_s0 + $0x8] sm:$0x11]  ;;  %v20_v2 = vld [vmem:[%s220_s0 + $0x10] sm:$0xff] }
   0x2   :  { %v22_v3 = vunpack.c.l.bf16 %v18_v0  ;;  %v23_v4 = vunpack.c.h.bf16 %v18_v0  ;;  %v24_v5 = vunpack.c.l.bf16 %v19_v1  ;;  %v25_v6 = vunpack.c.h.bf16 %v19_v1  ;;  %v21_v7 = vld [vmem:[%s220_s0 + $0x18] sm:$0x11] }
   0x3   :  { %7 = vsyncpa [#allocation3], 0  ;;  %v26_v8 = vunpack.c.l.bf16 %v20_v2  ;;  %v27_v9 = vunpack.c.h.bf16 %v20_v2  ;;  %v28_v10 = vunpack.c.l.bf16 %v21_v7  ;;  %v29_v11 = vunpack.c.h.bf16 %v21_v7  ;;  %v30_v43 = vld [vmem:[%s221_s1] sm:$0x3]  ;;  %s180_s1 = smov [#allocation2]  }
   0x4   :  { %v31_v12 = vmul.f32 %v22_v3, %v22_v3  ;;  %v32_v13 = vmul.f32 %v23_v4, %v23_v4  ;;  %v33_v14 = vmul.f32 %v24_v5, %v24_v5  ;;  %v34_v15 = vmul.f32 %v25_v6, %v25_v6  ;;  %s139_s18 = sshll.u32 %s180_s1, 4  ;;  %s140_s18 = int_to_ptr.vmem [resolvable:$true] %s139_s18 }
   0x5   :  { %v48_v16 = vmul.f32 %v26_v8, %v26_v8  ;;  %v49_v17 = vmul.f32 %v27_v9, %v27_v9  ;;  %v50_v18 = vmul.f32 %v28_v10, %v28_v10  ;;  %v51_v19 = vmul.f32 %v29_v11, %v29_v11  ;;  %s157_s19 = scalar_lea.vmem %s140_s18, 16  ;;  %s161_s20 = scalar_lea.vmem %s140_s18, 32 }
   0x6   :  { %v35_v20 = vadd.f32 %v32_v13, %v31_v12  ;;  %v39_v21 = vsel %vm38_vm0, %v33_v14, 0.0  ;;  %v40_v22 = vsel %vm38_vm0, %v34_v15, 0.0  ;;  %v81_v36 = vlaneseq  ;;  %p158_p0 = scmp.ne.s32.totalorder %s140_s18, %s157_s19  ;;  %p162_p1 = scmp.lt.s32.totalorder %s140_s18, %s140_s18 }
   0x7   :  { %v41_v23 = vadd.f32 %v40_v22, %v39_v21  ;;  %v55_v24 = vsel %vm38_vm0, %v50_v18, 0.0  ;;  %v56_v25 = vsel %vm38_vm0, %v51_v19, 0.0  ;;  %v52_v26 = vadd.f32 %v49_v17, %v48_v16  ;;  %p163_p2 = scmp.lt.s32.totalorder %s161_s20, %s157_s19 }
   0x8   :  { %36 = vadd.xlane.f32.xlu1 %v35_v20  ;;  %v57_v27 = vadd.f32 %v56_v25, %v55_v24  ;;  %v82_v37 = vshrl.u32 %v81_v36, 7  ;;  %v105_v7 = vand.u32 127, %v81_v36  ;;  %vm120_vm1 = vcmask 130112  }
   0x9   :  { %42 = vadd.xlane.f32.xlu0 %v41_v23  ;;  %vm125_vm3 = vcmask 65536   ;;  %vm16_vm4 = vcmask 0   ;;  %v179_v18 = vmov 0.0   ;;  %p164_p3 = por %p163_p2, %p162_p1 }
   0xa   :  { %v83_v40 = vsub.s32 0, %v82_v37  ;;  %v87_v41 = vsub.s32 1, %v82_v37  ;;  %vm108_vm2 = vcmp.lt.s32.totalorder %v105_v7, 9  ;;  %17 = vst.msk [vmem:[#allocation2] sm:$0x1] %vm16_vm4, %v179_v18 }
   0xb   :  { %p165_p4 = pnand %p164_p3, %p158_p0 }
   0xc   :  { %53 = vadd.xlane.f32.xlu1 %v52_v26  ;;  %v84_v55 = vrot.slane %v30_v43, %v83_v40  ;;  %v88_v56 = vrot.slane %v30_v43, %v87_v41 }
   0xd   :  { %58 = vadd.xlane.f32.xlu0 %v57_v27 }
  0x11   :  { %v124_v20 = vld [vmem:[#allocation2] sm:$0x1] }
  0x91   :  { %v37_v28 = vpop.xlane.xlu1 %36 }
  0x92   :  { %v44_v29 = vadd.f32 1e-20, %v37_v28  ;;  %v43_v30 = vpop.xlane.xlu0 %42 }
  0x93   :  { %v45_v31 = vadd.f32 1e-20, %v43_v30 }
  0x94   :  { %149 = vrsqrt.f32 %v44_v29 }
  0x95   :  { %v54_v32 = vpop.xlane.xlu1 %53  ;;  %151 = vrsqrt.f32 %v45_v31 }
  0x96   :  { %v60_v33 = vadd.f32 1e-20, %v54_v32  ;;  %v59_v34 = vpop.xlane.xlu0 %58 }
  0x97   :  { %v61_v35 = vadd.f32 1e-20, %v59_v34 }
  0x98   :  { %153 = vrsqrt.f32 %v60_v33 }
  0x99   :  { %155 = vrsqrt.f32 %v61_v35 }
  0xa1   :  { %v150_v38 = vpop.eup %149 }
  0xa2   :  { %v152_v39 = vpop.eup %151  ;;  %v64_v45 = vmul.f32 %v150_v38, %v22_v3  ;;  %v65_v46 = vmul.f32 %v150_v38, %v23_v4 }
  0xa3   :  { %v66_v49 = vmul.f32 %v152_v39, %v24_v5  ;;  %v67_v50 = vmul.f32 %v152_v39, %v25_v6 }
  0xa5   :  { %v154_v42 = vpop.eup %153 }
  0xa6   :  { %v156_v44 = vpop.eup %155  ;;  %v68_v47 = vmul.f32 %v154_v42, %v26_v8  ;;  %v69_v48 = vmul.f32 %v154_v42, %v27_v9  ;;  %v115_v8 = vadd.s32 4294967288, %v105_v7  ;;  %v113_v9 = vsub.s32 %v105_v7, %v82_v37 }
  0xa7   :  { %v70_v51 = vmul.f32 %v156_v44, %v28_v10  ;;  %v71_v52 = vmul.f32 %v156_v44, %v29_v11 }
  0xa8   :  { %v72_v53 = vsub.f32 %v64_v45, %v68_v47  ;;  %v73_v54 = vsub.f32 %v65_v46, %v69_v48  ;;  %v118_v10 = vsub.s32 %v115_v8, %v82_v37 }
  0xa9   :  { %v74_v57 = vsub.f32 %v66_v49, %v70_v51  ;;  %v75_v58 = vsub.f32 %v67_v50, %v71_v52 }
  0xaa   :  { %v76_v59 = vmul.f32 %v72_v53, %v72_v53  ;;  %v77_v60 = vmul.f32 %v73_v54, %v73_v54 }
  0xab   :  { %v78_v61 = vmul.f32 %v74_v57, %v74_v57  ;;  %v79_v62 = vmul.f32 %v75_v58, %v75_v58 }
  0xac   :  { %v91_v63 = vmul.f32 %v84_v55, %v76_v59  ;;  %v92_v0 = vmul.f32 %v88_v56, %v77_v60 }
  0xad   :  { %v93_v1 = vmul.f32 %v84_v55, %v78_v61  ;;  %v94_v2 = vmul.f32 %v88_v56, %v79_v62 }
  0xae   :  { %v95_v3 = vadd.f32 %v92_v0, %v91_v63 }
  0xaf   :  { %v98_v4 = vsel %vm38_vm0, %v93_v1, 0.0  ;;  %v99_v5 = vsel %vm38_vm0, %v94_v2, 0.0 }
  0xb0   :  { %96 = vadd.xlane.f32.xlu0 %v95_v3  ;;  %v100_v6 = vadd.f32 %v99_v5, %v98_v4 }
  0xb2   :  { %101 = vadd.xlane.f32.xlu1 %v100_v6 }
 0x139   :  { %v97_v11 = vpop.xlane.xlu0 %96 }
 0x13a   :  { %v114_v13 = vrot.slane %v97_v11, %v113_v9 }
 0x13b   :  { %v102_v12 = vpop.xlane.xlu1 %101 }
 0x13c   :  { %v119_v14 = vrot.slane %v102_v12, %v118_v10 }
 0x13e   :  { %v121_v15 = vsel %vm120_vm1, %v119_v14, %v114_v13 }
 0x13f   :  { %v123_v16 = vsel %vm108_vm2, %v121_v15, 0.0 }
 0x140   :  { %v126_v17 = vsel %vm125_vm3, %v123_v16, 0.0 }
 0x141   :  { %127 = vadd.xlane.f32.xlu0 %v126_v17 }
 0x1ca   :  { %v128_v19 = vpop.xlane.xlu0 %127 }
 0x1cb   :  { %v129_v21 = vmul.f32 0.11111111, %v128_v19 }
 0x1cd   :  { %v130_v22 = vadd.f32 %v129_v21, %v124_v20 }
 0x1cf   :  { %132 = vst.msk [vmem:[#allocation2] sm:$0x1] %vm16_vm4, %v130_v22 }
 0x1d0   :  { %168 = shalt.err (!%p165_p4)
}
 0x1d1   :  { %142 = dma.vmem_to_hbm [thread:$0]  %s140_s18, 16, %s222_s2, [#allocation3]  }
 0x1d2   :  { %177 = dma.done.wait [#allocation3], 16  }
 0x1d3   :  { %178 = vsyncadd [#allocation3], 4294967280 }
 0x1d4   :  { %146 = vsyncpa [#allocation3], 1 }

// kernel: _lambda_.14
= control target key start
LH: loop header
LB: loop body
LE: loop exit
PB: predicated region body
PF: predicated region fallthrough
CT: control target
= control target key end

     0   :  { %s3673_s12 = smov 0   ;;  %s3675_s13 = smov 0   ;;  %s4643_s0 = inlined_call_operand.vmem [shape: bf16[18,2304], index: 0, kind: input, shape index: {}]   ;;  %s4644_s1 = inlined_call_operand.vmem [shape: bf16[2304,256], index: 1, kind: input, shape index: {}]   ;;  %s4645_s2 = inlined_call_operand.vmem [shape: f32[1,256], index: 2, kind: input, shape index: {}]   ;;  %s4646_s3 = inlined_call_operand.vmem [shape: bf16[18,256], index: 3, kind: output, shape index: {}]  }
   0x1   :  { %s3677_s14 = smov 0  }
   0x2 LB: > { %s3686_s15 = sadd.s32 4294967295, %s3619_s14   ;;  %s3688_s16 = sadd.s32 1, %s3619_s14   ;;  %s3619_s14 = sphi %s3677_s14, %s4650_s14   ;;  %s3615_s13 = sphi %s3675_s13, %s4649_s13   ;;  %s3611_s12 = sphi %s3673_s12, %s4648_s12  }
   0x3   : > { %s85_s17 = ssub.s32 %s3619_s14, %s3688_s16  ;;  %s88_s18 = sadd.s32 1, %s3615_s13 }
   0x4   : > { %p86_p0 = scmp.eq.s32.totalorder %s85_s17, 0  ;;  %p98_p1 = scmp.ne.s32.totalorder %s3615_s13, %s3611_s12 }
   0x5   : > { %p99_p2 = scmp.eq.s32.totalorder %s3686_s15, 1  ;;  %p2679_p3 = scmp.ge.s32.totalorder %s3619_s14, 1 }
   0x6   : > { %s3696_s19 = scalar_select %p86_p0, %s3615_s13, %s88_s18  }
   0x7   : > { %p3698_p4 = por %p99_p2, %p98_p1  ;;  %p149_p5 = scmp.lt.s32.totalorder %s3619_s14, 3 }
   0x9   : > { %p150_p6 = pnand %p2679_p3, %p149_p5 }
   0xa   : > { %s3790_s10 = sshll.u32 (!%p150_p6), %s3686_s15, 1  ;;  %s175_s26 = sand.u32 (!%p150_p6), 1, %s3611_s12  }
   0xb   : > { %153 = sbr.rel (%p150_p6) target bundleno = 582 (0x246), region = 32  ;;  %p184_p7 = scmp.lt.s32.totalorder (!%p150_p6), %s3790_s10, 2 }
   0xc   : > { %s2680_s27 = sshll.u32 (!%p150_p6), %s175_s26, 4 }
   0xd   : > { %s4598_s28 = scalar_lea.vmem (!%p150_p6), [#allocation2], %s2680_s27  }
  0x10   : > { %v3106_v0 = vld [vmem:[%s4644_s1 + $0x74] ss:$8 sps:$4 sm:$0xff]   ;;  %v3108_v1 = vld [vmem:[%s4644_s1 + $0x70] ss:$8 sps:$4 sm:$0xff]   ;;  %v3112_v4 = vld [vmem:[%s4644_s1 + $0x64] ss:$8 sps:$4 sm:$0xff]  }
  0x11   : > { %2049 = vmatprep.subr.bf16.mxu0 %v3106_v0  ;;  %v3109_v2 = vld [vmem:[%s4644_s1 + $0x174] ss:$8 sps:$4 sm:$0xff]   ;;  %v3111_v3 = vld [vmem:[%s4644_s1 + $0x170] ss:$8 sps:$4 sm:$0xff]   ;;  %v3114_v5 = vld [vmem:[%s4644_s1 + $0x60] ss:$8 sps:$4 sm:$0xff]  }
  0x12   : > { %2050 = vmatpush1.bf16.msra.mxu0 %v3108_v1  ;;  %2092 = vmatprep.subr.bf16.mxu1 %v3109_v2  ;;  %v3115_v6 = vld [vmem:[%s4644_s1 + $0x164] ss:$8 sps:$4 sm:$0xff]   ;;  %v3117_v7 = vld [vmem:[%s4644_s1 + $0x160] ss:$8 sps:$4 sm:$0xff]   ;;  %v3118_v8 = vld [vmem:[%s4644_s1 + $0x54] ss:$8 sps:$4 sm:$0xff]  }
  0x13   : > { %2093 = vmatpush1.bf16.msra.mxu1 %v3111_v3  ;;  %2051 = vmatprep.subr.bf16.mxu0 %v3112_v4  ;;  %v3120_v9 = vld [vmem:[%s4644_s1 + $0x50] ss:$8 sps:$4 sm:$0xff]   ;;  %v3121_v10 = vld [vmem:[%s4644_s1 + $0x154] ss:$8 sps:$4 sm:$0xff]   ;;  %v3124_v11 = vld [vmem:[%s4644_s1 + $0x44] ss:$8 sps:$4 sm:$0xff]  }
  0x14   : > { %2094 = vmatprep.subr.bf16.mxu1 %v3115_v6  ;;  %v3123_v12 = vld [vmem:[%s4644_s1 + $0x150] ss:$8 sps:$4 sm:$0xff]   ;;  %v3127_v13 = vld [vmem:[%s4644_s1 + $0x144] ss:$8 sps:$4 sm:$0xff]   ;;  %v3126_v14 = vld [vmem:[%s4644_s1 + $0x40] ss:$8 sps:$4 sm:$0xff]  }
  0x15   : > { %v3130_v15 = vld [vmem:[%s4644_s1 + $0x34] ss:$8 sps:$4 sm:$0xff]   ;;  %v3129_v16 = vld [vmem:[%s4644_s1 + $0x140] ss:$8 sps:$4 sm:$0xff]   ;;  %v3132_v18 = vld [vmem:[%s4644_s1 + $0x30] ss:$8 sps:$4 sm:$0xff]  }
  0x16   : > { %2052 = vmatpush1.bf16.msra.mxu0 %v3114_v5  ;;  %v3133_v17 = vld [vmem:[%s4644_s1 + $0x134] ss:$8 sps:$4 sm:$0xff]   ;;  %v3136_v19 = vld [vmem:[%s4644_s1 + $0x24] ss:$8 sps:$4 sm:$0xff]   ;;  %v3135_v20 = vld [vmem:[%s4644_s1 + $0x130] ss:$8 sps:$4 sm:$0xff]  }
  0x17   : > { %2053 = vmatprep.subr.bf16.mxu0 %v3118_v8  ;;  %2095 = vmatpush1.bf16.msra.mxu1 %v3117_v7  ;;  %v3139_v21 = vld [vmem:[%s4644_s1 + $0x124] ss:$8 sps:$4 sm:$0xff]   ;;  %v3138_v22 = vld [vmem:[%s4644_s1 + $0x20] ss:$8 sps:$4 sm:$0xff]   ;;  %v3142_v23 = vld [vmem:[%s4644_s1 + $0x14] ss:$8 sps:$4 sm:$0xff]  }
  0x18   : > { %2096 = vmatprep.subr.bf16.mxu1 %v3121_v10  ;;  %v3141_v24 = vld [vmem:[%s4644_s1 + $0x120] ss:$8 sps:$4 sm:$0xff]   ;;  %v3145_v25 = vld [vmem:[%s4644_s1 + $0x114] ss:$8 sps:$4 sm:$0xff]   ;;  %v3144_v26 = vld [vmem:[%s4644_s1 + $0x10] ss:$8 sps:$4 sm:$0xff]  }
  0x19   : > { %v3148_v27 = vld [vmem:[%s4644_s1 + $0x4] ss:$8 sps:$4 sm:$0xff]   ;;  %v3147_v28 = vld [vmem:[%s4644_s1 + $0x110] ss:$8 sps:$4 sm:$0xff]   ;;  %v3150_v30 = vld [vmem:[%s4644_s1] ss:$8 sps:$4 sm:$0xff]  }
  0x1a   : > { %2054 = vmatpush1.bf16.msra.mxu0 %v3120_v9  ;;  %v3151_v29 = vld [vmem:[%s4644_s1 + $0x104] ss:$8 sps:$4 sm:$0xff]   ;;  %v3154_v31 = vld [vmem:[%s4644_s1 + $0xf4] ss:$8 sps:$4 sm:$0xff]   ;;  %v3153_v32 = vld [vmem:[%s4644_s1 + $0x100] ss:$8 sps:$4 sm:$0xff]  }
  0x1b   : > { %2055 = vmatprep.subr.bf16.mxu0 %v3124_v11  ;;  %2097 = vmatpush1.bf16.msra.mxu1 %v3123_v12  ;;  %v3157_v33 = vld [vmem:[%s4644_s1 + $0x1f4] ss:$8 sps:$4 sm:$0xff]   ;;  %v3156_v34 = vld [vmem:[%s4644_s1 + $0xf0] ss:$8 sps:$4 sm:$0xff]   ;;  %v3160_v35 = vld [vmem:[%s4644_s1 + $0xe4] ss:$8 sps:$4 sm:$0xff]  }
  0x1c   : > { %2098 = vmatprep.subr.bf16.mxu1 %v3127_v13  ;;  %s185_s4 = scalar_select %p184_p7, %s3790_s10, 2  ;;  %v3159_v36 = vld [vmem:[%s4644_s1 + $0x1f0] ss:$8 sps:$4 sm:$0xff]   ;;  %v3163_v37 = vld [vmem:[%s4644_s1 + $0x1e4] ss:$8 sps:$4 sm:$0xff]  }
  0x1d   : > { %v3162_v38 = vld [vmem:[%s4644_s1 + $0xe0] ss:$8 sps:$4 sm:$0xff]   ;;  %v3166_v39 = vld [vmem:[%s4644_s1 + $0xd4] ss:$8 sps:$4 sm:$0xff]   ;;  %v3168_v42 = vld [vmem:[%s4644_s1 + $0xd0] ss:$8 sps:$4 sm:$0xff]  }
  0x1e   : > { %2056 = vmatpush1.bf16.msra.mxu0 %v3126_v14  ;;  %s3017_s18 = smul.u32 72, %s185_s4  ;;  %v3165_v40 = vld [vmem:[%s4644_s1 + $0x1e0] ss:$8 sps:$4 sm:$0xff]   ;;  %v3169_v41 = vld [vmem:[%s4644_s1 + $0x1d4] ss:$8 sps:$4 sm:$0xff]   ;;  %s2462_s12 = ssub.s32 (%p3698_p4), 3, %s3790_s10 }
  0x1f   : > { %2057 = vmatprep.subr.bf16.mxu0 %v3130_v15  ;;  %2099 = vmatpush1.bf16.msra.mxu1 %v3129_v16  ;;  %v3172_v43 = vld [vmem:[%s4644_s1 + $0xc4] ss:$8 sps:$4 sm:$0xff]   ;;  %v3171_v44 = vld [vmem:[%s4644_s1 + $0x1d0] ss:$8 sps:$4 sm:$0xff]   ;;  %v3174_v46 = vld [vmem:[%s4644_s1 + $0xc0] ss:$8 sps:$4 sm:$0xff]  }
  0x20   : > { %2100 = vmatprep.subr.bf16.mxu1 %v3133_v17  ;;  %s3842_s4 = scalar_lea.vmem %s4643_s0, %s3017_s18  ;;  %v3175_v45 = vld [vmem:[%s4644_s1 + $0x1c4] ss:$8 sps:$4 sm:$0xff]   ;;  %v3178_v48 = vld [vmem:[%s4644_s1 + $0xb4] ss:$8 sps:$4 sm:$0xff]   ;;  %v3177_v49 = vld [vmem:[%s4644_s1 + $0x1c0] ss:$8 sps:$4 sm:$0xff]  }
  0x21   : > { %v3203_v47 = vld [vmem:[%s3842_s4 + $0x4] ss:$72 sps:$4 sm:$0xff]   ;;  %v3181_v50 = vld [vmem:[%s4644_s1 + $0x1b4] ss:$8 sps:$4 sm:$0xff]   ;;  %v3180_v52 = vld [vmem:[%s4644_s1 + $0xb0] ss:$8 sps:$4 sm:$0xff]  }
  0x22   : > { %2058 = vmatpush1.bf16.msra.mxu0 %v3132_v18  ;;  %2081 = vmatprep.mubr.bf16.mxu0 %v3203_v47  ;;  %v3210_v51 = vld [vmem:[%s3842_s4 + $0xc] ss:$72 sps:$4 sm:$0xff]   ;;  %v3183_v54 = vld [vmem:[%s4644_s1 + $0x1b0] ss:$8 sps:$4 sm:$0xff]   ;;  %v3186_v56 = vld [vmem:[%s4644_s1 + $0xa0] ss:$8 sps:$4 sm:$0xff]  }
  0x23   : > { %2059 = vmatprep.subr.bf16.mxu0 %v3136_v19  ;;  %2101 = vmatpush1.bf16.msra.mxu1 %v3135_v20  ;;  %v3184_v53 = vld [vmem:[%s4644_s1 + $0xa4] ss:$8 sps:$4 sm:$0xff]   ;;  %v3190_v57 = vld [vmem:[%s4644_s1 + $0x94] ss:$8 sps:$4 sm:$0xff]   ;;  %v3189_v58 = vld [vmem:[%s4644_s1 + $0x1a0] ss:$8 sps:$4 sm:$0xff]  }
  0x24   : > { %2102 = vmatprep.subr.bf16.mxu1 %v3139_v21  ;;  %2124 = vmatprep.mubr.bf16.mxu1 %v3210_v51  ;;  %v3187_v55 = vld [vmem:[%s4644_s1 + $0x1a4] ss:$8 sps:$4 sm:$0xff]   ;;  %v3193_v59 = vld [vmem:[%s4644_s1 + $0x194] ss:$8 sps:$4 sm:$0xff]   ;;  %v3192_v60 = vld [vmem:[%s4644_s1 + $0x90] ss:$8 sps:$4 sm:$0xff]  }
  0x25   : > { %v3196_v61 = vld [vmem:[%s4644_s1 + $0x84] ss:$8 sps:$4 sm:$0xff]   ;;  %v3195_v62 = vld [vmem:[%s4644_s1 + $0x190] ss:$8 sps:$4 sm:$0xff]   ;;  %v3198_v0 = vld [vmem:[%s4644_s1 + $0x80] ss:$8 sps:$4 sm:$0xff]  }
  0x26   : > { %2060 = vmatpush1.bf16.msra.mxu0 %v3138_v22  ;;  %v3199_v63 = vld [vmem:[%s4644_s1 + $0x184] ss:$8 sps:$4 sm:$0xff]   ;;  %v3207_v1 = vld [vmem:[%s4644_s1 + $0x274] ss:$8 sps:$4 sm:$0xff]   ;;  %v3204_v2 = vld [vmem:[%s4644_s1 + $0x180] ss:$8 sps:$4 sm:$0xff]  }
  0x27   : > { %2061 = vmatprep.subr.bf16.mxu0 %v3142_v23  ;;  %2103 = vmatpush1.bf16.msra.mxu1 %v3141_v24  ;;  %v3201_v3 = vld [vmem:[%s3842_s4] ss:$72 sps:$4 sm:$0xff]   ;;  %v3213_v4 = vld [vmem:[%s4644_s1 + $0x374] ss:$8 sps:$4 sm:$0xff]   ;;  %v3205_v5 = vld [vmem:[%s4644_s1 + $0x270] ss:$8 sps:$4 sm:$0xff]  }
  0x28   : > { %2104 = vmatprep.subr.bf16.mxu1 %v3145_v25  ;;  %v3208_v6 = vld [vmem:[%s3842_s4 + $0x8] ss:$72 sps:$4 sm:$0xff]   ;;  %v3216_v7 = vld [vmem:[%s4644_s1 + $0x264] ss:$8 sps:$4 sm:$0xff]   ;;  %v3222_v11 = vld [vmem:[%s4644_s1 + $0x254] ss:$8 sps:$4 sm:$0xff]  }
  0x29   : > { %v3211_v8 = vld [vmem:[%s4644_s1 + $0x370] ss:$8 sps:$4 sm:$0xff]   ;;  %v3219_v9 = vld [vmem:[%s4644_s1 + $0x364] ss:$8 sps:$4 sm:$0xff]   ;;  %v3214_v10 = vld [vmem:[%s4644_s1 + $0x260] ss:$8 sps:$4 sm:$0xff]  }
  0x2a   : > { %2062 = vmatpush1.bf16.msra.mxu0 %v3144_v26  ;;  %v3217_v12 = vld [vmem:[%s4644_s1 + $0x360] ss:$8 sps:$4 sm:$0xff]   ;;  %v3225_v13 = vld [vmem:[%s4644_s1 + $0x354] ss:$8 sps:$4 sm:$0xff]   ;;  %v3220_v14 = vld [vmem:[%s4644_s1 + $0x250] ss:$8 sps:$4 sm:$0xff]  }
  0x2b   : > { %2063 = vmatprep.subr.bf16.mxu0 %v3148_v27  ;;  %2105 = vmatpush1.bf16.msra.mxu1 %v3147_v28  ;;  %v3228_v15 = vld [vmem:[%s4644_s1 + $0x244] ss:$8 sps:$4 sm:$0xff]   ;;  %v3223_v16 = vld [vmem:[%s4644_s1 + $0x350] ss:$8 sps:$4 sm:$0xff]   ;;  %v3226_v18 = vld [vmem:[%s4644_s1 + $0x240] ss:$8 sps:$4 sm:$0xff]  }
  0x2c   : > { %2106 = vmatprep.subr.bf16.mxu1 %v3151_v29  ;;  %v3231_v17 = vld [vmem:[%s4644_s1 + $0x344] ss:$8 sps:$4 sm:$0xff]   ;;  %v3234_v19 = vld [vmem:[%s4644_s1 + $0x234] ss:$8 sps:$4 sm:$0xff]   ;;  %v3229_v20 = vld [vmem:[%s4644_s1 + $0x340] ss:$8 sps:$4 sm:$0xff]  }
  0x2d   : > { %v3237_v21 = vld [vmem:[%s4644_s1 + $0x334] ss:$8 sps:$4 sm:$0xff]   ;;  %v3232_v22 = vld [vmem:[%s4644_s1 + $0x230] ss:$8 sps:$4 sm:$0xff]   ;;  %v3240_v23 = vld [vmem:[%s4644_s1 + $0x224] ss:$8 sps:$4 sm:$0xff]  }
  0x2e   : > { %2064 = vmatpush1.bf16.msra.mxu0 %v3150_v30  ;;  %v3235_v24 = vld [vmem:[%s4644_s1 + $0x330] ss:$8 sps:$4 sm:$0xff]   ;;  %v3243_v25 = vld [vmem:[%s4644_s1 + $0x324] ss:$8 sps:$4 sm:$0xff]   ;;  %v3238_v26 = vld [vmem:[%s4644_s1 + $0x220] ss:$8 sps:$4 sm:$0xff]  }
  0x2f   : > { %2065 = vmatprep.subr.bf16.mxu0 %v3154_v31  ;;  %2107 = vmatpush1.bf16.msra.mxu1 %v3153_v32  ;;  %v3246_v27 = vld [vmem:[%s4644_s1 + $0x214] ss:$8 sps:$4 sm:$0xff]   ;;  %v3241_v28 = vld [vmem:[%s4644_s1 + $0x320] ss:$8 sps:$4 sm:$0xff]   ;;  %v3244_v30 = vld [vmem:[%s4644_s1 + $0x210] ss:$8 sps:$4 sm:$0xff]  }
  0x30   : > { %2108 = vmatprep.subr.bf16.mxu1 %v3157_v33  ;;  %v3249_v29 = vld [vmem:[%s4644_s1 + $0x314] ss:$8 sps:$4 sm:$0xff]   ;;  %v3247_v31 = vld [vmem:[%s4644_s1 + $0x310] ss:$8 sps:$4 sm:$0xff]   ;;  %v3252_v32 = vld [vmem:[%s4644_s1 + $0x204] ss:$8 sps:$4 sm:$0xff]  }
  0x31   : > { %v3306_v33 = vld [vmem:[%s3842_s4 + $0x14] ss:$72 sps:$4 sm:$0xff]   ;;  %v3279_v51 = vld [vmem:[%s4644_s1 + $0x3c4] ss:$8 sps:$4 sm:$0xff]   ;;  %s3014_s29 = sshll.u32 (%p3698_p4), %s3686_s15, 4  ;;  %p2463_p8 = scmp.lt.s32.totalorder (%p3698_p4), %s2462_s12, 2 }
  0x32   : > { %2066 = vmatpush2.bf16.msra.mxu0 %v3156_v34  ;;  %v3255_v34 = vld [vmem:[%s4644_s1 + $0x304] ss:$8 sps:$4 sm:$0xff]   ;;  %v3273_v47 = vld [vmem:[%s4644_s1 + $0x3d4] ss:$8 sps:$4 sm:$0xff]   ;;  %s4609_s6 = scalar_lea.vmem (%p3698_p4), %s4646_s3, %s3014_s29  }
  0x33   : > { %2067 = vmatprep.subr.bf16.mxu0 %v3160_v35  ;;  %2109 = vmatpush2.bf16.msra.mxu1 %v3159_v36  ;;  %v3250_v35 = vld [vmem:[%s4644_s1 + $0x200] ss:$8 sps:$4 sm:$0xff]   ;;  %v3312_v36 = vld [vmem:[%s3842_s4 + $0x1c] ss:$72 sps:$4 sm:$0xff]  }
  0x34   : > { %2110 = vmatprep.subr.bf16.mxu1 %v3163_v37  ;;  %v3258_v37 = vld [vmem:[%s4644_s1 + $0x2f4] ss:$8 sps:$4 sm:$0xff]  }
  0x36   : > { %2068 = vmatpush2.bf16.msra.mxu0 %v3162_v38  ;;  %v3253_v38 = vld [vmem:[%s4644_s1 + $0x300] ss:$8 sps:$4 sm:$0xff]  }
  0x37   : > { %2069 = vmatprep.subr.bf16.mxu0 %v3166_v39  ;;  %2111 = vmatpush2.bf16.msra.mxu1 %v3165_v40  ;;  %v3261_v39 = vld [vmem:[%s4644_s1 + $0x3f4] ss:$8 sps:$4 sm:$0xff]   ;;  %v3256_v40 = vld [vmem:[%s4644_s1 + $0x2f0] ss:$8 sps:$4 sm:$0xff]  }
  0x38   : > { %2112 = vmatprep.subr.bf16.mxu1 %v3169_v41  ;;  %v3264_v41 = vld [vmem:[%s4644_s1 + $0x2e4] ss:$8 sps:$4 sm:$0xff]  }
  0x3a   : > { %2070 = vmatpush2.bf16.msra.mxu0 %v3168_v42  ;;  %v3259_v42 = vld [vmem:[%s4644_s1 + $0x3f0] ss:$8 sps:$4 sm:$0xff]  }
  0x3b   : > { %2071 = vmatprep.subr.bf16.mxu0 %v3172_v43  ;;  %2113 = vmatpush2.bf16.msra.mxu1 %v3171_v44  ;;  %v3267_v43 = vld [vmem:[%s4644_s1 + $0x3e4] ss:$8 sps:$4 sm:$0xff]   ;;  %v3262_v44 = vld [vmem:[%s4644_s1 + $0x2e0] ss:$8 sps:$4 sm:$0xff]  }
  0x3c   : > { %2114 = vmatprep.subr.bf16.mxu1 %v3175_v45  ;;  %v3270_v45 = vld [vmem:[%s4644_s1 + $0x2d4] ss:$8 sps:$4 sm:$0xff]  }
  0x3e   : > { %2072 = vmatpush2.bf16.msra.mxu0 %v3174_v46  ;;  %v3265_v46 = vld [vmem:[%s4644_s1 + $0x3e0] ss:$8 sps:$4 sm:$0xff]  }
  0x3f   : > { %2073 = vmatprep.subr.bf16.mxu0 %v3178_v48  ;;  %2115 = vmatpush2.bf16.msra.mxu1 %v3177_v49  ;;  %v3268_v48 = vld [vmem:[%s4644_s1 + $0x2d0] ss:$8 sps:$4 sm:$0xff]   ;;  %v3276_v49 = vld [vmem:[%s4644_s1 + $0x2c4] ss:$8 sps:$4 sm:$0xff]  }
  0x40   : > { %2116 = vmatprep.subr.bf16.mxu1 %v3181_v50  ;;  %v3271_v50 = vld [vmem:[%s4644_s1 + $0x3d0] ss:$8 sps:$4 sm:$0xff]  }
  0x42   : > { %2074 = vmatpush2.bf16.msra.mxu0 %v3180_v52  ;;  %v3274_v52 = vld [vmem:[%s4644_s1 + $0x2c0] ss:$8 sps:$4 sm:$0xff]  }
  0x43   : > { %2075 = vmatprep.subr.bf16.mxu0 %v3184_v53  ;;  %2117 = vmatpush2.bf16.msra.mxu1 %v3183_v54  ;;  %v3282_v53 = vld [vmem:[%s4644_s1 + $0x2b4] ss:$8 sps:$4 sm:$0xff]   ;;  %v3277_v54 = vld [vmem:[%s4644_s1 + $0x3c0] ss:$8 sps:$4 sm:$0xff]  }
  0x44   : > { %2118 = vmatprep.subr.bf16.mxu1 %v3187_v55  ;;  %v3285_v55 = vld [vmem:[%s4644_s1 + $0x3b4] ss:$8 sps:$4 sm:$0xff]  }
  0x46   : > { %2076 = vmatpush2.bf16.msra.mxu0 %v3186_v56  ;;  %v3280_v56 = vld [vmem:[%s4644_s1 + $0x2b0] ss:$8 sps:$4 sm:$0xff]  }
  0x47   : > { %2077 = vmatprep.subr.bf16.mxu0 %v3190_v57  ;;  %2119 = vmatpush2.bf16.msra.mxu1 %v3189_v58  ;;  %v3288_v57 = vld [vmem:[%s4644_s1 + $0x2a4] ss:$8 sps:$4 sm:$0xff]   ;;  %v3283_v58 = vld [vmem:[%s4644_s1 + $0x3b0] ss:$8 sps:$4 sm:$0xff]  }
  0x48   : > { %2120 = vmatprep.subr.bf16.mxu1 %v3193_v59  ;;  %v3291_v59 = vld [vmem:[%s4644_s1 + $0x3a4] ss:$8 sps:$4 sm:$0xff]  }
  0x4a   : > { %2078 = vmatpush2.bf16.msra.mxu0 %v3192_v60  ;;  %v3286_v60 = vld [vmem:[%s4644_s1 + $0x2a0] ss:$8 sps:$4 sm:$0xff]  }
  0x4b   : > { %2079 = vmatprep.subr.bf16.mxu0 %v3196_v61  ;;  %2121 = vmatpush2.bf16.msra.mxu1 %v3195_v62  ;;  %v3294_v61 = vld [vmem:[%s4644_s1 + $0x294] ss:$8 sps:$4 sm:$0xff]   ;;  %v3289_v62 = vld [vmem:[%s4644_s1 + $0x3a0] ss:$8 sps:$4 sm:$0xff]  }
  0x4c   : > { %2122 = vmatprep.subr.bf16.mxu1 %v3199_v63  ;;  %v3297_v63 = vld [vmem:[%s4644_s1 + $0x394] ss:$8 sps:$4 sm:$0xff]  }
  0x4e   : > { %2080 = vmatpush2.bf16.msra.mxu0 %v3198_v0  ;;  %v3292_v0 = vld [vmem:[%s4644_s1 + $0x290] ss:$8 sps:$4 sm:$0xff]  }
  0x4f   : > { %2135 = vmatprep.subr.bf16.mxu0 %v3207_v1  ;;  %2123 = vmatpush2.bf16.msra.mxu1 %v3204_v2  ;;  %v3300_v1 = vld [vmem:[%s4644_s1 + $0x284] ss:$8 sps:$4 sm:$0xff]   ;;  %v3295_v2 = vld [vmem:[%s4644_s1 + $0x390] ss:$8 sps:$4 sm:$0xff]  }
  0x50   : > { %2178 = vmatprep.subr.bf16.mxu1 %v3213_v4  ;;  %v3298_v4 = vld [vmem:[%s4644_s1 + $0x280] ss:$8 sps:$4 sm:$0xff]  }
  0x51   : > { %2082 = vmatmul.mubr.bf16.vlgmr.msra.gmra.mxu0 %v3201_v3  ;;  %v3303_v3 = vld [vmem:[%s4644_s1 + $0x384] ss:$8 sps:$4 sm:$0xff]  }
  0x52   : > { %2136 = vmatpush1.bf16.msra.mxu0 %v3205_v5  ;;  %2125 = vmatmul.mubr.bf16.vlgmr.msra.gmra.mxu1 %v3208_v6  ;;  %v3309_v5 = vld [vmem:[%s4644_s1 + $0x474] ss:$8 sps:$4 sm:$0xff]   ;;  %v3301_v6 = vld [vmem:[%s4644_s1 + $0x380] ss:$8 sps:$4 sm:$0xff]  }
  0x53   : > { %2137 = vmatprep.subr.bf16.mxu0 %v3216_v7  ;;  %2179 = vmatpush1.bf16.msra.mxu1 %v3211_v8  ;;  %v3304_v7 = vld [vmem:[%s3842_s4 + $0x10] ss:$72 sps:$4 sm:$0xff]   ;;  %v3315_v8 = vld [vmem:[%s4644_s1 + $0x574] ss:$8 sps:$4 sm:$0xff]  }
  0x54   : > { %2180 = vmatprep.subr.bf16.mxu1 %v3219_v9  ;;  %2167 = vmatprep.mubr.bf16.mxu0 %v3306_v33  ;;  %v3307_v9 = vld [vmem:[%s4644_s1 + $0x470] ss:$8 sps:$4 sm:$0xff]   ;;  %v3348_v33 = vld [vmem:[%s4644_s1 + $0x414] ss:$8 sps:$4 sm:$0xff]  }
  0x55   : > { %2210 = vmatprep.mubr.bf16.mxu1 %v3312_v36  ;;  %v3346_v36 = vld [vmem:[%s4644_s1 + $0x410] ss:$8 sps:$4 sm:$0xff]  }
  0x56   : > { %2138 = vmatpush1.bf16.msra.mxu0 %v3214_v10  ;;  %v3310_v10 = vld [vmem:[%s3842_s4 + $0x18] ss:$72 sps:$4 sm:$0xff]  }
  0x57   : > { %2139 = vmatprep.subr.bf16.mxu0 %v3222_v11  ;;  %2181 = vmatpush1.bf16.msra.mxu1 %v3217_v12  ;;  %v3318_v11 = vld [vmem:[%s4644_s1 + $0x464] ss:$8 sps:$4 sm:$0xff]   ;;  %v3313_v12 = vld [vmem:[%s4644_s1 + $0x570] ss:$8 sps:$4 sm:$0xff]  }
  0x58   : > { %2182 = vmatprep.subr.bf16.mxu1 %v3225_v13  ;;  %v3321_v13 = vld [vmem:[%s4644_s1 + $0x564] ss:$8 sps:$4 sm:$0xff]  }
  0x5a   : > { %2140 = vmatpush1.bf16.msra.mxu0 %v3220_v14  ;;  %v3316_v14 = vld [vmem:[%s4644_s1 + $0x460] ss:$8 sps:$4 sm:$0xff]  }
  0x5b   : > { %2141 = vmatprep.subr.bf16.mxu0 %v3228_v15  ;;  %2183 = vmatpush1.bf16.msra.mxu1 %v3223_v16  ;;  %v3324_v15 = vld [vmem:[%s4644_s1 + $0x454] ss:$8 sps:$4 sm:$0xff]   ;;  %v3319_v16 = vld [vmem:[%s4644_s1 + $0x560] ss:$8 sps:$4 sm:$0xff]  }
  0x5c   : > { %2184 = vmatprep.subr.bf16.mxu1 %v3231_v17  ;;  %v3327_v17 = vld [vmem:[%s4644_s1 + $0x554] ss:$8 sps:$4 sm:$0xff]  }
  0x5e   : > { %2142 = vmatpush1.bf16.msra.mxu0 %v3226_v18  ;;  %v3408_v18 = vld [vmem:[%s3842_s4 + $0x24] ss:$72 sps:$4 sm:$0xff]  }
  0x5f   : > { %2143 = vmatprep.subr.bf16.mxu0 %v3234_v19  ;;  %2185 = vmatpush1.bf16.msra.mxu1 %v3229_v20  ;;  %v3322_v19 = vld [vmem:[%s4644_s1 + $0x450] ss:$8 sps:$4 sm:$0xff]  }
  0x60   : > { %2186 = vmatprep.subr.bf16.mxu1 %v3237_v21  ;;  %v3325_v20 = vld [vmem:[%s4644_s1 + $0x550] ss:$8 sps:$4 sm:$0xff]   ;;  %v3330_v21 = vld [vmem:[%s4644_s1 + $0x444] ss:$8 sps:$4 sm:$0xff]  }
  0x62   : > { %2144 = vmatpush1.bf16.msra.mxu0 %v3232_v22  ;;  %v3414_v22 = vld [vmem:[%s3842_s4 + $0x2c] ss:$72 sps:$4 sm:$0xff]  }
  0x63   : > { %2145 = vmatprep.subr.bf16.mxu0 %v3240_v23  ;;  %2187 = vmatpush1.bf16.msra.mxu1 %v3235_v24  ;;  %v3333_v23 = vld [vmem:[%s4644_s1 + $0x544] ss:$8 sps:$4 sm:$0xff]   ;;  %v3328_v24 = vld [vmem:[%s4644_s1 + $0x440] ss:$8 sps:$4 sm:$0xff]  }
  0x64   : > { %2188 = vmatprep.subr.bf16.mxu1 %v3243_v25  ;;  %v3336_v25 = vld [vmem:[%s4644_s1 + $0x434] ss:$8 sps:$4 sm:$0xff]  }
  0x66   : > { %2146 = vmatpush1.bf16.msra.mxu0 %v3238_v26  ;;  %v3331_v26 = vld [vmem:[%s4644_s1 + $0x540] ss:$8 sps:$4 sm:$0xff]  }
  0x67   : > { %2147 = vmatprep.subr.bf16.mxu0 %v3246_v27  ;;  %2189 = vmatpush1.bf16.msra.mxu1 %v3241_v28  ;;  %v3339_v27 = vld [vmem:[%s4644_s1 + $0x534] ss:$8 sps:$4 sm:$0xff]   ;;  %v3334_v28 = vld [vmem:[%s4644_s1 + $0x430] ss:$8 sps:$4 sm:$0xff]  }
  0x68   : > { %2190 = vmatprep.subr.bf16.mxu1 %v3249_v29  ;;  %v3342_v29 = vld [vmem:[%s4644_s1 + $0x424] ss:$8 sps:$4 sm:$0xff]  }
  0x6a   : > { %2148 = vmatpush1.bf16.msra.mxu0 %v3244_v30  ;;  %v3337_v30 = vld [vmem:[%s4644_s1 + $0x530] ss:$8 sps:$4 sm:$0xff]  }
  0x6b   : > { %2149 = vmatprep.subr.bf16.mxu0 %v3252_v32  ;;  %2191 = vmatpush1.bf16.msra.mxu1 %v3247_v31  ;;  %v3345_v31 = vld [vmem:[%s4644_s1 + $0x524] ss:$8 sps:$4 sm:$0xff]   ;;  %v3340_v32 = vld [vmem:[%s4644_s1 + $0x420] ss:$8 sps:$4 sm:$0xff]  }
  0x6c   : > { %2192 = vmatprep.subr.bf16.mxu1 %v3255_v34  ;;  %v3343_v34 = vld [vmem:[%s4644_s1 + $0x520] ss:$8 sps:$4 sm:$0xff]  }
  0x6e   : > { %2150 = vmatpush1.bf16.msra.mxu0 %v3250_v35  ;;  %v3351_v35 = vld [vmem:[%s4644_s1 + $0x514] ss:$8 sps:$4 sm:$0xff]  }
  0x6f   : > { %2151 = vmatprep.subr.bf16.mxu0 %v3258_v37  ;;  %2193 = vmatpush1.bf16.msra.mxu1 %v3253_v38  ;;  %v3354_v37 = vld [vmem:[%s4644_s1 + $0x404] ss:$8 sps:$4 sm:$0xff]   ;;  %v3349_v38 = vld [vmem:[%s4644_s1 + $0x510] ss:$8 sps:$4 sm:$0xff]  }
  0x70   : > { %2194 = vmatprep.subr.bf16.mxu1 %v3261_v39  ;;  %v3357_v39 = vld [vmem:[%s4644_s1 + $0x504] ss:$8 sps:$4 sm:$0xff]  }
  0x72   : > { %2152 = vmatpush2.bf16.msra.mxu0 %v3256_v40  ;;  %v3352_v40 = vld [vmem:[%s4644_s1 + $0x400] ss:$8 sps:$4 sm:$0xff]  }
  0x73   : > { %2153 = vmatprep.subr.bf16.mxu0 %v3264_v41  ;;  %2195 = vmatpush2.bf16.msra.mxu1 %v3259_v42  ;;  %v3360_v41 = vld [vmem:[%s4644_s1 + $0x4f4] ss:$8 sps:$4 sm:$0xff]   ;;  %v3355_v42 = vld [vmem:[%s4644_s1 + $0x500] ss:$8 sps:$4 sm:$0xff]  }
  0x74   : > { %2196 = vmatprep.subr.bf16.mxu1 %v3267_v43  ;;  %v3363_v43 = vld [vmem:[%s4644_s1 + $0x5f4] ss:$8 sps:$4 sm:$0xff]  }
  0x76   : > { %2154 = vmatpush2.bf16.msra.mxu0 %v3262_v44  ;;  %v3358_v44 = vld [vmem:[%s4644_s1 + $0x4f0] ss:$8 sps:$4 sm:$0xff]  }
  0x77   : > { %2155 = vmatprep.subr.bf16.mxu0 %v3270_v45  ;;  %2197 = vmatpush2.bf16.msra.mxu1 %v3265_v46  ;;  %v3366_v45 = vld [vmem:[%s4644_s1 + $0x4e4] ss:$8 sps:$4 sm:$0xff]   ;;  %v3361_v46 = vld [vmem:[%s4644_s1 + $0x5f0] ss:$8 sps:$4 sm:$0xff]  }
  0x78   : > { %2198 = vmatprep.subr.bf16.mxu1 %v3273_v47  ;;  %v3369_v47 = vld [vmem:[%s4644_s1 + $0x5e4] ss:$8 sps:$4 sm:$0xff]  }
  0x7a   : > { %2156 = vmatpush2.bf16.msra.mxu0 %v3268_v48  ;;  %v3364_v48 = vld [vmem:[%s4644_s1 + $0x4e0] ss:$8 sps:$4 sm:$0xff]  }
  0x7b   : > { %2157 = vmatprep.subr.bf16.mxu0 %v3276_v49  ;;  %2199 = vmatpush2.bf16.msra.mxu1 %v3271_v50  ;;  %v3372_v49 = vld [vmem:[%s4644_s1 + $0x4d4] ss:$8 sps:$4 sm:$0xff]   ;;  %v3367_v50 = vld [vmem:[%s4644_s1 + $0x5e0] ss:$8 sps:$4 sm:$0xff]  }
  0x7c   : > { %2200 = vmatprep.subr.bf16.mxu1 %v3279_v51  ;;  %v3375_v51 = vld [vmem:[%s4644_s1 + $0x5d4] ss:$8 sps:$4 sm:$0xff]  }
  0x7e   : > { %2158 = vmatpush2.bf16.msra.mxu0 %v3274_v52  ;;  %v3370_v52 = vld [vmem:[%s4644_s1 + $0x4d0] ss:$8 sps:$4 sm:$0xff]  }
  0x7f   : > { %2159 = vmatprep.subr.bf16.mxu0 %v3282_v53  ;;  %2201 = vmatpush2.bf16.msra.mxu1 %v3277_v54  ;;  %v3378_v53 = vld [vmem:[%s4644_s1 + $0x4c4] ss:$8 sps:$4 sm:$0xff]   ;;  %v3373_v54 = vld [vmem:[%s4644_s1 + $0x5d0] ss:$8 sps:$4 sm:$0xff]  }
  0x80   : > { %2202 = vmatprep.subr.bf16.mxu1 %v3285_v55  ;;  %v3381_v55 = vld [vmem:[%s4644_s1 + $0x5c4] ss:$8 sps:$4 sm:$0xff]  }
  0x82   : > { %2160 = vmatpush2.bf16.msra.mxu0 %v3280_v56  ;;  %v3376_v56 = vld [vmem:[%s4644_s1 + $0x4c0] ss:$8 sps:$4 sm:$0xff]  }
  0x83   : > { %2161 = vmatprep.subr.bf16.mxu0 %v3288_v57  ;;  %2203 = vmatpush2.bf16.msra.mxu1 %v3283_v58  ;;  %v3384_v57 = vld [vmem:[%s4644_s1 + $0x4b4] ss:$8 sps:$4 sm:$0xff]   ;;  %v3379_v58 = vld [vmem:[%s4644_s1 + $0x5c0] ss:$8 sps:$4 sm:$0xff]  }
  0x84   : > { %2204 = vmatprep.subr.bf16.mxu1 %v3291_v59  ;;  %v3387_v59 = vld [vmem:[%s4644_s1 + $0x5b4] ss:$8 sps:$4 sm:$0xff]  }
  0x86   : > { %2162 = vmatpush2.bf16.msra.mxu0 %v3286_v60  ;;  %v3382_v60 = vld [vmem:[%s4644_s1 + $0x4b0] ss:$8 sps:$4 sm:$0xff]  }
  0x87   : > { %2163 = vmatprep.subr.bf16.mxu0 %v3294_v61  ;;  %2205 = vmatpush2.bf16.msra.mxu1 %v3289_v62  ;;  %v3390_v61 = vld [vmem:[%s4644_s1 + $0x4a4] ss:$8 sps:$4 sm:$0xff]   ;;  %v3385_v62 = vld [vmem:[%s4644_s1 + $0x5b0] ss:$8 sps:$4 sm:$0xff]  }
  0x88   : > { %2206 = vmatprep.subr.bf16.mxu1 %v3297_v63  ;;  %v3393_v63 = vld [vmem:[%s4644_s1 + $0x5a4] ss:$8 sps:$4 sm:$0xff]  }
  0x8a   : > { %2164 = vmatpush2.bf16.msra.mxu0 %v3292_v0  ;;  %v3388_v0 = vld [vmem:[%s4644_s1 + $0x4a0] ss:$8 sps:$4 sm:$0xff]  }
  0x8b   : > { %2165 = vmatprep.subr.bf16.mxu0 %v3300_v1  ;;  %2207 = vmatpush2.bf16.msra.mxu1 %v3295_v2  ;;  %v3396_v1 = vld [vmem:[%s4644_s1 + $0x494] ss:$8 sps:$4 sm:$0xff]   ;;  %v3391_v2 = vld [vmem:[%s4644_s1 + $0x5a0] ss:$8 sps:$4 sm:$0xff]  }
  0x8c   : > { %2208 = vmatprep.subr.bf16.mxu1 %v3303_v3  ;;  %v3399_v3 = vld [vmem:[%s4644_s1 + $0x594] ss:$8 sps:$4 sm:$0xff]  }
  0x8e   : > { %2166 = vmatpush2.bf16.msra.mxu0 %v3298_v4  ;;  %v3394_v4 = vld [vmem:[%s4644_s1 + $0x490] ss:$8 sps:$4 sm:$0xff]  }
  0x8f   : > { %2221 = vmatprep.subr.bf16.mxu0 %v3309_v5  ;;  %2209 = vmatpush2.bf16.msra.mxu1 %v3301_v6  ;;  %v3402_v5 = vld [vmem:[%s4644_s1 + $0x484] ss:$8 sps:$4 sm:$0xff]   ;;  %v3397_v6 = vld [vmem:[%s4644_s1 + $0x590] ss:$8 sps:$4 sm:$0xff]  }
  0x90   : > { %2264 = vmatprep.subr.bf16.mxu1 %v3315_v8  ;;  %v3405_v8 = vld [vmem:[%s4644_s1 + $0x584] ss:$8 sps:$4 sm:$0xff]  }
  0x91   : > { %2168 = vmatmul.mubr.bf16.vlgmr.msra.gmra.mxu0 %v3304_v7  ;;  %v3400_v7 = vld [vmem:[%s4644_s1 + $0x480] ss:$8 sps:$4 sm:$0xff]  }
  0x92   : > { %2222 = vmatpush1.bf16.msra.mxu0 %v3307_v9  ;;  %2211 = vmatmul.mubr.bf16.vlgmr.msra.gmra.mxu1 %v3310_v10  ;;  %v3403_v9 = vld [vmem:[%s4644_s1 + $0x580] ss:$8 sps:$4 sm:$0xff]   ;;  %v3411_v10 = vld [vmem:[%s4644_s1 + $0x674] ss:$8 sps:$4 sm:$0xff]  }
  0x93   : > { %2223 = vmatprep.subr.bf16.mxu0 %v3318_v11  ;;  %2265 = vmatpush1.bf16.msra.mxu1 %v3313_v12  ;;  %v3406_v11 = vld [vmem:[%s3842_s4 + $0x20] ss:$72 sps:$4 sm:$0xff]   ;;  %v3409_v12 = vld [vmem:[%s4644_s1 + $0x670] ss:$8 sps:$4 sm:$0xff]  }
  0x94   : > { %2266 = vmatprep.subr.bf16.mxu1 %v3321_v13  ;;  %2253 = vmatprep.mubr.bf16.mxu0 %v3408_v18  ;;  %v3412_v13 = vld [vmem:[%s3842_s4 + $0x28] ss:$72 sps:$4 sm:$0xff]   ;;  %v3516_v18 = vld [vmem:[%s3842_s4 + $0x3c] ss:$72 sps:$4 sm:$0xff]  }
  0x95   : > { %2296 = vmatprep.mubr.bf16.mxu1 %v3414_v22  ;;  %v3421_v22 = vld [vmem:[%s4644_s1 + $0x760] ss:$8 sps:$4 sm:$0xff]  }
  0x96   : > { %2224 = vmatpush1.bf16.msra.mxu0 %v3316_v14  ;;  %v3417_v14 = vld [vmem:[%s4644_s1 + $0x774] ss:$8 sps:$4 sm:$0xff]  }
  0x97   : > { %2225 = vmatprep.subr.bf16.mxu0 %v3324_v15  ;;  %2267 = vmatpush1.bf16.msra.mxu1 %v3319_v16  ;;  %v3510_v15 = vld [vmem:[%s3842_s4 + $0x34] ss:$72 sps:$4 sm:$0xff]   ;;  %v3420_v16 = vld [vmem:[%s4644_s1 + $0x664] ss:$8 sps:$4 sm:$0xff]  }
  0x98   : > { %2268 = vmatprep.subr.bf16.mxu1 %v3327_v17  ;;  %v3415_v17 = vld [vmem:[%s4644_s1 + $0x770] ss:$8 sps:$4 sm:$0xff]  }
  0x9a   : > { %2226 = vmatpush1.bf16.msra.mxu0 %v3322_v19  ;;  %v3423_v19 = vld [vmem:[%s4644_s1 + $0x764] ss:$8 sps:$4 sm:$0xff]  }
  0x9b   : > { %2227 = vmatprep.subr.bf16.mxu0 %v3330_v21  ;;  %2269 = vmatpush1.bf16.msra.mxu1 %v3325_v20  ;;  %v3418_v20 = vld [vmem:[%s4644_s1 + $0x660] ss:$8 sps:$4 sm:$0xff]   ;;  %v3426_v21 = vld [vmem:[%s4644_s1 + $0x654] ss:$8 sps:$4 sm:$0xff]  }
  0x9c   : > { %2270 = vmatprep.subr.bf16.mxu1 %v3333_v23  ;;  %v3429_v23 = vld [vmem:[%s4644_s1 + $0x754] ss:$8 sps:$4 sm:$0xff]  }
  0x9e   : > { %2228 = vmatpush1.bf16.msra.mxu0 %v3328_v24  ;;  %v3424_v24 = vld [vmem:[%s4644_s1 + $0x650] ss:$8 sps:$4 sm:$0xff]  }
  0x9f   : > { %2229 = vmatprep.subr.bf16.mxu0 %v3336_v25  ;;  %2271 = vmatpush1.bf16.msra.mxu1 %v3331_v26  ;;  %v3432_v25 = vld [vmem:[%s4644_s1 + $0x644] ss:$8 sps:$4 sm:$0xff]   ;;  %v3427_v26 = vld [vmem:[%s4644_s1 + $0x750] ss:$8 sps:$4 sm:$0xff]  }
  0xa0   : > { %2272 = vmatprep.subr.bf16.mxu1 %v3339_v27  ;;  %v3435_v27 = vld [vmem:[%s4644_s1 + $0x744] ss:$8 sps:$4 sm:$0xff]  }
  0xa2   : > { %2230 = vmatpush1.bf16.msra.mxu0 %v3334_v28  ;;  %v3430_v28 = vld [vmem:[%s4644_s1 + $0x640] ss:$8 sps:$4 sm:$0xff]  }
  0xa3   : > { %2231 = vmatprep.subr.bf16.mxu0 %v3342_v29  ;;  %2273 = vmatpush1.bf16.msra.mxu1 %v3337_v30  ;;  %v3438_v29 = vld [vmem:[%s4644_s1 + $0x634] ss:$8 sps:$4 sm:$0xff]   ;;  %v3433_v30 = vld [vmem:[%s4644_s1 + $0x740] ss:$8 sps:$4 sm:$0xff]  }
  0xa4   : > { %2274 = vmatprep.subr.bf16.mxu1 %v3345_v31  ;;  %v3441_v31 = vld [vmem:[%s4644_s1 + $0x734] ss:$8 sps:$4 sm:$0xff]  }
  0xa6   : > { %2232 = vmatpush1.bf16.msra.mxu0 %v3340_v32  ;;  %v3436_v32 = vld [vmem:[%s4644_s1 + $0x630] ss:$8 sps:$4 sm:$0xff]  }
  0xa7   : > { %2233 = vmatprep.subr.bf16.mxu0 %v3348_v33  ;;  %2275 = vmatpush1.bf16.msra.mxu1 %v3343_v34  ;;  %v3444_v33 = vld [vmem:[%s4644_s1 + $0x624] ss:$8 sps:$4 sm:$0xff]   ;;  %v3439_v34 = vld [vmem:[%s4644_s1 + $0x730] ss:$8 sps:$4 sm:$0xff]  }
  0xa8   : > { %2276 = vmatprep.subr.bf16.mxu1 %v3351_v35  ;;  %v3447_v35 = vld [vmem:[%s4644_s1 + $0x724] ss:$8 sps:$4 sm:$0xff]  }
  0xaa   : > { %2234 = vmatpush1.bf16.msra.mxu0 %v3346_v36  ;;  %v3442_v36 = vld [vmem:[%s4644_s1 + $0x620] ss:$8 sps:$4 sm:$0xff]  }
  0xab   : > { %2235 = vmatprep.subr.bf16.mxu0 %v3354_v37  ;;  %2277 = vmatpush1.bf16.msra.mxu1 %v3349_v38  ;;  %v3450_v37 = vld [vmem:[%s4644_s1 + $0x614] ss:$8 sps:$4 sm:$0xff]   ;;  %v3445_v38 = vld [vmem:[%s4644_s1 + $0x720] ss:$8 sps:$4 sm:$0xff]  }
  0xac   : > { %2278 = vmatprep.subr.bf16.mxu1 %v3357_v39  ;;  %v3453_v39 = vld [vmem:[%s4644_s1 + $0x714] ss:$8 sps:$4 sm:$0xff]  }
  0xae   : > { %2236 = vmatpush1.bf16.msra.mxu0 %v3352_v40  ;;  %v3448_v40 = vld [vmem:[%s4644_s1 + $0x610] ss:$8 sps:$4 sm:$0xff]  }
  0xaf   : > { %2237 = vmatprep.subr.bf16.mxu0 %v3360_v41  ;;  %2279 = vmatpush1.bf16.msra.mxu1 %v3355_v42  ;;  %v3456_v41 = vld [vmem:[%s4644_s1 + $0x604] ss:$8 sps:$4 sm:$0xff]   ;;  %v3451_v42 = vld [vmem:[%s4644_s1 + $0x710] ss:$8 sps:$4 sm:$0xff]  }
  0xb0   : > { %2280 = vmatprep.subr.bf16.mxu1 %v3363_v43  ;;  %v3459_v43 = vld [vmem:[%s4644_s1 + $0x704] ss:$8 sps:$4 sm:$0xff]  }
  0xb2   : > { %2238 = vmatpush2.bf16.msra.mxu0 %v3358_v44  ;;  %v3454_v44 = vld [vmem:[%s4644_s1 + $0x600] ss:$8 sps:$4 sm:$0xff]  }
  0xb3   : > { %2239 = vmatprep.subr.bf16.mxu0 %v3366_v45  ;;  %2281 = vmatpush2.bf16.msra.mxu1 %v3361_v46  ;;  %v3462_v45 = vld [vmem:[%s4644_s1 + $0x6f4] ss:$8 sps:$4 sm:$0xff]   ;;  %v3457_v46 = vld [vmem:[%s4644_s1 + $0x700] ss:$8 sps:$4 sm:$0xff]  }
  0xb4   : > { %2282 = vmatprep.subr.bf16.mxu1 %v3369_v47  ;;  %v3465_v47 = vld [vmem:[%s4644_s1 + $0x7f4] ss:$8 sps:$4 sm:$0xff]  }
  0xb6   : > { %2240 = vmatpush2.bf16.msra.mxu0 %v3364_v48  ;;  %v3460_v48 = vld [vmem:[%s4644_s1 + $0x6f0] ss:$8 sps:$4 sm:$0xff]  }
  0xb7   : > { %2241 = vmatprep.subr.bf16.mxu0 %v3372_v49  ;;  %2283 = vmatpush2.bf16.msra.mxu1 %v3367_v50  ;;  %v3468_v49 = vld [vmem:[%s4644_s1 + $0x6e4] ss:$8 sps:$4 sm:$0xff]   ;;  %v3463_v50 = vld [vmem:[%s4644_s1 + $0x7f0] ss:$8 sps:$4 sm:$0xff]  }
  0xb8   : > { %2284 = vmatprep.subr.bf16.mxu1 %v3375_v51  ;;  %v3471_v51 = vld [vmem:[%s4644_s1 + $0x7e4] ss:$8 sps:$4 sm:$0xff]  }
  0xba   : > { %2242 = vmatpush2.bf16.msra.mxu0 %v3370_v52  ;;  %v3466_v52 = vld [vmem:[%s4644_s1 + $0x6e0] ss:$8 sps:$4 sm:$0xff]  }
  0xbb   : > { %2243 = vmatprep.subr.bf16.mxu0 %v3378_v53  ;;  %2285 = vmatpush2.bf16.msra.mxu1 %v3373_v54  ;;  %v3474_v53 = vld [vmem:[%s4644_s1 + $0x6d4] ss:$8 sps:$4 sm:$0xff]   ;;  %v3469_v54 = vld [vmem:[%s4644_s1 + $0x7e0] ss:$8 sps:$4 sm:$0xff]  }
  0xbc   : > { %2286 = vmatprep.subr.bf16.mxu1 %v3381_v55  ;;  %v3477_v55 = vld [vmem:[%s4644_s1 + $0x7d4] ss:$8 sps:$4 sm:$0xff]  }
  0xbe   : > { %2244 = vmatpush2.bf16.msra.mxu0 %v3376_v56  ;;  %v3472_v56 = vld [vmem:[%s4644_s1 + $0x6d0] ss:$8 sps:$4 sm:$0xff]  }
  0xbf   : > { %2245 = vmatprep.subr.bf16.mxu0 %v3384_v57  ;;  %2287 = vmatpush2.bf16.msra.mxu1 %v3379_v58  ;;  %v3480_v57 = vld [vmem:[%s4644_s1 + $0x6c4] ss:$8 sps:$4 sm:$0xff]   ;;  %v3475_v58 = vld [vmem:[%s4644_s1 + $0x7d0] ss:$8 sps:$4 sm:$0xff]  }
  0xc0   : > { %2288 = vmatprep.subr.bf16.mxu1 %v3387_v59  ;;  %v3483_v59 = vld [vmem:[%s4644_s1 + $0x7c4] ss:$8 sps:$4 sm:$0xff]  }
  0xc2   : > { %2246 = vmatpush2.bf16.msra.mxu0 %v3382_v60  ;;  %v3478_v60 = vld [vmem:[%s4644_s1 + $0x6c0] ss:$8 sps:$4 sm:$0xff]  }
  0xc3   : > { %2247 = vmatprep.subr.bf16.mxu0 %v3390_v61  ;;  %2289 = vmatpush2.bf16.msra.mxu1 %v3385_v62  ;;  %v3486_v61 = vld [vmem:[%s4644_s1 + $0x6b4] ss:$8 sps:$4 sm:$0xff]   ;;  %v3481_v62 = vld [vmem:[%s4644_s1 + $0x7c0] ss:$8 sps:$4 sm:$0xff]  }
  0xc4   : > { %2290 = vmatprep.subr.bf16.mxu1 %v3393_v63  ;;  %v3489_v63 = vld [vmem:[%s4644_s1 + $0x7b4] ss:$8 sps:$4 sm:$0xff]  }
  0xc6   : > { %2248 = vmatpush2.bf16.msra.mxu0 %v3388_v0  ;;  %v3484_v0 = vld [vmem:[%s4644_s1 + $0x6b0] ss:$8 sps:$4 sm:$0xff]  }
  0xc7   : > { %2249 = vmatprep.subr.bf16.mxu0 %v3396_v1  ;;  %2291 = vmatpush2.bf16.msra.mxu1 %v3391_v2  ;;  %v3492_v1 = vld [vmem:[%s4644_s1 + $0x6a4] ss:$8 sps:$4 sm:$0xff]   ;;  %v3487_v2 = vld [vmem:[%s4644_s1 + $0x7b0] ss:$8 sps:$4 sm:$0xff]  }
  0xc8   : > { %2292 = vmatprep.subr.bf16.mxu1 %v3399_v3  ;;  %v3495_v3 = vld [vmem:[%s4644_s1 + $0x7a4] ss:$8 sps:$4 sm:$0xff]  }
  0xca   : > { %2250 = vmatpush2.bf16.msra.mxu0 %v3394_v4  ;;  %v3490_v4 = vld [vmem:[%s4644_s1 + $0x6a0] ss:$8 sps:$4 sm:$0xff]  }
  0xcb   : > { %2251 = vmatprep.subr.bf16.mxu0 %v3402_v5  ;;  %2293 = vmatpush2.bf16.msra.mxu1 %v3397_v6  ;;  %v3498_v5 = vld [vmem:[%s4644_s1 + $0x694] ss:$8 sps:$4 sm:$0xff]   ;;  %v3493_v6 = vld [vmem:[%s4644_s1 + $0x7a0] ss:$8 sps:$4 sm:$0xff]  }
  0xcc   : > { %2294 = vmatprep.subr.bf16.mxu1 %v3405_v8  ;;  %v3496_v8 = vld [vmem:[%s4644_s1 + $0x690] ss:$8 sps:$4 sm:$0xff]  }
  0xce   : > { %2252 = vmatpush2.bf16.msra.mxu0 %v3400_v7  ;;  %v3501_v7 = vld [vmem:[%s4644_s1 + $0x794] ss:$8 sps:$4 sm:$0xff]  }
  0xcf   : > { %2307 = vmatprep.subr.bf16.mxu0 %v3411_v10  ;;  %2295 = vmatpush2.bf16.msra.mxu1 %v3403_v9  ;;  %v3504_v9 = vld [vmem:[%s4644_s1 + $0x684] ss:$8 sps:$4 sm:$0xff]   ;;  %v3499_v10 = vld [vmem:[%s4644_s1 + $0x790] ss:$8 sps:$4 sm:$0xff]  }
  0xd0   : > { %2350 = vmatprep.subr.bf16.mxu1 %v3417_v14  ;;  %v3505_v14 = vld [vmem:[%s4644_s1 + $0x780] ss:$8 sps:$4 sm:$0xff]  }
  0xd1   : > { %2254 = vmatmul.mubr.bf16.vlgmr.msra.gmra.mxu0 %v3406_v11  ;;  %v3507_v11 = vld [vmem:[%s4644_s1 + $0x784] ss:$8 sps:$4 sm:$0xff]  }
  0xd2   : > { %2308 = vmatpush1.bf16.msra.mxu0 %v3409_v12  ;;  %2339 = vmatprep.mubr.bf16.mxu0 %v3510_v15  ;;  %v3502_v12 = vld [vmem:[%s4644_s1 + $0x680] ss:$8 sps:$4 sm:$0xff]   ;;  %v3508_v15 = vld [vmem:[%s3842_s4 + $0x30] ss:$72 sps:$4 sm:$0xff]  }
  0xd3   : > { %2297 = vmatmul.mubr.bf16.vlgmr.msra.gmra.mxu1 %v3412_v13  ;;  %2309 = vmatprep.subr.bf16.mxu0 %v3420_v16  ;;  %v3513_v13 = vld [vmem:[%s4644_s1 + $0x874] ss:$8 sps:$4 sm:$0xff]   ;;  %v3511_v16 = vld [vmem:[%s4644_s1 + $0x870] ss:$8 sps:$4 sm:$0xff]  }
  0xd4   : > { %2351 = vmatpush1.bf16.msra.mxu1 %v3415_v17  ;;  %2382 = vmatprep.mubr.bf16.mxu1 %v3516_v18  ;;  %v3564_v17 = vld [vmem:[%s3842_s4 + $0x44] ss:$72 sps:$4 sm:$0xff]   ;;  %v3514_v18 = vld [vmem:[%s3842_s4 + $0x38] ss:$72 sps:$4 sm:$0xff]  }
  0xd5   : > { %2352 = vmatprep.subr.bf16.mxu1 %v3423_v19  ;;  %v3519_v19 = vld [vmem:[%s4644_s1 + $0x864] ss:$8 sps:$4 sm:$0xff]  }
  0xd6   : > { %2310 = vmatpush1.bf16.msra.mxu0 %v3418_v20  ;;  %v3517_v20 = vld [vmem:[%s4644_s1 + $0x860] ss:$8 sps:$4 sm:$0xff]  }
  0xd7   : > { %2311 = vmatprep.subr.bf16.mxu0 %v3426_v21  ;;  %v3522_v21 = vld [vmem:[%s4644_s1 + $0x854] ss:$8 sps:$4 sm:$0xff]  }
  0xd8   : > { %2353 = vmatpush1.bf16.msra.mxu1 %v3421_v22  ;;  %v3520_v22 = vld [vmem:[%s4644_s1 + $0x850] ss:$8 sps:$4 sm:$0xff]  }
  0xd9   : > { %2354 = vmatprep.subr.bf16.mxu1 %v3429_v23  ;;  %v3525_v23 = vld [vmem:[%s4644_s1 + $0x844] ss:$8 sps:$4 sm:$0xff]  }
  0xda   : > { %2312 = vmatpush1.bf16.msra.mxu0 %v3424_v24  ;;  %v3523_v24 = vld [vmem:[%s4644_s1 + $0x840] ss:$8 sps:$4 sm:$0xff]  }
  0xdb   : > { %2313 = vmatprep.subr.bf16.mxu0 %v3432_v25  ;;  %v3528_v25 = vld [vmem:[%s4644_s1 + $0x834] ss:$8 sps:$4 sm:$0xff]  }
  0xdc   : > { %2355 = vmatpush1.bf16.msra.mxu1 %v3427_v26  ;;  %v3526_v26 = vld [vmem:[%s4644_s1 + $0x830] ss:$8 sps:$4 sm:$0xff]  }
  0xdd   : > { %2356 = vmatprep.subr.bf16.mxu1 %v3435_v27  ;;  %v3531_v27 = vld [vmem:[%s4644_s1 + $0x824] ss:$8 sps:$4 sm:$0xff]  }
  0xde   : > { %2314 = vmatpush1.bf16.msra.mxu0 %v3430_v28  ;;  %v3529_v28 = vld [vmem:[%s4644_s1 + $0x820] ss:$8 sps:$4 sm:$0xff]  }
  0xdf   : > { %2315 = vmatprep.subr.bf16.mxu0 %v3438_v29  ;;  %v3534_v29 = vld [vmem:[%s4644_s1 + $0x814] ss:$8 sps:$4 sm:$0xff]  }
  0xe0   : > { %2357 = vmatpush1.bf16.msra.mxu1 %v3433_v30  ;;  %v3532_v30 = vld [vmem:[%s4644_s1 + $0x810] ss:$8 sps:$4 sm:$0xff]  }
  0xe1   : > { %2358 = vmatprep.subr.bf16.mxu1 %v3441_v31  ;;  %v3537_v31 = vld [vmem:[%s4644_s1 + $0x804] ss:$8 sps:$4 sm:$0xff]  }
  0xe2   : > { %2316 = vmatpush1.bf16.msra.mxu0 %v3436_v32  ;;  %v3535_v32 = vld [vmem:[%s4644_s1 + $0x800] ss:$8 sps:$4 sm:$0xff]  }
  0xe3   : > { %2317 = vmatprep.subr.bf16.mxu0 %v3444_v33  ;;  %v3540_v33 = vld [vmem:[%s4644_s1 + $0x8f4] ss:$8 sps:$4 sm:$0xff]  }
  0xe4   : > { %2359 = vmatpush1.bf16.msra.mxu1 %v3439_v34  ;;  %v3538_v34 = vld [vmem:[%s4644_s1 + $0x8f0] ss:$8 sps:$4 sm:$0xff]  }
  0xe5   : > { %2360 = vmatprep.subr.bf16.mxu1 %v3447_v35  ;;  %v3543_v35 = vld [vmem:[%s4644_s1 + $0x8e4] ss:$8 sps:$4 sm:$0xff]  }
  0xe6   : > { %2318 = vmatpush1.bf16.msra.mxu0 %v3442_v36  ;;  %v3541_v36 = vld [vmem:[%s4644_s1 + $0x8e0] ss:$8 sps:$4 sm:$0xff]  }
  0xe7   : > { %2319 = vmatprep.subr.bf16.mxu0 %v3450_v37  ;;  %v3546_v37 = vld [vmem:[%s4644_s1 + $0x8d4] ss:$8 sps:$4 sm:$0xff]  }
  0xe8   : > { %2361 = vmatpush1.bf16.msra.mxu1 %v3445_v38  ;;  %v3544_v38 = vld [vmem:[%s4644_s1 + $0x8d0] ss:$8 sps:$4 sm:$0xff]  }
  0xe9   : > { %2362 = vmatprep.subr.bf16.mxu1 %v3453_v39  ;;  %v3549_v39 = vld [vmem:[%s4644_s1 + $0x8c4] ss:$8 sps:$4 sm:$0xff]  }
  0xea   : > { %2320 = vmatpush1.bf16.msra.mxu0 %v3448_v40  ;;  %v3547_v40 = vld [vmem:[%s4644_s1 + $0x8c0] ss:$8 sps:$4 sm:$0xff]  }
  0xeb   : > { %2321 = vmatprep.subr.bf16.mxu0 %v3456_v41  ;;  %v3552_v41 = vld [vmem:[%s4644_s1 + $0x8b4] ss:$8 sps:$4 sm:$0xff]  }
  0xec   : > { %2363 = vmatpush1.bf16.msra.mxu1 %v3451_v42  ;;  %v3550_v42 = vld [vmem:[%s4644_s1 + $0x8b0] ss:$8 sps:$4 sm:$0xff]  }
  0xed   : > { %2364 = vmatprep.subr.bf16.mxu1 %v3459_v43  ;;  %v3555_v43 = vld [vmem:[%s4644_s1 + $0x8a4] ss:$8 sps:$4 sm:$0xff]  }
  0xee   : > { %2322 = vmatpush1.bf16.msra.mxu0 %v3454_v44  ;;  %v3553_v44 = vld [vmem:[%s4644_s1 + $0x8a0] ss:$8 sps:$4 sm:$0xff]  }
  0xef   : > { %2323 = vmatprep.subr.bf16.mxu0 %v3462_v45  ;;  %v3558_v45 = vld [vmem:[%s4644_s1 + $0x894] ss:$8 sps:$4 sm:$0xff]  }
  0xf0   : > { %2365 = vmatpush1.bf16.msra.mxu1 %v3457_v46  ;;  %v3556_v46 = vld [vmem:[%s4644_s1 + $0x890] ss:$8 sps:$4 sm:$0xff]  }
  0xf1   : > { %2366 = vmatprep.subr.bf16.mxu1 %v3465_v47  ;;  %v3561_v47 = vld [vmem:[%s4644_s1 + $0x884] ss:$8 sps:$4 sm:$0xff]  }
  0xf2   : > { %2324 = vmatpush2.bf16.msra.mxu0 %v3460_v48  ;;  %v3559_v48 = vld [vmem:[%s4644_s1 + $0x880] ss:$8 sps:$4 sm:$0xff]  }
  0xf3   : > { %2325 = vmatprep.subr.bf16.mxu0 %v3468_v49  ;;  %v3562_v49 = vld [vmem:[%s3842_s4 + $0x40] ss:$72 sps:$4 sm:$0xff]  }
  0xf4   : > { %2367 = vmatpush2.bf16.msra.mxu1 %v3463_v50 }
  0xf5   : > { %2368 = vmatprep.subr.bf16.mxu1 %v3471_v51 }
  0xf6   : > { %2326 = vmatpush2.bf16.msra.mxu0 %v3466_v52 }
  0xf7   : > { %2327 = vmatprep.subr.bf16.mxu0 %v3474_v53 }
  0xf8   : > { %2369 = vmatpush2.bf16.msra.mxu1 %v3469_v54 }
  0xf9   : > { %2370 = vmatprep.subr.bf16.mxu1 %v3477_v55 }
  0xfa   : > { %2328 = vmatpush2.bf16.msra.mxu0 %v3472_v56 }
  0xfb   : > { %2329 = vmatprep.subr.bf16.mxu0 %v3480_v57 }
  0xfc   : > { %2371 = vmatpush2.bf16.msra.mxu1 %v3475_v58 }
  0xfd   : > { %2372 = vmatprep.subr.bf16.mxu1 %v3483_v59  ;;  %v509_v59 = vlaneseq }
  0xfe   : > { %2330 = vmatpush2.bf16.msra.mxu0 %v3478_v60 }
  0xff   : > { %2331 = vmatprep.subr.bf16.mxu0 %v3486_v61 }
 0x100   : > { %2373 = vmatpush2.bf16.msra.mxu1 %v3481_v62  ;;  %v510_v62 = vshrl.u32 %v509_v59, 7 }
 0x101   : > { %2374 = vmatprep.subr.bf16.mxu1 %v3489_v63 }
 0x102   : > { %2332 = vmatpush2.bf16.msra.mxu0 %v3484_v0 }
 0x103   : > { %2333 = vmatprep.subr.bf16.mxu0 %v3492_v1  ;;  %v511_v1 = vsub.s32 0, %v510_v62 }
 0x104   : > { %2375 = vmatpush2.bf16.msra.mxu1 %v3487_v2  ;;  %v507_v2 = vld [vmem:[%s4645_s2] sm:$0x3] }
 0x105   : > { %2376 = vmatprep.subr.bf16.mxu1 %v3495_v3 }
 0x106   : > { %2334 = vmatpush2.bf16.msra.mxu0 %v3490_v4 }
 0x107   : > { %2335 = vmatprep.subr.bf16.mxu0 %v3498_v5  ;;  %v515_v5 = vsub.s32 1, %v510_v62 }
 0x108   : > { %2377 = vmatpush2.bf16.msra.mxu1 %v3493_v6 }
 0x109   : > { %2378 = vmatprep.subr.bf16.mxu1 %v3501_v7  ;;  %v512_v7 = vrot.slane %v507_v2, %v511_v1 }
 0x10a   : > { %2336 = vmatpush2.bf16.msra.mxu0 %v3496_v8 }
 0x10b   : > { %2337 = vmatprep.subr.bf16.mxu0 %v3504_v9  ;;  %v516_v9 = vrot.slane %v507_v2, %v515_v5 }
 0x10c   : > { %2379 = vmatpush2.bf16.msra.mxu1 %v3499_v10 }
 0x10d   : > { %2380 = vmatprep.subr.bf16.mxu1 %v3507_v11 }
 0x10e   : > { %2338 = vmatpush2.bf16.msra.mxu0 %v3502_v12 }
 0x10f   : > { %2393 = vmatprep.subr.bf16.mxu0 %v3513_v13 }
 0x110   : > { %2381 = vmatpush2.bf16.msra.mxu1 %v3505_v14 }
 0x111   : > { %2340 = vmatmul.mubr.bf16.vlgmr.msra.gmra.mxu0 %v3508_v15  ;;  %v2083_v50 = vpop.f32.mrf.mxu0 }
 0x112   : > { %2394 = vmatpush1.bf16.msra.mxu0 %v3511_v16  ;;  %2425 = vmatprep.mubr.bf16.mxu0 %v3564_v17  ;;  %v2126_v52 = vpop.f32.mrf.mxu1  ;;  %v2084_v12 = vadd.f32 %v2083_v50, %v512_v7 }
 0x113   : > { %2383 = vmatmul.mubr.bf16.vlgmr.msra.gmra.mxu1 %v3514_v18  ;;  %2395 = vmatprep.subr.bf16.mxu0 %v3519_v19  ;;  %v2085_v51 = vpop.f32.mrf.mxu0 }
 0x114   : > { %v2128_v54 = vpop.f32.mrf.mxu1  ;;  %v2086_v13 = vadd.f32 %v2085_v51, %v516_v9  ;;  %v2127_v16 = vadd.f32 %v2126_v52, %v2084_v12 }
 0x115   : > { %v2087_v53 = vpop.f32.mrf.mxu0 }
 0x116   : > { %2396 = vmatpush1.bf16.msra.mxu0 %v3517_v20  ;;  %v2130_v56 = vpop.f32.mrf.mxu1  ;;  %v2088_v17 = vadd.f32 %v2087_v53, %v512_v7  ;;  %v2129_v18 = vadd.f32 %v2128_v54, %v2086_v13 }
 0x117   : > { %2397 = vmatprep.subr.bf16.mxu0 %v3522_v21  ;;  %v2089_v55 = vpop.f32.mrf.mxu0 }
 0x118   : > { %v2132_v58 = vpop.f32.mrf.mxu1  ;;  %v2090_v19 = vadd.f32 %v2089_v55, %v516_v9 }
 0x11a   : > { %2398 = vmatpush1.bf16.msra.mxu0 %v3520_v22 }
 0x11b   : > { %2399 = vmatprep.subr.bf16.mxu0 %v3525_v23  ;;  %v2131_v23 = vadd.f32 %v2130_v56, %v2088_v17 }
 0x11e   : > { %2400 = vmatpush1.bf16.msra.mxu0 %v3523_v24 }
 0x11f   : > { %2401 = vmatprep.subr.bf16.mxu0 %v3528_v25 }
 0x122   : > { %2402 = vmatpush1.bf16.msra.mxu0 %v3526_v26  ;;  %v2133_v26 = vadd.f32 %v2132_v58, %v2090_v19 }
 0x123   : > { %2403 = vmatprep.subr.bf16.mxu0 %v3531_v27 }
 0x126   : > { %2404 = vmatpush1.bf16.msra.mxu0 %v3529_v28 }
 0x127   : > { %2405 = vmatprep.subr.bf16.mxu0 %v3534_v29 }
 0x12a   : > { %2406 = vmatpush1.bf16.msra.mxu0 %v3532_v30 }
 0x12b   : > { %2407 = vmatprep.subr.bf16.mxu0 %v3537_v31 }
 0x12e   : > { %2408 = vmatpush1.bf16.msra.mxu0 %v3535_v32 }
 0x12f   : > { %2409 = vmatprep.subr.bf16.mxu0 %v3540_v33 }
 0x132   : > { %2410 = vmatpush2.bf16.msra.mxu0 %v3538_v34 }
 0x133   : > { %2411 = vmatprep.subr.bf16.mxu0 %v3543_v35 }
 0x136   : > { %2412 = vmatpush2.bf16.msra.mxu0 %v3541_v36 }
 0x137   : > { %2413 = vmatprep.subr.bf16.mxu0 %v3546_v37 }
 0x13a   : > { %2414 = vmatpush2.bf16.msra.mxu0 %v3544_v38 }
 0x13b   : > { %2415 = vmatprep.subr.bf16.mxu0 %v3549_v39 }
 0x13e   : > { %2416 = vmatpush2.bf16.msra.mxu0 %v3547_v40 }
 0x13f   : > { %2417 = vmatprep.subr.bf16.mxu0 %v3552_v41 }
 0x142   : > { %2418 = vmatpush2.bf16.msra.mxu0 %v3550_v42 }
 0x143   : > { %2419 = vmatprep.subr.bf16.mxu0 %v3555_v43 }
 0x146   : > { %2420 = vmatpush2.bf16.msra.mxu0 %v3553_v44 }
 0x147   : > { %2421 = vmatprep.subr.bf16.mxu0 %v3558_v45 }
 0x14a   : > { %2422 = vmatpush2.bf16.msra.mxu0 %v3556_v46 }
 0x14b   : > { %2423 = vmatprep.subr.bf16.mxu0 %v3561_v47 }
 0x14e   : > { %2424 = vmatpush2.bf16.msra.mxu0 %v3559_v48 }
 0x151   : > { %2426 = vmatmul.mubr.bf16.vlgmr.msra.gmra.mxu0 %v3562_v49  ;;  %v2169_v57 = vpop.f32.mrf.mxu0 }
 0x152   : > { %v2212_v61 = vpop.f32.mrf.mxu1  ;;  %v2170_v20 = vadd.f32 %v2169_v57, %v2127_v16 }
 0x153   : > { %v2171_v60 = vpop.f32.mrf.mxu0 }
 0x154   : > { %v2214_v0 = vpop.f32.mrf.mxu1  ;;  %v2172_v24 = vadd.f32 %v2171_v60, %v2129_v18  ;;  %v2213_v27 = vadd.f32 %v2212_v61, %v2170_v20 }
 0x155   : > { %v2173_v63 = vpop.f32.mrf.mxu0 }
 0x156   : > { %v2216_v4 = vpop.f32.mrf.mxu1  ;;  %v2174_v28 = vadd.f32 %v2173_v63, %v2131_v23  ;;  %v2215_v30 = vadd.f32 %v2214_v0, %v2172_v24 }
 0x157   : > { %v2175_v3 = vpop.f32.mrf.mxu0 }
 0x158   : > { %v2218_v8 = vpop.f32.mrf.mxu1  ;;  %v2176_v31 = vadd.f32 %v2175_v3, %v2133_v26  ;;  %v2217_v35 = vadd.f32 %v2216_v4, %v2174_v28 }
 0x15a   : > { %v2219_v37 = vadd.f32 %v2218_v8, %v2176_v31 }
 0x191   : > { %v2255_v6 = vpop.f32.mrf.mxu0 }
 0x192   : > { %v2256_v32 = vadd.f32 %v2255_v6, %v2213_v27 }
 0x193   : > { %v2257_v10 = vpop.f32.mrf.mxu0  ;;  %v2298_v11 = vpop.f32.mrf.mxu1 }
 0x194   : > { %v2258_v36 = vadd.f32 %v2257_v10, %v2215_v30  ;;  %v2299_v38 = vadd.f32 %v2298_v11, %v2256_v32 }
 0x195   : > { %v2259_v14 = vpop.f32.mrf.mxu0  ;;  %v2300_v15 = vpop.f32.mrf.mxu1 }
 0x196   : > { %v2260_v39 = vadd.f32 %v2259_v14, %v2217_v35  ;;  %v2301_v42 = vadd.f32 %v2300_v15, %v2258_v36 }
 0x197   : > { %v2261_v21 = vpop.f32.mrf.mxu0  ;;  %v2302_v22 = vpop.f32.mrf.mxu1 }
 0x198   : > { %v2262_v43 = vadd.f32 %v2261_v21, %v2219_v37  ;;  %v2303_v45 = vadd.f32 %v2302_v22, %v2260_v39 }
 0x199   : > { %v2304_v29 = vpop.f32.mrf.mxu1 }
 0x19a   : > { %v2305_v49 = vadd.f32 %v2304_v29, %v2262_v43 }
 0x1d1   : > { %v2341_v25 = vpop.f32.mrf.mxu0 }
 0x1d2   : > { %v2342_v44 = vadd.f32 %v2341_v25, %v2299_v38 }
 0x1d3   : > { %v2343_v33 = vpop.f32.mrf.mxu0  ;;  %v2384_v34 = vpop.f32.mrf.mxu1 }
 0x1d4   : > { %v2344_v46 = vadd.f32 %v2343_v33, %v2301_v42  ;;  %v2385_v50 = vadd.f32 %v2384_v34, %v2342_v44 }
 0x1d5   : > { %v2345_v40 = vpop.f32.mrf.mxu0  ;;  %v2386_v41 = vpop.f32.mrf.mxu1 }
 0x1d6   : > { %v2346_v51 = vadd.f32 %v2345_v40, %v2303_v45  ;;  %v2387_v53 = vadd.f32 %v2386_v41, %v2344_v46 }
 0x1d7   : > { %v2347_v47 = vpop.f32.mrf.mxu0  ;;  %v2388_v48 = vpop.f32.mrf.mxu1 }
 0x1d8   : > { %v2348_v54 = vadd.f32 %v2347_v47, %v2305_v49  ;;  %v2389_v58 = vadd.f32 %v2388_v48, %v2346_v51 }
 0x1d9   : > { %v2390_v56 = vpop.f32.mrf.mxu1 }
 0x1da   : > { %v2391_v61 = vadd.f32 %v2390_v56, %v2348_v54 }
 0x211   : > { %v2427_v52 = vpop.f32.mrf.mxu0 }
 0x212   : > { %v2428_v55 = vadd.f32 %v2427_v52, %v2385_v50 }
 0x213   : > { %v2429_v57 = vpop.f32.mrf.mxu0 }
 0x214   : > { %v2430_v59 = vadd.f32 %v2429_v57, %v2387_v53  ;;  %v2436_v62 = vmax.f32 %v2428_v55, 0.0 }
 0x215   : > { %v2431_v60 = vpop.f32.mrf.mxu0 }
 0x216   : > { %v2437_v63 = vmax.f32 %v2430_v59, 0.0  ;;  %v2432_v0 = vadd.f32 %v2431_v60, %v2389_v58 }
 0x217   : > { %v2433_v1 = vpop.f32.mrf.mxu0 }
 0x218   : > { %v3010_v2 = vpack.c.bf16 %v2437_v63, %v2436_v62  ;;  %v2434_v3 = vadd.f32 %v2433_v1, %v2391_v61  ;;  %v2438_v4 = vmax.f32 %v2432_v0, 0.0 }
 0x21a   : > { %2452 = vst [vmem:[%s4598_s28] sm:$0xff] %v3010_v2  ;;  %v2439_v5 = vmax.f32 %v2434_v3, 0.0  ;;  %2460 = sbr.rel (!%p3698_p4) target bundleno = 582 (0x246), region = 36 }
 0x21c   : > { %v3011_v6 = vpack.c.bf16 %v2439_v5, %v2438_v4 }
 0x21e   : > { %2453 = vst [vmem:[%s4598_s28 + $0x8] sm:$0xff] %v3011_v6 }
 0x21f   : > { %s4652_s12 = smov (!%p2463_p8, %s2462_s12), 2 }
 0x220   : > { %s3012_s7 = sshll.u32 %s4652_s12, 7 }
 0x221   : > { %p2998_p9 = scmp.eq.s32.totalorder %s3012_s7, 0 }
 0x222   : > { %s4615_s8 = sshrl.u32 (!%p2998_p9), %s4652_s12, 1 }
 0x223   : > { %2473 = sbr.rel (%p2998_p9) target bundleno = 582 (0x246), region = 40  ;;  %p2999_p10 = scmp.le.s32.totalorder (!%p2998_p9), %s4615_s8, 0 }
 0x228   : > { %2632 = sbr.rel (%p2999_p10) target bundleno = 565 (0x235), region = 116  ;;  %s3621_s15 = smov (!%p2999_p10), %s4609_s6  }
 0x229   : > { %s3625_s20 = smov (!%p2999_p10), %s4598_s28   ;;  %s3629_s10 = smov (!%p2999_p10), 0  }
 0x22a   : > { %s3633_s9 = smov (!%p2999_p10), 0  }
 0x22d LB: >> { %v2538_v7 = vld [vmem:[%s3627_s20] sm:$0xff]  ;;  %v2540_v8 = vld [vmem:[%s3627_s20 + $0x8] sm:$0xff]  ;;  %s2542_s11 = sadd.s32 1, %s3631_s10  ;;  %s2532_s9 = sadd.s32 1, %s3635_s9   ;;  %s3635_s9 = sphi %s3633_s9, %s2532_s9   ;;  %s3631_s10 = sphi %s3629_s10, %s3630_s10   ;;  %s3627_s20 = sphi %s3625_s20, %s2547_s20   ;;  %s3623_s15 = sphi %s3621_s15, %s2548_s15  }
 0x22e   : >> { %2539 = vst [vmem:[%s3623_s15] sm:$0xff] %v2538_v7  ;;  %2541 = vst [vmem:[%s3623_s15 + $0x8] sm:$0xff] %v2540_v8  ;;  %p2543_p11 = scmp.ge.s32.totalorder %s2542_s11, %s4615_s8  ;;  %p2531_p12 = scmp.ge.s32.totalorder %s2532_s9, %s4615_s8 }
 0x230   : >> { %s4654_s11 = smov (%p2543_p11, %s2542_s11), 0  ;;  %2534 = sbr.rel (!%p2531_p12) target bundleno = 557 (0x22d), region = 122 }
 0x231   : >> { %s3000_s14 = sshll.u32 %s4654_s11, 4  ;;  %s3630_s10 = smov %s4654_s11  }
 0x232   : >> { %s2547_s20 = scalar_lea.vmem %s4598_s28, %s3000_s14 [#allocation2]   ;;  %s2548_s15 = scalar_lea.vmem %s4609_s6, %s3000_s14  }
 0x235 PF: > { %s4625_s17 = sand.u32 1, %s4652_s12   ;;  %s3015_s18 = sshll.u32 %s4615_s8, 4 }
 0x236   : > { %s2553_s21 = scalar_lea.vmem %s4598_s28, %s3015_s18 [#allocation2]   ;;  %s2555_s22 = scalar_lea.vmem %s4609_s6, %s3015_s18  }
 0x237   : > { %p3005_p13 = scmp.le.s32.totalorder %s4625_s17, 0 }
 0x238   : > { %s3637_s23 = smov (!%p3005_p13), %s2555_s22   ;;  %s3641_s24 = smov (!%p3005_p13), %s2553_s21  }
 0x239   : > { %2646 = sbr.rel (%p3005_p13) target bundleno = 582 (0x246), region = 127  ;;  %s3645_s25 = smov (!%p3005_p13), 0  }
 0x23a   : > { %s3649_s4 = smov (!%p3005_p13), 0  }
 0x23e LB: >> { %v2565_v9 = vld [vmem:[%s3643_s24] sm:$0xff]  ;;  %s2567_s26 = sadd.s32 1, %s3647_s25  ;;  %s2559_s4 = sadd.s32 1, %s3651_s4   ;;  %s3651_s4 = sphi %s3649_s4, %s2559_s4   ;;  %s3647_s25 = sphi %s3645_s25, %s3646_s25   ;;  %s3643_s24 = sphi %s3641_s24, %s2572_s24   ;;  %s3639_s23 = sphi %s3637_s23, %s2573_s23  }
 0x23f   : >> { %2566 = vst [vmem:[%s3639_s23] sm:$0xff] %v2565_v9  ;;  %p2568_p0 = scmp.ge.s32.totalorder %s2567_s26, %s4625_s17  ;;  %p2558_p1 = scmp.ge.s32.totalorder %s2559_s4, %s4625_s17 }
 0x241   : >> { %s4656_s26 = smov (%p2568_p0, %s2567_s26), 0  ;;  %2561 = sbr.rel (!%p2558_p1) target bundleno = 574 (0x23e), region = 133 }
 0x242   : >> { %s3006_s27 = sshll.u32 %s4656_s26, 3  ;;  %s3646_s25 = smov %s4656_s26  }
 0x243   : >> { %s2572_s24 = scalar_lea.vmem %s2553_s21, %s3006_s27 [#allocation2]   ;;  %s2573_s23 = scalar_lea.vmem %s2555_s22, %s3006_s27  }
 0x246 PF: > { %p10_p2 = scmp.ge.s32.totalorder %s3688_s16, 4   ;;  %s4648_s12 = smov %s3615_s13 }
 0x247   : > { %s4649_s13 = smov %s3696_s19  ;;  %s4650_s14 = smov %s3688_s16 }
 0x248   :  { %12 = sbr.rel (!%p10_p2) target bundleno = 2 (0x2), region = 144 }

</bundles_post_ra>
